<compile_context>
chip_gen: v5e
topology: v5e:2x2
jax: 0.10.0
libtpu: 0.0.40
codegen_flags: <defaults>
</compile_context>

<pallas_src>
import functools

import jax
import jax.numpy as jnp
from jax.experimental import pallas as pl
from jax.experimental.pallas import tpu as pltpu


def _round_up(n, m):
    return (n + m - 1) // m * m


# -----------------------------------------------------------------------------
# Fused ResBlock kernel (one grid step = one batch element)
# -----------------------------------------------------------------------------
def _resblock_kernel(mask_ref, x_ref, w1_ref, b1_ref, w2_ref, b2_ref, *rest,
                     H, W, has_downsample):
    if has_downsample:
        wd_ref, bd_ref, o_ref, xr_s, r1p_s = rest
    else:
        o_ref, xr_s, r1p_s = rest

    Wp = W + 2
    M = H * Wp                      # conv-output rows in the flat (H, W+2) layout

    def conv9(tap, w_ref):
        # 3x3 "same" conv as 9 shifted bf16 MXU matmuls; f32 VALUE accumulation
        # (uninterrupted dot chain -> MRB in-place accumulate on v7x, no VMEM RMW).
        acc = jnp.dot(tap(0), w_ref[0], preferred_element_type=jnp.float32)
        for di in range(3):
            for dj in range(3):
                if di == 0 and dj == 0:
                    continue
                acc = acc + jnp.dot(tap(di * Wp + dj), w_ref[3 * di + dj],
                                    preferred_element_type=jnp.float32)
        return acc

    # Pre-activation ReLU hoisted out of the tap loop: stage relu(x) once (bf16);
    # taps below are static ref slices that stream straight from VMEM.
    xr_s[...] = jnp.maximum(x_ref[0], 0)

    # conv1 + bias + ReLU.  Junk columns (c = W, W+1 of every flat row) are zeroed
    # and the result is stored into the padded-flat layout conv2 expects (shift by
    # Wp+1 puts image pixel (r,c) at padded position (r+1,c+1)); zero border rows /
    # cols / tail come from the zero fill.  r1 never touches HBM.
    r1p_s[...] = jnp.zeros_like(r1p_s)
    y1 = conv9(lambda off: xr_s[off:off + M, :], w1_ref) + b1_ref[...]
    y1 = jnp.maximum(y1, 0.0) * mask_ref[...]
    r1p_s[Wp + 1:Wp + 1 + M, :] = y1.astype(jnp.bfloat16)

    # conv2 + bias.
    y2 = conv9(lambda off: r1p_s[off:off + M, :], w2_ref) + b2_ref[...]

    # Identity branch (raw, un-ReLU'd x) + residual add fused into the epilogue.
    if has_downsample:
        ident = conv9(lambda off: x_ref[0, off:off + M, :], wd_ref) + bd_ref[...]
    else:
        ident = x_ref[0, Wp + 1:Wp + 1 + M, :].astype(jnp.float32)

    o_ref[0] = (ident + y2).astype(o_ref.dtype)


# -----------------------------------------------------------------------------
# JAX glue: layout plumbing only (pad / flatten / unpad), activations in bf16
# -----------------------------------------------------------------------------
def _to_padded_flat(x_nhwc, c_pad, mp):
    """(N,H,W,C) -> (N, MP, c_pad) bf16: zero-pad 1px border (+ zero channel pad),
    flatten spatial with row stride W+2, append zero rows so tap slices stay in bounds."""
    N, H, W, C = x_nhwc.shape
    Hp, Wp = H + 2, W + 2
    xp = jnp.pad(x_nhwc, ((0, 0), (1, 1), (1, 1), (0, c_pad - C)))
    flat = xp.reshape(N, Hp * Wp, c_pad)
    flat = jnp.pad(flat, ((0, 0), (0, mp - Hp * Wp), (0, 0)))
    return flat.astype(jnp.bfloat16)


def _prep_w(w, cin_p, cout_p):
    """(3,3,Cin,Cout) HWIO -> (9, cin_p, cout_p) bf16, zero-padded."""
    _, _, cin, cout = w.shape
    wm = w.reshape(9, cin, cout)
    wm = jnp.pad(wm, ((0, 0), (0, cin_p - cin), (0, cout_p - cout)))
    return wm.astype(jnp.bfloat16)


def _prep_b(b, cout_p):
    return jnp.pad(b, (0, cout_p - b.shape[0])).reshape(1, cout_p).astype(jnp.float32)


# -----------------------------------------------------------------------------
# ResBlock forward (matches the PyTorch module's semantics)
# -----------------------------------------------------------------------------
def resblock_forward(x_nchw, params):
    """r = conv1(relu(x)); r = conv2(relu(r)); x = downsample(x) if present; x + r."""
    x = jnp.transpose(x_nchw, (0, 2, 3, 1)).astype(jnp.float32)   # NCHW -> NHWC
    N, H, W, Cin = x.shape
    Cout = params["w1"].shape[-1]
    has_ds = "wd" in params

    Wp = W + 2
    M = H * Wp
    MP = _round_up((H + 2) * Wp + 2, 16)
    Coutp = _round_up(Cout, 128)          # lane-dense (unmasked) output stores
    # Without a downsample the identity is raw x, added to the Coutp-wide conv2
    # output inside the kernel, so pad x's channels (and conv1's input dim) to Coutp.
    Cin_k = Coutp if not has_ds else Cin

    x_flat = _to_padded_flat(x, Cin_k, MP)                        # (N, MP, Cin_k) bf16
    col = jnp.arange(M, dtype=jnp.int32) % Wp
    mask = (col < W).astype(jnp.float32).reshape(M, 1)            # zero 2 junk cols/row

    w1 = _prep_w(params["w1"], Cin_k, Coutp); b1 = _prep_b(params["b1"], Coutp)
    w2 = _prep_w(params["w2"], Coutp, Coutp); b2 = _prep_b(params["b2"], Coutp)

    args = [mask, x_flat, w1, b1, w2, b2]
    in_specs = [
        pl.BlockSpec((M, 1), lambda n: (0, 0)),
        pl.BlockSpec((1, MP, Cin_k), lambda n: (n, 0, 0)),
        # weight / bias block indices are constant across n -> DMA'd once
        pl.BlockSpec((9, Cin_k, Coutp), lambda n: (0, 0, 0)),
        pl.BlockSpec((1, Coutp), lambda n: (0, 0)),
        pl.BlockSpec((9, Coutp, Coutp), lambda n: (0, 0, 0)),
        pl.BlockSpec((1, Coutp), lambda n: (0, 0)),
    ]
    if has_ds:
        args += [_prep_w(params["wd"], Cin_k, Coutp), _prep_b(params["bd"], Coutp)]
        in_specs += [
            pl.BlockSpec((9, Cin_k, Coutp), lambda n: (0, 0, 0)),
            pl.BlockSpec((1, Coutp), lambda n: (0, 0)),
        ]

    kernel = functools.partial(_resblock_kernel, H=H, W=W, has_downsample=has_ds)

    out = pl.pallas_call(
        kernel,
        out_shape=jax.ShapeDtypeStruct((N, M, Coutp), jnp.float32),
        grid=(N,),
        in_specs=in_specs,
        out_specs=pl.BlockSpec((1, M, Coutp), lambda n: (n, 0, 0)),
        scratch_shapes=[pltpu.VMEM((MP, Cin_k), jnp.bfloat16),    # relu(x), staged once
                        pltpu.VMEM((MP, Coutp), jnp.bfloat16)],   # padded-flat r1
        compiler_params=pltpu.CompilerParams(dimension_semantics=("parallel",)),
    )(*args)

    # Drop the 2 junk columns per row and the zero channel padding; back to NCHW.
    y = out.reshape(N, H, Wp, Coutp)[:, :, :W, :Cout]
    return jnp.transpose(y, (0, 3, 1, 2))


# -----------------------------------------------------------------------------
# Deterministic synthetic parameters (HWIO weight layout) + pure-JAX reference
# -----------------------------------------------------------------------------
def make_resblock_params(key, indim, outdim=None):
    if outdim is None:
        outdim = indim
    ks = jax.random.split(key, 6)

    def conv_init(kw, kb, cin, cout):
        bound = 1.0 / (9 * cin) ** 0.5
        w = jax.random.uniform(kw, (3, 3, cin, cout), jnp.float32, -bound, bound)
        b = jax.random.uniform(kb, (cout,), jnp.float32, -bound, bound)
        return w, b

    p = {}
    p["w1"], p["b1"] = conv_init(ks[0], ks[1], indim, outdim)
    p["w2"], p["b2"] = conv_init(ks[2], ks[3], outdim, outdim)
    if indim != outdim:
        p["wd"], p["bd"] = conv_init(ks[4], ks[5], indim, outdim)
    return p


def resblock_reference(x_nchw, params):
    x = jnp.transpose(x_nchw, (0, 2, 3, 1))

    def conv(v, w, b):
        y = jax.lax.conv_general_dilated(
            v, w, window_strides=(1, 1), padding="SAME",
            dimension_numbers=("NHWC", "HWIO", "NHWC"))
        return y + b

    r = conv(jax.nn.relu(x), params["w1"], params["b1"])
    r = conv(jax.nn.relu(r), params["w2"], params["b2"])
    identity = conv(x, params["wd"], params["bd"]) if "wd" in params else x
    return jnp.transpose(identity + r, (0, 3, 1, 2))


# -----------------------------------------------------------------------------
if __name__ == "__main__":
    key = jax.random.PRNGKey(0)
    k_p1, k_p2, k_x = jax.random.split(key, 3)

    N, C_IN, C_OUT, H, W = 2, 32, 64, 16, 16
    x = jax.random.normal(k_x, (N, C_IN, H, W), jnp.float32)

    fwd = jax.jit(resblock_forward)

    # Case 1: indim != outdim -> downsample conv active.
    params_ds = make_resblock_params(k_p1, C_IN, C_OUT)
    y_ds = fwd(x, params_ds)
    # Case 2: indim == outdim -> pure identity skip.
    params_id = make_resblock_params(k_p2, C_IN, C_IN)
    y_id = fwd(x, params_id)
    jax.block_until_ready((y_ds, y_id))

    assert y_ds.shape == (N, C_OUT, H, W), y_ds.shape
    assert y_id.shape == (N, C_IN, H, W), y_id.shape
    assert bool(jnp.all(jnp.isfinite(y_ds))) and bool(jnp.all(jnp.isfinite(y_id)))

    # Numerical check against a pure-JAX/XLA reference (bf16 MXU operands -> loose tol).
    for y, p in ((y_ds, params_ds), (y_id, params_id)):
        ref = resblock_reference(x, p)
        err = float(jnp.max(jnp.abs(y - ref)))
        scale = float(jnp.max(jnp.abs(ref))) + 1e-6
        assert err <= 2e-2 + 5e-2 * scale, (err, scale)

    print("KERNEL_OK")
</pallas_src>

<mosaic_0001>
module attributes {stable_mosaic.version = 11 : i64} {
  func.func @_resblock_kernel(%arg0: i32, %arg1: memref<288x1xf32, #tpu.memory_space<vmem>>, %arg2: memref<1x336x32xbf16, #tpu.memory_space<vmem>>, %arg3: memref<9x32x128xbf16, #tpu.memory_space<vmem>>, %arg4: memref<1x128xf32, #tpu.memory_space<vmem>>, %arg5: memref<9x128x128xbf16, #tpu.memory_space<vmem>>, %arg6: memref<1x128xf32, #tpu.memory_space<vmem>>, %arg7: memref<9x32x128xbf16, #tpu.memory_space<vmem>>, %arg8: memref<1x128xf32, #tpu.memory_space<vmem>>, %arg9: memref<1x288x128xf32, #tpu.memory_space<vmem>>, %arg10: memref<336x32xbf16, #tpu.memory_space<vmem>>, %arg11: memref<336x128xbf16, #tpu.memory_space<vmem>>) attributes {dimension_semantics = [#tpu.dimension_semantics<parallel>], iteration_bounds = array<i64: 2>, scalar_prefetch = 0 : i64, scratch_operands = 2 : i64, tpu.core_type = #tpu.core_type<tc>, window_params = [{pipeline_mode = #tpu.pipeline_mode<synchronous>, transform_indices = @transform_0, window_bounds = array<i64: 288, 1>}, {transform_indices = @transform_1, window_bounds = array<i64: 1, 336, 32>}, {pipeline_mode = #tpu.pipeline_mode<synchronous>, transform_indices = @transform_2, window_bounds = array<i64: 9, 32, 128>}, {pipeline_mode = #tpu.pipeline_mode<synchronous>, transform_indices = @transform_3, window_bounds = array<i64: 1, 128>}, {pipeline_mode = #tpu.pipeline_mode<synchronous>, transform_indices = @transform_4, window_bounds = array<i64: 9, 128, 128>}, {pipeline_mode = #tpu.pipeline_mode<synchronous>, transform_indices = @transform_5, window_bounds = array<i64: 1, 128>}, {pipeline_mode = #tpu.pipeline_mode<synchronous>, transform_indices = @transform_6, window_bounds = array<i64: 9, 32, 128>}, {pipeline_mode = #tpu.pipeline_mode<synchronous>, transform_indices = @transform_7, window_bounds = array<i64: 1, 128>}, {transform_indices = @transform_8, window_bounds = array<i64: 1, 288, 128>}]} {
    %c0 = arith.constant 0 : index
    %c0_0 = arith.constant 0 : index
    %c0_1 = arith.constant 0 : index
    %0 = vector.load %arg2[%c0, %c0_0, %c0_1] : memref<1x336x32xbf16, #tpu.memory_space<vmem>>, vector<1x336x32xbf16>
    %1 = vector.shape_cast %0 : vector<1x336x32xbf16> to vector<336x32xbf16>
    %cst = arith.constant 0.000000e+00 : bf16
    %2 = vector.broadcast %cst : bf16 to vector<336x32xbf16>
    %3 = arith.maximumf %1, %2 : vector<336x32xbf16>
    %c0_2 = arith.constant 0 : index
    %c0_3 = arith.constant 0 : index
    %4 = vector.load %arg10[%c0_2, %c0_3] : memref<336x32xbf16, #tpu.memory_space<vmem>>, vector<336x32xbf16>
    tpu.vector_store %arg10[%c0_2, %c0_3], %3 {strides = array<i32>} : memref<336x32xbf16, #tpu.memory_space<vmem>>, vector<336x32xbf16>,
    %cst_4 = arith.constant 0.000000e+00 : bf16
    %5 = vector.broadcast %cst_4 : bf16 to vector<336x128xbf16>
    %c0_5 = arith.constant 0 : index
    %c0_6 = arith.constant 0 : index
    %6 = vector.load %arg11[%c0_5, %c0_6] : memref<336x128xbf16, #tpu.memory_space<vmem>>, vector<336x128xbf16>
    tpu.vector_store %arg11[%c0_5, %c0_6], %5 {strides = array<i32>} : memref<336x128xbf16, #tpu.memory_space<vmem>>, vector<336x128xbf16>,
    %c0_7 = arith.constant 0 : index
    %c0_8 = arith.constant 0 : index
    %7 = vector.load %arg10[%c0_7, %c0_8] : memref<336x32xbf16, #tpu.memory_space<vmem>>, vector<288x32xbf16>
    %c0_9 = arith.constant 0 : index
    %c0_10 = arith.constant 0 : index
    %c0_11 = arith.constant 0 : index
    %8 = vector.load %arg3[%c0_9, %c0_10, %c0_11] : memref<9x32x128xbf16, #tpu.memory_space<vmem>>, vector<1x32x128xbf16>
    %9 = vector.shape_cast %8 : vector<1x32x128xbf16> to vector<32x128xbf16>
    %cst_12 = arith.constant dense<0.000000e+00> : vector<288x128xf32>
    %10 = tpu.matmul %7, %9, %cst_12 {dimension_numbers = #tpu.dot_dimension_numbers<[1], [0], [0], [1], [0, 0, 1, 1], [], []>} : vector<288x32xbf16>, vector<32x128xbf16>, vector<288x128xf32> -> vector<288x128xf32>
    %c1 = arith.constant 1 : index
    %c0_13 = arith.constant 0 : index
    %11 = vector.load %arg10[%c1, %c0_13] : memref<336x32xbf16, #tpu.memory_space<vmem>>, vector<288x32xbf16>
    %c1_14 = arith.constant 1 : index
    %c0_15 = arith.constant 0 : index
    %c0_16 = arith.constant 0 : index
    %12 = vector.load %arg3[%c1_14, %c0_15, %c0_16] : memref<9x32x128xbf16, #tpu.memory_space<vmem>>, vector<1x32x128xbf16>
    %13 = vector.shape_cast %12 : vector<1x32x128xbf16> to vector<32x128xbf16>
    %cst_17 = arith.constant dense<0.000000e+00> : vector<288x128xf32>
    %14 = tpu.matmul %11, %13, %cst_17 {dimension_numbers = #tpu.dot_dimension_numbers<[1], [0], [0], [1], [0, 0, 1, 1], [], []>} : vector<288x32xbf16>, vector<32x128xbf16>, vector<288x128xf32> -> vector<288x128xf32>
    %15 = arith.addf %10, %14 : vector<288x128xf32>
    %c2 = arith.constant 2 : index
    %c0_18 = arith.constant 0 : index
    %16 = vector.load %arg10[%c2, %c0_18] : memref<336x32xbf16, #tpu.memory_space<vmem>>, vector<288x32xbf16>
    %c2_19 = arith.constant 2 : index
    %c0_20 = arith.constant 0 : index
    %c0_21 = arith.constant 0 : index
    %17 = vector.load %arg3[%c2_19, %c0_20, %c0_21] : memref<9x32x128xbf16, #tpu.memory_space<vmem>>, vector<1x32x128xbf16>
    %18 = vector.shape_cast %17 : vector<1x32x128xbf16> to vector<32x128xbf16>
    %cst_22 = arith.constant dense<0.000000e+00> : vector<288x128xf32>
    %19 = tpu.matmul %16, %18, %cst_22 {dimension_numbers = #tpu.dot_dimension_numbers<[1], [0], [0], [1], [0, 0, 1, 1], [], []>} : vector<288x32xbf16>, vector<32x128xbf16>, vector<288x128xf32> -> vector<288x128xf32>
    %20 = arith.addf %15, %19 : vector<288x128xf32>
    %c18 = arith.constant 18 : index
    %c0_23 = arith.constant 0 : index
    %21 = vector.load %arg10[%c18, %c0_23] : memref<336x32xbf16, #tpu.memory_space<vmem>>, vector<288x32xbf16>
    %c3 = arith.constant 3 : index
    %c0_24 = arith.constant 0 : index
    %c0_25 = arith.constant 0 : index
    %22 = vector.load %arg3[%c3, %c0_24, %c0_25] : memref<9x32x128xbf16, #tpu.memory_space<vmem>>, vector<1x32x128xbf16>
    %23 = vector.shape_cast %22 : vector<1x32x128xbf16> to vector<32x128xbf16>
    %cst_26 = arith.constant dense<0.000000e+00> : vector<288x128xf32>
    %24 = tpu.matmul %21, %23, %cst_26 {dimension_numbers = #tpu.dot_dimension_numbers<[1], [0], [0], [1], [0, 0, 1, 1], [], []>} : vector<288x32xbf16>, vector<32x128xbf16>, vector<288x128xf32> -> vector<288x128xf32>
    %25 = arith.addf %20, %24 : vector<288x128xf32>
    %c19 = arith.constant 19 : index
    %c0_27 = arith.constant 0 : index
    %26 = vector.load %arg10[%c19, %c0_27] : memref<336x32xbf16, #tpu.memory_space<vmem>>, vector<288x32xbf16>
    %c4 = arith.constant 4 : index
    %c0_28 = arith.constant 0 : index
    %c0_29 = arith.constant 0 : index
    %27 = vector.load %arg3[%c4, %c0_28, %c0_29] : memref<9x32x128xbf16, #tpu.memory_space<vmem>>, vector<1x32x128xbf16>
    %28 = vector.shape_cast %27 : vector<1x32x128xbf16> to vector<32x128xbf16>
    %cst_30 = arith.constant dense<0.000000e+00> : vector<288x128xf32>
    %29 = tpu.matmul %26, %28, %cst_30 {dimension_numbers = #tpu.dot_dimension_numbers<[1], [0], [0], [1], [0, 0, 1, 1], [], []>} : vector<288x32xbf16>, vector<32x128xbf16>, vector<288x128xf32> -> vector<288x128xf32>
    %30 = arith.addf %25, %29 : vector<288x128xf32>
    %c20 = arith.constant 20 : index
    %c0_31 = arith.constant 0 : index
    %31 = vector.load %arg10[%c20, %c0_31] : memref<336x32xbf16, #tpu.memory_space<vmem>>, vector<288x32xbf16>
    %c5 = arith.constant 5 : index
    %c0_32 = arith.constant 0 : index
    %c0_33 = arith.constant 0 : index
    %32 = vector.load %arg3[%c5, %c0_32, %c0_33] : memref<9x32x128xbf16, #tpu.memory_space<vmem>>, vector<1x32x128xbf16>
    %33 = vector.shape_cast %32 : vector<1x32x128xbf16> to vector<32x128xbf16>
    %cst_34 = arith.constant dense<0.000000e+00> : vector<288x128xf32>
    %34 = tpu.matmul %31, %33, %cst_34 {dimension_numbers = #tpu.dot_dimension_numbers<[1], [0], [0], [1], [0, 0, 1, 1], [], []>} : vector<288x32xbf16>, vector<32x128xbf16>, vector<288x128xf32> -> vector<288x128xf32>
    %35 = arith.addf %30, %34 : vector<288x128xf32>
    %c36 = arith.constant 36 : index
    %c0_35 = arith.constant 0 : index
    %36 = vector.load %arg10[%c36, %c0_35] : memref<336x32xbf16, #tpu.memory_space<vmem>>, vector<288x32xbf16>
    %c6 = arith.constant 6 : index
    %c0_36 = arith.constant 0 : index
    %c0_37 = arith.constant 0 : index
    %37 = vector.load %arg3[%c6, %c0_36, %c0_37] : memref<9x32x128xbf16, #tpu.memory_space<vmem>>, vector<1x32x128xbf16>
    %38 = vector.shape_cast %37 : vector<1x32x128xbf16> to vector<32x128xbf16>
    %cst_38 = arith.constant dense<0.000000e+00> : vector<288x128xf32>
    %39 = tpu.matmul %36, %38, %cst_38 {dimension_numbers = #tpu.dot_dimension_numbers<[1], [0], [0], [1], [0, 0, 1, 1], [], []>} : vector<288x32xbf16>, vector<32x128xbf16>, vector<288x128xf32> -> vector<288x128xf32>
    %40 = arith.addf %35, %39 : vector<288x128xf32>
    %c37 = arith.constant 37 : index
    %c0_39 = arith.constant 0 : index
    %41 = vector.load %arg10[%c37, %c0_39] : memref<336x32xbf16, #tpu.memory_space<vmem>>, vector<288x32xbf16>
    %c7 = arith.constant 7 : index
    %c0_40 = arith.constant 0 : index
    %c0_41 = arith.constant 0 : index
    %42 = vector.load %arg3[%c7, %c0_40, %c0_41] : memref<9x32x128xbf16, #tpu.memory_space<vmem>>, vector<1x32x128xbf16>
    %43 = vector.shape_cast %42 : vector<1x32x128xbf16> to vector<32x128xbf16>
    %cst_42 = arith.constant dense<0.000000e+00> : vector<288x128xf32>
    %44 = tpu.matmul %41, %43, %cst_42 {dimension_numbers = #tpu.dot_dimension_numbers<[1], [0], [0], [1], [0, 0, 1, 1], [], []>} : vector<288x32xbf16>, vector<32x128xbf16>, vector<288x128xf32> -> vector<288x128xf32>
    %45 = arith.addf %40, %44 : vector<288x128xf32>
    %c38 = arith.constant 38 : index
    %c0_43 = arith.constant 0 : index
    %46 = vector.load %arg10[%c38, %c0_43] : memref<336x32xbf16, #tpu.memory_space<vmem>>, vector<288x32xbf16>
    %c8 = arith.constant 8 : index
    %c0_44 = arith.constant 0 : index
    %c0_45 = arith.constant 0 : index
    %47 = vector.load %arg3[%c8, %c0_44, %c0_45] : memref<9x32x128xbf16, #tpu.memory_space<vmem>>, vector<1x32x128xbf16>
    %48 = vector.shape_cast %47 : vector<1x32x128xbf16> to vector<32x128xbf16>
    %cst_46 = arith.constant dense<0.000000e+00> : vector<288x128xf32>
    %49 = tpu.matmul %46, %48, %cst_46 {dimension_numbers = #tpu.dot_dimension_numbers<[1], [0], [0], [1], [0, 0, 1, 1], [], []>} : vector<288x32xbf16>, vector<32x128xbf16>, vector<288x128xf32> -> vector<288x128xf32>
    %50 = arith.addf %45, %49 : vector<288x128xf32>
    %c0_47 = arith.constant 0 : index
    %c0_48 = arith.constant 0 : index
    %51 = vector.load %arg4[%c0_47, %c0_48] : memref<1x128xf32, #tpu.memory_space<vmem>>, vector<1x128xf32>
    %52 = vector.broadcast %51 : vector<1x128xf32> to vector<288x128xf32>
    %53 = arith.addf %50, %52 : vector<288x128xf32>
    %cst_49 = arith.constant 0.000000e+00 : f32
    %54 = vector.broadcast %cst_49 : f32 to vector<288x128xf32>
    %55 = arith.maximumf %53, %54 : vector<288x128xf32>
    %c0_50 = arith.constant 0 : index
    %c0_51 = arith.constant 0 : index
    %56 = vector.load %arg1[%c0_50, %c0_51] : memref<288x1xf32, #tpu.memory_space<vmem>>, vector<288x1xf32>
    %57 = vector.broadcast %56 : vector<288x1xf32> to vector<288x128xf32>
    %58 = arith.mulf %55, %57 : vector<288x128xf32>
    %59 = arith.truncf %58 : vector<288x128xf32> to vector<288x128xbf16>
    %c19_52 = arith.constant 19 : index
    %c0_53 = arith.constant 0 : index
    %60 = vector.load %arg11[%c19_52, %c0_53] : memref<336x128xbf16, #tpu.memory_space<vmem>>, vector<288x128xbf16>
    tpu.vector_store %arg11[%c19_52, %c0_53], %59 {strides = array<i32>} : memref<336x128xbf16, #tpu.memory_space<vmem>>, vector<288x128xbf16>,
    %c0_54 = arith.constant 0 : index
    %c0_55 = arith.constant 0 : index
    %61 = vector.load %arg11[%c0_54, %c0_55] : memref<336x128xbf16, #tpu.memory_space<vmem>>, vector<288x128xbf16>
    %c0_56 = arith.constant 0 : index
    %c0_57 = arith.constant 0 : index
    %c0_58 = arith.constant 0 : index
    %62 = vector.load %arg5[%c0_56, %c0_57, %c0_58] : memref<9x128x128xbf16, #tpu.memory_space<vmem>>, vector<1x128x128xbf16>
    %63 = vector.shape_cast %62 : vector<1x128x128xbf16> to vector<128x128xbf16>
    %cst_59 = arith.constant dense<0.000000e+00> : vector<288x128xf32>
    %64 = tpu.matmul %61, %63, %cst_59 {dimension_numbers = #tpu.dot_dimension_numbers<[1], [0], [0], [1], [0, 0, 1, 1], [], []>} : vector<288x128xbf16>, vector<128x128xbf16>, vector<288x128xf32> -> vector<288x128xf32>
    %c1_60 = arith.constant 1 : index
    %c0_61 = arith.constant 0 : index
    %65 = vector.load %arg11[%c1_60, %c0_61] : memref<336x128xbf16, #tpu.memory_space<vmem>>, vector<288x128xbf16>
    %c1_62 = arith.constant 1 : index
    %c0_63 = arith.constant 0 : index
    %c0_64 = arith.constant 0 : index
    %66 = vector.load %arg5[%c1_62, %c0_63, %c0_64] : memref<9x128x128xbf16, #tpu.memory_space<vmem>>, vector<1x128x128xbf16>
    %67 = vector.shape_cast %66 : vector<1x128x128xbf16> to vector<128x128xbf16>
    %cst_65 = arith.constant dense<0.000000e+00> : vector<288x128xf32>
    %68 = tpu.matmul %65, %67, %cst_65 {dimension_numbers = #tpu.dot_dimension_numbers<[1], [0], [0], [1], [0, 0, 1, 1], [], []>} : vector<288x128xbf16>, vector<128x128xbf16>, vector<288x128xf32> -> vector<288x128xf32>
    %69 = arith.addf %64, %68 : vector<288x128xf32>
    %c2_66 = arith.constant 2 : index
    %c0_67 = arith.constant 0 : index
    %70 = vector.load %arg11[%c2_66, %c0_67] : memref<336x128xbf16, #tpu.memory_space<vmem>>, vector<288x128xbf16>
    %c2_68 = arith.constant 2 : index
    %c0_69 = arith.constant 0 : index
    %c0_70 = arith.constant 0 : index
    %71 = vector.load %arg5[%c2_68, %c0_69, %c0_70] : memref<9x128x128xbf16, #tpu.memory_space<vmem>>, vector<1x128x128xbf16>
    %72 = vector.shape_cast %71 : vector<1x128x128xbf16> to vector<128x128xbf16>
    %cst_71 = arith.constant dense<0.000000e+00> : vector<288x128xf32>
    %73 = tpu.matmul %70, %72, %cst_71 {dimension_numbers = #tpu.dot_dimension_numbers<[1], [0], [0], [1], [0, 0, 1, 1], [], []>} : vector<288x128xbf16>, vector<128x128xbf16>, vector<288x128xf32> -> vector<288x128xf32>
    %74 = arith.addf %69, %73 : vector<288x128xf32>
    %c18_72 = arith.constant 18 : index
    %c0_73 = arith.constant 0 : index
    %75 = vector.load %arg11[%c18_72, %c0_73] : memref<336x128xbf16, #tpu.memory_space<vmem>>, vector<288x128xbf16>
    %c3_74 = arith.constant 3 : index
    %c0_75 = arith.constant 0 : index
    %c0_76 = arith.constant 0 : index
    %76 = vector.load %arg5[%c3_74, %c0_75, %c0_76] : memref<9x128x128xbf16, #tpu.memory_space<vmem>>, vector<1x128x128xbf16>
    %77 = vector.shape_cast %76 : vector<1x128x128xbf16> to vector<128x128xbf16>
    %cst_77 = arith.constant dense<0.000000e+00> : vector<288x128xf32>
    %78 = tpu.matmul %75, %77, %cst_77 {dimension_numbers = #tpu.dot_dimension_numbers<[1], [0], [0], [1], [0, 0, 1, 1], [], []>} : vector<288x128xbf16>, vector<128x128xbf16>, vector<288x128xf32> -> vector<288x128xf32>
    %79 = arith.addf %74, %78 : vector<288x128xf32>
    %c19_78 = arith.constant 19 : index
    %c0_79 = arith.constant 0 : index
    %80 = vector.load %arg11[%c19_78, %c0_79] : memref<336x128xbf16, #tpu.memory_space<vmem>>, vector<288x128xbf16>
    %c4_80 = arith.constant 4 : index
    %c0_81 = arith.constant 0 : index
    %c0_82 = arith.constant 0 : index
    %81 = vector.load %arg5[%c4_80, %c0_81, %c0_82] : memref<9x128x128xbf16, #tpu.memory_space<vmem>>, vector<1x128x128xbf16>
    %82 = vector.shape_cast %81 : vector<1x128x128xbf16> to vector<128x128xbf16>
    %cst_83 = arith.constant dense<0.000000e+00> : vector<288x128xf32>
    %83 = tpu.matmul %80, %82, %cst_83 {dimension_numbers = #tpu.dot_dimension_numbers<[1], [0], [0], [1], [0, 0, 1, 1], [], []>} : vector<288x128xbf16>, vector<128x128xbf16>, vector<288x128xf32> -> vector<288x128xf32>
    %84 = arith.addf %79, %83 : vector<288x128xf32>
    %c20_84 = arith.constant 20 : index
    %c0_85 = arith.constant 0 : index
    %85 = vector.load %arg11[%c20_84, %c0_85] : memref<336x128xbf16, #tpu.memory_space<vmem>>, vector<288x128xbf16>
    %c5_86 = arith.constant 5 : index
    %c0_87 = arith.constant 0 : index
    %c0_88 = arith.constant 0 : index
    %86 = vector.load %arg5[%c5_86, %c0_87, %c0_88] : memref<9x128x128xbf16, #tpu.memory_space<vmem>>, vector<1x128x128xbf16>
    %87 = vector.shape_cast %86 : vector<1x128x128xbf16> to vector<128x128xbf16>
    %cst_89 = arith.constant dense<0.000000e+00> : vector<288x128xf32>
    %88 = tpu.matmul %85, %87, %cst_89 {dimension_numbers = #tpu.dot_dimension_numbers<[1], [0], [0], [1], [0, 0, 1, 1], [], []>} : vector<288x128xbf16>, vector<128x128xbf16>, vector<288x128xf32> -> vector<288x128xf32>
    %89 = arith.addf %84, %88 : vector<288x128xf32>
    %c36_90 = arith.constant 36 : index
    %c0_91 = arith.constant 0 : index
    %90 = vector.load %arg11[%c36_90, %c0_91] : memref<336x128xbf16, #tpu.memory_space<vmem>>, vector<288x128xbf16>
    %c6_92 = arith.constant 6 : index
    %c0_93 = arith.constant 0 : index
    %c0_94 = arith.constant 0 : index
    %91 = vector.load %arg5[%c6_92, %c0_93, %c0_94] : memref<9x128x128xbf16, #tpu.memory_space<vmem>>, vector<1x128x128xbf16>
    %92 = vector.shape_cast %91 : vector<1x128x128xbf16> to vector<128x128xbf16>
    %cst_95 = arith.constant dense<0.000000e+00> : vector<288x128xf32>
    %93 = tpu.matmul %90, %92, %cst_95 {dimension_numbers = #tpu.dot_dimension_numbers<[1], [0], [0], [1], [0, 0, 1, 1], [], []>} : vector<288x128xbf16>, vector<128x128xbf16>, vector<288x128xf32> -> vector<288x128xf32>
    %94 = arith.addf %89, %93 : vector<288x128xf32>
    %c37_96 = arith.constant 37 : index
    %c0_97 = arith.constant 0 : index
    %95 = vector.load %arg11[%c37_96, %c0_97] : memref<336x128xbf16, #tpu.memory_space<vmem>>, vector<288x128xbf16>
    %c7_98 = arith.constant 7 : index
    %c0_99 = arith.constant 0 : index
    %c0_100 = arith.constant 0 : index
    %96 = vector.load %arg5[%c7_98, %c0_99, %c0_100] : memref<9x128x128xbf16, #tpu.memory_space<vmem>>, vector<1x128x128xbf16>
    %97 = vector.shape_cast %96 : vector<1x128x128xbf16> to vector<128x128xbf16>
    %cst_101 = arith.constant dense<0.000000e+00> : vector<288x128xf32>
    %98 = tpu.matmul %95, %97, %cst_101 {dimension_numbers = #tpu.dot_dimension_numbers<[1], [0], [0], [1], [0, 0, 1, 1], [], []>} : vector<288x128xbf16>, vector<128x128xbf16>, vector<288x128xf32> -> vector<288x128xf32>
    %99 = arith.addf %94, %98 : vector<288x128xf32>
    %c38_102 = arith.constant 38 : index
    %c0_103 = arith.constant 0 : index
    %100 = vector.load %arg11[%c38_102, %c0_103] : memref<336x128xbf16, #tpu.memory_space<vmem>>, vector<288x128xbf16>
    %c8_104 = arith.constant 8 : index
    %c0_105 = arith.constant 0 : index
    %c0_106 = arith.constant 0 : index
    %101 = vector.load %arg5[%c8_104, %c0_105, %c0_106] : memref<9x128x128xbf16, #tpu.memory_space<vmem>>, vector<1x128x128xbf16>
    %102 = vector.shape_cast %101 : vector<1x128x128xbf16> to vector<128x128xbf16>
    %cst_107 = arith.constant dense<0.000000e+00> : vector<288x128xf32>
    %103 = tpu.matmul %100, %102, %cst_107 {dimension_numbers = #tpu.dot_dimension_numbers<[1], [0], [0], [1], [0, 0, 1, 1], [], []>} : vector<288x128xbf16>, vector<128x128xbf16>, vector<288x128xf32> -> vector<288x128xf32>
    %104 = arith.addf %99, %103 : vector<288x128xf32>
    %c0_108 = arith.constant 0 : index
    %c0_109 = arith.constant 0 : index
    %105 = vector.load %arg6[%c0_108, %c0_109] : memref<1x128xf32, #tpu.memory_space<vmem>>, vector<1x128xf32>
    %106 = vector.broadcast %105 : vector<1x128xf32> to vector<288x128xf32>
    %107 = arith.addf %104, %106 : vector<288x128xf32>
    %c0_110 = arith.constant 0 : index
    %c0_111 = arith.constant 0 : index
    %c0_112 = arith.constant 0 : index
    %108 = vector.load %arg2[%c0_110, %c0_111, %c0_112] : memref<1x336x32xbf16, #tpu.memory_space<vmem>>, vector<1x288x32xbf16>
    %109 = vector.shape_cast %108 : vector<1x288x32xbf16> to vector<288x32xbf16>
    %c0_113 = arith.constant 0 : index
    %c0_114 = arith.constant 0 : index
    %c0_115 = arith.constant 0 : index
    %110 = vector.load %arg7[%c0_113, %c0_114, %c0_115] : memref<9x32x128xbf16, #tpu.memory_space<vmem>>, vector<1x32x128xbf16>
    %111 = vector.shape_cast %110 : vector<1x32x128xbf16> to vector<32x128xbf16>
    %cst_116 = arith.constant dense<0.000000e+00> : vector<288x128xf32>
    %112 = tpu.matmul %109, %111, %cst_116 {dimension_numbers = #tpu.dot_dimension_numbers<[1], [0], [0], [1], [0, 0, 1, 1], [], []>} : vector<288x32xbf16>, vector<32x128xbf16>, vector<288x128xf32> -> vector<288x128xf32>
    %c0_117 = arith.constant 0 : index
    %c1_118 = arith.constant 1 : index
    %c0_119 = arith.constant 0 : index
    %113 = vector.load %arg2[%c0_117, %c1_118, %c0_119] : memref<1x336x32xbf16, #tpu.memory_space<vmem>>, vector<1x288x32xbf16>
    %114 = vector.shape_cast %113 : vector<1x288x32xbf16> to vector<288x32xbf16>
    %c1_120 = arith.constant 1 : index
    %c0_121 = arith.constant 0 : index
    %c0_122 = arith.constant 0 : index
    %115 = vector.load %arg7[%c1_120, %c0_121, %c0_122] : memref<9x32x128xbf16, #tpu.memory_space<vmem>>, vector<1x32x128xbf16>
    %116 = vector.shape_cast %115 : vector<1x32x128xbf16> to vector<32x128xbf16>
    %cst_123 = arith.constant dense<0.000000e+00> : vector<288x128xf32>
    %117 = tpu.matmul %114, %116, %cst_123 {dimension_numbers = #tpu.dot_dimension_numbers<[1], [0], [0], [1], [0, 0, 1, 1], [], []>} : vector<288x32xbf16>, vector<32x128xbf16>, vector<288x128xf32> -> vector<288x128xf32>
    %118 = arith.addf %112, %117 : vector<288x128xf32>
    %c0_124 = arith.constant 0 : index
    %c2_125 = arith.constant 2 : index
    %c0_126 = arith.constant 0 : index
    %119 = vector.load %arg2[%c0_124, %c2_125, %c0_126] : memref<1x336x32xbf16, #tpu.memory_space<vmem>>, vector<1x288x32xbf16>
    %120 = vector.shape_cast %119 : vector<1x288x32xbf16> to vector<288x32xbf16>
    %c2_127 = arith.constant 2 : index
    %c0_128 = arith.constant 0 : index
    %c0_129 = arith.constant 0 : index
    %121 = vector.load %arg7[%c2_127, %c0_128, %c0_129] : memref<9x32x128xbf16, #tpu.memory_space<vmem>>, vector<1x32x128xbf16>
    %122 = vector.shape_cast %121 : vector<1x32x128xbf16> to vector<32x128xbf16>
    %cst_130 = arith.constant dense<0.000000e+00> : vector<288x128xf32>
    %123 = tpu.matmul %120, %122, %cst_130 {dimension_numbers = #tpu.dot_dimension_numbers<[1], [0], [0], [1], [0, 0, 1, 1], [], []>} : vector<288x32xbf16>, vector<32x128xbf16>, vector<288x128xf32> -> vector<288x128xf32>
    %124 = arith.addf %118, %123 : vector<288x128xf32>
    %c0_131 = arith.constant 0 : index
    %c18_132 = arith.constant 18 : index
    %c0_133 = arith.constant 0 : index
    %125 = vector.load %arg2[%c0_131, %c18_132, %c0_133] : memref<1x336x32xbf16, #tpu.memory_space<vmem>>, vector<1x288x32xbf16>
    %126 = vector.shape_cast %125 : vector<1x288x32xbf16> to vector<288x32xbf16>
    %c3_134 = arith.constant 3 : index
    %c0_135 = arith.constant 0 : index
    %c0_136 = arith.constant 0 : index
    %127 = vector.load %arg7[%c3_134, %c0_135, %c0_136] : memref<9x32x128xbf16, #tpu.memory_space<vmem>>, vector<1x32x128xbf16>
    %128 = vector.shape_cast %127 : vector<1x32x128xbf16> to vector<32x128xbf16>
    %cst_137 = arith.constant dense<0.000000e+00> : vector<288x128xf32>
    %129 = tpu.matmul %126, %128, %cst_137 {dimension_numbers = #tpu.dot_dimension_numbers<[1], [0], [0], [1], [0, 0, 1, 1], [], []>} : vector<288x32xbf16>, vector<32x128xbf16>, vector<288x128xf32> -> vector<288x128xf32>
    %130 = arith.addf %124, %129 : vector<288x128xf32>
    %c0_138 = arith.constant 0 : index
    %c19_139 = arith.constant 19 : index
    %c0_140 = arith.constant 0 : index
    %131 = vector.load %arg2[%c0_138, %c19_139, %c0_140] : memref<1x336x32xbf16, #tpu.memory_space<vmem>>, vector<1x288x32xbf16>
    %132 = vector.shape_cast %131 : vector<1x288x32xbf16> to vector<288x32xbf16>
    %c4_141 = arith.constant 4 : index
    %c0_142 = arith.constant 0 : index
    %c0_143 = arith.constant 0 : index
    %133 = vector.load %arg7[%c4_141, %c0_142, %c0_143] : memref<9x32x128xbf16, #tpu.memory_space<vmem>>, vector<1x32x128xbf16>
    %134 = vector.shape_cast %133 : vector<1x32x128xbf16> to vector<32x128xbf16>
    %cst_144 = arith.constant dense<0.000000e+00> : vector<288x128xf32>
    %135 = tpu.matmul %132, %134, %cst_144 {dimension_numbers = #tpu.dot_dimension_numbers<[1], [0], [0], [1], [0, 0, 1, 1], [], []>} : vector<288x32xbf16>, vector<32x128xbf16>, vector<288x128xf32> -> vector<288x128xf32>
    %136 = arith.addf %130, %135 : vector<288x128xf32>
    %c0_145 = arith.constant 0 : index
    %c20_146 = arith.constant 20 : index
    %c0_147 = arith.constant 0 : index
    %137 = vector.load %arg2[%c0_145, %c20_146, %c0_147] : memref<1x336x32xbf16, #tpu.memory_space<vmem>>, vector<1x288x32xbf16>
    %138 = vector.shape_cast %137 : vector<1x288x32xbf16> to vector<288x32xbf16>
    %c5_148 = arith.constant 5 : index
    %c0_149 = arith.constant 0 : index
    %c0_150 = arith.constant 0 : index
    %139 = vector.load %arg7[%c5_148, %c0_149, %c0_150] : memref<9x32x128xbf16, #tpu.memory_space<vmem>>, vector<1x32x128xbf16>
    %140 = vector.shape_cast %139 : vector<1x32x128xbf16> to vector<32x128xbf16>
    %cst_151 = arith.constant dense<0.000000e+00> : vector<288x128xf32>
    %141 = tpu.matmul %138, %140, %cst_151 {dimension_numbers = #tpu.dot_dimension_numbers<[1], [0], [0], [1], [0, 0, 1, 1], [], []>} : vector<288x32xbf16>, vector<32x128xbf16>, vector<288x128xf32> -> vector<288x128xf32>
    %142 = arith.addf %136, %141 : vector<288x128xf32>
    %c0_152 = arith.constant 0 : index
    %c36_153 = arith.constant 36 : index
    %c0_154 = arith.constant 0 : index
    %143 = vector.load %arg2[%c0_152, %c36_153, %c0_154] : memref<1x336x32xbf16, #tpu.memory_space<vmem>>, vector<1x288x32xbf16>
    %144 = vector.shape_cast %143 : vector<1x288x32xbf16> to vector<288x32xbf16>
    %c6_155 = arith.constant 6 : index
    %c0_156 = arith.constant 0 : index
    %c0_157 = arith.constant 0 : index
    %145 = vector.load %arg7[%c6_155, %c0_156, %c0_157] : memref<9x32x128xbf16, #tpu.memory_space<vmem>>, vector<1x32x128xbf16>
    %146 = vector.shape_cast %145 : vector<1x32x128xbf16> to vector<32x128xbf16>
    %cst_158 = arith.constant dense<0.000000e+00> : vector<288x128xf32>
    %147 = tpu.matmul %144, %146, %cst_158 {dimension_numbers = #tpu.dot_dimension_numbers<[1], [0], [0], [1], [0, 0, 1, 1], [], []>} : vector<288x32xbf16>, vector<32x128xbf16>, vector<288x128xf32> -> vector<288x128xf32>
    %148 = arith.addf %142, %147 : vector<288x128xf32>
    %c0_159 = arith.constant 0 : index
    %c37_160 = arith.constant 37 : index
    %c0_161 = arith.constant 0 : index
    %149 = vector.load %arg2[%c0_159, %c37_160, %c0_161] : memref<1x336x32xbf16, #tpu.memory_space<vmem>>, vector<1x288x32xbf16>
    %150 = vector.shape_cast %149 : vector<1x288x32xbf16> to vector<288x32xbf16>
    %c7_162 = arith.constant 7 : index
    %c0_163 = arith.constant 0 : index
    %c0_164 = arith.constant 0 : index
    %151 = vector.load %arg7[%c7_162, %c0_163, %c0_164] : memref<9x32x128xbf16, #tpu.memory_space<vmem>>, vector<1x32x128xbf16>
    %152 = vector.shape_cast %151 : vector<1x32x128xbf16> to vector<32x128xbf16>
    %cst_165 = arith.constant dense<0.000000e+00> : vector<288x128xf32>
    %153 = tpu.matmul %150, %152, %cst_165 {dimension_numbers = #tpu.dot_dimension_numbers<[1], [0], [0], [1], [0, 0, 1, 1], [], []>} : vector<288x32xbf16>, vector<32x128xbf16>, vector<288x128xf32> -> vector<288x128xf32>
    %154 = arith.addf %148, %153 : vector<288x128xf32>
    %c0_166 = arith.constant 0 : index
    %c38_167 = arith.constant 38 : index
    %c0_168 = arith.constant 0 : index
    %155 = vector.load %arg2[%c0_166, %c38_167, %c0_168] : memref<1x336x32xbf16, #tpu.memory_space<vmem>>, vector<1x288x32xbf16>
    %156 = vector.shape_cast %155 : vector<1x288x32xbf16> to vector<288x32xbf16>
    %c8_169 = arith.constant 8 : index
    %c0_170 = arith.constant 0 : index
    %c0_171 = arith.constant 0 : index
    %157 = vector.load %arg7[%c8_169, %c0_170, %c0_171] : memref<9x32x128xbf16, #tpu.memory_space<vmem>>, vector<1x32x128xbf16>
    %158 = vector.shape_cast %157 : vector<1x32x128xbf16> to vector<32x128xbf16>
    %cst_172 = arith.constant dense<0.000000e+00> : vector<288x128xf32>
    %159 = tpu.matmul %156, %158, %cst_172 {dimension_numbers = #tpu.dot_dimension_numbers<[1], [0], [0], [1], [0, 0, 1, 1], [], []>} : vector<288x32xbf16>, vector<32x128xbf16>, vector<288x128xf32> -> vector<288x128xf32>
    %160 = arith.addf %154, %159 : vector<288x128xf32>
    %c0_173 = arith.constant 0 : index
    %c0_174 = arith.constant 0 : index
    %161 = vector.load %arg8[%c0_173, %c0_174] : memref<1x128xf32, #tpu.memory_space<vmem>>, vector<1x128xf32>
    %162 = vector.broadcast %161 : vector<1x128xf32> to vector<288x128xf32>
    %163 = arith.addf %160, %162 : vector<288x128xf32>
    %164 = arith.addf %163, %107 : vector<288x128xf32>
    %c0_175 = arith.constant 0 : index
    %c0_176 = arith.constant 0 : index
    %c0_177 = arith.constant 0 : index
    %165 = vector.load %arg9[%c0_175, %c0_176, %c0_177] : memref<1x288x128xf32, #tpu.memory_space<vmem>>, vector<1x288x128xf32>
    %166 = vector.shape_cast %165 : vector<1x288x128xf32> to vector<288x128xf32>
    %167 = vector.shape_cast %164 : vector<288x128xf32> to vector<1x288x128xf32>
    tpu.vector_store %arg9[%c0_175, %c0_176, %c0_177], %167 {strides = array<i32>} : memref<1x288x128xf32, #tpu.memory_space<vmem>>, vector<1x288x128xf32>,
    return
  }
  func.func @transform_0(%arg0: i32) -> (i32, i32) {
    %c0_i32 = arith.constant 0 : i32
    %c0_i32_0 = arith.constant 0 : i32
    %c0_i32_1 = arith.constant 0 : i32
    return %c0_i32, %c0_i32_0 : i32, i32
  }
  func.func @transform_1(%arg0: i32) -> (i32, i32, i32) {
    %c0_i32 = arith.constant 0 : i32
    %c0_i32_0 = arith.constant 0 : i32
    %c0_i32_1 = arith.constant 0 : i32
    return %arg0, %c0_i32, %c0_i32_0 : i32, i32, i32
  }
  func.func @transform_2(%arg0: i32) -> (i32, i32, i32) {
    %c0_i32 = arith.constant 0 : i32
    %c0_i32_0 = arith.constant 0 : i32
    %c0_i32_1 = arith.constant 0 : i32
    %c0_i32_2 = arith.constant 0 : i32
    return %c0_i32, %c0_i32_0, %c0_i32_1 : i32, i32, i32
  }
  func.func @transform_3(%arg0: i32) -> (i32, i32) {
    %c0_i32 = arith.constant 0 : i32
    %c0_i32_0 = arith.constant 0 : i32
    %c0_i32_1 = arith.constant 0 : i32
    return %c0_i32, %c0_i32_0 : i32, i32
  }
  func.func @transform_4(%arg0: i32) -> (i32, i32, i32) {
    %c0_i32 = arith.constant 0 : i32
    %c0_i32_0 = arith.constant 0 : i32
    %c0_i32_1 = arith.constant 0 : i32
    %c0_i32_2 = arith.constant 0 : i32
    return %c0_i32, %c0_i32_0, %c0_i32_1 : i32, i32, i32
  }
  func.func @transform_5(%arg0: i32) -> (i32, i32) {
    %c0_i32 = arith.constant 0 : i32
    %c0_i32_0 = arith.constant 0 : i32
    %c0_i32_1 = arith.constant 0 : i32
    return %c0_i32, %c0_i32_0 : i32, i32
  }
  func.func @transform_6(%arg0: i32) -> (i32, i32, i32) {
    %c0_i32 = arith.constant 0 : i32
    %c0_i32_0 = arith.constant 0 : i32
    %c0_i32_1 = arith.constant 0 : i32
    %c0_i32_2 = arith.constant 0 : i32
    return %c0_i32, %c0_i32_0, %c0_i32_1 : i32, i32, i32
  }
  func.func @transform_7(%arg0: i32) -> (i32, i32) {
    %c0_i32 = arith.constant 0 : i32
    %c0_i32_0 = arith.constant 0 : i32
    %c0_i32_1 = arith.constant 0 : i32
    return %c0_i32, %c0_i32_0 : i32, i32
  }
  func.func @transform_8(%arg0: i32) -> (i32, i32, i32) {
    %c0_i32 = arith.constant 0 : i32
    %c0_i32_0 = arith.constant 0 : i32
    %c0_i32_1 = arith.constant 0 : i32
    return %arg0, %c0_i32, %c0_i32_0 : i32, i32, i32
  }
}

</mosaic_0001>

<bundles_post_ra>
// kernel: resblock_forward.1
= control target key start
LH: loop header
LB: loop body
LE: loop exit
PB: predicated region body
PF: predicated region fallthrough
CT: control target
= control target key end

     0   :  { %s12315_s27 = smov 0   ;;  %s16998_s0 = inlined_call_operand.vmem [shape: f32[288,1], index: 0, kind: input, shape index: {}]   ;;  %s16999_s1 = inlined_call_operand.vmem [shape: bf16[2,336,32], index: 1, kind: input, shape index: {}]   ;;  %s17000_s2 = inlined_call_operand.vmem [shape: bf16[9,32,128], index: 2, kind: input, shape index: {}]   ;;  %s17001_s3 = inlined_call_operand.vmem [shape: f32[1,128], index: 3, kind: input, shape index: {}]   ;;  %s17002_s4 = inlined_call_operand.vmem [shape: bf16[9,128,128], index: 4, kind: input, shape index: {}]   ;;  %s17003_s5 = inlined_call_operand.vmem [shape: f32[1,128], index: 5, kind: input, shape index: {}]   ;;  %s17004_s6 = inlined_call_operand.vmem [shape: bf16[9,32,128], index: 6, kind: input, shape index: {}]   ;;  %s17005_s7 = inlined_call_operand.vmem [shape: f32[1,128], index: 7, kind: input, shape index: {}]   ;;  %s17006_s8 = inlined_call_operand.vmem [shape: f32[2,288,128], index: 8, kind: output, shape index: {}]  }
   0x1 LB: > { %s10247_s28 = sadd.s32 4294967295, %s12267_s27   ;;  %p10251_p0 = scmp.ge.s32.totalorder %s12267_s27, 1  ;;  %s12267_s27 = sphi %s12315_s27, %s18_s27  }
   0x2   : > { %p262_p1 = scmp.lt.s32.totalorder %s12267_s27, 3 }
   0x4   : > { %p263_p2 = pnand %p10251_p0, %p262_p1 }
   0x6   : > { %266 = sbr.rel (%p263_p2) target bundleno = 2284 (0x8ec), region = 52 }
   0xb   : > { %v12326_v0 = vld [vmem:[%s17000_s2 + $0x28] sm:$0xff]  ;;  %v11836_v1 = vld [vmem:[%s17000_s2 + $0x18] sm:$0xff]  ;;  %p296_p3 = scmp.lt.s32.totalorder %s10247_s28, 1  ;;  %v12337_v3 = vld [vmem:[%s17000_s2 + $0x20] sm:$0xff]  ;;  %vm475_vm0 = vcmask 257024   ;;  %vm860_vm1 = vcmask 261120  }
   0xc   : > { %v11834_v2 = vld [vmem:[%s17000_s2 + $0x8] sm:$0xff]  ;;  %1280 = vmatpush.bf16.msra.mxu2 %v12326_v0  ;;  %921 = vmatpush.bf16.msra.mxu0 %v11836_v1  ;;  %v11835_v4 = vld [vmem:[%s17000_s2 + $0x10] sm:$0xff]  ;;  %v11833_v5 = vld [vmem:[%s17000_s2] sm:$0xff]  ;;  %vm1170_vm2 = vcmask 1046528   ;;  %vm699_vm3 = vsmask.f32 7424 }
   0xd   : > { %s17450_s28 = smov (!%p296_p3, %s10247_s28), 1  ;;  %1068 = vmatpush.bf16.msra.mxu1 %v11834_v2  ;;  %12202 = vmatpush.bf16.msra.mxu3 %v11836_v1  ;;  %v11859_v6 = vld [vmem:[%s17000_s2 + $0x48] sm:$0xff]  ;;  %vm2172_vm4 = vcmask 1045504   ;;  %vm1791_vm5 = vsmask.f32 6400  ;;  %vm3174_vm7 = vcmask 1044480  }
   0xe   : > { %s12208_s19 = smul.u32 168, %s17450_s28  ;;  %vm2793_vm6 = vsmask.f32 5376  ;;  %vm4176_vm8 = vcmask 1043457   ;;  %vm4177_vm9 = vsmask.f32 7942 }
   0xf   : > { %vm4178_vm10 = vmand %vm4176_vm8, %vm4177_vm9  ;;  %vm3777_vm11 = vsmask.f32 1280  ;;  %vm3778_vm12 = vsmask.f32 5392  ;;  %vm4217_vm14 = vcmask 1041408   ;;  %s12209_s23 = smul.u32 288, %s17450_s28 }
  0x10   : > { %1281 = vmatpush.bf16.msra.mxu2 %v12337_v3  ;;  %922 = vmatpush.bf16.msra.mxu0 %v11835_v4  ;;  %s12356_s24 = scalar_lea.vmem %s16999_s1, %s12208_s19  ;;  %vm13584_vm13 = vmor %vm3777_vm11, %vm3778_vm12 }
  0x11   : > { %1069 = vmatpush.bf16.msra.mxu1 %v11833_v5  ;;  %v12078_v7 = vld [vmem:[%s12356_s24] sm:$0xff]   ;;  %v12173_v8 = vld [vmem:[%s12356_s24 + $0x8] sm:$0xff]   ;;  %12203 = vmatpush.bf16.msra.mxu3 %v11835_v4  ;;  %v12186_v9 = vld [vmem:[%s12356_s24 + $0x70] sm:$0xff]   ;;  %s16713_s29 = scalar_lea.vmem %s17006_s8, %s12209_s23 }
  0x12   : > { %v12079_v10 = vunpack.c.l.bf16 %v12078_v7  ;;  %v12080_v11 = vunpack.c.h.bf16 %v12078_v7  ;;  %v12083_v12 = vunpack.c.l.bf16 %v12173_v8  ;;  %v12084_v13 = vunpack.c.h.bf16 %v12173_v8  ;;  %v12187_v14 = vld [vmem:[%s12356_s24 + $0x78] sm:$0xff]   ;;  %v12174_v26 = vld [vmem:[%s12356_s24 + $0x10] sm:$0xff]   ;;  %v12188_v27 = vld [vmem:[%s12356_s24 + $0x80] sm:$0xff]  }
  0x13   : > { %v12135_v15 = vunpack.c.l.bf16 %v12186_v9  ;;  %v12136_v16 = vunpack.c.h.bf16 %v12186_v9  ;;  %v12139_v17 = vunpack.c.l.bf16 %v12187_v14  ;;  %v12140_v18 = vunpack.c.h.bf16 %v12187_v14  ;;  %v12175_v34 = vld [vmem:[%s12356_s24 + $0x18] sm:$0xff]   ;;  %v12189_v39 = vld [vmem:[%s12356_s24 + $0x88] sm:$0xff]   ;;  %v12190_v14 = vld [vmem:[%s12356_s24 + $0x90] sm:$0xff]  }
  0x14   : > { %2034 = vmatpush.bf16.msrb.mxu0 %v11859_v6  ;;  %v391_v19 = vmax.f32 %v12079_v10, 0.0  ;;  %v392_v20 = vmax.f32 %v12080_v11, 0.0  ;;  %v393_v21 = vmax.f32 %v12083_v12, 0.0  ;;  %v394_v22 = vmax.f32 %v12084_v13, 0.0  ;;  %vm14934_vm15 = vmand %vm4217_vm14, %vm3777_vm11 }
  0x15   : > { %12204 = vmatpush.bf16.msrb.mxu3 %v11834_v2  ;;  %v419_v23 = vmax.f32 %v12135_v15, 0.0  ;;  %v420_v24 = vmax.f32 %v12136_v16, 0.0  ;;  %v421_v25 = vmax.f32 %v12139_v17, 0.0  ;;  %v422_v32 = vmax.f32 %v12140_v18, 0.0 }
  0x16   : > { %v433_v28 = vpack.c.bf16 %v391_v19, %v391_v19  ;;  %v434_v29 = vpack.c.bf16 %v392_v20, %v392_v20  ;;  %v435_v30 = vpack.c.bf16 %v393_v21, %v393_v21  ;;  %v436_v31 = vpack.c.bf16 %v394_v22, %v394_v22  ;;  %v12176_v20 = vld [vmem:[%s12356_s24 + $0x20] sm:$0xff]  }
  0x17   : > { %v461_v33 = vpack.c.bf16 %v419_v23, %v419_v23  ;;  %v12087_v35 = vunpack.c.l.bf16 %v12174_v26  ;;  %v12088_v36 = vunpack.c.h.bf16 %v12174_v26  ;;  %v12143_v37 = vunpack.c.l.bf16 %v12188_v27 }
  0x18   : > { %476 = vst.msk [vmem:[#allocation2] sm:$0xf] %vm475_vm0, %v433_v28  ;;  %v12144_v38 = vunpack.c.h.bf16 %v12188_v27  ;;  %v462_v40 = vpack.c.bf16 %v420_v24, %v420_v24  ;;  %v463_v41 = vpack.c.bf16 %v421_v25, %v421_v25  ;;  %v12091_v42 = vunpack.c.l.bf16 %v12175_v34 }
  0x19   : > { %12205 = vmatpush.bf16.msrb.mxu3 %v11833_v5  ;;  %477 = vst.msk [vmem:[#allocation2 + $0x4] sm:$0xf] %vm475_vm0, %v434_v29  ;;  %v12092_v43 = vunpack.c.h.bf16 %v12175_v34  ;;  %v395_v44 = vmax.f32 %v12087_v35, 0.0  ;;  %v396_v45 = vmax.f32 %v12088_v36, 0.0  ;;  %v423_v46 = vmax.f32 %v12143_v37, 0.0 }
  0x1a   : > { %478 = vst.msk [vmem:[#allocation2 + $0x8] sm:$0xf] %vm475_vm0, %v435_v30  ;;  %v12147_v47 = vunpack.c.l.bf16 %v12189_v39  ;;  %v464_v48 = vpack.c.bf16 %v422_v32, %v422_v32  ;;  %v424_v49 = vmax.f32 %v12144_v38, 0.0  ;;  %v12148_v50 = vunpack.c.h.bf16 %v12189_v39 }
  0x1b   : > { %479 = vst.msk [vmem:[#allocation2 + $0xc] sm:$0xf] %vm475_vm0, %v436_v31  ;;  %v437_v51 = vpack.c.bf16 %v395_v44, %v395_v44  ;;  %v397_v52 = vmax.f32 %v12091_v42, 0.0  ;;  %v438_v53 = vpack.c.bf16 %v396_v45, %v396_v45  ;;  %v398_v54 = vmax.f32 %v12092_v43, 0.0 }
  0x1c   : > { %504 = vst.msk [vmem:[#allocation2 + $0x70] sm:$0xf] %vm475_vm0, %v461_v33  ;;  %v465_v55 = vpack.c.bf16 %v423_v46, %v423_v46  ;;  %v425_v56 = vmax.f32 %v12147_v47, 0.0  ;;  %v466_v58 = vpack.c.bf16 %v424_v49, %v424_v49  ;;  %v426_v59 = vmax.f32 %v12148_v50, 0.0 }
  0x1d   : > { %505 = vst.msk [vmem:[#allocation2 + $0x74] sm:$0xf] %vm475_vm0, %v462_v40  ;;  %v439_v62 = vpack.c.bf16 %v397_v52, %v397_v52  ;;  %v440_v4 = vpack.c.bf16 %v398_v54, %v398_v54  ;;  %v12151_v21 = vunpack.c.l.bf16 %v12190_v14  ;;  %v12095_v25 = vunpack.c.l.bf16 %v12176_v20 }
  0x1e   : > { %506 = vst.msk [vmem:[#allocation2 + $0x78] sm:$0xf] %vm475_vm0, %v463_v41  ;;  %v467_v6 = vpack.c.bf16 %v425_v56, %v425_v56  ;;  %v468_v9 = vpack.c.bf16 %v426_v59, %v426_v59  ;;  %v12096_v26 = vunpack.c.h.bf16 %v12176_v20 }
  0x1f   : > { %v12194_v57 = vld [vmem:[#allocation2] sm:$0xe]  ;;  %507 = vst.msk [vmem:[#allocation2 + $0x7c] sm:$0xf] %vm475_vm0, %v464_v48  ;;  %v427_v27 = vmax.f32 %v12151_v21, 0.0  ;;  %v399_v31 = vmax.f32 %v12095_v25, 0.0 }
  0x20   : > { %v12193_v60 = vld [vmem:[#allocation2] sm:$0xf0]  ;;  %480 = vst.msk [vmem:[#allocation2 + $0x10] sm:$0xf] %vm475_vm0, %v437_v51  ;;  %v400_v32 = vmax.f32 %v12096_v26, 0.0  ;;  %v12177_v48 = vld [vmem:[%s12356_s24 + $0x28] sm:$0xff]   ;;  %v12152_v51 = vunpack.c.h.bf16 %v12190_v14 }
  0x21   : > { %v12162_v61 = vld [vmem:[#allocation2] sm:$0xff]   ;;  %v12195_v63 = vor.u32 %v12194_v57, %v12193_v60  ;;  %481 = vst.msk [vmem:[#allocation2 + $0x14] sm:$0xf] %vm475_vm0, %v438_v53  ;;  %v469_v33 = vpack.c.bf16 %v427_v27, %v427_v27  ;;  %v441_v35 = vpack.c.bf16 %v399_v31, %v399_v31  ;;  %v12099_v49 = vunpack.c.l.bf16 %v12177_v48 }
  0x22   : > { %v701_v1 = vshrl.u32 %v12162_v61, 16  ;;  %v703_v2 = vshll.u32 %v12162_v61, 16  ;;  %10360 = vmatmul.msk.bf16.vlgmr.msra.gmra.mxu1 %vm860_vm1, %v12162_v61  ;;  %v11816_v5 = vld [vmem:[#allocation2 + $0x8] sm:$0xff]  ;;  %508 = vst.msk [vmem:[#allocation2 + $0x80] sm:$0xf] %vm475_vm0, %v465_v55  ;;  %v442_v36 = vpack.c.bf16 %v400_v32, %v400_v32  ;;  %v12100_v50 = vunpack.c.h.bf16 %v12177_v48 }
  0x23   : > { %v1171_v7 = vrot.slane %v12195_v63, 1  ;;  %509 = vst.msk [vmem:[#allocation2 + $0x84] sm:$0xf] %vm475_vm0, %v466_v58  ;;  %v1172_v10 = vrot.slane %v11816_v5, 1  ;;  %v708_v11 = vshll.u32 %v11816_v5, 16  ;;  %v712_v37 = vshrl.u32 %v11816_v5, 16 }
  0x24   : > { %v705_v8 = vrot.slane %v703_v2, 1  ;;  %v12379_v12 = vld [vmem:[#allocation2 + $0x70] sm:$0xff]  ;;  %482 = vst.msk [vmem:[#allocation2 + $0x18] sm:$0xf] %vm475_vm0, %v439_v62  ;;  %v401_v54 = vmax.f32 %v12099_v49, 0.0  ;;  %v402_v55 = vmax.f32 %v12100_v50, 0.0 }
  0x25   : > { %483 = vst.msk [vmem:[#allocation2 + $0x1c] sm:$0xf] %vm475_vm0, %v440_v4  ;;  %v1173_v15 = vsel %vm1170_vm2, %v1171_v7, %v1172_v10  ;;  %v710_v16 = vrot.slane %v708_v11, 1  ;;  %v812_v18 = vshll.u32 %v12379_v12, 16  ;;  %v816_v19 = vshrl.u32 %v12379_v12, 16 }
  0x26   : > { %v706_v13 = vor.u32 %v705_v8, %v701_v1  ;;  %v12385_v17 = vld [vmem:[#allocation2 + $0x78] sm:$0xff]  ;;  %510 = vst.msk [vmem:[#allocation2 + $0x88] sm:$0xf] %vm475_vm0, %v467_v6  ;;  %10390 = vmatmul.msk.bf16.vlgmr.msra.gmra.mxu2 %vm860_vm1, %v1173_v15  ;;  %v443_v56 = vpack.c.bf16 %v401_v54, %v401_v54  ;;  %v444_v57 = vpack.c.bf16 %v402_v55, %v402_v55 }
  0x27   : > { %511 = vst.msk [vmem:[#allocation2 + $0x8c] sm:$0xf] %vm475_vm0, %v468_v9  ;;  %v12394_v23 = vrot.slane %v812_v18, 1  ;;  %v820_v24 = vshll.u32 %v12385_v17, 16  ;;  %v714_v41 = vor.u32 %v712_v37, %v710_v16  ;;  %v824_v43 = vshrl.u32 %v12385_v17, 16 }
  0x28   : > { %v711_v22 = vsel %vm699_vm3, %v706_v13, %v710_v16  ;;  %v11817_v30 = vld [vmem:[#allocation2 + $0x10] sm:$0xff]  ;;  %512 = vst.msk [vmem:[#allocation2 + $0x90] sm:$0xf] %vm475_vm0, %v469_v33 }
  0x29   : > { %10334 = vmatmul.msk.bf16.vlgmr.msra.gmra.mxu0 %vm860_vm1, %v711_v22  ;;  %v818_v28 = vor.u32 %v816_v19, %v12394_v23  ;;  %v822_v29 = vrot.slane %v820_v24, 1  ;;  %v716_v38 = vshll.u32 %v11817_v30, 16  ;;  %484 = vst.msk [vmem:[#allocation2 + $0x20] sm:$0xf] %vm475_vm0, %v441_v35  ;;  %v1174_v40 = vrot.slane %v11817_v30, 1  ;;  %v12179_v35 = vld [vmem:[%s12356_s24 + $0x38] sm:$0xff]  }
  0x2a   : > { %v12402_v39 = vld [vmem:[#allocation2 + $0x80] sm:$0xff]  ;;  %485 = vst.msk [vmem:[#allocation2 + $0x24] sm:$0xf] %vm475_vm0, %v442_v36  ;;  %v720_v59 = vshrl.u32 %v11817_v30, 16  ;;  %v12107_v36 = vunpack.c.l.bf16 %v12179_v35  ;;  %v12108_v37 = vunpack.c.h.bf16 %v12179_v35 }
  0x2b   : > { %v823_v34 = vsel %vm699_vm3, %v818_v28, %v822_v29  ;;  %v718_v42 = vrot.slane %v716_v38, 1  ;;  %v828_v44 = vshll.u32 %v12402_v39, 16  ;;  %v1175_v45 = vsel %vm1170_vm2, %v1172_v10, %v1174_v40  ;;  %486 = vst.msk [vmem:[#allocation2 + $0x28] sm:$0xf] %vm475_vm0, %v443_v56  ;;  %v12178_v10 = vld [vmem:[%s12356_s24 + $0x30] sm:$0xff]  }
  0x2c   : > { %10348 = vmatmul.msk.bf16.vlgmr.msra.gmra.mxu3 %vm860_vm1, %v823_v34  ;;  %v11818_v53 = vld [vmem:[#allocation2 + $0x18] sm:$0xff]  ;;  %487 = vst.msk [vmem:[#allocation2 + $0x2c] sm:$0xf] %vm475_vm0, %v444_v57  ;;  %v832_v2 = vshrl.u32 %v12402_v39, 16  ;;  %v12103_v11 = vunpack.c.l.bf16 %v12178_v10  ;;  %v12104_v13 = vunpack.c.h.bf16 %v12178_v10 }
  0x2d   : > { %12206 = vmatpush.bf16.msra.mxu3 %v12326_v0  ;;  %v719_v46 = vsel %vm699_vm3, %v714_v41, %v718_v42  ;;  %v826_v0 = vor.u32 %v824_v43, %v822_v29  ;;  %v830_v47 = vrot.slane %v828_v44, 1  ;;  %v724_v60 = vshll.u32 %v11818_v53, 16 }
  0x2e   : > { %v12418_v61 = vld [vmem:[#allocation2 + $0x88] sm:$0xff]  ;;  %v1176_v62 = vrot.slane %v11818_v53, 1  ;;  %v722_v63 = vor.u32 %v720_v59, %v718_v42  ;;  %v403_v18 = vmax.f32 %v12103_v11, 0.0  ;;  %v404_v19 = vmax.f32 %v12104_v13, 0.0 }
  0x2f   : > { %v831_v52 = vsel %vm699_vm3, %v826_v0, %v830_v47  ;;  %v726_v1 = vrot.slane %v724_v60, 1  ;;  %v836_v4 = vshll.u32 %v12418_v61, 16  ;;  %v834_v7 = vor.u32 %v832_v2, %v830_v47  ;;  %v600_v9 = vld [vmem:[#allocation2 + $0x90] sm:$0x1] }
  0x30   : > { %v679_v16 = vunpack.c.l.b16 %v600_v9  ;;  %v445_v20 = vpack.c.bf16 %v403_v18, %v403_v18  ;;  %v446_v21 = vpack.c.bf16 %v404_v19, %v404_v19  ;;  %v728_v22 = vshrl.u32 %v11818_v53, 16 }
  0x31   : > { %12207 = vmatpush.bf16.msra.mxu3 %v12337_v3  ;;  %v428_v3 = vmax.f32 %v12152_v51, 0.0  ;;  %v727_v6 = vsel %vm699_vm3, %v722_v63, %v726_v1  ;;  %v838_v8 = vrot.slane %v836_v4, 1  ;;  %v11819_v15 = vld [vmem:[#allocation2 + $0x20] sm:$0xff]  ;;  %v840_v29 = vshrl.u32 %v12418_v61, 16  ;;  %v12181_v4 = vld [vmem:[%s12356_s24 + $0x48] sm:$0xff]  }
  0x32   : > { %10361 = vmatmul.msk.bf16.gmra.mxu1 %vm860_vm1, %v11816_v5  ;;  %v1177_v5 = vsel %vm1170_vm2, %v1174_v40, %v1176_v62  ;;  %v732_v24 = vshll.u32 %v11819_v15, 16  ;;  %v12433_v25 = vpack.c.b16 %v679_v16, %v679_v16  ;;  %488 = vst.msk [vmem:[#allocation2 + $0x30] sm:$0xf] %vm475_vm0, %v445_v20  ;;  %v1178_v26 = vrot.slane %v11819_v15, 1  ;;  %v12180_v51 = vld [vmem:[%s12356_s24 + $0x40] sm:$0xff]  }
  0x33   : > { %v470_v58 = vpack.c.bf16 %v428_v3, %v428_v3  ;;  %v839_v14 = vsel %vm699_vm3, %v834_v7, %v838_v8  ;;  %489 = vst.msk [vmem:[#allocation2 + $0x34] sm:$0xf] %vm475_vm0, %v446_v21  ;;  %v730_v27 = vor.u32 %v728_v22, %v726_v1  ;;  %v842_v33 = vor.u32 %v840_v29, %v838_v8  ;;  %v11820_v40 = vld [vmem:[#allocation2 + $0x28] sm:$0xff]  ;;  %v11858_v7 = vld [vmem:[%s17000_s2 + $0x40] sm:$0xff]  ;;  %v12182_v22 = vld [vmem:[%s12356_s24 + $0x50] sm:$0xff]  }
  0x34   : > { %v734_v28 = vrot.slane %v732_v24, 1  ;;  %v1179_v31 = vsel %vm1170_vm2, %v1176_v62, %v1178_v26  ;;  %v405_v41 = vmax.f32 %v12107_v36, 0.0  ;;  %v406_v42 = vmax.f32 %v12108_v37, 0.0  ;;  %2035 = vmatpush.bf16.msrb.mxu0 %v11858_v7 }
  0x35   : > { %513 = vst.msk [vmem:[#allocation2 + $0x94] sm:$0xf] %vm475_vm0, %v470_v58  ;;  %v1180_v0 = vrot.slane %v11820_v40, 1  ;;  %v744_v58 = vshrl.u32 %v11820_v40, 16  ;;  %v12119_v24 = vunpack.c.l.bf16 %v12182_v22 }
  0x36   : > { %10391 = vmatmul.msk.bf16.gmra.mxu2 %vm860_vm1, %v1175_v45  ;;  %v735_v32 = vsel %vm699_vm3, %v730_v27, %v734_v28  ;;  %v447_v43 = vpack.c.bf16 %v405_v41, %v405_v41  ;;  %v448_v44 = vpack.c.bf16 %v406_v42, %v406_v42  ;;  %v736_v45 = vshrl.u32 %v11819_v15, 16 }
  0x37   : > { %v1181_v49 = vsel %vm1170_vm2, %v1178_v26, %v1180_v0  ;;  %v12120_v26 = vunpack.c.h.bf16 %v12182_v22 }
  0x38   : > { %490 = vst.msk [vmem:[#allocation2 + $0x38] sm:$0xf] %vm475_vm0, %v447_v43  ;;  %v738_v47 = vor.u32 %v736_v45, %v734_v28  ;;  %v411_v28 = vmax.f32 %v12119_v24, 0.0 }
  0x39   : > { %10335 = vmatmul.msk.bf16.gmra.mxu0 %vm860_vm1, %v719_v46  ;;  %v740_v46 = vshll.u32 %v11820_v40, 16  ;;  %491 = vst.msk [vmem:[#allocation2 + $0x3c] sm:$0xf] %vm475_vm0, %v448_v44  ;;  %v412_v29 = vmax.f32 %v12120_v26, 0.0 }
  0x3a   : > { %v11821_v54 = vld [vmem:[#allocation2 + $0x30] sm:$0xff] }
  0x3b   : > { %v742_v48 = vrot.slane %v740_v46, 1  ;;  %v748_v59 = vshll.u32 %v11821_v54, 16  ;;  %v1182_v60 = vrot.slane %v11821_v54, 1 }
  0x3c   : > { %10349 = vmatmul.msk.bf16.gmra.mxu3 %vm860_vm1, %v831_v52  ;;  %v12111_v52 = vunpack.c.l.bf16 %v12180_v51 }
  0x3d   : > { %v743_v50 = vsel %vm699_vm3, %v738_v47, %v742_v48  ;;  %v746_v62 = vor.u32 %v744_v58, %v742_v48  ;;  %v750_v63 = vrot.slane %v748_v59, 1  ;;  %v1183_v1 = vsel %vm1170_vm2, %v1180_v0, %v1182_v60 }
  0x3e   : > { %v407_v55 = vmax.f32 %v12111_v52, 0.0 }
  0x3f   : > { %v751_v2 = vsel %vm699_vm3, %v746_v62, %v750_v63 }
  0x40   : > { %v449_v56 = vpack.c.bf16 %v407_v55, %v407_v55  ;;  %v11822_v8 = vld [vmem:[#allocation2 + $0x38] sm:$0xff] }
  0x41   : > { %v1184_v16 = vrot.slane %v11822_v8, 1 }
  0x42   : > { %10362 = vmatmul.msk.bf16.gmra.mxu1 %vm860_vm1, %v11817_v30  ;;  %v844_v30 = vshll.u32 %v12433_v25, 16  ;;  %492 = vst.msk [vmem:[#allocation2 + $0x40] sm:$0xf] %vm475_vm0, %v449_v56  ;;  %v1198_v56 = vrot.slane %v12379_v12, 1 }
  0x43   : > { %v1185_v20 = vsel %vm1170_vm2, %v1182_v60, %v1184_v16  ;;  %v12184_v60 = vld [vmem:[%s12356_s24 + $0x60] sm:$0xff]  }
  0x44   : > { %v846_v34 = vrot.slane %v844_v30, 1  ;;  %v453_v30 = vpack.c.bf16 %v411_v28, %v411_v28  ;;  %v12127_v62 = vunpack.c.l.bf16 %v12184_v60 }
  0x46   : > { %10392 = vmatmul.msk.bf16.gmra.mxu2 %vm860_vm1, %v1177_v5  ;;  %v847_v38 = vsel %vm699_vm3, %v842_v33, %v846_v34  ;;  %v12115_v5 = vunpack.c.l.bf16 %v12181_v4  ;;  %496 = vst.msk [vmem:[#allocation2 + $0x50] sm:$0xf] %vm475_vm0, %v453_v30 }
  0x48   : > { %v409_v9 = vmax.f32 %v12115_v5, 0.0  ;;  %v415_v5 = vmax.f32 %v12127_v62, 0.0 }
  0x49   : > { %10336 = vmatmul.msk.bf16.gmra.mxu0 %vm860_vm1, %v727_v6  ;;  %v12116_v6 = vunpack.c.h.bf16 %v12181_v4 }
  0x4a   : > { %v451_v11 = vpack.c.bf16 %v409_v9, %v409_v9  ;;  %v457_v7 = vpack.c.bf16 %v415_v5, %v415_v5 }
  0x4b   : > { %v410_v10 = vmax.f32 %v12116_v6, 0.0 }
  0x4c   : > { %10350 = vmatmul.msk.bf16.gmra.mxu3 %vm860_vm1, %v839_v14  ;;  %v752_v14 = vshrl.u32 %v11821_v54, 16  ;;  %494 = vst.msk [vmem:[#allocation2 + $0x48] sm:$0xf] %vm475_vm0, %v451_v11 }
  0x4d   : > { %v452_v13 = vpack.c.bf16 %v410_v10, %v410_v10  ;;  %500 = vst.msk [vmem:[#allocation2 + $0x60] sm:$0xf] %vm475_vm0, %v457_v7 }
  0x4e   : > { %v754_v18 = vor.u32 %v752_v14, %v750_v63  ;;  %v12128_v63 = vunpack.c.h.bf16 %v12184_v60 }
  0x4f   : > { %495 = vst.msk [vmem:[#allocation2 + $0x4c] sm:$0xf] %vm475_vm0, %v452_v13 }
  0x52   : > { %10363 = vmatmul.msk.bf16.gmra.mxu1 %vm860_vm1, %v11818_v53  ;;  %v12112_v53 = vunpack.c.h.bf16 %v12180_v51  ;;  %v11857_v51 = vld [vmem:[%s17000_s2 + $0x38] sm:$0xff] }
  0x54   : > { %v408_v3 = vmax.f32 %v12112_v53, 0.0 }
  0x56   : > { %10393 = vmatmul.msk.bf16.gmra.mxu2 %vm860_vm1, %v1179_v31  ;;  %v450_v57 = vpack.c.bf16 %v408_v3, %v408_v3  ;;  %v454_v31 = vpack.c.bf16 %v412_v29, %v412_v29  ;;  %v11824_v43 = vld [vmem:[#allocation2 + $0x48] sm:$0xff]  ;;  %v1202_v29 = vrot.slane %v12402_v39, 1 }
  0x57   : > { %v776_v13 = vshrl.u32 %v11824_v43, 16 }
  0x58   : > { %493 = vst.msk [vmem:[#allocation2 + $0x44] sm:$0xf] %vm475_vm0, %v450_v57  ;;  %v1200_v57 = vrot.slane %v12385_v17, 1 }
  0x59   : > { %10337 = vmatmul.msk.bf16.gmra.mxu0 %vm860_vm1, %v735_v32  ;;  %v760_v32 = vshrl.u32 %v11822_v8, 16  ;;  %497 = vst.msk [vmem:[#allocation2 + $0x54] sm:$0xf] %vm475_vm0, %v454_v31 }
  0x5c   : > { %10351 = vmatmul.msk.bf16.gmra.mxu3 %vm860_vm1, %v847_v38 }
  0x5f   : > { %v11823_v27 = vld [vmem:[#allocation2 + $0x40] sm:$0xff] }
  0x60   : > { %v764_v33 = vshll.u32 %v11823_v27, 16  ;;  %v1186_v34 = vrot.slane %v11823_v27, 1  ;;  %v768_v48 = vshrl.u32 %v11823_v27, 16  ;;  %v12506_v4 = vld [vmem:[#allocation2 + $0x50] sm:$0xff] }
  0x61   : > { %v780_v14 = vshll.u32 %v12506_v4, 16 }
  0x62   : > { %10364 = vmatmul.msk.bf16.gmra.mxu1 %vm860_vm1, %v11819_v15  ;;  %v756_v15 = vshll.u32 %v11822_v8, 16  ;;  %v766_v36 = vrot.slane %v764_v33, 1  ;;  %v1187_v37 = vsel %vm1170_vm2, %v1184_v16, %v1186_v34 }
  0x63   : > { %v782_v22 = vrot.slane %v780_v14, 1 }
  0x64   : > { %v758_v19 = vrot.slane %v756_v15, 1  ;;  %v770_v52 = vor.u32 %v768_v48, %v766_v36 }
  0x66   : > { %10394 = vmatmul.msk.bf16.gmra.mxu2 %vm860_vm1, %v1181_v49  ;;  %v759_v21 = vsel %vm699_vm3, %v754_v18, %v758_v19  ;;  %v762_v35 = vor.u32 %v760_v32, %v758_v19  ;;  %v772_v49 = vshll.u32 %v11824_v43, 16  ;;  %v1190_v18 = vrot.slane %v12506_v4, 1  ;;  %v11861_v19 = vld [vmem:[%s17000_s2 + $0x58] sm:$0xff]  ;;  %v12185_v32 = vld [vmem:[%s12356_s24 + $0x68] sm:$0xff]  }
  0x67   : > { %2282 = vmatpush.bf16.msrb.mxu1 %v11861_v19 }
  0x68   : > { %v767_v38 = vsel %vm699_vm3, %v762_v35, %v766_v36  ;;  %v774_v53 = vrot.slane %v772_v49, 1  ;;  %v12132_v35 = vunpack.c.h.bf16 %v12185_v32 }
  0x69   : > { %10338 = vmatmul.msk.bf16.gmra.mxu0 %vm860_vm1, %v743_v50  ;;  %v1188_v50 = vrot.slane %v11824_v43, 1 }
  0x6a   : > { %v775_v3 = vsel %vm699_vm3, %v770_v52, %v774_v53 }
  0x6b   : > { %v1191_v26 = vsel %vm1170_vm2, %v1188_v50, %v1190_v18 }
  0x6c   : > { %10374 = vmatmul.msk.bf16.vlgmr.msrb.gmra.mxu3 %vm860_vm1, %v12379_v12 }
  0x6d   : > { %1653 = vmatpush.bf16.msrb.mxu3 %v11857_v51 }
  0x72   : > { %10365 = vmatmul.msk.bf16.gmra.mxu1 %vm860_vm1, %v11820_v40  ;;  %v12183_v40 = vld [vmem:[%s12356_s24 + $0x58] sm:$0xff]  }
  0x73   : > { %v12123_v41 = vunpack.c.l.bf16 %v12183_v40  ;;  %v12124_v42 = vunpack.c.h.bf16 %v12183_v40 }
  0x75   : > { %v413_v44 = vmax.f32 %v12123_v41, 0.0  ;;  %v414_v45 = vmax.f32 %v12124_v42, 0.0  ;;  %v418_v42 = vmax.f32 %v12132_v35, 0.0 }
  0x76   : > { %10395 = vmatmul.msk.bf16.gmra.mxu2 %vm860_vm1, %v1183_v1 }
  0x77   : > { %v455_v46 = vpack.c.bf16 %v413_v44, %v413_v44  ;;  %v456_v0 = vpack.c.bf16 %v414_v45, %v414_v45 }
  0x79   : > { %10339 = vmatmul.msk.bf16.gmra.mxu0 %vm860_vm1, %v751_v2  ;;  %498 = vst.msk [vmem:[#allocation2 + $0x58] sm:$0xf] %vm475_vm0, %v455_v46  ;;  %v1201_v2 = vsel %vm1170_vm2, %v1198_v56, %v1200_v57  ;;  %v784_v46 = vshrl.u32 %v12506_v4, 16 }
  0x7a   : > { %499 = vst.msk [vmem:[#allocation2 + $0x5c] sm:$0xf] %vm475_vm0, %v456_v0 }
  0x7b   : > { %v786_v52 = vor.u32 %v784_v46, %v782_v22 }
  0x7c   : > { %10375 = vmatmul.msk.bf16.gmra.mxu3 %vm860_vm1, %v12385_v17  ;;  %v416_v17 = vmax.f32 %v12128_v63, 0.0 }
  0x7e   : > { %v458_v9 = vpack.c.bf16 %v416_v17, %v416_v17 }
  0x80   : > { %501 = vst.msk [vmem:[#allocation2 + $0x64] sm:$0xf] %vm475_vm0, %v458_v9 }
  0x82   : > { %10366 = vmatmul.msk.bf16.gmra.mxu1 %vm860_vm1, %v11821_v54  ;;  %v1189_v54 = vsel %vm1170_vm2, %v1186_v34, %v1188_v50  ;;  %v12131_v34 = vunpack.c.l.bf16 %v12185_v32  ;;  %v11856_v50 = vld [vmem:[%s17000_s2 + $0x30] sm:$0xff]  ;;  %v1409_v32 = vld [vmem:[#allocation2 + $0x8] sm:$0xe] }
  0x83   : > { %1654 = vmatpush.bf16.msrb.mxu3 %v11856_v50 }
  0x84   : > { %v417_v40 = vmax.f32 %v12131_v34, 0.0  ;;  %v1410_v34 = vld [vmem:[#allocation2 + $0xc] sm:$0xf] }
  0x86   : > { %10396 = vmatmul.msk.bf16.gmra.mxu2 %vm860_vm1, %v1185_v20 }
  0x89   : > { %10340 = vmatmul.msk.bf16.gmra.mxu0 %vm860_vm1, %v759_v21  ;;  %v778_v21 = vor.u32 %v776_v13, %v774_v53 }
  0x8b   : > { %v783_v28 = vsel %vm699_vm3, %v778_v21, %v782_v22  ;;  %v1206_v21 = vrot.slane %v12433_v25, 1 }
  0x8c   : > { %10376 = vmatmul.msk.bf16.gmra.mxu3 %vm860_vm1, %v12402_v39  ;;  %v459_v39 = vpack.c.bf16 %v417_v40, %v417_v40  ;;  %v1489_v40 = vunpack.c.l.b16 %v1410_v34 }
  0x8e   : > { %502 = vst.msk [vmem:[#allocation2 + $0x68] sm:$0xf] %vm475_vm0, %v459_v39 }
  0x92   : > { %10367 = vmatmul.msk.bf16.gmra.mxu1 %vm860_vm1, %v11822_v8  ;;  %v11880_v8 = vld [vmem:[%s17000_s2 + $0x68] sm:$0xff] }
  0x93   : > { %2655 = vmatpush.bf16.msrb.mxu2 %v11880_v8 }
  0x96   : > { %10397 = vmatmul.msk.bf16.gmra.mxu2 %vm860_vm1, %v1187_v37  ;;  %v1203_v37 = vsel %vm1170_vm2, %v1200_v57, %v1202_v29 }
  0x99   : > { %10341 = vmatmul.msk.bf16.gmra.mxu0 %vm860_vm1, %v767_v38  ;;  %v11826_v38 = vld [vmem:[#allocation2 + $0x58] sm:$0xff] }
  0x9a   : > { %v788_v0 = vshll.u32 %v11826_v38, 16  ;;  %v1192_v49 = vrot.slane %v11826_v38, 1  ;;  %v792_v7 = vshrl.u32 %v11826_v38, 16 }
  0x9c   : > { %10377 = vmatmul.msk.bf16.gmra.mxu3 %vm860_vm1, %v12418_v61  ;;  %v790_v53 = vrot.slane %v788_v0, 1 }
  0x9e   : > { %v791_v57 = vsel %vm699_vm3, %v786_v52, %v790_v53  ;;  %v794_v13 = vor.u32 %v792_v7, %v790_v53 }
  0x9f   : > { %v1071_v47 = vpop.f32.mrf.mxu1 }
  0xa2   : > { %10368 = vmatmul.msk.bf16.gmra.mxu1 %vm860_vm1, %v11823_v27 }
  0xa6   : > { %v924_v55 = vpop.f32.mrf.mxu0  ;;  %10398 = vmatmul.msk.bf16.gmra.mxu2 %vm860_vm1, %v1189_v54 }
  0xa7   : > { %v1073_v58 = vpop.f32.mrf.mxu1  ;;  %v1072_v59 = vadd.f32 %v1071_v47, %v924_v55  ;;  %v1193_v55 = vsel %vm1170_vm2, %v1190_v18, %v1192_v49 }
  0xa9   : > { %10342 = vmatmul.msk.bf16.gmra.mxu0 %vm860_vm1, %v775_v3  ;;  %v1283_v1 = vpop.f32.mrf.mxu2 }
  0xaa   : > { %v12508_v6 = vadd.f32 %v1283_v1, %v1072_v59 }
  0xac   : > { %10404 = vmatmul.msk.bf16.vlgmr.msra.gmra.mxu3 %vm860_vm1, %v1201_v2  ;;  %v11827_v2 = vld [vmem:[#allocation2 + $0x60] sm:$0xff] }
  0xae   : > { %v926_v10 = vpop.f32.mrf.mxu0 }
  0xaf   : > { %v1076_v11 = vpop.f32.mrf.mxu1  ;;  %v1074_v15 = vadd.f32 %v1073_v58, %v926_v10  ;;  %v12517_v16 = vpop.f32.mrf.mxu3  ;;  %v1204_v58 = vrot.slane %v12418_v61, 1  ;;  %v796_v61 = vshll.u32 %v11827_v2, 16  ;;  %v1194_v10 = vrot.slane %v11827_v2, 1 }
  0xb1   : > { %v1285_v20 = vpop.f32.mrf.mxu2  ;;  %v1205_v1 = vsel %vm1170_vm2, %v1202_v29, %v1204_v58  ;;  %v798_v14 = vrot.slane %v796_v61, 1  ;;  %v1195_v18 = vsel %vm1170_vm2, %v1192_v49, %v1194_v10  ;;  %v1207_v29 = vsel %vm1170_vm2, %v1204_v58, %v1206_v21 }
  0xb2   : > { %10369 = vmatmul.msk.bf16.gmra.mxu1 %vm860_vm1, %v11824_v43  ;;  %v12524_v24 = vadd.f32 %v1285_v20, %v1074_v15  ;;  %v460_v43 = vpack.c.bf16 %v418_v42, %v418_v42 }
  0xb3   : > { %v799_v20 = vsel %vm699_vm3, %v794_v13, %v798_v14 }
  0xb4   : > { %503 = vst.msk [vmem:[#allocation2 + $0x6c] sm:$0xf] %vm475_vm0, %v460_v43 }
  0xb6   : > { %v929_v27 = vpop.f32.mrf.mxu0  ;;  %10399 = vmatmul.msk.bf16.gmra.mxu2 %vm860_vm1, %v1191_v26 }
  0xb7   : > { %v1078_v30 = vpop.f32.mrf.mxu1  ;;  %v1077_v31 = vadd.f32 %v1076_v11, %v929_v27  ;;  %v12531_v33 = vpop.f32.mrf.mxu3 }
  0xb9   : > { %10343 = vmatmul.msk.bf16.gmra.mxu0 %vm860_vm1, %v783_v28  ;;  %v1288_v36 = vpop.f32.mrf.mxu2 }
  0xba   : > { %v12535_v41 = vadd.f32 %v1288_v36, %v1077_v31  ;;  %v800_v36 = vshrl.u32 %v11827_v2, 16 }
  0xbc   : > { %10405 = vmatmul.msk.bf16.gmra.mxu3 %vm860_vm1, %v1203_v37  ;;  %v802_v46 = vor.u32 %v800_v36, %v798_v14 }
  0xbe   : > { %v931_v44 = vpop.f32.mrf.mxu0 }
  0xbf   : > { %v1081_v45 = vpop.f32.mrf.mxu1  ;;  %v1079_v47 = vadd.f32 %v1078_v30, %v931_v44  ;;  %v12541_v48 = vpop.f32.mrf.mxu3  ;;  %v11828_v30 = vld [vmem:[#allocation2 + $0x68] sm:$0xff]  ;;  %v11882_v44 = vld [vmem:[%s17000_s2 + $0x78] sm:$0xff] }
  0xc0   : > { %v804_v37 = vshll.u32 %v11828_v30, 16  ;;  %v1196_v43 = vrot.slane %v11828_v30, 1  ;;  %3036 = vmatpush.bf16.msra.mxu3 %v11882_v44 }
  0xc1   : > { %v1290_v51 = vpop.f32.mrf.mxu2 }
  0xc2   : > { %10370 = vmatmul.msk.bf16.gmra.mxu1 %vm860_vm1, %v12506_v4  ;;  %v12548_v54 = vadd.f32 %v1290_v51, %v1079_v47  ;;  %v806_v0 = vrot.slane %v804_v37, 1  ;;  %v12583_v47 = vld [vmem:[#allocation2 + $0x10] sm:$0xff]  ;;  %v11879_v51 = vld [vmem:[%s17000_s2 + $0x60] sm:$0xff]  ;;  %v1197_v52 = vsel %vm1170_vm2, %v1194_v10, %v1196_v43 }
  0xc3   : > { %2656 = vmatpush.bf16.msrb.mxu2 %v11879_v51  ;;  %v1804_v44 = vshll.u32 %v12583_v47, 16 }
  0xc6   : > { %v934_v3 = vpop.f32.mrf.mxu0  ;;  %10400 = vmatmul.msk.bf16.gmra.mxu2 %vm860_vm1, %v1193_v55  ;;  %v807_v55 = vsel %vm699_vm3, %v802_v46, %v806_v0  ;;  %v2174_v46 = vrot.slane %v12583_v47, 2 }
  0xc7   : > { %v1083_v59 = vpop.f32.mrf.mxu1  ;;  %v1082_v60 = vadd.f32 %v1081_v45, %v934_v3  ;;  %v12554_v62 = vpop.f32.mrf.mxu3 }
  0xc9   : > { %10344 = vmatmul.msk.bf16.gmra.mxu0 %vm860_vm1, %v791_v57  ;;  %v1293_v63 = vpop.f32.mrf.mxu2  ;;  %v1545_v57 = vrot.slane %v12583_v47, 1 }
  0xca   : > { %v12558_v4 = vadd.f32 %v1293_v63, %v1082_v60  ;;  %v11860_v63 = vld [vmem:[%s17000_s2 + $0x50] sm:$0xff] }
  0xcb   : > { %2283 = vmatpush.bf16.msrb.mxu1 %v11860_v63 }
  0xcc   : > { %10406 = vmatmul.msk.bf16.gmra.mxu3 %vm860_vm1, %v1205_v1  ;;  %v11884_v1 = vld [vmem:[%s17000_s2 + $0x88] sm:$0xff] }
  0xcd   : > { %3284 = vmatpush.bf16.msra.mxu0 %v11884_v1 }
  0xce   : > { %v936_v5 = vpop.f32.mrf.mxu0 }
  0xcf   : > { %v1086_v17 = vpop.f32.mrf.mxu1  ;;  %v1084_v8 = vadd.f32 %v1083_v59, %v936_v5  ;;  %v12561_v9 = vpop.f32.mrf.mxu3 }
  0xd1   : > { %v1295_v11 = vpop.f32.mrf.mxu2 }
  0xd2   : > { %10371 = vmatmul.msk.bf16.gmra.mxu1 %vm860_vm1, %v11826_v38  ;;  %v12564_v15 = vadd.f32 %v1295_v11, %v1084_v8  ;;  %v1488_v38 = vunpack.c.l.b16 %v1409_v32  ;;  %v808_v8 = vshrl.u32 %v11828_v30, 16  ;;  %v2163_v11 = vld [vmem:[#allocation2 + $0x8] sm:$0xc]  ;;  %v12622_v32 = vld [vmem:[#allocation2 + $0x14] sm:$0xf] }
  0xd3   : > { %v2170_v21 = vunpack.c.l.b16 %v2163_v11  ;;  %v17007_v12 = vunpack.c.l.b16 %v12622_v32 }
  0xd4   : > { %v12585_v49 = vpack.c.b16 %v1489_v40, %v1488_v38 }
  0xd6   : > { %v939_v19 = vpop.f32.mrf.mxu0  ;;  %10401 = vmatmul.msk.bf16.gmra.mxu2 %vm860_vm1, %v1195_v18  ;;  %v1544_v3 = vrot.slane %v12585_v49, 1  ;;  %v12614_v18 = vld [vmem:[#allocation2 + $0x18] sm:$0xff] }
  0xd7   : > { %v1088_v22 = vpop.f32.mrf.mxu1  ;;  %v1087_v26 = vadd.f32 %v1086_v17, %v939_v19  ;;  %v12570_v27 = vpop.f32.mrf.mxu3 }
  0xd8   : > { %v1546_v5 = vsel %vm1170_vm2, %v1544_v3, %v1545_v57 }
  0xd9   : > { %10345 = vmatmul.msk.bf16.gmra.mxu0 %vm860_vm1, %v799_v20  ;;  %v1298_v28 = vpop.f32.mrf.mxu2  ;;  %v810_v20 = vor.u32 %v808_v8, %v806_v0  ;;  %v12651_v8 = vld [vmem:[#allocation2 + $0x20] sm:$0xff] }
  0xda   : > { %v12574_v31 = vadd.f32 %v1298_v28, %v1087_v26  ;;  %v1199_v26 = vsel %vm1170_vm2, %v1196_v43, %v1198_v56  ;;  %v1547_v28 = vrot.slane %v12614_v18, 1 }
  0xdc   : > { %10407 = vmatmul.msk.bf16.gmra.mxu3 %vm860_vm1, %v1207_v29  ;;  %v2411_v29 = vld [vmem:[#allocation2 + $0x10] sm:$0xc]  ;;  %v1548_v38 = vsel %vm1170_vm2, %v1545_v57, %v1547_v28  ;;  %v1806_v57 = vrot.slane %v1804_v44, 2 }
  0xdd   : > { %v2490_v37 = vunpack.c.l.b16 %v2411_v29 }
  0xde   : > { %v941_v35 = vpop.f32.mrf.mxu0 }
  0xdf   : > { %v1091_v25 = vpop.f32.mrf.mxu1  ;;  %v1089_v42 = vadd.f32 %v1088_v22, %v941_v35  ;;  %v12577_v39 = vpop.f32.mrf.mxu3  ;;  %v2171_v35 = vpack.c.b16 %v1489_v40, %v2170_v21  ;;  %v1801_v40 = vshrl.u32 %v12583_v47, 16  ;;  %v12642_v51 = vpack.c.b16 %v17007_v12, %v2490_v37  ;;  %v11863_v37 = vld [vmem:[#allocation2 + $0x20] sm:$0xff] }
  0xe1   : > { %v1300_v45 = vpop.f32.mrf.mxu2  ;;  %v1803_v3 = vrot.slane %v1801_v40, 1  ;;  %v2546_v63 = vrot.slane %v12642_v51, 2 }
  0xe2   : > { %10372 = vmatmul.msk.bf16.gmra.mxu1 %vm860_vm1, %v11827_v2  ;;  %v12587_v50 = vadd.f32 %v1300_v45, %v1089_v42  ;;  %v1793_v42 = vshrl.u32 %v12585_v49, 16  ;;  %v2173_v45 = vrot.slane %v2171_v35, 2  ;;  %v1813_v35 = vshll.u32 %v12614_v18, 16 }
  0xe6   : > { %v944_v53 = vpop.f32.mrf.mxu0  ;;  %10402 = vmatmul.msk.bf16.gmra.mxu2 %vm860_vm1, %v1197_v52  ;;  %v1795_v52 = vrot.slane %v1793_v42, 1 }
  0xe7   : > { %v1093_v58 = vpop.f32.mrf.mxu1  ;;  %v1092_v59 = vadd.f32 %v1091_v25, %v944_v53  ;;  %v12597_v60 = vpop.f32.mrf.mxu3 }
  0xe9   : > { %10346 = vmatmul.msk.bf16.gmra.mxu0 %vm860_vm1, %v807_v55  ;;  %v1303_v2 = vpop.f32.mrf.mxu2 }
  0xea   : > { %v12607_v17 = vadd.f32 %v1303_v2, %v1092_v59 }
  0xec   : > { %10488 = vmatmul.msk.bf16.vlgmr.msrb.gmra.mxu3 %vm860_vm1, %v1546_v5 }
  0xee   : > { %v946_v7 = vpop.f32.mrf.mxu0 }
  0xef   : > { %v1096_v61 = vpop.f32.mrf.mxu1  ;;  %v1094_v10 = vadd.f32 %v1093_v58, %v946_v7  ;;  %v1141_v13 = vpop.f32.mrf.mxu3  ;;  %v2175_v58 = vsel %vm2172_vm4, %v2173_v45, %v2174_v46 }
  0xf0   : > { %v12611_v14 = vadd.f32 %v1141_v13, %v12517_v16 }
  0xf1   : > { %v1305_v19 = vpop.f32.mrf.mxu2 }
  0xf2   : > { %10373 = vmatmul.msk.bf16.gmra.mxu1 %vm860_vm1, %v11828_v30  ;;  %v12616_v22 = vadd.f32 %v1305_v19, %v1094_v10  ;;  %v815_v30 = vsel %vm699_vm3, %v810_v20, %v12394_v23  ;;  %v1796_v23 = vshll.u32 %v12585_v49, 16  ;;  %v1549_v20 = vrot.slane %v12651_v8, 1 }
  0xf4   : > { %v1798_v55 = vrot.slane %v1796_v23, 2  ;;  %v1815_v23 = vrot.slane %v1813_v35, 2  ;;  %v12699_v35 = vld [vmem:[#allocation2 + $0x30] sm:$0xff] }
  0xf6   : > { %v949_v16 = vpop.f32.mrf.mxu0  ;;  %10403 = vmatmul.msk.bf16.gmra.mxu2 %vm860_vm1, %v1199_v26  ;;  %v1799_v7 = vor.u32 %v1798_v55, %v1795_v52  ;;  %v12675_v52 = vld [vmem:[#allocation2 + $0x28] sm:$0xff] }
  0xf7   : > { %v1098_v34 = vpop.f32.mrf.mxu1  ;;  %v1097_v25 = vadd.f32 %v1096_v61, %v949_v16  ;;  %v1143_v36 = vpop.f32.mrf.mxu3  ;;  %v1807_v61 = vor.u32 %v1806_v57, %v1803_v3 }
  0xf8   : > { %v12629_v56 = vadd.f32 %v1143_v36, %v12531_v33  ;;  %v11862_v33 = vld [vmem:[#allocation2 + $0x18] sm:$0xff] }
  0xf9   : > { %10347 = vmatmul.msk.bf16.gmra.mxu0 %vm860_vm1, %v815_v30  ;;  %v1308_v43 = vpop.f32.mrf.mxu2  ;;  %v2547_v1 = vrot.slane %v11862_v33, 2  ;;  %v1808_v19 = vsel %vm1791_vm5, %v1799_v7, %v1807_v61  ;;  %v1550_v30 = vsel %vm1170_vm2, %v1547_v28, %v1549_v20  ;;  %v2549_v28 = vrot.slane %v11863_v37, 2 }
  0xfa   : > { %v12638_v0 = vadd.f32 %v1308_v43, %v1097_v25  ;;  %v2176_v25 = vrot.slane %v12614_v18, 2  ;;  %v2178_v7 = vrot.slane %v12651_v8, 2 }
  0xfb   : > { %v2548_v11 = vsel %vm2172_vm4, %v2546_v63, %v2547_v1 }
  0xfc   : > { %10489 = vmatmul.msk.bf16.gmra.mxu3 %vm860_vm1, %v1548_v38  ;;  %v2177_v43 = vsel %vm2172_vm4, %v2174_v46, %v2176_v25  ;;  %v1551_v46 = vrot.slane %v12675_v52, 1 }
  0xfe   : > { %v951_v49 = vpop.f32.mrf.mxu0  ;;  %v1552_v63 = vsel %vm1170_vm2, %v1549_v20, %v1551_v46 }
  0xff   : > { %v1101_v53 = vpop.f32.mrf.mxu1  ;;  %v1099_v59 = vadd.f32 %v1098_v34, %v951_v49  ;;  %v1146_v47 = vpop.f32.mrf.mxu3  ;;  %v1810_v34 = vshrl.u32 %v12614_v18, 16 }
 0x100   : > { %v12648_v2 = vadd.f32 %v1146_v47, %v12541_v48 }
 0x101   : > { %v1310_v5 = vpop.f32.mrf.mxu2 }
 0x102   : > { %10548 = vmatmul.msk.bf16.vlgmr.msrb.gmra.mxu1 %vm860_vm1, %v2175_v58  ;;  %v12653_v10 = vadd.f32 %v1310_v5, %v1099_v59  ;;  %v1822_v5 = vshll.u32 %v12651_v8, 16 }
 0x106   : > { %v954_v13 = vpop.f32.mrf.mxu0  ;;  %10646 = vmatmul.msk.bf16.vlgmr.msrb.gmra.mxu2 %vm860_vm1, %v2548_v11  ;;  %v11864_v11 = vld [vmem:[#allocation2 + $0x28] sm:$0xff] }
 0x107   : > { %v1103_v21 = vpop.f32.mrf.mxu1  ;;  %v1102_v48 = vadd.f32 %v1101_v53, %v954_v13  ;;  %v1148_v26 = vpop.f32.mrf.mxu3  ;;  %v2550_v53 = vsel %vm2172_vm4, %v2547_v1, %v2549_v28  ;;  %v1819_v1 = vshrl.u32 %v12651_v8, 16  ;;  %v2551_v20 = vrot.slane %v11864_v11, 2 }
 0x108   : > { %v12660_v29 = vadd.f32 %v1148_v26, %v12554_v62  ;;  %v1812_v62 = vrot.slane %v1810_v34, 1 }
 0x109   : > { %10518 = vmatmul.msk.bf16.vlgmr.msrb.gmra.mxu0 %vm860_vm1, %v1808_v19  ;;  %v1313_v16 = vpop.f32.mrf.mxu2 }
 0x10a   : > { %v12667_v36 = vadd.f32 %v1313_v16, %v1102_v48  ;;  %v1816_v33 = vor.u32 %v1815_v23, %v1812_v62  ;;  %v2179_v48 = vsel %vm2172_vm4, %v2176_v25, %v2178_v7  ;;  %v1553_v25 = vrot.slane %v12699_v35, 1 }
 0x10c   : > { %10490 = vmatmul.msk.bf16.gmra.mxu3 %vm860_vm1, %v1550_v30  ;;  %v1817_v3 = vsel %vm1791_vm5, %v1807_v61, %v1816_v33 }
 0x10e   : > { %v956_v38 = vpop.f32.mrf.mxu0 }
 0x10f   : > { %v1106_v42 = vpop.f32.mrf.mxu1  ;;  %v1104_v40 = vadd.f32 %v1103_v21, %v956_v38  ;;  %v1151_v44 = vpop.f32.mrf.mxu3  ;;  %v1824_v21 = vrot.slane %v1822_v5, 2  ;;  %v2552_v38 = vsel %vm2172_vm4, %v2549_v28, %v2551_v20  ;;  %v1828_v28 = vshrl.u32 %v12675_v52, 16 }
 0x110   : > { %v12672_v45 = vadd.f32 %v1151_v44, %v12561_v9 }
 0x111   : > { %v1315_v18 = vpop.f32.mrf.mxu2 }
 0x112   : > { %10549 = vmatmul.msk.bf16.gmra.mxu1 %vm860_vm1, %v2177_v43  ;;  %v12677_v49 = vadd.f32 %v1315_v18, %v1104_v40  ;;  %v1554_v18 = vsel %vm1170_vm2, %v1551_v46, %v1553_v25 }
 0x116   : > { %v959_v55 = vpop.f32.mrf.mxu0  ;;  %10647 = vmatmul.msk.bf16.gmra.mxu2 %vm860_vm1, %v2550_v53  ;;  %v1831_v53 = vshll.u32 %v12675_v52, 16 }
 0x117   : > { %v1108_v57 = vpop.f32.mrf.mxu1  ;;  %v1107_v58 = vadd.f32 %v1106_v42, %v959_v55  ;;  %v1153_v9 = vpop.f32.mrf.mxu3 }
 0x118   : > { %v12684_v59 = vadd.f32 %v1153_v9, %v12570_v27  ;;  %v1821_v27 = vrot.slane %v1819_v1, 1  ;;  %v1833_v9 = vrot.slane %v1831_v53, 2 }
 0x119   : > { %10519 = vmatmul.msk.bf16.gmra.mxu0 %vm860_vm1, %v1817_v3  ;;  %v1318_v47 = vpop.f32.mrf.mxu2  ;;  %v11865_v3 = vld [vmem:[#allocation2 + $0x30] sm:$0xff] }
 0x11a   : > { %v12691_v61 = vadd.f32 %v1318_v47, %v1107_v58  ;;  %v1825_v34 = vor.u32 %v1824_v21, %v1821_v27  ;;  %v2553_v46 = vrot.slane %v11865_v3, 2 }
 0x11c   : > { %10491 = vmatmul.msk.bf16.gmra.mxu3 %vm860_vm1, %v1552_v63  ;;  %v1826_v62 = vsel %vm1791_vm5, %v1816_v33, %v1825_v34  ;;  %v2180_v33 = vrot.slane %v12675_v52, 2  ;;  %v2554_v27 = vsel %vm2172_vm4, %v2551_v20, %v2553_v46  ;;  %v1837_v20 = vshrl.u32 %v12699_v35, 16 }
 0x11e   : > { %v961_v13 = vpop.f32.mrf.mxu0  ;;  %v2181_v47 = vsel %vm2172_vm4, %v2178_v7, %v2180_v33 }
 0x11f   : > { %v1111_v19 = vpop.f32.mrf.mxu1  ;;  %v1109_v26 = vadd.f32 %v1108_v57, %v961_v13  ;;  %v1156_v16 = vpop.f32.mrf.mxu3  ;;  %v12723_v13 = vld [vmem:[#allocation2 + $0x38] sm:$0xff] }
 0x120   : > { %v12696_v30 = vadd.f32 %v1156_v16, %v12577_v39  ;;  %v1555_v7 = vrot.slane %v12723_v13, 1 }
 0x121   : > { %v1320_v8 = vpop.f32.mrf.mxu2 }
 0x122   : > { %10550 = vmatmul.msk.bf16.gmra.mxu1 %vm860_vm1, %v2179_v48  ;;  %v12701_v37 = vadd.f32 %v1320_v8, %v1109_v26 }
 0x126   : > { %v964_v42 = vpop.f32.mrf.mxu0  ;;  %10648 = vmatmul.msk.bf16.gmra.mxu2 %vm860_vm1, %v2552_v38 }
 0x127   : > { %v1113_v23 = vpop.f32.mrf.mxu1  ;;  %v1112_v43 = vadd.f32 %v1111_v19, %v964_v42  ;;  %v1158_v39 = vpop.f32.mrf.mxu3  ;;  %v1556_v42 = vsel %vm1170_vm2, %v1553_v25, %v1555_v7 }
 0x128   : > { %v12708_v40 = vadd.f32 %v1158_v39, %v12597_v60  ;;  %v1830_v60 = vrot.slane %v1828_v28, 1 }
 0x129   : > { %10520 = vmatmul.msk.bf16.gmra.mxu0 %vm860_vm1, %v1826_v62  ;;  %v1323_v44 = vpop.f32.mrf.mxu2  ;;  %v1840_v62 = vshll.u32 %v12699_v35, 16 }
 0x12a   : > { %v12715_v55 = vadd.f32 %v1323_v44, %v1112_v43  ;;  %v1834_v11 = vor.u32 %v1833_v9, %v1830_v60  ;;  %v11866_v43 = vld [vmem:[#allocation2 + $0x38] sm:$0xff]  ;;  %v12747_v60 = vld [vmem:[#allocation2 + $0x40] sm:$0xff] }
 0x12b   : > { %v2555_v25 = vrot.slane %v11866_v43, 2 }
 0x12c   : > { %10492 = vmatmul.msk.bf16.gmra.mxu3 %vm860_vm1, %v1554_v18  ;;  %v1835_v48 = vsel %vm1791_vm5, %v1825_v34, %v1834_v11  ;;  %v2182_v34 = vrot.slane %v12699_v35, 2  ;;  %v1842_v18 = vrot.slane %v1840_v62, 2 }
 0x12e   : > { %v966_v57 = vpop.f32.mrf.mxu0  ;;  %v2183_v28 = vsel %vm2172_vm4, %v2180_v33, %v2182_v34  ;;  %v1557_v33 = vrot.slane %v12747_v60, 1 }
 0x12f   : > { %v1116_v58 = vpop.f32.mrf.mxu1  ;;  %v1114_v63 = vadd.f32 %v1113_v23, %v966_v57  ;;  %v1353_v1 = vpop.f32.mrf.mxu3 }
 0x130   : > { %v12720_v5 = vadd.f32 %v1353_v1, %v12611_v14 }
 0x131   : > { %v1325_v52 = vpop.f32.mrf.mxu2 }
 0x132   : > { %10551 = vmatmul.msk.bf16.gmra.mxu1 %vm860_vm1, %v2181_v47  ;;  %v12725_v19 = vadd.f32 %v1325_v52, %v1114_v63  ;;  %v2556_v47 = vsel %vm2172_vm4, %v2553_v46, %v2555_v25  ;;  %v1846_v46 = vshrl.u32 %v12723_v13, 16 }
 0x136   : > { %v969_v21 = vpop.f32.mrf.mxu0  ;;  %10649 = vmatmul.msk.bf16.gmra.mxu2 %vm860_vm1, %v2554_v27 }
 0x137   : > { %v1118_v26 = vpop.f32.mrf.mxu1  ;;  %v1117_v16 = vadd.f32 %v1116_v58, %v969_v21  ;;  %v1355_v14 = vpop.f32.mrf.mxu3 }
 0x138   : > { %v12732_v8 = vadd.f32 %v1355_v14, %v12629_v56  ;;  %v1839_v56 = vrot.slane %v1837_v20, 1 }
 0x139   : > { %10521 = vmatmul.msk.bf16.gmra.mxu0 %vm860_vm1, %v1835_v48  ;;  %v1328_v38 = vpop.f32.mrf.mxu2 }
 0x13a   : > { %v12739_v23 = vadd.f32 %v1328_v38, %v1117_v16  ;;  %v1843_v58 = vor.u32 %v1842_v18, %v1839_v56  ;;  %v1849_v16 = vshll.u32 %v12723_v13, 16  ;;  %v11867_v38 = vld [vmem:[#allocation2 + $0x40] sm:$0xff] }
 0x13c   : > { %10493 = vmatmul.msk.bf16.gmra.mxu3 %vm860_vm1, %v1556_v42  ;;  %v1844_v1 = vsel %vm1791_vm5, %v1834_v11, %v1843_v58  ;;  %v2184_v11 = vrot.slane %v12723_v13, 2  ;;  %v1851_v62 = vrot.slane %v1849_v16, 2 }
 0x13e   : > { %v971_v39 = vpop.f32.mrf.mxu0  ;;  %v2185_v43 = vsel %vm2172_vm4, %v2182_v34, %v2184_v11 }
 0x13f   : > { %v1121_v44 = vpop.f32.mrf.mxu1  ;;  %v1119_v53 = vadd.f32 %v1118_v26, %v971_v39  ;;  %v1358_v3 = vpop.f32.mrf.mxu3  ;;  %v1558_v26 = vsel %vm1170_vm2, %v1555_v7, %v1557_v33  ;;  %v2557_v7 = vrot.slane %v11867_v38, 2 }
 0x140   : > { %v12744_v57 = vadd.f32 %v1358_v3, %v12648_v2 }
 0x141   : > { %v1330_v35 = vpop.f32.mrf.mxu2  ;;  %v2558_v3 = vsel %vm2172_vm4, %v2555_v25, %v2557_v7  ;;  %v1855_v25 = vshrl.u32 %v12747_v60, 16 }
 0x142   : > { %10552 = vmatmul.msk.bf16.gmra.mxu1 %vm860_vm1, %v2183_v28  ;;  %v12749_v9 = vadd.f32 %v1330_v35, %v1119_v53  ;;  %v12771_v28 = vld [vmem:[#allocation2 + $0x48] sm:$0xff] }
 0x143   : > { %v1559_v34 = vrot.slane %v12771_v28, 1 }
 0x146   : > { %v974_v63 = vpop.f32.mrf.mxu0  ;;  %10650 = vmatmul.msk.bf16.gmra.mxu2 %vm860_vm1, %v2556_v47 }
 0x147   : > { %v1123_v52 = vpop.f32.mrf.mxu1  ;;  %v1122_v27 = vadd.f32 %v1121_v44, %v974_v63  ;;  %v1360_v2 = vpop.f32.mrf.mxu3 }
 0x148   : > { %v12756_v21 = vadd.f32 %v1360_v2, %v12660_v29  ;;  %v1848_v29 = vrot.slane %v1846_v46, 1  ;;  %v1560_v2 = vsel %vm1170_vm2, %v1557_v33, %v1559_v34  ;;  %v11868_v46 = vld [vmem:[#allocation2 + $0x48] sm:$0xff] }
 0x149   : > { %10522 = vmatmul.msk.bf16.gmra.mxu0 %vm860_vm1, %v1844_v1  ;;  %v1333_v48 = vpop.f32.mrf.mxu2  ;;  %v2559_v33 = vrot.slane %v11868_v46, 2  ;;  %v11869_v46 = vld [vmem:[#allocation2 + $0x50] sm:$0xff] }
 0x14a   : > { %v12763_v14 = vadd.f32 %v1333_v48, %v1122_v27  ;;  %v1852_v18 = vor.u32 %v1851_v62, %v1848_v29  ;;  %v1858_v48 = vshll.u32 %v12747_v60, 16 }
 0x14c   : > { %10494 = vmatmul.msk.bf16.gmra.mxu3 %vm860_vm1, %v1558_v26  ;;  %v1853_v47 = vsel %vm1791_vm5, %v1843_v58, %v1852_v18  ;;  %v2186_v58 = vrot.slane %v12747_v60, 2 }
 0x14e   : > { %v976_v42 = vpop.f32.mrf.mxu0 }
 0x14f   : > { %v1126_v20 = vpop.f32.mrf.mxu1  ;;  %v1124_v39 = vadd.f32 %v1123_v52, %v976_v42  ;;  %v1363_v44 = vpop.f32.mrf.mxu3  ;;  %v1860_v42 = vrot.slane %v1858_v48, 2 }
 0x150   : > { %v12768_v56 = vadd.f32 %v1363_v44, %v12672_v45  ;;  %v12795_v44 = vld [vmem:[#allocation2 + $0x50] sm:$0xff] }
 0x151   : > { %v1335_v13 = vpop.f32.mrf.mxu2 }
 0x152   : > { %10553 = vmatmul.msk.bf16.gmra.mxu1 %vm860_vm1, %v2185_v43  ;;  %v12773_v53 = vadd.f32 %v1335_v13, %v1124_v39 }
 0x156   : > { %v979_v35 = vpop.f32.mrf.mxu0  ;;  %10651 = vmatmul.msk.bf16.gmra.mxu2 %vm860_vm1, %v2558_v3  ;;  %v2560_v3 = vsel %vm2172_vm4, %v2557_v7, %v2559_v33  ;;  %v1864_v7 = vshrl.u32 %v12771_v28, 16 }
 0x157   : > { %v1128_v63 = vpop.f32.mrf.mxu1  ;;  %v1127_v1 = vadd.f32 %v1126_v20, %v979_v35  ;;  %v1365_v45 = vpop.f32.mrf.mxu3  ;;  %v2187_v20 = vsel %vm2172_vm4, %v2184_v11, %v2186_v58  ;;  %v1561_v11 = vrot.slane %v12795_v44, 1 }
 0x158   : > { %v12780_v52 = vadd.f32 %v1365_v45, %v12684_v59  ;;  %v1857_v59 = vrot.slane %v1855_v25, 1  ;;  %v1867_v25 = vshll.u32 %v12771_v28, 16 }
 0x159   : > { %10523 = vmatmul.msk.bf16.gmra.mxu0 %vm860_vm1, %v1853_v47  ;;  %v1338_v27 = vpop.f32.mrf.mxu2 }
 0x15a   : > { %v12787_v26 = vadd.f32 %v1338_v27, %v1127_v1  ;;  %v1861_v39 = vor.u32 %v1860_v42, %v1857_v59  ;;  %v1869_v59 = vrot.slane %v1867_v25, 2  ;;  %v11883_v25 = vld [vmem:[%s17000_s2 + $0x80] sm:$0xff] }
 0x15b   : > { %3285 = vmatpush.bf16.msra.mxu0 %v11883_v25 }
 0x15c   : > { %10495 = vmatmul.msk.bf16.gmra.mxu3 %vm860_vm1, %v1560_v2  ;;  %v1862_v47 = vsel %vm1791_vm5, %v1852_v18, %v1861_v39  ;;  %v1562_v2 = vsel %vm1170_vm2, %v1559_v34, %v1561_v11  ;;  %v2188_v18 = vrot.slane %v12771_v28, 2  ;;  %v2561_v34 = vrot.slane %v11869_v46, 2  ;;  %v11881_v28 = vld [vmem:[%s17000_s2 + $0x70] sm:$0xff] }
 0x15d   : > { %3037 = vmatpush.bf16.msra.mxu3 %v11881_v28 }
 0x15e   : > { %v981_v16 = vpop.f32.mrf.mxu0  ;;  %v2189_v42 = vsel %vm2172_vm4, %v2186_v58, %v2188_v18  ;;  %v2562_v58 = vsel %vm2172_vm4, %v2559_v33, %v2561_v34 }
 0x15f   : > { %v1131_v38 = vpop.f32.mrf.mxu1  ;;  %v1129_v29 = vadd.f32 %v1128_v63, %v981_v16  ;;  %v1368_v62 = vpop.f32.mrf.mxu3 }
 0x160   : > { %v12792_v43 = vadd.f32 %v1368_v62, %v12696_v30 }
 0x161   : > { %v1340_v60 = vpop.f32.mrf.mxu2 }
 0x162   : > { %10554 = vmatmul.msk.bf16.gmra.mxu1 %vm860_vm1, %v2187_v20  ;;  %v12797_v13 = vadd.f32 %v1340_v60, %v1129_v29 }
 0x166   : > { %v984_v35 = vpop.f32.mrf.mxu0  ;;  %10652 = vmatmul.msk.bf16.gmra.mxu2 %vm860_vm1, %v2560_v3 }
 0x167   : > { %v1133_v63 = vpop.f32.mrf.mxu1  ;;  %v1132_v1 = vadd.f32 %v1131_v38, %v984_v35  ;;  %v1370_v30 = vpop.f32.mrf.mxu3  ;;  %v12820_v35 = vld [vmem:[#allocation2 + $0x58] sm:$0xff] }
 0x168   : > { %v12804_v45 = vadd.f32 %v1370_v30, %v12708_v40  ;;  %v1866_v40 = vrot.slane %v1864_v7, 1 }
 0x169   : > { %10524 = vmatmul.msk.bf16.gmra.mxu0 %vm860_vm1, %v1862_v47  ;;  %v1343_v27 = vpop.f32.mrf.mxu2 }
 0x16a   : > { %v12811_v48 = vadd.f32 %v1343_v27, %v1132_v1  ;;  %v1870_v3 = vor.u32 %v1869_v59, %v1866_v40  ;;  %v11870_v59 = vld [vmem:[#allocation2 + $0x58] sm:$0xff] }
 0x16c   : > { %10496 = vmatmul.msk.bf16.gmra.mxu3 %vm860_vm1, %v1562_v2  ;;  %v1871_v1 = vsel %vm1791_vm5, %v1861_v39, %v1870_v3  ;;  %v1873_v39 = vshrl.u32 %v12795_v44, 16 }
 0x16e   : > { %v986_v16 = vpop.f32.mrf.mxu0 }
 0x16f   : > { %v1136_v38 = vpop.f32.mrf.mxu1  ;;  %v1134_v20 = vadd.f32 %v1133_v63, %v986_v16  ;;  %v1656_v29 = vpop.f32.mrf.mxu3  ;;  %v1876_v16 = vshll.u32 %v12795_v44, 16 }
 0x170   : > { %v1746_v62 = vadd.f32 %v1656_v29, %v12508_v6  ;;  %v1563_v6 = vrot.slane %v12820_v35, 1 }
 0x171   : > { %v1345_v60 = vpop.f32.mrf.mxu2  ;;  %v1878_v29 = vrot.slane %v1876_v16, 2 }
 0x172   : > { %10555 = vmatmul.msk.bf16.gmra.mxu1 %vm860_vm1, %v2189_v42  ;;  %v12822_v47 = vadd.f32 %v1345_v60, %v1134_v20  ;;  %v1564_v33 = vsel %vm1170_vm2, %v1561_v11, %v1563_v6  ;;  %v1875_v20 = vrot.slane %v1873_v39, 1 }
 0x176   : > { %v989_v63 = vpop.f32.mrf.mxu0  ;;  %10653 = vmatmul.msk.bf16.gmra.mxu2 %vm860_vm1, %v2562_v58  ;;  %v2563_v58 = vrot.slane %v11870_v59, 2 }
 0x177   : > { %v1138_v30 = vpop.f32.mrf.mxu1  ;;  %v1137_v27 = vadd.f32 %v1136_v38, %v989_v63  ;;  %v1658_v2 = vpop.f32.mrf.mxu3  ;;  %v2190_v38 = vrot.slane %v12795_v44, 2 }
 0x178   : > { %v1747_v7 = vadd.f32 %v1658_v2, %v12524_v24  ;;  %v2564_v25 = vsel %vm2172_vm4, %v2561_v34, %v2563_v58  ;;  %v1882_v34 = vshrl.u32 %v12820_v35, 16 }
 0x179   : > { %10525 = vmatmul.msk.bf16.gmra.mxu0 %vm860_vm1, %v1871_v1  ;;  %v1348_v46 = vpop.f32.mrf.mxu2  ;;  %v2191_v28 = vsel %vm2172_vm4, %v2188_v18, %v2190_v38  ;;  %v1879_v1 = vor.u32 %v1878_v29, %v1875_v20  ;;  %v1885_v29 = vshll.u32 %v12820_v35, 16 }
 0x17a   : > { %v12837_v40 = vadd.f32 %v1348_v46, %v1137_v27  ;;  %v12843_v27 = vld [vmem:[#allocation2 + $0x60] sm:$0xff] }
 0x17b   : > { %v1565_v18 = vrot.slane %v12843_v27, 1 }
 0x17c   : > { %10497 = vmatmul.msk.bf16.gmra.mxu3 %vm860_vm1, %v1564_v33  ;;  %v1880_v33 = vsel %vm1791_vm5, %v1870_v3, %v1879_v1  ;;  %v2192_v3 = vrot.slane %v12820_v35, 2 }
 0x17d   : > { %v1566_v20 = vsel %vm1170_vm2, %v1563_v6, %v1565_v18 }
 0x17e   : > { %v991_v24 = vpop.f32.mrf.mxu0  ;;  %v2193_v6 = vsel %vm2172_vm4, %v2190_v38, %v2192_v3 }
 0x17f   : > { %v2285_v42 = vpop.f32.mrf.mxu1  ;;  %v1139_v60 = vadd.f32 %v1138_v30, %v991_v24  ;;  %v1661_v11 = vpop.f32.mrf.mxu3 }
 0x180   : > { %v1748_v63 = vadd.f32 %v1661_v11, %v12535_v41  ;;  %v1884_v11 = vrot.slane %v1882_v34, 1 }
 0x181   : > { %v1350_v44 = vpop.f32.mrf.mxu2 }
 0x182   : > { %10556 = vmatmul.msk.bf16.gmra.mxu1 %vm860_vm1, %v2191_v28  ;;  %v12845_v2 = vadd.f32 %v1350_v44, %v1139_v60  ;;  %v1887_v44 = vrot.slane %v1885_v29, 2 }
 0x186   : > { %v2037_v46 = vpop.f32.mrf.mxu0  ;;  %10654 = vmatmul.msk.bf16.gmra.mxu2 %vm860_vm1, %v2564_v25 }
 0x187   : > { %v2287_v30 = vpop.f32.mrf.mxu1  ;;  %v2127_v39 = vadd.f32 %v2037_v46, %v1746_v62  ;;  %v1663_v41 = vpop.f32.mrf.mxu3  ;;  %v11871_v62 = vld [vmem:[#allocation2 + $0x60] sm:$0xff] }
 0x188   : > { %v1749_v16 = vadd.f32 %v1663_v41, %v12548_v54  ;;  %v11909_v54 = vld [vmem:[%s17002_s4 + $0x38] sm:$0xff] }
 0x189   : > { %v2375_v59 = vadd.f32 %v2285_v42, %v2127_v39  ;;  %10526 = vmatmul.msk.bf16.gmra.mxu0 %vm860_vm1, %v1880_v33  ;;  %v2658_v24 = vpop.f32.mrf.mxu2  ;;  %4764 = vmatpush.bf16.msra.mxu2 %v11909_v54  ;;  %v2565_v33 = vrot.slane %v11871_v62, 2  ;;  %v11917_v41 = vld [vmem:[%s17002_s4 + $0x78] sm:$0xff] }
 0x18a   : > { %4599 = vmatpush.bf16.msra.mxu1 %v11917_v41 }
 0x18b   : > { %v12857_v28 = vadd.f32 %v2658_v24, %v2375_v59  ;;  %v1888_v24 = vor.u32 %v1887_v44, %v1884_v11 }
 0x18c   : > { %10498 = vmatmul.msk.bf16.gmra.mxu3 %vm860_vm1, %v1566_v20  ;;  %v12869_v20 = vld [vmem:[#allocation2 + $0x68] sm:$0xff] }
 0x18d   : > { %v1889_v29 = vsel %vm1791_vm5, %v1879_v1, %v1888_v24  ;;  %v2194_v1 = vrot.slane %v12843_v27, 2 }
 0x18e   : > { %v2039_v42 = vpop.f32.mrf.mxu0 }
 0x18f   : > { %v2290_v60 = vpop.f32.mrf.mxu1  ;;  %v2128_v25 = vadd.f32 %v2039_v42, %v1747_v7  ;;  %v1666_v46 = vpop.f32.mrf.mxu3  ;;  %v2566_v7 = vsel %vm2172_vm4, %v2563_v58, %v2565_v33  ;;  %v1891_v58 = vshrl.u32 %v12843_v27, 16 }
 0x190   : > { %v1750_v35 = vadd.f32 %v1666_v46, %v12558_v4  ;;  %v1567_v4 = vrot.slane %v12869_v20, 1 }
 0x191   : > { %v2376_v39 = vadd.f32 %v2287_v30, %v2128_v25  ;;  %v2660_v59 = vpop.f32.mrf.mxu2  ;;  %v1894_v25 = vshll.u32 %v12843_v27, 16 }
 0x192   : > { %10557 = vmatmul.msk.bf16.gmra.mxu1 %vm860_vm1, %v2193_v6  ;;  %v1568_v6 = vsel %vm1170_vm2, %v1565_v18, %v1567_v4 }
 0x193   : > { %v12871_v34 = vadd.f32 %v2660_v59, %v2376_v39  ;;  %v2195_v59 = vsel %vm2172_vm4, %v2192_v3, %v2194_v1 }
 0x196   : > { %v2042_v38 = vpop.f32.mrf.mxu0  ;;  %10655 = vmatmul.msk.bf16.gmra.mxu2 %vm860_vm1, %v2566_v7 }
 0x197   : > { %v2292_v30 = vpop.f32.mrf.mxu1  ;;  %v2129_v62 = vadd.f32 %v2042_v38, %v1748_v63  ;;  %v1668_v54 = vpop.f32.mrf.mxu3  ;;  %v11872_v63 = vld [vmem:[#allocation2 + $0x68] sm:$0xff] }
 0x198   : > { %v1751_v42 = vadd.f32 %v1668_v54, %v12564_v15  ;;  %v1893_v15 = vrot.slane %v1891_v58, 1  ;;  %v2567_v18 = vrot.slane %v11872_v63, 2 }
 0x199   : > { %v2377_v11 = vadd.f32 %v2290_v60, %v2129_v62  ;;  %10527 = vmatmul.msk.bf16.gmra.mxu0 %vm860_vm1, %v1889_v29  ;;  %v2663_v44 = vpop.f32.mrf.mxu2  ;;  %v1896_v60 = vrot.slane %v1894_v25, 2 }
 0x19b   : > { %v12883_v46 = vadd.f32 %v2663_v44, %v2377_v11  ;;  %v1897_v54 = vor.u32 %v1896_v60, %v1893_v15  ;;  %v12889_v11 = vld [vmem:[#allocation2 + $0x70] sm:$0xff] }
 0x19c   : > { %10499 = vmatmul.msk.bf16.gmra.mxu3 %vm860_vm1, %v1568_v6  ;;  %v2568_v6 = vsel %vm2172_vm4, %v2565_v33, %v2567_v18  ;;  %v1900_v33 = vshrl.u32 %v12869_v20, 16 }
 0x19d   : > { %v1898_v25 = vsel %vm1791_vm5, %v1888_v24, %v1897_v54  ;;  %v2196_v24 = vrot.slane %v12869_v20, 2 }
 0x19e   : > { %v2044_v39 = vpop.f32.mrf.mxu0 }
 0x19f   : > { %v2295_v41 = vpop.f32.mrf.mxu1  ;;  %v2130_v7 = vadd.f32 %v2044_v39, %v1749_v16  ;;  %v1671_v38 = vpop.f32.mrf.mxu3  ;;  %v1569_v16 = vrot.slane %v12889_v11, 1 }
 0x1a0   : > { %v1752_v29 = vadd.f32 %v1671_v38, %v12574_v31 }
 0x1a1   : > { %v2378_v62 = vadd.f32 %v2292_v30, %v2130_v7  ;;  %v2665_v27 = vpop.f32.mrf.mxu2  ;;  %v1570_v60 = vsel %vm1170_vm2, %v1567_v4, %v1569_v16 }
 0x1a2   : > { %10558 = vmatmul.msk.bf16.gmra.mxu1 %vm860_vm1, %v2195_v59  ;;  %v1903_v59 = vshll.u32 %v12869_v20, 16  ;;  %v11908_v20 = vld [vmem:[%s17002_s4 + $0x30] sm:$0xff] }
 0x1a3   : > { %v12891_v44 = vadd.f32 %v2665_v27, %v2378_v62  ;;  %v2197_v27 = vsel %vm2172_vm4, %v2194_v1, %v2196_v24  ;;  %4765 = vmatpush.bf16.msra.mxu2 %v11908_v20 }
 0x1a4   : > { %v1905_v62 = vrot.slane %v1903_v59, 2 }
 0x1a6   : > { %v2047_v58 = vpop.f32.mrf.mxu0  ;;  %10656 = vmatmul.msk.bf16.gmra.mxu2 %vm860_vm1, %v2568_v6 }
 0x1a7   : > { %v2297_v3 = vpop.f32.mrf.mxu1  ;;  %v2131_v63 = vadd.f32 %v2047_v58, %v1750_v35  ;;  %v1673_v31 = vpop.f32.mrf.mxu3  ;;  %v12905_v35 = vld [vmem:[#allocation2 + $0x70] sm:$0xff] }
 0x1a8   : > { %v1753_v30 = vadd.f32 %v1673_v31, %v12587_v50  ;;  %v2569_v58 = vrot.slane %v12905_v35, 2 }
 0x1a9   : > { %v2379_v39 = vadd.f32 %v2295_v41, %v2131_v63  ;;  %10528 = vmatmul.msk.bf16.gmra.mxu0 %vm860_vm1, %v1898_v25  ;;  %v2668_v15 = vpop.f32.mrf.mxu2  ;;  %v1902_v41 = vrot.slane %v1900_v33, 1 }
 0x1ab   : > { %v12903_v7 = vadd.f32 %v2668_v15, %v2379_v39  ;;  %v1906_v39 = vor.u32 %v1905_v62, %v1902_v41  ;;  %v12915_v15 = vld [vmem:[#allocation2 + $0x78] sm:$0xff] }
 0x1ac   : > { %10500 = vmatmul.msk.bf16.gmra.mxu3 %vm860_vm1, %v1570_v60  ;;  %v1571_v33 = vrot.slane %v12915_v15, 1 }
 0x1ae   : > { %v2049_v38 = vpop.f32.mrf.mxu0 }
 0x1af   : > { %v2300_v50 = vpop.f32.mrf.mxu1  ;;  %v2132_v6 = vadd.f32 %v2049_v38, %v1751_v42  ;;  %v1676_v4 = vpop.f32.mrf.mxu3  ;;  %v11916_v42 = vld [vmem:[%s17002_s4 + $0x70] sm:$0xff] }
 0x1b0   : > { %v1754_v25 = vadd.f32 %v1676_v4, %v12607_v17  ;;  %v2570_v17 = vsel %vm2172_vm4, %v2567_v18, %v2569_v58  ;;  %4600 = vmatpush.bf16.msra.mxu1 %v11916_v42  ;;  %v1572_v18 = vsel %vm1170_vm2, %v1569_v16, %v1571_v33  ;;  %v2198_v4 = vrot.slane %v12889_v11, 2 }
 0x1b1   : > { %v2380_v63 = vadd.f32 %v2297_v3, %v2132_v6  ;;  %v2670_v31 = vpop.f32.mrf.mxu2  ;;  %v1907_v3 = vsel %vm1791_vm5, %v1897_v54, %v1906_v39  ;;  %v1909_v6 = vshrl.u32 %v12889_v11, 16  ;;  %v1912_v54 = vshll.u32 %v12889_v11, 16  ;;  %v3491_v11 = vld [vmem:[%s16998_s0 + $0x10] sm:$0xff] }
 0x1b2   : > { %10559 = vmatmul.msk.bf16.gmra.mxu1 %vm860_vm1, %v2197_v27  ;;  %v2199_v16 = vsel %vm2172_vm4, %v2196_v24, %v2198_v4  ;;  %v3489_v24 = vld [vmem:[%s16998_s0] sm:$0xff] }
 0x1b3   : > { %v12917_v60 = vadd.f32 %v2670_v31, %v2380_v63  ;;  %v1914_v31 = vrot.slane %v1912_v54, 2 }
 0x1b6   : > { %v2052_v1 = vpop.f32.mrf.mxu0  ;;  %10657 = vmatmul.msk.bf16.gmra.mxu2 %vm860_vm1, %v2570_v17 }
 0x1b7   : > { %v2302_v59 = vpop.f32.mrf.mxu1  ;;  %v2133_v35 = vadd.f32 %v2052_v1, %v1752_v29  ;;  %v1678_v38 = vpop.f32.mrf.mxu3  ;;  %v12936_v29 = vld [vmem:[#allocation2 + $0x78] sm:$0xff] }
 0x1b8   : > { %v12927_v41 = vadd.f32 %v1678_v38, %v12616_v22  ;;  %v2571_v1 = vrot.slane %v12936_v29, 2 }
 0x1b9   : > { %v2381_v62 = vadd.f32 %v2300_v50, %v2133_v35  ;;  %10529 = vmatmul.msk.bf16.gmra.mxu0 %vm860_vm1, %v1907_v3  ;;  %v2673_v27 = vpop.f32.mrf.mxu2  ;;  %v1911_v50 = vrot.slane %v1909_v6, 1 }
 0x1bb   : > { %v12934_v63 = vadd.f32 %v2673_v27, %v2381_v62  ;;  %v12947_v62 = vor.u32 %v1914_v31, %v1911_v50  ;;  %v12949_v27 = vld [vmem:[#allocation2 + $0x80] sm:$0xff] }
 0x1bc   : > { %10501 = vmatmul.msk.bf16.gmra.mxu3 %vm860_vm1, %v1572_v18  ;;  %v12269_v18 = vmov 0   ;;  %v1573_v54 = vrot.slane %v12949_v27, 1 }
 0x1bd   : > { %12219 = vset.pattern.permute.xlu0 %v12269_v18  ;;  %518 = vst [vmem:[#allocation3] sm:$0xf] %v12269_v18  ;;  %12220 = vset.pattern.permute.xlu1 %v12269_v18  ;;  %v1916_v6 = vsel %vm1791_vm5, %v1906_v39, %v12947_v62 }
 0x1be   : > { %v2054_v22 = vpop.f32.mrf.mxu0  ;;  %519 = vst [vmem:[#allocation3 + $0x4] sm:$0xf] %v12269_v18  ;;  %12221 = vset.pattern.permute.xlu2 %v12269_v18  ;;  %3527 = vperm.xlu0 %12219, %v3489_v24  }
 0x1bf   : > { %v2305_v20 = vpop.f32.mrf.mxu1  ;;  %v2134_v42 = vadd.f32 %v2054_v22, %v1753_v30  ;;  %v1681_v17 = vpop.f32.mrf.mxu3  ;;  %520 = vst [vmem:[#allocation3 + $0x8] sm:$0xf] %v12269_v18  ;;  %3537 = vperm.xlu1 %12220, %v3491_v11   ;;  %v1930_v11 = vshll.u32 %v12949_v27, 16 }
 0x1c0   : > { %v12944_v3 = vadd.f32 %v1681_v17, %v12638_v0  ;;  %v2572_v0 = vsel %vm2172_vm4, %v2569_v58, %v2571_v1  ;;  %521 = vst [vmem:[#allocation3 + $0xc] sm:$0xf] %v12269_v18  ;;  %v1921_v17 = vshll.u32 %v12915_v15, 16 }
 0x1c1   : > { %v2382_v35 = vadd.f32 %v2302_v59, %v2134_v42  ;;  %v2675_v38 = vpop.f32.mrf.mxu2  ;;  %522 = vst [vmem:[#allocation3 + $0x10] sm:$0xf] %v12269_v18  ;;  %v1918_v42 = vshrl.u32 %v12915_v15, 16 }
 0x1c2   : > { %10560 = vmatmul.msk.bf16.gmra.mxu1 %vm860_vm1, %v2199_v16  ;;  %523 = vst [vmem:[#allocation3 + $0x14] sm:$0xf] %v12269_v18 }
 0x1c3   : > { %v12954_v30 = vadd.f32 %v2675_v38, %v2382_v35  ;;  %524 = vst [vmem:[#allocation3 + $0x18] sm:$0xf] %v12269_v18  ;;  %v2200_v35 = vrot.slane %v12915_v15, 2  ;;  %v12991_v38 = vld [vmem:[#allocation2 + $0x80] sm:$0xff]  ;;  %v1920_v24 = vrot.slane %v1918_v42, 1  ;;  %v13016_v42 = vld [vmem:[#allocation2 + $0x88] sm:$0xff] }
 0x1c4   : > { %525 = vst [vmem:[#allocation3 + $0x1c] sm:$0xf] %v12269_v18 }
 0x1c5   : > { %526 = vst [vmem:[#allocation3 + $0x20] sm:$0xf] %v12269_v18 }
 0x1c6   : > { %v2057_v59 = vpop.f32.mrf.mxu0  ;;  %10658 = vmatmul.msk.bf16.gmra.mxu2 %vm860_vm1, %v2572_v0  ;;  %527 = vst [vmem:[#allocation3 + $0x24] sm:$0xf] %v12269_v18 }
 0x1c7   : > { %v2307_v22 = vpop.f32.mrf.mxu1  ;;  %v2135_v50 = vadd.f32 %v2057_v59, %v1754_v25  ;;  %v1683_v58 = vpop.f32.mrf.mxu3  ;;  %v1574_v25 = vsel %vm1170_vm2, %v1571_v33, %v1573_v54  ;;  %528 = vst [vmem:[#allocation3 + $0x28] sm:$0xf] %v12269_v18  ;;  %v1923_v59 = vrot.slane %v1921_v17, 2  ;;  %v11907_v17 = vld [vmem:[%s17002_s4 + $0x28] sm:$0xff] }
 0x1c8   : > { %v12974_v31 = vadd.f32 %v1683_v58, %v12653_v10  ;;  %529 = vst [vmem:[#allocation3 + $0x2c] sm:$0xf] %v12269_v18  ;;  %4766 = vmatpush.bf16.msra.mxu2 %v11907_v17 }
 0x1c9   : > { %v2383_v16 = vadd.f32 %v2305_v20, %v2135_v50  ;;  %10530 = vmatmul.msk.bf16.gmra.mxu0 %vm860_vm1, %v1916_v6  ;;  %v2678_v39 = vpop.f32.mrf.mxu2  ;;  %v3490_v20 = vld [vmem:[%s16998_s0 + $0x8] sm:$0xff]  ;;  %v2201_v6 = vsel %vm2172_vm4, %v2198_v4, %v2200_v35  ;;  %530 = vst [vmem:[#allocation3 + $0x30] sm:$0xf] %v12269_v18  ;;  %v13014_v4 = vor.u32 %v1923_v59, %v1920_v24  ;;  %v1575_v59 = vrot.slane %v13016_v42, 1 }
 0x1ca   : > { %3532 = vperm.xlu0 %12219, %v3490_v20   ;;  %531 = vst [vmem:[#allocation3 + $0x34] sm:$0xf] %v12269_v18 }
 0x1cb   : > { %v12985_v10 = vadd.f32 %v2678_v39, %v2383_v16  ;;  %v2573_v16 = vrot.slane %v12991_v38, 2  ;;  %532 = vst [vmem:[#allocation3 + $0x38] sm:$0xf] %v12269_v18  ;;  %v1925_v24 = vsel %vm1791_vm5, %v12947_v62, %v13014_v4  ;;  %v11915_v62 = vld [vmem:[%s17002_s4 + $0x68] sm:$0xff] }
 0x1cc   : > { %10502 = vmatmul.msk.bf16.gmra.mxu3 %vm860_vm1, %v1574_v25  ;;  %533 = vst [vmem:[#allocation3 + $0x3c] sm:$0xf] %v12269_v18  ;;  %4601 = vmatpush.bf16.msra.mxu1 %v11915_v62 }
 0x1cd   : > { %534 = vst [vmem:[#allocation3 + $0x40] sm:$0xf] %v12269_v18  ;;  %v2574_v20 = vsel %vm2172_vm4, %v2571_v1, %v2573_v16 }
 0x1ce   : > { %v2059_v33 = vpop.f32.mrf.mxu0  ;;  %535 = vst [vmem:[#allocation3 + $0x44] sm:$0xf] %v12269_v18 }
 0x1cf   : > { %v2310_v0 = vpop.f32.mrf.mxu1  ;;  %v2136_v50 = vadd.f32 %v2059_v33, %v12927_v41  ;;  %v1686_v58 = vpop.f32.mrf.mxu3  ;;  %536 = vst [vmem:[#allocation3 + $0x48] sm:$0xf] %v12269_v18 }
 0x1d0   : > { %v13007_v39 = vadd.f32 %v1686_v58, %v12667_v36  ;;  %v3495_v36 = vld [vmem:[%s16998_s0 + $0x30] sm:$0xff]  ;;  %537 = vst [vmem:[#allocation3 + $0x4c] sm:$0xf] %v12269_v18 }
 0x1d1   : > { %v2384_v25 = vadd.f32 %v2307_v22, %v2136_v50  ;;  %v2680_v41 = vpop.f32.mrf.mxu2  ;;  %538 = vst [vmem:[#allocation3 + $0x50] sm:$0xf] %v12269_v18 }
 0x1d2   : > { %10561 = vmatmul.msk.bf16.gmra.mxu1 %vm860_vm1, %v2201_v6  ;;  %3557 = vperm.xlu0 %12219, %v3495_v36   ;;  %539 = vst [vmem:[#allocation3 + $0x54] sm:$0xf] %v12269_v18  ;;  %v3498_v36 = vld [vmem:[%s16998_s0 + $0x48] sm:$0xff] }
 0x1d3   : > { %v13022_v22 = vadd.f32 %v2680_v41, %v2384_v25  ;;  %540 = vst [vmem:[#allocation3 + $0x58] sm:$0xf] %v12269_v18  ;;  %v2202_v41 = vrot.slane %v12949_v27, 2 }
 0x1d4   : > { %541 = vst [vmem:[#allocation3 + $0x5c] sm:$0xf] %v12269_v18 }
 0x1d5   : > { %542 = vst [vmem:[#allocation3 + $0x60] sm:$0xf] %v12269_v18 }
 0x1d6   : > { %v2062_v33 = vpop.f32.mrf.mxu0  ;;  %10659 = vmatmul.msk.bf16.gmra.mxu2 %vm860_vm1, %v2574_v20  ;;  %543 = vst [vmem:[#allocation3 + $0x64] sm:$0xf] %v12269_v18  ;;  %v12191_v20 = vld [vmem:[%s12356_s24 + $0x98] sm:$0xff]  }
 0x1d7   : > { %v2312_v6 = vpop.f32.mrf.mxu1  ;;  %v2137_v29 = vadd.f32 %v2062_v33, %v12944_v3  ;;  %v1688_v1 = vpop.f32.mrf.mxu3  ;;  %v3492_v3 = vld [vmem:[%s16998_s0 + $0x18] sm:$0xff]  ;;  %544 = vst [vmem:[#allocation3 + $0x68] sm:$0xf] %v12269_v18  ;;  %v12156_v15 = vunpack.c.h.bf16 %v12191_v20 }
 0x1d8   : > { %v13045_v50 = vadd.f32 %v1688_v1, %v12677_v49  ;;  %v1576_v49 = vsel %vm1170_vm2, %v1573_v54, %v1575_v59  ;;  %3542 = vperm.xlu1 %12220, %v3492_v3   ;;  %v13071_v54 = vld [vmem:[#allocation2 + $0x88] sm:$0xff]  ;;  %545 = vst [vmem:[#allocation3 + $0x6c] sm:$0xf] %v12269_v18  ;;  %v1932_v1 = vrot.slane %v1930_v11, 2 }
 0x1d9   : > { %v2385_v58 = vadd.f32 %v2310_v0, %v2137_v29  ;;  %10531 = vmatmul.msk.bf16.gmra.mxu0 %vm860_vm1, %v1925_v24  ;;  %v2683_v25 = vpop.f32.mrf.mxu2  ;;  %v1927_v0 = vshrl.u32 %v12949_v27, 16  ;;  %546 = vst [vmem:[#allocation3 + $0x70] sm:$0xf] %v12269_v18 }
 0x1da   : > { %3572 = vperm.xlu0 %12219, %v3498_v36   ;;  %547 = vst [vmem:[#allocation3 + $0x74] sm:$0xf] %v12269_v18  ;;  %v12155_v36 = vunpack.c.l.bf16 %v12191_v20 }
 0x1db   : > { %v13067_v17 = vadd.f32 %v2683_v25, %v2385_v58  ;;  %v1929_v29 = vrot.slane %v1927_v0, 1  ;;  %v2203_v58 = vsel %vm2172_vm4, %v2200_v35, %v2202_v41  ;;  %548 = vst [vmem:[#allocation3 + $0x78] sm:$0xf] %v12269_v18  ;;  %v2575_v25 = vrot.slane %v13071_v54, 2 }
 0x1dc   : > { %10503 = vmatmul.msk.bf16.gmra.mxu3 %vm860_vm1, %v1576_v49  ;;  %v13086_v49 = vld [vmem:[#allocation2 + $0x90] sm:$0xff]  ;;  %549 = vst [vmem:[#allocation3 + $0x7c] sm:$0xf] %v12269_v18 }
 0x1dd   : > { %550 = vst [vmem:[#allocation3 + $0x80] sm:$0xf] %v12269_v18  ;;  %v2576_v20 = vsel %vm2172_vm4, %v2573_v16, %v2575_v25 }
 0x1de   : > { %v2064_v33 = vpop.f32.mrf.mxu0  ;;  %551 = vst [vmem:[#allocation3 + $0x84] sm:$0xf] %v12269_v18 }
 0x1df   : > { %v2315_v24 = vpop.f32.mrf.mxu1  ;;  %v2138_v62 = vadd.f32 %v2064_v33, %v12974_v31  ;;  %v1691_v3 = vpop.f32.mrf.mxu3  ;;  %v3496_v31 = vld [vmem:[%s16998_s0 + $0x38] sm:$0xff]  ;;  %v13097_v33 = vor.u32 %v1932_v1, %v1929_v29  ;;  %552 = vst [vmem:[#allocation3 + $0x88] sm:$0xf] %v12269_v18  ;;  %v1577_v29 = vrot.slane %v13086_v49, 1  ;;  %v429_v1 = vmax.f32 %v12155_v36, 0.0 }
 0x1e0   : > { %v13089_v0 = vadd.f32 %v1691_v3, %v12691_v61  ;;  %3562 = vperm.xlu1 %12220, %v3496_v31   ;;  %v3501_v61 = vld [vmem:[%s16998_s0 + $0x60] sm:$0xff]  ;;  %553 = vst [vmem:[#allocation3 + $0x8c] sm:$0xf] %v12269_v18 }
 0x1e1   : > { %v2386_v11 = vadd.f32 %v2312_v6, %v2138_v62  ;;  %v2685_v35 = vpop.f32.mrf.mxu2  ;;  %v430_v62 = vmax.f32 %v12156_v15, 0.0  ;;  %554 = vst [vmem:[#allocation3 + $0x90] sm:$0xf] %v12269_v18  ;;  %v1934_v31 = vsel %vm1791_vm5, %v13014_v4, %v13097_v33  ;;  %v1578_v15 = vsel %vm1170_vm2, %v1575_v59, %v1577_v29 }
 0x1e2   : > { %10562 = vmatmul.msk.bf16.gmra.mxu1 %vm860_vm1, %v2203_v58  ;;  %v12192_v58 = vld [vmem:[%s12356_s24 + $0xa0] sm:$0xff]   ;;  %3587 = vperm.xlu0 %12219, %v3501_v61   ;;  %555 = vst [vmem:[#allocation3 + $0x94] sm:$0xf] %v12269_v18  ;;  %v471_v61 = vpack.c.bf16 %v429_v1, %v429_v1  ;;  %v1939_v59 = vshll.u32 %v13016_v42, 16  ;;  %v2204_v1 = vrot.slane %v13016_v42, 2 }
 0x1e3   : > { %v13103_v6 = vadd.f32 %v2685_v35, %v2386_v11  ;;  %v12159_v3 = vunpack.c.l.bf16 %v12192_v58  ;;  %556 = vst [vmem:[#allocation3 + $0x98] sm:$0xf] %v12269_v18 }
 0x1e4   : > { %557 = vst [vmem:[#allocation3 + $0x9c] sm:$0xf] %v12269_v18 }
 0x1e5   : > { %v431_v16 = vmax.f32 %v12159_v3, 0.0  ;;  %558 = vst [vmem:[#allocation3 + $0xa0] sm:$0xf] %v12269_v18 }
 0x1e6   : > { %v2067_v11 = vpop.f32.mrf.mxu0  ;;  %10660 = vmatmul.msk.bf16.gmra.mxu2 %vm860_vm1, %v2576_v20  ;;  %v3499_v20 = vld [vmem:[%s16998_s0 + $0x50] sm:$0xff]  ;;  %514 = vst.msk [vmem:[#allocation2 + $0x98] sm:$0xf] %vm475_vm0, %v471_v61 }
 0x1e7   : > { %v13118_v35 = vpop.f32.mrf.mxu1  ;;  %v2139_v38 = vadd.f32 %v2067_v11, %v13007_v39  ;;  %v1693_v36 = vpop.f32.mrf.mxu3  ;;  %v472_v39 = vpack.c.bf16 %v430_v62, %v430_v62  ;;  %v1936_v11 = vshrl.u32 %v13016_v42, 16  ;;  %v3494_v42 = vld [vmem:[%s16998_s0 + $0x28] sm:$0xff] }
 0x1e8   : > { %v13131_v4 = vadd.f32 %v1693_v36, %v12701_v37  ;;  %3577 = vperm.xlu1 %12220, %v3499_v20   ;;  %v3504_v37 = vld [vmem:[%s16998_s0 + $0x78] sm:$0xff]  ;;  %v1941_v20 = vrot.slane %v1939_v59, 2 }
 0x1e9   : > { %v2387_v58 = vadd.f32 %v2315_v24, %v2139_v38  ;;  %10532 = vmatmul.msk.bf16.gmra.mxu0 %vm860_vm1, %v1934_v31  ;;  %v2688_v3 = vpop.f32.mrf.mxu2  ;;  %v473_v24 = vpack.c.bf16 %v431_v16, %v431_v16  ;;  %v13146_v31 = vld [vmem:[#allocation2 + $0x90] sm:$0xff]  ;;  %515 = vst.msk [vmem:[#allocation2 + $0x9c] sm:$0xf] %vm475_vm0, %v472_v39  ;;  %v1938_v36 = vrot.slane %v1936_v11, 1  ;;  %v2205_v16 = vsel %vm2172_vm4, %v2202_v41, %v2204_v1 }
 0x1ea   : > { %3602 = vperm.xlu0 %12219, %v3504_v37  }
 0x1eb   : > { %v13144_v62 = vadd.f32 %v2688_v3, %v2387_v58  ;;  %516 = vst.msk [vmem:[#allocation2 + $0xa0] sm:$0xf] %vm475_vm0, %v473_v24  ;;  %v3502_v3 = vld [vmem:[%s16998_s0 + $0x68] sm:$0xff]  ;;  %v13170_v41 = vor.u32 %v1941_v20, %v1938_v36 }
 0x1ec   : > { %10504 = vmatmul.msk.bf16.gmra.mxu3 %vm860_vm1, %v1578_v15  ;;  %v17008_v15 = vrot.slane %v13146_v31, 2 }
 0x1ed   : > { %v1445_v11 = vld [vmem:[#allocation2 + $0x98] sm:$0x1]  ;;  %v1943_v24 = vsel %vm1791_vm5, %v13097_v33, %v13170_v41  ;;  %v3493_v33 = vld [vmem:[%s16998_s0 + $0x20] sm:$0xff] }
 0x1ee   : > { %v2069_v18 = vpop.f32.mrf.mxu0  ;;  %v1524_v59 = vunpack.c.l.b16 %v1445_v11  ;;  %v1948_v11 = vshll.u32 %v13086_v49, 16  ;;  %3547 = vperm.xlu2 %12221, %v3493_v33  }
 0x1ef   : > { %v2320_v38 = vpop.f32.mrf.mxu1  ;;  %v13158_v58 = vadd.f32 %v2069_v18, %v13045_v50  ;;  %v1696_v61 = vpop.f32.mrf.mxu3  ;;  %v3507_v50 = vld [vmem:[%s16998_s0 + $0x90] sm:$0xff] }
 0x1f0   : > { %v13162_v39 = vadd.f32 %v1696_v61, %v12715_v55  ;;  %3592 = vperm.xlu1 %12220, %v3502_v3   ;;  %v2578_v55 = vsel %vm2172_vm4, %v2575_v25, %v17008_v15  ;;  %v1543_v18 = vpack.c.b16 %v1524_v59, %v1524_v59  ;;  %v11906_v3 = vld [vmem:[%s17002_s4 + $0x20] sm:$0xff]  ;;  %v3510_v59 = vld [vmem:[%s16998_s0 + $0xa8] sm:$0xff] }
 0x1f1   : > { %v13168_v27 = vpop.f32.mrf.mxu2  ;;  %4767 = vmatpush.bf16.msra.mxu2 %v11906_v3 }
 0x1f2   : > { %10563 = vmatmul.msk.bf16.gmra.mxu1 %vm860_vm1, %v2205_v16  ;;  %3617 = vperm.xlu0 %12219, %v3507_v50   ;;  %v1579_v61 = vrot.slane %v1543_v18, 1  ;;  %v2798_v18 = vshll.u32 %v12642_v51, 16 }
 0x1f6   : > { %v2072_v37 = vpop.f32.mrf.mxu0  ;;  %10661 = vmatmul.msk.bf16.gmra.mxu2 %vm860_vm1, %v2578_v55  ;;  %v17009_v55 = vrot.slane %v13086_v49, 2  ;;  %3552 = vperm.xlu2 %12221, %v3494_v42  }
 0x1f7   : > { %v13183_v36 = vpop.f32.mrf.mxu1  ;;  %v2141_v20 = vadd.f32 %v2072_v37, %v13089_v0  ;;  %v1698_v16 = vpop.f32.mrf.mxu3  ;;  %v3505_v0 = vld [vmem:[%s16998_s0 + $0x80] sm:$0xff] }
 0x1f8   : > { %v13188_v54 = vadd.f32 %v1698_v16, %v12725_v19  ;;  %v1580_v19 = vsel %vm1170_vm2, %v1577_v29, %v1579_v61  ;;  %3607 = vperm.xlu1 %12220, %v3505_v0   ;;  %v2795_v29 = vshrl.u32 %v12642_v51, 16  ;;  %v11914_v61 = vld [vmem:[%s17002_s4 + $0x60] sm:$0xff]  ;;  %v1950_v0 = vrot.slane %v1948_v11, 2 }
 0x1f9   : > { %v2389_v25 = vadd.f32 %v2320_v38, %v2141_v20  ;;  %10533 = vmatmul.msk.bf16.gmra.mxu0 %vm860_vm1, %v1943_v24  ;;  %v2693_v50 = vpop.f32.mrf.mxu2  ;;  %v1945_v38 = vshrl.u32 %v13086_v49, 16  ;;  %v13211_v24 = vld [vmem:[#allocation2 + $0x98] sm:$0xff]  ;;  %4602 = vmatpush.bf16.msra.mxu1 %v11914_v61  ;;  %v2800_v11 = vrot.slane %v2798_v18, 3 }
 0x1fa   : > { %v13216_v20 = vld [vmem:[#allocation2 + $0x18] sm:$0xff]  ;;  %3632 = vperm.xlu0 %12219, %v3510_v59   ;;  %v2579_v15 = vrot.slane %v13211_v24, 2  ;;  %v3517_v24 = vld [vmem:[%s16998_s0 + $0xe0] sm:$0xff] }
 0x1fb   : > { %v13209_v37 = vadd.f32 %v2693_v50, %v2389_v25  ;;  %v2803_v16 = vshrl.u32 %v13216_v20, 16  ;;  %v1947_v3 = vrot.slane %v1945_v38, 1  ;;  %v2207_v50 = vsel %vm2172_vm4, %v2204_v1, %v17009_v55  ;;  %v1782_v59 = vld [vmem:[#allocation2 + $0x98] sm:$0x3] }
 0x1fc   : > { %10505 = vmatmul.msk.bf16.gmra.mxu3 %vm860_vm1, %v1580_v19  ;;  %v2806_v51 = vshll.u32 %v13216_v20, 16  ;;  %v2797_v38 = vrot.slane %v2795_v29, 2  ;;  %v17081_v29 = vrot.slane %v13146_v31, 2 }
 0x1fd   : > { %17079 = vst [vmem:[#allocation4_spill] sm:$0xff] %v13209_v37  ;;  %v13244_v61 = vor.u32 %v1950_v0, %v1947_v3 }
 0x1fe   : > { %v2074_v25 = vpop.f32.mrf.mxu0  ;;  %v2808_v55 = vrot.slane %v2806_v51, 3  ;;  %v2580_v18 = vsel %vm2172_vm4, %v17081_v29, %v2579_v15  ;;  %v2801_v3 = vor.u32 %v2800_v11, %v2797_v38 }
 0x1ff   : > { %v2325_v33 = vpop.f32.mrf.mxu1  ;;  %v13229_v19 = vadd.f32 %v2074_v25, %v13131_v4  ;;  %v1701_v12 = vpop.f32.mrf.mxu3  ;;  %v3508_v4 = vld [vmem:[%s16998_s0 + $0x98] sm:$0xff]  ;;  %v2805_v25 = vrot.slane %v2803_v16, 2  ;;  %v1952_v16 = vsel %vm1791_vm5, %v13170_v41, %v13244_v61  ;;  %v3497_v41 = vld [vmem:[%s16998_s0 + $0x40] sm:$0xff] }
 0x200   : > { %v13233_v37 = vadd.f32 %v1701_v12, %v12739_v23  ;;  %v1789_v12 = vunpack.c.l.b16 %v1782_v59  ;;  %3622 = vperm.xlu1 %12220, %v3508_v4   ;;  %v3513_v23 = vld [vmem:[%s16998_s0 + $0xc0] sm:$0xff]  ;;  %3567 = vperm.xlu2 %12221, %v3497_v41  }
 0x201   : > { %v13242_v1 = vpop.f32.mrf.mxu2  ;;  %v13257_v0 = vor.u32 %v2808_v55, %v2805_v25  ;;  %v3511_v55 = vld [vmem:[%s16998_s0 + $0xb0] sm:$0xff] }
 0x202   : > { %10564 = vmatmul.msk.bf16.gmra.mxu1 %vm860_vm1, %v2207_v50  ;;  %17080 = vst [vmem:[#allocation5_spill] sm:$0xff] %v13242_v1  ;;  %v2447_v50 = vld [vmem:[#allocation2 + $0xa0] sm:$0x3]  ;;  %3647 = vperm.xlu0 %12219, %v3513_v23   ;;  %v1790_v59 = vpack.c.b16 %v1789_v12, %v1789_v12 }
 0x203   : > { %v2526_v4 = vunpack.c.l.b16 %v2447_v50  ;;  %v2810_v38 = vsel %vm2793_vm6, %v2801_v3, %v13257_v0 }
 0x204   : > { %v1954_v11 = vshrl.u32 %v1790_v59, 16  ;;  %v2208_v25 = vrot.slane %v1790_v59, 2 }
 0x205   : > { %v2545_v12 = vpack.c.b16 %v2526_v4, %v2526_v4 }
 0x206   : > { %v2077_v1 = vpop.f32.mrf.mxu0  ;;  %10662 = vmatmul.msk.bf16.gmra.mxu2 %vm860_vm1, %v2580_v18  ;;  %v13281_v18 = vld [vmem:[#allocation2 + $0x20] sm:$0xff] }
 0x207   : > { %v13259_v51 = vpop.f32.mrf.mxu1  ;;  %v2143_v42 = vadd.f32 %v2077_v1, %v13162_v39  ;;  %v1703_v31 = vpop.f32.mrf.mxu3  ;;  %v1957_v1 = vshll.u32 %v1790_v59, 16  ;;  %v2812_v50 = vshrl.u32 %v13281_v18, 16 }
 0x208   : > { %v13264_v23 = vadd.f32 %v1703_v31, %v12749_v9  ;;  %3637 = vperm.xlu1 %12220, %v3511_v55   ;;  %v3516_v9 = vld [vmem:[%s16998_s0 + $0xd8] sm:$0xff]  ;;  %v17082_v31 = vrot.slane %v13086_v49, 2  ;;  %v2815_v55 = vshll.u32 %v13281_v18, 16  ;;  %v3514_v49 = vld [vmem:[%s16998_s0 + $0xc8] sm:$0xff] }
 0x209   : > { %v2391_v29 = vadd.f32 %v2325_v33, %v2143_v42  ;;  %10534 = vmatmul.msk.bf16.gmra.mxu0 %vm860_vm1, %v1952_v16  ;;  %v2698_v39 = vpop.f32.mrf.mxu2  ;;  %v1956_v42 = vrot.slane %v1954_v11, 1  ;;  %v1959_v59 = vrot.slane %v1957_v1, 2  ;;  %v3500_v11 = vld [vmem:[%s16998_s0 + $0x58] sm:$0xff] }
 0x20a   : > { %3662 = vperm.xlu0 %12219, %v3516_v9   ;;  %v2209_v41 = vsel %vm2172_vm4, %v17082_v31, %v2208_v25  ;;  %v2814_v9 = vrot.slane %v2812_v50, 2  ;;  %3582 = vperm.xlu2 %12221, %v3500_v11  }
 0x20b   : > { %v13278_v33 = vadd.f32 %v2698_v39, %v2391_v29  ;;  %v2581_v39 = vrot.slane %v2545_v12, 2  ;;  %v1960_v25 = vor.u32 %v1959_v59, %v1956_v42  ;;  %v3165_v42 = vld [vmem:[#allocation2 + $0x10] sm:$0x8] }
 0x20c   : > { %10676 = vmatmul.msk.bf16.vlgmr.msra.gmra.mxu3 %vm860_vm1, %v2810_v38 }
 0x20d   : > { %v2582_v12 = vsel %vm2172_vm4, %v2579_v15, %v2581_v39  ;;  %v1961_v31 = vsel %vm1791_vm5, %v13244_v61, %v1960_v25  ;;  %v3503_v15 = vld [vmem:[%s16998_s0 + $0x70] sm:$0xff]  ;;  %v3172_v39 = vunpack.c.l.b16 %v3165_v42 }
 0x20e   : > { %v2079_v16 = vpop.f32.mrf.mxu0 }
 0x20f   : > { %v2330_v3 = vpop.f32.mrf.mxu1  ;;  %v13289_v29 = vadd.f32 %v2079_v16, %v13188_v54  ;;  %v1706_v4 = vpop.f32.mrf.mxu3  ;;  %v2817_v54 = vrot.slane %v2815_v55, 3 }
 0x210   : > { %v1766_v38 = vadd.f32 %v1706_v4, %v12763_v14  ;;  %3652 = vperm.xlu1 %12220, %v3514_v49   ;;  %v3519_v14 = vld [vmem:[%s16998_s0 + $0xf0] sm:$0xff]  ;;  %v11905_v49 = vld [vmem:[%s17002_s4 + $0x18] sm:$0xff] }
 0x211   : > { %v13299_v1 = vpop.f32.mrf.mxu2  ;;  %4768 = vmatpush.bf16.msra.mxu2 %v11905_v49 }
 0x212   : > { %10565 = vmatmul.msk.bf16.gmra.mxu1 %vm860_vm1, %v2209_v41  ;;  %3677 = vperm.xlu0 %12219, %v3519_v14   ;;  %v2818_v41 = vor.u32 %v2817_v54, %v2814_v9  ;;  %v13334_v14 = vld [vmem:[#allocation2 + $0x28] sm:$0xff] }
 0x213   : > { %3597 = vperm.xlu2 %12221, %v3503_v15  }
 0x216   : > { %v2082_v16 = vpop.f32.mrf.mxu0  ;;  %10663 = vmatmul.msk.bf16.gmra.mxu2 %vm860_vm1, %v2582_v12  ;;  %v2821_v12 = vshrl.u32 %v13334_v14, 16 }
 0x217   : > { %v13309_v4 = vpop.f32.mrf.mxu1  ;;  %v2145_v50 = vadd.f32 %v2082_v16, %v13233_v37  ;;  %v1708_v59 = vpop.f32.mrf.mxu3  ;;  %v2819_v37 = vsel %vm2793_vm6, %v13257_v0, %v2818_v41  ;;  %v17083_v0 = vunpack.c.l.b16 %v12622_v32  ;;  %v2824_v16 = vshll.u32 %v13334_v14, 16  ;;  %v3506_v32 = vld [vmem:[%s16998_s0 + $0x88] sm:$0xff] }
 0x218   : > { %v1767_v55 = vadd.f32 %v1708_v59, %v12773_v53  ;;  %3667 = vperm.xlu1 %12220, %v3517_v24   ;;  %v3522_v53 = vld [vmem:[%s16998_s0 + $0x108] sm:$0xff]  ;;  %v11913_v59 = vld [vmem:[%s17002_s4 + $0x58] sm:$0xff]  ;;  %v3176_v24 = vrot.slane %v13216_v20, 3  ;;  %v3509_v20 = vld [vmem:[%s16998_s0 + $0xa0] sm:$0xff] }
 0x219   : > { %v2393_v11 = vadd.f32 %v2330_v3, %v2145_v50  ;;  %10535 = vmatmul.msk.bf16.gmra.mxu0 %vm860_vm1, %v1961_v31  ;;  %v2703_v61 = vpop.f32.mrf.mxu2  ;;  %v3173_v54 = vpack.c.b16 %v17083_v0, %v3172_v39  ;;  %4603 = vmatpush.bf16.msra.mxu1 %v11913_v59  ;;  %v13369_v59 = vld [vmem:[#allocation2 + $0x30] sm:$0xff] }
 0x21a   : > { %3692 = vperm.xlu0 %12219, %v3522_v53  }
 0x21b   : > { %v13326_v3 = vadd.f32 %v2703_v61, %v2393_v11  ;;  %v3520_v11 = vld [vmem:[%s16998_s0 + $0xf8] sm:$0xff]  ;;  %v2823_v61 = vrot.slane %v2821_v12, 2  ;;  %3612 = vperm.xlu2 %12221, %v3506_v32   ;;  %v2830_v32 = vshrl.u32 %v13369_v59, 16 }
 0x21c   : > { %10677 = vmatmul.msk.bf16.gmra.mxu3 %vm860_vm1, %v2819_v37  ;;  %v2826_v37 = vrot.slane %v2824_v16, 3 }
 0x21e   : > { %v2084_v25 = vpop.f32.mrf.mxu0  ;;  %v2827_v53 = vor.u32 %v2826_v37, %v2823_v61 }
 0x21f   : > { %v2335_v9 = vpop.f32.mrf.mxu1  ;;  %v13339_v31 = vadd.f32 %v2084_v25, %v13264_v23  ;;  %v1711_v50 = vpop.f32.mrf.mxu3  ;;  %v3175_v23 = vrot.slane %v3173_v54, 3  ;;  %v3523_v54 = vld [vmem:[%s16998_s0 + $0x110] sm:$0xff] }
 0x220   : > { %v1768_v42 = vadd.f32 %v1711_v50, %v12787_v26  ;;  %3682 = vperm.xlu1 %12220, %v3520_v11   ;;  %v2828_v16 = vsel %vm2793_vm6, %v2818_v41, %v2827_v53  ;;  %v2833_v11 = vshll.u32 %v13369_v59, 16  ;;  %v3512_v41 = vld [vmem:[%s16998_s0 + $0xb8] sm:$0xff] }
 0x221   : > { %v13351_v15 = vpop.f32.mrf.mxu2  ;;  %v3177_v39 = vsel %vm3174_vm7, %v3175_v23, %v3176_v24 }
 0x222   : > { %17084 = vst [vmem:[#allocation6_spill] sm:$0xff] %v13351_v15 }
 0x223   : > { %3627 = vperm.xlu2 %12221, %v3509_v20  }
 0x226   : > { %v2087_v26 = vpop.f32.mrf.mxu0 }
 0x227   : > { %v13355_v49 = vpop.f32.mrf.mxu1  ;;  %v2147_v25 = vadd.f32 %v2087_v26, %v1766_v38  ;;  %v1713_v0 = vpop.f32.mrf.mxu3  ;;  %v3178_v26 = vrot.slane %v13281_v18, 3  ;;  %v3515_v18 = vld [vmem:[%s16998_s0 + $0xd0] sm:$0xff] }
 0x228   : > { %v1769_v50 = vadd.f32 %v1713_v0, %v12797_v13  ;;  %3697 = vperm.xlu1 %12220, %v3523_v54  }
 0x229   : > { %v2395_v15 = vadd.f32 %v2335_v9, %v2147_v25  ;;  %10706 = vmatmul.msk.bf16.vlgmr.msra.gmra.mxu0 %vm860_vm1, %v3177_v39  ;;  %v2708_v12 = vpop.f32.mrf.mxu2  ;;  %v2832_v39 = vrot.slane %v2830_v32, 2  ;;  %v2835_v25 = vrot.slane %v2833_v11, 3  ;;  %v3179_v20 = vsel %vm3174_vm7, %v3176_v24, %v3178_v26 }
 0x22b   : > { %v13366_v38 = vadd.f32 %v2708_v12, %v2395_v15  ;;  %3642 = vperm.xlu2 %12221, %v3512_v41   ;;  %v2836_v54 = vor.u32 %v2835_v25, %v2832_v39  ;;  %v13394_v41 = vld [vmem:[#allocation2 + $0x38] sm:$0xff] }
 0x22c   : > { %10678 = vmatmul.msk.bf16.gmra.mxu3 %vm860_vm1, %v2828_v16 }
 0x22d   : > { %v2837_v11 = vsel %vm2793_vm6, %v2827_v53, %v2836_v54  ;;  %v11904_v53 = vld [vmem:[%s17002_s4 + $0x10] sm:$0xff] }
 0x22e   : > { %v2089_v13 = vpop.f32.mrf.mxu0  ;;  %4769 = vmatpush.bf16.msra.mxu2 %v11904_v53 }
 0x22f   : > { %v2340_v9 = vpop.f32.mrf.mxu1  ;;  %v13373_v23 = vadd.f32 %v2089_v13, %v1767_v55  ;;  %v1716_v61 = vpop.f32.mrf.mxu3 }
 0x230   : > { %v1770_v37 = vadd.f32 %v1716_v61, %v12811_v48 }
 0x231   : > { %v13379_v15 = vpop.f32.mrf.mxu2 }
 0x233   : > { %3657 = vperm.xlu2 %12221, %v3515_v18  }
 0x236   : > { %v2092_v0 = vpop.f32.mrf.mxu0 }
 0x237   : > { %v13383_v55 = vpop.f32.mrf.mxu1  ;;  %v2149_v12 = vadd.f32 %v2092_v0, %v1768_v42  ;;  %v1718_v16 = vpop.f32.mrf.mxu3 }
 0x238   : > { %17085 = vst [vmem:[#allocation7_spill] sm:$0xff] %v13383_v55  ;;  %v1771_v48 = vadd.f32 %v1718_v16, %v12822_v47  ;;  %v2839_v47 = vshrl.u32 %v13394_v41, 16  ;;  %v3180_v16 = vrot.slane %v13334_v14, 3 }
 0x239   : > { %v2397_v13 = vadd.f32 %v2340_v9, %v2149_v12  ;;  %10707 = vmatmul.msk.bf16.gmra.mxu0 %vm860_vm1, %v3179_v20  ;;  %v2713_v32 = vpop.f32.mrf.mxu2  ;;  %v2842_v9 = vshll.u32 %v13394_v41, 16  ;;  %v3518_v20 = vld [vmem:[%s16998_s0 + $0xe8] sm:$0xff] }
 0x23b   : > { %v13391_v61 = vadd.f32 %v2713_v32, %v2397_v13  ;;  %v2841_v13 = vrot.slane %v2839_v47, 2  ;;  %v2844_v18 = vrot.slane %v2842_v9, 3  ;;  %3672 = vperm.xlu2 %12221, %v3518_v20   ;;  %v3181_v32 = vsel %vm3174_vm7, %v3178_v26, %v3180_v16  ;;  %v3521_v47 = vld [vmem:[%s16998_s0 + $0x100] sm:$0xff] }
 0x23c   : > { %10679 = vmatmul.msk.bf16.gmra.mxu3 %vm860_vm1, %v2837_v11 }
 0x23d   : > { %17086 = vst [vmem:[#allocation8_spill] sm:$0xff] %v13391_v61  ;;  %v2845_v11 = vor.u32 %v2844_v18, %v2841_v13  ;;  %v13425_v13 = vld [vmem:[#allocation2 + $0x40] sm:$0xff] }
 0x23e   : > { %v2094_v24 = vpop.f32.mrf.mxu0 }
 0x23f   : > { %v2345_v42 = vpop.f32.mrf.mxu1  ;;  %v13398_v39 = vadd.f32 %v2094_v24, %v1769_v50  ;;  %v1721_v25 = vpop.f32.mrf.mxu3  ;;  %v2846_v53 = vsel %vm2793_vm6, %v2836_v54, %v2845_v11  ;;  %v3524_v54 = vld [vmem:[%s16998_s0 + $0x118] sm:$0xff] }
 0x240   : > { %v1772_v0 = vadd.f32 %v1721_v25, %v12837_v40  ;;  %v11912_v40 = vld [vmem:[%s17002_s4 + $0x50] sm:$0xff] }
 0x241   : > { %v13407_v12 = vpop.f32.mrf.mxu2  ;;  %4604 = vmatpush.bf16.msra.mxu1 %v11912_v40 }
 0x242   : > { %17087 = vst [vmem:[#allocation9_spill] sm:$0xff] %v13407_v12 }
 0x243   : > { %3687 = vperm.xlu2 %12221, %v3521_v47  }
 0x246   : > { %v2097_v50 = vpop.f32.mrf.mxu0 }
 0x247   : > { %v13414_v24 = vpop.f32.mrf.mxu1  ;;  %v2151_v25 = vadd.f32 %v2097_v50, %v1770_v37  ;;  %v1723_v61 = vpop.f32.mrf.mxu3 }
 0x248   : > { %17088 = vst [vmem:[#allocation10_spill] sm:$0xff] %v13414_v24  ;;  %v1773_v12 = vadd.f32 %v1723_v61, %v12845_v2  ;;  %v2848_v2 = vshrl.u32 %v13425_v13, 16  ;;  %v2851_v61 = vshll.u32 %v13425_v13, 16 }
 0x249   : > { %v2399_v14 = vadd.f32 %v2345_v42, %v2151_v25  ;;  %10708 = vmatmul.msk.bf16.gmra.mxu0 %vm860_vm1, %v3181_v32  ;;  %v2718_v9 = vpop.f32.mrf.mxu2  ;;  %v3182_v32 = vrot.slane %v13369_v59, 3 }
 0x24a   : > { %v2850_v25 = vrot.slane %v2848_v2, 2 }
 0x24b   : > { %v13422_v20 = vadd.f32 %v2718_v9, %v2399_v14  ;;  %v2853_v14 = vrot.slane %v2851_v61, 3  ;;  %3702 = vperm.xlu2 %12221, %v3524_v54   ;;  %v3183_v9 = vsel %vm3174_vm7, %v3180_v16, %v3182_v32  ;;  %v13447_v16 = vld [vmem:[#allocation2 + $0x48] sm:$0xff] }
 0x24c   : > { %10680 = vmatmul.msk.bf16.gmra.mxu3 %vm860_vm1, %v2846_v53  ;;  %v2857_v54 = vshrl.u32 %v13447_v16, 16 }
 0x24d   : > { %17089 = vst [vmem:[#allocation11_spill] sm:$0xff] %v13422_v20  ;;  %v2854_v53 = vor.u32 %v2853_v14, %v2850_v25 }
 0x24e   : > { %v2099_v26 = vpop.f32.mrf.mxu0 }
 0x24f   : > { %v2350_v37 = vpop.f32.mrf.mxu1  ;;  %v13429_v42 = vadd.f32 %v2099_v26, %v1771_v48  ;;  %v1726_v18 = vpop.f32.mrf.mxu3 }
 0x250   : > { %v1774_v40 = vadd.f32 %v1726_v18, %v12720_v5 }
 0x251   : > { %17090 = vst [vmem:[#allocation12_spill] sm:$0xff] %v13429_v42  ;;  %v13435_v50 = vpop.f32.mrf.mxu2 }
 0x252   : > { %17091 = vst [vmem:[#allocation13_spill] sm:$0xff] %v13435_v50  ;;  %v2855_v50 = vsel %vm2793_vm6, %v2845_v11, %v2854_v53  ;;  %v3184_v11 = vrot.slane %v13394_v41, 3  ;;  %v11911_v41 = vld [vmem:[%s17002_s4 + $0x48] sm:$0xff] }
 0x253   : > { %4605 = vmatpush.bf16.msra.mxu1 %v11911_v41 }
 0x256   : > { %v2102_v47 = vpop.f32.mrf.mxu0 }
 0x257   : > { %v13439_v48 = vpop.f32.mrf.mxu1  ;;  %v2153_v26 = vadd.f32 %v2102_v47, %v1772_v0  ;;  %v1728_v20 = vpop.f32.mrf.mxu3  ;;  %v2860_v0 = vshll.u32 %v13447_v16, 16 }
 0x258   : > { %17092 = vst [vmem:[#allocation14_spill] sm:$0xff] %v13439_v48  ;;  %v1775_v5 = vadd.f32 %v1728_v20, %v12732_v8 }
 0x259   : > { %v2401_v18 = vadd.f32 %v2350_v37, %v2153_v26  ;;  %10709 = vmatmul.msk.bf16.gmra.mxu0 %vm860_vm1, %v3183_v9  ;;  %v2723_v24 = vpop.f32.mrf.mxu2  ;;  %v2862_v14 = vrot.slane %v2860_v0, 3  ;;  %v3185_v9 = vsel %vm3174_vm7, %v3182_v32, %v3184_v11 }
 0x25b   : > { %v13444_v59 = vadd.f32 %v2723_v24, %v2401_v18  ;;  %v2859_v24 = vrot.slane %v2857_v54, 2 }
 0x25c   : > { %10681 = vmatmul.msk.bf16.gmra.mxu3 %vm860_vm1, %v2855_v50  ;;  %v11903_v50 = vld [vmem:[%s17002_s4 + $0x8] sm:$0xff] }
 0x25d   : > { %17093 = vst [vmem:[#allocation15_spill] sm:$0xff] %v13444_v59  ;;  %4770 = vmatpush.bf16.msra.mxu2 %v11903_v50  ;;  %v2863_v26 = vor.u32 %v2862_v14, %v2859_v24  ;;  %v13472_v24 = vld [vmem:[#allocation2 + $0x50] sm:$0xff] }
 0x25e   : > { %v2104_v2 = vpop.f32.mrf.mxu0 }
 0x25f   : > { %v2355_v61 = vpop.f32.mrf.mxu1  ;;  %v13451_v25 = vadd.f32 %v2104_v2, %v1773_v12  ;;  %v1731_v8 = vpop.f32.mrf.mxu3  ;;  %v2864_v0 = vsel %vm2793_vm6, %v2854_v53, %v2863_v26  ;;  %v3186_v53 = vrot.slane %v13425_v13, 3 }
 0x260   : > { %v1776_v20 = vadd.f32 %v1731_v8, %v12744_v57 }
 0x261   : > { %17094 = vst [vmem:[#allocation16_spill] sm:$0xff] %v13451_v25  ;;  %v13454_v37 = vpop.f32.mrf.mxu2 }
 0x262   : > { %17095 = vst [vmem:[#allocation17_spill] sm:$0xff] %v13454_v37 }
 0x266   : > { %v2107_v47 = vpop.f32.mrf.mxu0 }
 0x267   : > { %v13461_v12 = vpop.f32.mrf.mxu1  ;;  %v2155_v18 = vadd.f32 %v2107_v47, %v1774_v40  ;;  %v1733_v2 = vpop.f32.mrf.mxu3 }
 0x268   : > { %17096 = vst [vmem:[#allocation18_spill] sm:$0xff] %v13461_v12  ;;  %v1777_v57 = vadd.f32 %v1733_v2, %v12756_v21  ;;  %v2866_v21 = vshrl.u32 %v13472_v24, 16 }
 0x269   : > { %v2403_v8 = vadd.f32 %v2355_v61, %v2155_v18  ;;  %10710 = vmatmul.msk.bf16.gmra.mxu0 %vm860_vm1, %v3185_v9  ;;  %v2728_v54 = vpop.f32.mrf.mxu2  ;;  %v2869_v61 = vshll.u32 %v13472_v24, 16 }
 0x26a   : > { %v2868_v2 = vrot.slane %v2866_v21, 2  ;;  %v13491_v21 = vld [vmem:[#allocation2 + $0x58] sm:$0xff] }
 0x26b   : > { %v13469_v50 = vadd.f32 %v2728_v54, %v2403_v8  ;;  %v2871_v8 = vrot.slane %v2869_v61, 3  ;;  %v3187_v54 = vsel %vm3174_vm7, %v3184_v11, %v3186_v53  ;;  %v2878_v11 = vshll.u32 %v13491_v21, 16 }
 0x26c   : > { %10682 = vmatmul.msk.bf16.gmra.mxu3 %vm860_vm1, %v2864_v0 }
 0x26d   : > { %17097 = vst [vmem:[#allocation19_spill] sm:$0xff] %v13469_v50  ;;  %v2872_v0 = vor.u32 %v2871_v8, %v2868_v2  ;;  %v2880_v8 = vrot.slane %v2878_v11, 3 }
 0x26e   : > { %v2109_v32 = vpop.f32.mrf.mxu0 }
 0x26f   : > { %v2360_v40 = vpop.f32.mrf.mxu1  ;;  %v13476_v14 = vadd.f32 %v2109_v32, %v1775_v5  ;;  %v1736_v47 = vpop.f32.mrf.mxu3 }
 0x270   : > { %v1778_v9 = vadd.f32 %v1736_v47, %v12768_v56  ;;  %v2873_v47 = vsel %vm2793_vm6, %v2863_v26, %v2872_v0  ;;  %v3188_v26 = vrot.slane %v13447_v16, 3 }
 0x271   : > { %17098 = vst [vmem:[#allocation20_spill] sm:$0xff] %v13476_v14  ;;  %v13479_v18 = vpop.f32.mrf.mxu2 }
 0x272   : > { %17099 = vst [vmem:[#allocation21_spill] sm:$0xff] %v13479_v18 }
 0x276   : > { %v2112_v41 = vpop.f32.mrf.mxu0 }
 0x277   : > { %v2157_v50 = vadd.f32 %v2112_v41, %v1776_v20  ;;  %v1738_v12 = vpop.f32.mrf.mxu3  ;;  %v13483_v37 = vpop.f32.mrf.mxu1  ;;  %v2875_v20 = vshrl.u32 %v13491_v21, 16 }
 0x278   : > { %17100 = vst [vmem:[#allocation22_spill] sm:$0xff] %v13483_v37  ;;  %v1779_v5 = vadd.f32 %v1738_v12, %v12780_v52 }
 0x279   : > { %v2405_v32 = vadd.f32 %v2360_v40, %v2157_v50  ;;  %10711 = vmatmul.msk.bf16.gmra.mxu0 %vm860_vm1, %v3187_v54  ;;  %v2733_v56 = vpop.f32.mrf.mxu2  ;;  %v2877_v2 = vrot.slane %v2875_v20, 2  ;;  %v3189_v54 = vsel %vm3174_vm7, %v3186_v53, %v3188_v26  ;;  %v13510_v20 = vld [vmem:[#allocation2 + $0x60] sm:$0xff] }
 0x27a   : > { %v2887_v53 = vshll.u32 %v13510_v20, 16 }
 0x27b   : > { %v13488_v18 = vadd.f32 %v2733_v56, %v2405_v32  ;;  %v2881_v32 = vor.u32 %v2880_v8, %v2877_v2 }
 0x27c   : > { %10683 = vmatmul.msk.bf16.gmra.mxu3 %vm860_vm1, %v2873_v47  ;;  %v2889_v8 = vrot.slane %v2887_v53, 3 }
 0x27d   : > { %17101 = vst [vmem:[#allocation23_spill] sm:$0xff] %v13488_v18 }
 0x27e   : > { %v2114_v13 = vpop.f32.mrf.mxu0 }
 0x27f   : > { %v13495_v61 = vadd.f32 %v2114_v13, %v1777_v57  ;;  %v1741_v52 = vpop.f32.mrf.mxu3  ;;  %v2365_v40 = vpop.f32.mrf.mxu1 }
 0x280   : > { %v1780_v12 = vadd.f32 %v1741_v52, %v12792_v43  ;;  %v2882_v43 = vsel %vm2793_vm6, %v2872_v0, %v2881_v32  ;;  %v3190_v0 = vrot.slane %v13472_v24, 3 }
 0x281   : > { %17102 = vst [vmem:[#allocation24_spill] sm:$0xff] %v13495_v61  ;;  %v13498_v50 = vpop.f32.mrf.mxu2 }
 0x282   : > { %17103 = vst [vmem:[#allocation25_spill] sm:$0xff] %v13498_v50 }
 0x286   : > { %v2117_v41 = vpop.f32.mrf.mxu0 }
 0x287   : > { %v2159_v56 = vadd.f32 %v2117_v41, %v1778_v9  ;;  %v1743_v47 = vpop.f32.mrf.mxu3  ;;  %v13507_v50 = vpop.f32.mrf.mxu1  ;;  %v2884_v9 = vshrl.u32 %v13510_v20, 16 }
 0x288   : > { %v1781_v18 = vadd.f32 %v1743_v47, %v12804_v45  ;;  %17105 = vst [vmem:[#allocation27_spill] sm:$0xff] %v13507_v50 }
 0x289   : > { %v2407_v57 = vadd.f32 %v2365_v40, %v2159_v56  ;;  %10712 = vmatmul.msk.bf16.gmra.mxu0 %vm860_vm1, %v3189_v54  ;;  %v2738_v13 = vpop.f32.mrf.mxu2  ;;  %v2886_v2 = vrot.slane %v2884_v9, 2  ;;  %v3191_v56 = vsel %vm3174_vm7, %v3188_v26, %v3190_v0 }
 0x28b   : > { %v13505_v52 = vadd.f32 %v2738_v13, %v2407_v57  ;;  %v2890_v47 = vor.u32 %v2889_v8, %v2886_v2  ;;  %v11902_v13 = vld [vmem:[%s17002_s4] sm:$0xff]  ;;  %v13534_v2 = vld [vmem:[#allocation2 + $0x68] sm:$0xff] }
 0x28c   : > { %10684 = vmatmul.msk.bf16.gmra.mxu3 %vm860_vm1, %v2882_v43  ;;  %4771 = vmatpush.bf16.msra.mxu2 %v11902_v13  ;;  %v2893_v8 = vshrl.u32 %v13534_v2, 16 }
 0x28d   : > { %17104 = vst [vmem:[#allocation26_spill] sm:$0xff] %v13505_v52  ;;  %v2891_v9 = vsel %vm2793_vm6, %v2881_v32, %v2890_v47  ;;  %v3192_v32 = vrot.slane %v13491_v21, 3  ;;  %v3528_v21 = vpop.permute.xlu0 %3527 }
 0x28e   : > { %v2119_v16 = vpop.f32.mrf.mxu0 }
 0x28f   : > { %v13514_v45 = vadd.f32 %v2119_v16, %v1779_v5  ;;  %v3039_v11 = vpop.f32.mrf.mxu3  ;;  %v2370_v54 = vpop.f32.mrf.mxu1  ;;  %v11910_v5 = vld [vmem:[%s17002_s4 + $0x40] sm:$0xff] }
 0x290   : > { %4606 = vmatpush.bf16.msra.mxu1 %v11910_v5  ;;  %v3129_v5 = vadd.f32 %v3039_v11, %v12857_v28 }
 0x291   : > { %17106 = vst [vmem:[#allocation28_spill] sm:$0xff] %v13514_v45  ;;  %v13516_v40 = vpop.f32.mrf.mxu2 }
 0x292   : > { %17107 = vst [vmem:[#allocation29_spill] sm:$0xff] %v13516_v40 }
 0x296   : > { %v2122_v41 = vpop.f32.mrf.mxu0 }
 0x297   : > { %v2161_v57 = vadd.f32 %v2122_v41, %v1780_v12  ;;  %v3041_v43 = vpop.f32.mrf.mxu3  ;;  %v13530_v12 = vld [vmem:[#allocation3] sm:$0xff]   ;;  %v2896_v41 = vshll.u32 %v13534_v2, 16 }
 0x298   : > { %4772 = vmatmul.bf16.vlgmr.msra.gmra.mxu2 %v13530_v12  ;;  %v3130_v28 = vadd.f32 %v3041_v43, %v12871_v34 }
 0x299   : > { %v2409_v16 = vadd.f32 %v2370_v54, %v2161_v57  ;;  %10713 = vmatmul.msk.bf16.gmra.mxu0 %vm860_vm1, %v3191_v56  ;;  %v2743_v24 = vpop.f32.mrf.mxu2  ;;  %v2895_v57 = vrot.slane %v2893_v8, 2  ;;  %v2898_v13 = vrot.slane %v2896_v41, 3 }
 0x29b   : > { %v13528_v26 = vadd.f32 %v2743_v24, %v2409_v16  ;;  %v13545_v16 = vld [vmem:[%s17001_s3] ss:$0 sm:$0xff] }
 0x29c   : > { %10685 = vmatmul.msk.bf16.gmra.mxu3 %vm860_vm1, %v2891_v9  ;;  %v3193_v9 = vsel %vm3174_vm7, %v3190_v0, %v3192_v32 }
 0x29d   : > { %17108 = vst [vmem:[#allocation30_spill] sm:$0xff] %v13528_v26  ;;  %v2899_v26 = vor.u32 %v2898_v13, %v2895_v57 }
 0x29e   : > { %v2124_v53 = vpop.f32.mrf.mxu0 }
 0x29f   : > { %v13538_v54 = vadd.f32 %v2124_v53, %v1781_v18  ;;  %v3044_v56 = vpop.f32.mrf.mxu3  ;;  %v2900_v53 = vsel %vm2793_vm6, %v2890_v47, %v2899_v26  ;;  %v11925_v47 = vld [vmem:[%s17002_s4 + $0xb8] sm:$0xff] }
 0x2a0   : > { %4987 = vmatpush.bf16.msrb.mxu3 %v11925_v47  ;;  %v3131_v50 = vadd.f32 %v3044_v56, %v12883_v46  ;;  %v11966_v46 = vld [vmem:[%s17002_s4 + $0x178] sm:$0xff] }
 0x2a1   : > { %17109 = vst [vmem:[#allocation31_spill] sm:$0xff] %v13538_v54  ;;  %v13553_v54 = vld [vmem:[#allocation2 + $0x70] sm:$0xff]  ;;  %v11950_v56 = vld [vmem:[%s17002_s4 + $0xf8] sm:$0xff]  ;;  %6023 = vmatpush.bf16.msrb.mxu2 %v11966_v46 }
 0x2a2   : > { %v2902_v0 = vshrl.u32 %v13553_v54, 16  ;;  %v2905_v57 = vshll.u32 %v13553_v54, 16  ;;  %5372 = vmatpush.bf16.msrb.mxu0 %v11950_v56 }
 0x2a6   : > { %v3287_v24 = vpop.f32.mrf.mxu0 }
 0x2a7   : > { %v3377_v40 = vadd.f32 %v3287_v24, %v3129_v5  ;;  %v3046_v52 = vpop.f32.mrf.mxu3 }
 0x2a9   : > { %v3417_v18 = vadd.f32 %v13545_v16, %v3377_v40  ;;  %10714 = vmatmul.msk.bf16.gmra.mxu0 %vm860_vm1, %v3193_v9  ;;  %v17010_v9 = vrot.slane %v13510_v20, 3 }
 0x2ab   : > { %v3453_v8 = vmax.f32 %v3417_v18, 0.0  ;;  %v2904_v18 = vrot.slane %v2902_v0, 2 }
 0x2ac   : > { %10686 = vmatmul.msk.bf16.gmra.mxu3 %vm860_vm1, %v2900_v53 }
 0x2ad   : > { %v3705_v11 = vmul.f32 %v3528_v21, %v3453_v8  ;;  %v2907_v21 = vrot.slane %v2905_v57, 3 }
 0x2ae   : > { %v3289_v41 = vpop.f32.mrf.mxu0 }
 0x2af   : > { %v3741_v13 = vpack.c.bf16 %v3705_v11, %v3705_v11  ;;  %v3378_v40 = vadd.f32 %v3289_v41, %v3130_v28  ;;  %v13557_v5 = vpop.f32.mrf.mxu3  ;;  %v3533_v11 = vpop.permute.xlu0 %3532  ;;  %v4179_v41 = vld [vmem:[#allocation3 + $0x8] sm:$0xe]  ;;  %v13569_v61 = vor.u32 %v2907_v21, %v2904_v18 }
 0x2b1   : > { %v3781_v34 = vshrl.u32 %v3741_v13, 16  ;;  %v3784_v43 = vshll.u32 %v3741_v13, 16  ;;  %v3418_v24 = vadd.f32 %v13545_v16, %v3378_v40  ;;  %v3195_v40 = vsel %vm3174_vm7, %v3192_v32, %v17010_v9 }
 0x2b3   : > { %v3783_v53 = vrot.slane %v3781_v34, 6  ;;  %v3786_v8 = vrot.slane %v3784_v43, 7  ;;  %v3454_v28 = vmax.f32 %v3418_v24, 0.0 }
 0x2b5   : > { %v3787_v45 = vor.u32 %v3786_v8, %v3783_v53  ;;  %v3706_v37 = vmul.f32 %v3533_v11, %v3454_v28  ;;  %v3132_v28 = vadd.f32 %v3046_v52, %v12891_v44  ;;  %v11958_v44 = vld [vmem:[%s17002_s4 + $0x138] sm:$0xff] }
 0x2b6   : > { %v3292_v13 = vpop.f32.mrf.mxu0  ;;  %5764 = vmatpush.bf16.msrb.mxu1 %v11958_v44  ;;  %v12007_v8 = vld [vmem:[%s17002_s4 + $0x238] sm:$0xff] }
 0x2b7   : > { %v4180_v0 = vsel %vm4178_vm10, %v3787_v45, %v4179_v41  ;;  %v3742_v57 = vpack.c.bf16 %v3706_v37, %v3706_v37  ;;  %v3379_v47 = vadd.f32 %v3292_v13, %v3131_v50  ;;  %v13571_v34 = vpop.f32.mrf.mxu3  ;;  %v3538_v37 = vpop.permute.xlu1 %3537  ;;  %v2909_v50 = vsel %vm2793_vm6, %v2899_v26, %v13569_v61 }
 0x2b8   : > { %4181 = vst [vmem:[#allocation3 + $0x8] sm:$0xe] %v4180_v0  ;;  %v3788_v11 = vrot.slane %v3787_v45, 4  ;;  %v13590_v0 = vld [vmem:[#allocation2 + $0x78] sm:$0xff] }
 0x2b9   : > { %v3790_v43 = vshrl.u32 %v3742_v57, 16  ;;  %v3793_v32 = vshll.u32 %v3742_v57, 16  ;;  %v3419_v24 = vadd.f32 %v13545_v16, %v3379_v47  ;;  %10715 = vmatmul.msk.bf16.gmra.mxu0 %vm860_vm1, %v3195_v40  ;;  %v2911_v26 = vshrl.u32 %v13590_v0, 16 }
 0x2ba   : > { %v2914_v57 = vshll.u32 %v13590_v0, 16 }
 0x2bb   : > { %v3792_v18 = vrot.slane %v3790_v43, 6  ;;  %v3795_v21 = vrot.slane %v3793_v32, 7  ;;  %v3455_v53 = vmax.f32 %v3419_v24, 0.0  ;;  %v4388_v24 = vshll.u32 %v13530_v12, 16 }
 0x2bc   : > { %10687 = vmatmul.msk.bf16.gmra.mxu3 %vm860_vm1, %v2909_v50  ;;  %v2913_v50 = vrot.slane %v2911_v26, 2  ;;  %v17112_v26 = vrot.slane %v13510_v20, 3  ;;  %v3548_v20 = vpop.permute.xlu2 %3547 }
 0x2bd   : > { %v3796_v41 = vor.u32 %v3795_v21, %v3792_v18  ;;  %v3707_v13 = vmul.f32 %v3538_v37, %v3455_v53  ;;  %v3196_v37 = vrot.slane %v13534_v2, 3  ;;  %v2916_v18 = vrot.slane %v2914_v57, 3  ;;  %v11924_v2 = vld [vmem:[%s17002_s4 + $0xb0] sm:$0xff] }
 0x2be   : > { %v3294_v40 = vpop.f32.mrf.mxu0  ;;  %4988 = vmatpush.bf16.msrb.mxu3 %v11924_v2 }
 0x2bf   : > { %v3797_v47 = vsel %vm13584_vm13, %v3788_v11, %v3796_v41  ;;  %v3743_v46 = vpack.c.bf16 %v3707_v13, %v3707_v13  ;;  %v3380_v56 = vadd.f32 %v3294_v40, %v3132_v28  ;;  %v13596_v43 = vpop.f32.mrf.mxu3  ;;  %v3543_v11 = vpop.permute.xlu1 %3542  ;;  %v3133_v13 = vadd.f32 %v13557_v5, %v12903_v7 }
 0x2c0   : > { %4182 = vst [vmem:[#allocation3 + $0xc] sm:$0xf] %v3797_v47  ;;  %v3798_v40 = vrot.slane %v3796_v41, 4  ;;  %v3197_v57 = vsel %vm3174_vm7, %v17112_v26, %v3196_v37  ;;  %v13612_v44 = vor.u32 %v2916_v18, %v2913_v50  ;;  %v13627_v18 = vld [vmem:[#allocation2 + $0x80] sm:$0xff] }
 0x2c1   : > { %v3800_v52 = vshrl.u32 %v3743_v46, 16  ;;  %v3803_v45 = vshll.u32 %v3743_v46, 16  ;;  %v3420_v32 = vadd.f32 %v13545_v16, %v3380_v56  ;;  %v4386_v46 = vshrl.u32 %v13530_v12, 16 }
 0x2c2   : > { %v4390_v56 = vrot.slane %v4388_v24, 1 }
 0x2c3   : > { %v3802_v21 = vrot.slane %v3800_v52, 6  ;;  %v3805_v53 = vrot.slane %v3803_v45, 7  ;;  %v3456_v28 = vmax.f32 %v3420_v32, 0.0 }
 0x2c4   : > { %v4391_v50 = vor.u32 %v4390_v56, %v4386_v46  ;;  %v3134_v46 = vadd.f32 %v13571_v34, %v12917_v60 }
 0x2c5   : > { %v3806_v47 = vor.u32 %v3805_v53, %v3802_v21  ;;  %v3708_v9 = vmul.f32 %v3543_v11, %v3456_v28  ;;  %v2920_v21 = vshrl.u32 %v13627_v18, 16 }
 0x2c6   : > { %v3297_v14 = vpop.f32.mrf.mxu0 }
 0x2c7   : > { %v3807_v52 = vsel %vm13584_vm13, %v3798_v40, %v3806_v47  ;;  %v3744_v45 = vpack.c.bf16 %v3708_v9, %v3708_v9  ;;  %v3381_v7 = vadd.f32 %v3297_v14, %v3133_v13  ;;  %v13616_v5 = vld [vmem:[#allocation3 + $0x8] sm:$0xff]  ;;  %v13618_v41 = vpop.f32.mrf.mxu3  ;;  %v2918_v9 = vsel %vm2793_vm6, %v13569_v61, %v13612_v44  ;;  %v3563_v55 = vpop.permute.xlu1 %3562 }
 0x2c8   : > { %4183 = vst [vmem:[#allocation3 + $0x10] sm:$0xf] %v3807_v52  ;;  %4777 = vmatmul.bf16.gmra.mxu2 %v13616_v5  ;;  %v4393_v14 = vshll.u32 %v13616_v5, 16  ;;  %v2923_v13 = vshll.u32 %v13627_v18, 16  ;;  %v3808_v56 = vrot.slane %v3806_v47, 4 }
 0x2c9   : > { %v3810_v12 = vshrl.u32 %v3744_v45, 16  ;;  %v3813_v32 = vshll.u32 %v3744_v45, 16  ;;  %v3421_v24 = vadd.f32 %v13545_v16, %v3381_v7  ;;  %10716 = vmatmul.msk.bf16.gmra.mxu0 %vm860_vm1, %v3197_v57  ;;  %v2922_v45 = vrot.slane %v2920_v21, 2 }
 0x2ca   : > { %v13631_v40 = vrot.slane %v4393_v14, 1 }
 0x2cb   : > { %v3812_v53 = vrot.slane %v3810_v12, 6  ;;  %v3815_v28 = vrot.slane %v3813_v32, 7  ;;  %v3457_v11 = vmax.f32 %v3421_v24, 0.0  ;;  %v2925_v24 = vrot.slane %v2923_v13, 3 }
 0x2cc   : > { %10688 = vmatmul.msk.bf16.gmra.mxu3 %vm860_vm1, %v2918_v9  ;;  %v4396_v52 = vsel %vm699_vm3, %v4391_v50, %v13631_v40  ;;  %v17011_v9 = vrot.slane %v13553_v54, 3  ;;  %v3135_v13 = vadd.f32 %v13596_v43, %v12934_v63 }
 0x2cd   : > { %v3816_v26 = vor.u32 %v3815_v28, %v3812_v53  ;;  %v3709_v57 = vmul.f32 %v3548_v20, %v3457_v11  ;;  %4607 = vmatmul.bf16.vlgmr.msra.gmra.mxu1 %v4396_v52  ;;  %v5123_v20 = vld [vmem:[#allocation3 + $0xc] sm:$0xf]  ;;  %v13644_v28 = vor.u32 %v2925_v24, %v2922_v45  ;;  %v5122_v11 = vld [vmem:[#allocation3 + $0x8] sm:$0xe] }
 0x2ce   : > { %v3299_v61 = vpop.f32.mrf.mxu0 }
 0x2cf   : > { %v3817_v7 = vsel %vm13584_vm13, %v3808_v56, %v3816_v26  ;;  %v3745_v12 = vpack.c.bf16 %v3709_v57, %v3709_v57  ;;  %v3382_v32 = vadd.f32 %v3299_v61, %v3134_v46  ;;  %v13640_v14 = vpop.f32.mrf.mxu3  ;;  %v3553_v56 = vpop.permute.xlu2 %3552  ;;  %v5214_v46 = vunpack.c.l.b16 %v5123_v20 }
 0x2d0   : > { %4184 = vst [vmem:[#allocation3 + $0x14] sm:$0xf] %v3817_v7  ;;  %v3818_v57 = vrot.slane %v3816_v26, 4  ;;  %v5899_v7 = vld [vmem:[#allocation3 + $0x8] sm:$0xc]  ;;  %v2927_v63 = vsel %vm2793_vm6, %v13612_v44, %v13644_v28 }
 0x2d1   : > { %v3820_v60 = vshrl.u32 %v3745_v12, 16  ;;  %v3823_v34 = vshll.u32 %v3745_v12, 16  ;;  %v3422_v47 = vadd.f32 %v13545_v16, %v3382_v32  ;;  %v3199_v32 = vsel %vm3174_vm7, %v3196_v37, %v17011_v9  ;;  %v13665_v37 = vld [vmem:[#allocation2 + $0x88] sm:$0xff] }
 0x2d2   : > { %v2929_v26 = vshrl.u32 %v13665_v37, 16  ;;  %v2932_v20 = vshll.u32 %v13665_v37, 16 }
 0x2d3   : > { %v3822_v53 = vrot.slane %v3820_v60, 6  ;;  %v3825_v50 = vrot.slane %v3823_v34, 7  ;;  %v3458_v21 = vmax.f32 %v3422_v47, 0.0  ;;  %v5213_v60 = vunpack.c.l.b16 %v5122_v11 }
 0x2d5   : > { %v3826_v61 = vor.u32 %v3825_v50, %v3822_v53  ;;  %v3710_v52 = vmul.f32 %v3553_v56, %v3458_v21  ;;  %v13669_v53 = vpack.c.b16 %v5214_v46, %v5213_v60  ;;  %v5918_v50 = vunpack.c.l.b16 %v5899_v7 }
 0x2d6   : > { %v3302_v12 = vpop.f32.mrf.mxu0  ;;  %v3136_v21 = vadd.f32 %v13618_v41, %v12954_v30  ;;  %v17012_v7 = vrot.slane %v13616_v5, 1 }
 0x2d7   : > { %v3827_v45 = vsel %vm13584_vm13, %v3818_v57, %v3826_v61  ;;  %v3746_v24 = vpack.c.bf16 %v3710_v52, %v3710_v52  ;;  %v3383_v34 = vadd.f32 %v3302_v12, %v3135_v13  ;;  %v13655_v47 = vld [vmem:[#allocation3 + $0x10] sm:$0xff]  ;;  %v13660_v43 = vpop.f32.mrf.mxu3  ;;  %v4397_v57 = vshrl.u32 %v13616_v5, 16 }
 0x2d8   : > { %4185 = vst [vmem:[#allocation3 + $0x18] sm:$0xf] %v3827_v45  ;;  %4782 = vmatmul.bf16.gmra.mxu2 %v13655_v47  ;;  %v13676_v13 = vld [vmem:[#allocation3 + $0x10] sm:$0xff]  ;;  %v4401_v52 = vshll.u32 %v13655_v47, 16  ;;  %v5919_v12 = vpack.c.b16 %v5214_v46, %v5918_v50  ;;  %v17013_v45 = vrot.slane %v13655_v47, 1  ;;  %v5529_v59 = vshrl.u32 %v13669_v53, 16 }
 0x2d9   : > { %v3830_v44 = vshrl.u32 %v3746_v24, 16  ;;  %v3833_v11 = vshll.u32 %v3746_v24, 16  ;;  %v3423_v56 = vadd.f32 %v13545_v16, %v3383_v34  ;;  %10717 = vmatmul.msk.bf16.gmra.mxu0 %vm860_vm1, %v3199_v32  ;;  %v3558_v24 = vpop.permute.xlu0 %3557  ;;  %v3828_v34 = vrot.slane %v3826_v61, 4 }
 0x2da   : > { %v4399_v32 = vor.u32 %v4397_v57, %v13631_v40  ;;  %v13683_v9 = vrot.slane %v4401_v52, 1  ;;  %v13692_v46 = vsel %vm1170_vm2, %v17012_v7, %v17013_v45  ;;  %v17014_v2 = vrot.slane %v13676_v13, 2 }
 0x2db   : > { %v3832_v60 = vrot.slane %v3830_v44, 6  ;;  %v3835_v30 = vrot.slane %v3833_v11, 7  ;;  %v3459_v41 = vmax.f32 %v3423_v56, 0.0  ;;  %v5920_v50 = vrot.slane %v5919_v12, 2  ;;  %v11949_v12 = vld [vmem:[%s17002_s4 + $0xf0] sm:$0xff] }
 0x2dc   : > { %10689 = vmatmul.msk.bf16.gmra.mxu3 %vm860_vm1, %v2927_v63  ;;  %v4404_v40 = vsel %vm699_vm3, %v4399_v32, %v13683_v9  ;;  %v5532_v44 = vshll.u32 %v13669_v53, 16  ;;  %v5537_v11 = vshrl.u32 %v13676_v13, 16  ;;  %v2931_v52 = vrot.slane %v2929_v26, 2  ;;  %5373 = vmatpush.bf16.msrb.mxu0 %v11949_v12 }
 0x2dd   : > { %v3836_v48 = vor.u32 %v3835_v30, %v3832_v60  ;;  %v3711_v25 = vmul.f32 %v3558_v24, %v3459_v41  ;;  %4612 = vmatmul.bf16.gmra.mxu1 %v4404_v40  ;;  %v2934_v30 = vrot.slane %v2932_v20, 3  ;;  %v11965_v41 = vld [vmem:[%s17002_s4 + $0x170] sm:$0xff]  ;;  %v5531_v32 = vrot.slane %v5529_v59, 1 }
 0x2de   : > { %v3304_v61 = vpop.f32.mrf.mxu0  ;;  %v11957_v24 = vld [vmem:[%s17002_s4 + $0x130] sm:$0xff]  ;;  %6024 = vmatpush.bf16.msrb.mxu2 %v11965_v41  ;;  %v5539_v40 = vrot.slane %v5537_v11, 1  ;;  %v17114_v59 = vrot.slane %v13590_v0, 3 }
 0x2df   : > { %v3837_v63 = vsel %vm13584_vm13, %v3828_v34, %v3836_v48  ;;  %v3747_v56 = vpack.c.bf16 %v3711_v25, %v3711_v25  ;;  %v3384_v57 = vadd.f32 %v3304_v61, %v3136_v21  ;;  %v13701_v60 = vpop.f32.mrf.mxu3  ;;  %v13715_v25 = vsel %vm2172_vm4, %v5920_v50, %v17014_v2  ;;  %5765 = vmatpush.bf16.msrb.mxu1 %v11957_v24 }
 0x2e0   : > { %4186 = vst [vmem:[#allocation3 + $0x1c] sm:$0xf] %v3837_v63  ;;  %v5534_v61 = vrot.slane %v5532_v44, 2  ;;  %v5540_v63 = vshll.u32 %v13676_v13, 16  ;;  %v13720_v50 = vor.u32 %v2934_v30, %v2931_v52  ;;  %v17115_v44 = vrot.slane %v13553_v54, 3 }
 0x2e1   : > { %17113 = vst [vmem:[#allocation32_spill] sm:$0xff] %v13715_v25  ;;  %v3840_v26 = vshrl.u32 %v3747_v56, 16  ;;  %v3843_v21 = vshll.u32 %v3747_v56, 16  ;;  %v3424_v20 = vadd.f32 %v13545_v16, %v3384_v57  ;;  %v3137_v56 = vadd.f32 %v13640_v14, %v12985_v10  ;;  %v13735_v10 = vld [vmem:[#allocation3 + $0x14] sm:$0xf] }
 0x2e2   : > { %v5542_v2 = vrot.slane %v5540_v63, 2  ;;  %v3838_v57 = vrot.slane %v3836_v48, 4  ;;  %v3201_v11 = vsel %vm3174_vm7, %v17115_v44, %v17114_v59  ;;  %17116 = vst [vmem:[#allocation33_spill] sm:$0xff] %v13735_v10  ;;  %v6935_v59 = vld [vmem:[#allocation3 + $0x10] sm:$0x8]  ;;  %v3568_v44 = vpop.permute.xlu2 %3567 }
 0x2e3   : > { %v3842_v7 = vrot.slane %v3840_v26, 6  ;;  %v3845_v45 = vrot.slane %v3843_v21, 7  ;;  %v3460_v42 = vmax.f32 %v3424_v20, 0.0  ;;  %v5535_v26 = vor.u32 %v5534_v61, %v5531_v32 }
 0x2e4   : > { %v13729_v21 = vor.u32 %v5542_v2, %v5539_v40 }
 0x2e5   : > { %v3846_v34 = vor.u32 %v3845_v45, %v3842_v7  ;;  %v3712_v41 = vmul.f32 %v3563_v55, %v3460_v42  ;;  %v2936_v42 = vsel %vm2793_vm6, %v13644_v28, %v13720_v50  ;;  %v13749_v45 = vld [vmem:[#allocation2 + $0x90] sm:$0xff]  ;;  %v4405_v28 = vshrl.u32 %v13655_v47, 16 }
 0x2e6   : > { %v3307_v12 = vpop.f32.mrf.mxu0  ;;  %v13744_v48 = vsel %vm1791_vm5, %v5535_v26, %v13729_v21  ;;  %v2938_v2 = vshrl.u32 %v13749_v45, 16  ;;  %v2941_v40 = vshll.u32 %v13749_v45, 16 }
 0x2e7   : > { %v3847_v52 = vsel %vm13584_vm13, %v3838_v57, %v3846_v34  ;;  %v3748_v30 = vpack.c.bf16 %v3712_v41, %v3712_v41  ;;  %v3385_v24 = vadd.f32 %v3307_v12, %v3137_v56  ;;  %v13733_v20 = vld [vmem:[#allocation3 + $0x18] sm:$0xff]  ;;  %v13737_v55 = vpop.f32.mrf.mxu3  ;;  %17117 = vst [vmem:[#allocation34_spill] sm:$0xff] %v13744_v48  ;;  %v3848_v26 = vrot.slane %v3846_v34, 4 }
 0x2e8   : > { %4187 = vst [vmem:[#allocation3 + $0x20] sm:$0xf] %v3847_v52  ;;  %4787 = vmatmul.bf16.gmra.mxu2 %v13733_v20  ;;  %v13752_v32 = vld [vmem:[#allocation3 + $0x18] sm:$0xff]  ;;  %v4409_v61 = vshll.u32 %v13733_v20, 16  ;;  %v17015_v12 = vrot.slane %v13733_v20, 1  ;;  %v4407_v52 = vor.u32 %v4405_v28, %v13683_v9  ;;  %v2940_v9 = vrot.slane %v2938_v2, 2 }
 0x2e9   : > { %v3850_v54 = vshrl.u32 %v3748_v30, 16  ;;  %v3853_v14 = vshll.u32 %v3748_v30, 16  ;;  %v3425_v7 = vadd.f32 %v13545_v16, %v3385_v24  ;;  %10718 = vmatmul.msk.bf16.gmra.mxu0 %vm860_vm1, %v3201_v11  ;;  %v3138_v11 = vadd.f32 %v13660_v43, %v13022_v22 }
 0x2ea   : > { %v13762_v30 = vrot.slane %v4409_v61, 1  ;;  %v5546_v43 = vshrl.u32 %v13752_v32, 16  ;;  %v6954_v34 = vunpack.c.l.b16 %v6935_v59  ;;  %v5549_v59 = vshll.u32 %v13752_v32, 16 }
 0x2eb   : > { %v3852_v56 = vrot.slane %v3850_v54, 6  ;;  %v3855_v57 = vrot.slane %v3853_v14, 7  ;;  %v3461_v41 = vmax.f32 %v3425_v7, 0.0  ;;  %v17118_v54 = vrot.slane %v13655_v47, 1 }
 0x2ec   : > { %10690 = vmatmul.msk.bf16.gmra.mxu3 %vm860_vm1, %v2936_v42  ;;  %v17016_v7 = vrot.slane %v13752_v32, 2  ;;  %v4412_v22 = vsel %vm699_vm3, %v4407_v52, %v13762_v30  ;;  %v2943_v47 = vrot.slane %v2941_v40, 3  ;;  %v5548_v2 = vrot.slane %v5546_v43, 1  ;;  %v11923_v43 = vld [vmem:[%s17002_s4 + $0xa8] sm:$0xff] }
 0x2ed   : > { %v3856_v24 = vor.u32 %v3855_v57, %v3852_v56  ;;  %v3713_v48 = vmul.f32 %v3568_v44, %v3461_v41  ;;  %v13770_v14 = vsel %vm1170_vm2, %v17118_v54, %v17015_v12  ;;  %4617 = vmatmul.bf16.gmra.mxu1 %v4412_v22  ;;  %v17119_v57 = vrot.slane %v13676_v13, 2  ;;  %v13788_v44 = vld [vmem:[#allocation3 + $0x18] sm:$0xff]  ;;  %4989 = vmatpush.bf16.msrb.mxu3 %v11923_v43 }
 0x2ee   : > { %v3309_v63 = vpop.f32.mrf.mxu0  ;;  %v17017_v52 = vrot.slane %v13627_v18, 3  ;;  %v5551_v54 = vrot.slane %v5549_v59, 2  ;;  %v4413_v43 = vshrl.u32 %v13733_v20, 16 }
 0x2ef   : > { %v3857_v42 = vsel %vm13584_vm13, %v3848_v26, %v3856_v24  ;;  %v3749_v28 = vpack.c.bf16 %v3713_v48, %v3713_v48  ;;  %v3386_v61 = vadd.f32 %v3309_v63, %v3138_v11  ;;  %v13778_v56 = vpop.f32.mrf.mxu3  ;;  %v13785_v41 = vsel %vm2172_vm4, %v17119_v57, %v17016_v7  ;;  %v3573_v57 = vpop.permute.xlu0 %3572 }
 0x2f0   : > { %4188 = vst [vmem:[#allocation3 + $0x24] sm:$0xf] %v3857_v42  ;;  %v17121_v48 = vunpack.c.l.b16 %v13735_v10  ;;  %v13794_v7 = vor.u32 %v2943_v47, %v2940_v9  ;;  %v17122_v9 = vrot.slane %v13590_v0, 3 }
 0x2f1   : > { %17120 = vst [vmem:[#allocation35_spill] sm:$0xff] %v13785_v41  ;;  %v3860_v11 = vshrl.u32 %v3749_v28, 16  ;;  %v3863_v40 = vshll.u32 %v3749_v28, 16  ;;  %v3426_v26 = vadd.f32 %v13545_v16, %v3386_v61  ;;  %v13799_v41 = vor.u32 %v5551_v54, %v5548_v2 }
 0x2f2   : > { %v6955_v63 = vpack.c.b16 %v17121_v48, %v6954_v34  ;;  %v17018_v28 = vrot.slane %v13788_v44, 3  ;;  %v3139_v61 = vadd.f32 %v13701_v60, %v13067_v17  ;;  %v3858_v48 = vrot.slane %v3856_v24, 4 }
 0x2f3   : > { %v3862_v22 = vrot.slane %v3860_v11, 6  ;;  %v3865_v42 = vrot.slane %v3863_v40, 7  ;;  %v3462_v12 = vmax.f32 %v3426_v26, 0.0  ;;  %v3203_v47 = vsel %vm3174_vm7, %v17122_v9, %v17017_v52 }
 0x2f4   : > { %v6956_v34 = vrot.slane %v6955_v63, 3  ;;  %v13812_v2 = vsel %vm1791_vm5, %v13729_v21, %v13799_v41  ;;  %v11922_v21 = vld [vmem:[%s17002_s4 + $0xa0] sm:$0xff]  ;;  %v4415_v52 = vor.u32 %v4413_v43, %v13762_v30 }
 0x2f5   : > { %v3866_v59 = vor.u32 %v3865_v42, %v3862_v22  ;;  %v3714_v11 = vmul.f32 %v3573_v57, %v3462_v12  ;;  %17123 = vst [vmem:[#allocation36_spill] sm:$0xff] %v13812_v2  ;;  %v2945_v42 = vsel %vm2793_vm6, %v13720_v50, %v13794_v7  ;;  %4990 = vmatpush.bf16.msrb.mxu3 %v11922_v21 }
 0x2f6   : > { %v3312_v40 = vpop.f32.mrf.mxu0  ;;  %v13817_v17 = vsel %vm3174_vm7, %v6956_v34, %v17018_v28  ;;  %v3140_v50 = vadd.f32 %v13737_v55, %v13103_v6 }
 0x2f7   : > { %17124 = vst [vmem:[#allocation37_spill] sm:$0xff] %v13817_v17  ;;  %v3867_v60 = vsel %vm13584_vm13, %v3858_v48, %v3866_v59  ;;  %v3750_v12 = vpack.c.bf16 %v3714_v11, %v3714_v11  ;;  %v3387_v24 = vadd.f32 %v3312_v40, %v3139_v61  ;;  %v13821_v63 = vld [vmem:[#allocation3 + $0x20] sm:$0xff]  ;;  %v13823_v0 = vpop.f32.mrf.mxu3  ;;  %v13838_v61 = vld [vmem:[#allocation2 + $0x98] sm:$0xff] }
 0x2f8   : > { %4189 = vst [vmem:[#allocation3 + $0x28] sm:$0xf] %v3867_v60  ;;  %4792 = vmatmul.bf16.gmra.mxu2 %v13821_v63  ;;  %v13834_v57 = vld [vmem:[#allocation3 + $0x20] sm:$0xff]  ;;  %v4417_v34 = vshll.u32 %v13821_v63, 16  ;;  %v2947_v48 = vshrl.u32 %v13838_v61, 16  ;;  %v2950_v11 = vshll.u32 %v13838_v61, 16 }
 0x2f9   : > { %v3870_v26 = vshrl.u32 %v3750_v12, 16  ;;  %v3873_v54 = vshll.u32 %v3750_v12, 16  ;;  %v3427_v22 = vadd.f32 %v13545_v16, %v3387_v24  ;;  %10719 = vmatmul.msk.bf16.gmra.mxu0 %vm860_vm1, %v3203_v47  ;;  %v17020_v60 = vrot.slane %v13821_v63, 1  ;;  %v3578_v12 = vpop.permute.xlu1 %3577  ;;  %v11921_v17 = vld [vmem:[%s17002_s4 + $0x98] sm:$0xff] }
 0x2fa   : > { %v3868_v24 = vrot.slane %v3866_v59, 4  ;;  %v13846_v28 = vrot.slane %v4417_v34, 1  ;;  %v17021_v6 = vrot.slane %v13834_v57, 2  ;;  %4991 = vmatpush.bf16.msrb.mxu3 %v11921_v17  ;;  %v5555_v59 = vshrl.u32 %v13834_v57, 16  ;;  %v11948_v17 = vld [vmem:[%s17002_s4 + $0xe8] sm:$0xff] }
 0x2fb   : > { %v3872_v40 = vrot.slane %v3870_v26, 6  ;;  %v3875_v9 = vrot.slane %v3873_v54, 7  ;;  %v3463_v47 = vmax.f32 %v3427_v22, 0.0  ;;  %v17125_v26 = vrot.slane %v13733_v20, 1  ;;  %v2784_v20 = vld [vmem:[#allocation2 + $0xa0] sm:$0x7]  ;;  %5374 = vmatpush.bf16.msrb.mxu0 %v11948_v17 }
 0x2fc   : > { %10691 = vmatmul.msk.bf16.gmra.mxu3 %vm860_vm1, %v2945_v42  ;;  %v4420_v30 = vsel %vm699_vm3, %v4415_v52, %v13846_v28  ;;  %v2949_v34 = vrot.slane %v2947_v48, 2  ;;  %v11964_v52 = vld [vmem:[%s17002_s4 + $0x168] sm:$0xff]  ;;  %v17127_v48 = vrot.slane %v13752_v32, 2 }
 0x2fd   : > { %v3876_v10 = vor.u32 %v3875_v9, %v3872_v40  ;;  %v3715_v21 = vmul.f32 %v3578_v12, %v3463_v47  ;;  %v13857_v54 = vsel %vm1170_vm2, %v17125_v26, %v17020_v60  ;;  %4622 = vmatmul.bf16.gmra.mxu1 %v4420_v30  ;;  %v13865_v40 = vld [vmem:[#allocation3 + $0x20] sm:$0xff]  ;;  %v2952_v47 = vrot.slane %v2950_v11, 3  ;;  %v11920_v12 = vld [vmem:[%s17002_s4 + $0x90] sm:$0xff]  ;;  %6025 = vmatpush.bf16.msrb.mxu2 %v11964_v52 }
 0x2fe   : > { %17126 = vst [vmem:[#allocation38_spill] sm:$0xff] %v13857_v54  ;;  %v3314_v55 = vpop.f32.mrf.mxu0  ;;  %v17024_v26 = vrot.slane %v13665_v37, 3  ;;  %v5557_v30 = vrot.slane %v5555_v59, 1  ;;  %4992 = vmatpush.bf16.msrb.mxu3 %v11920_v12  ;;  %v17025_v54 = vrot.slane %v13865_v40, 3  ;;  %v11919_v59 = vld [vmem:[%s17002_s4 + $0x88] sm:$0xff]  ;;  %v17128_v12 = vrot.slane %v13788_v44, 3 }
 0x2ff   : > { %v3877_v22 = vsel %vm13584_vm13, %v3868_v24, %v3876_v10  ;;  %v3751_v42 = vpack.c.bf16 %v3715_v21, %v3715_v21  ;;  %v3388_v43 = vadd.f32 %v3314_v55, %v3140_v50  ;;  %v13867_v9 = vpop.f32.mrf.mxu3  ;;  %v13883_v50 = vsel %vm2172_vm4, %v17127_v48, %v17021_v6 }
 0x300   : > { %4190 = vst [vmem:[#allocation3 + $0x2c] sm:$0xf] %v3877_v22  ;;  %v2791_v55 = vunpack.c.l.b16 %v2784_v20  ;;  %v5558_v22 = vshll.u32 %v13834_v57, 16  ;;  %v2388_v48 = vadd.f32 %v13118_v35, %v13158_v58  ;;  %v13893_v6 = vor.u32 %v2952_v47, %v2949_v34 }
 0x301   : > { %v3880_v11 = vshrl.u32 %v3751_v42, 16  ;;  %v3883_v24 = vshll.u32 %v3751_v42, 16  ;;  %v3428_v21 = vadd.f32 %v13545_v16, %v3388_v43  ;;  %v3583_v42 = vpop.permute.xlu2 %3582  ;;  %v3141_v43 = vadd.f32 %v13778_v56, %v13144_v62 }
 0x302   : > { %v5560_v20 = vrot.slane %v5558_v22, 2  ;;  %v3878_v52 = vrot.slane %v3876_v10, 4  ;;  %v13903_v35 = vsel %vm3174_vm7, %v17128_v12, %v17025_v54  ;;  %v17130_v62 = vrot.slane %v13627_v18, 3  ;;  %4993 = vmatpush.bf16.msrb.mxu3 %v11919_v59  ;;  %v11956_v18 = vld [vmem:[%s17002_s4 + $0x128] sm:$0xff] }
 0x303   : > { %v3882_v60 = vrot.slane %v3880_v11, 6  ;;  %v3885_v2 = vrot.slane %v3883_v24, 7  ;;  %v3464_v25 = vmax.f32 %v3428_v21, 0.0  ;;  %17129 = vst [vmem:[#allocation39_spill] sm:$0xff] %v13903_v35  ;;  %v13910_v34 = vpack.c.b16 %v2791_v55, %v2791_v55  ;;  %v11918_v21 = vld [vmem:[%s17002_s4 + $0x80] sm:$0xff]  ;;  %5766 = vmatpush.bf16.msrb.mxu1 %v11956_v18 }
 0x304   : > { %v3205_v56 = vsel %vm3174_vm7, %v17130_v62, %v17024_v26  ;;  %v13912_v47 = vor.u32 %v5560_v20, %v5557_v30  ;;  %v3588_v62 = vpop.permute.xlu0 %3587 }
 0x305   : > { %v3886_v17 = vor.u32 %v3885_v2, %v3882_v60  ;;  %v3716_v11 = vmul.f32 %v3583_v42, %v3464_v25  ;;  %v2761_v60 = vadd.f32 %v13168_v27, %v2388_v48  ;;  %v2954_v42 = vsel %vm2793_vm6, %v13794_v7, %v13893_v6 }
 0x306   : > { %v3317_v58 = vpop.f32.mrf.mxu0  ;;  %v13932_v30 = vsel %vm1791_vm5, %v13799_v41, %v13912_v47  ;;  %v2956_v41 = vshrl.u32 %v13910_v34, 16  ;;  %4994 = vmatpush.bf16.msrb.mxu3 %v11918_v21  ;;  %v17131_v7 = vrot.slane %v13821_v63, 1 }
 0x307   : > { %v3887_v25 = vsel %vm13584_vm13, %v3878_v52, %v3886_v17  ;;  %v3752_v10 = vpack.c.bf16 %v3716_v11, %v3716_v11  ;;  %v3389_v2 = vadd.f32 %v3317_v58, %v3141_v43  ;;  %v13916_v44 = vld [vmem:[#allocation3 + $0x28] sm:$0xff]  ;;  %v13919_v24 = vpop.f32.mrf.mxu3  ;;  %v4421_v43 = vshrl.u32 %v13821_v63, 16 }
 0x308   : > { %4191 = vst [vmem:[#allocation3 + $0x30] sm:$0xf] %v3887_v25  ;;  %v13927_v55 = vld [vmem:[#allocation3 + $0x28] sm:$0xff]  ;;  %4797 = vmatmul.bf16.gmra.mxu2 %v13916_v44  ;;  %v4425_v59 = vshll.u32 %v13916_v44, 16  ;;  %v17023_v20 = vrot.slane %v13916_v44, 1  ;;  %v3142_v52 = vadd.f32 %v13823_v0, %v2761_v60  ;;  %v3888_v18 = vrot.slane %v3886_v17, 4 }
 0x309   : > { %v3890_v22 = vshrl.u32 %v3752_v10, 16  ;;  %v3893_v27 = vshll.u32 %v3752_v10, 16  ;;  %v3429_v48 = vadd.f32 %v13545_v16, %v3389_v2  ;;  %10720 = vmatmul.msk.bf16.gmra.mxu0 %vm860_vm1, %v3205_v56  ;;  %v4423_v56 = vor.u32 %v4421_v43, %v13846_v28 }
 0x30a   : > { %v13946_v25 = vrot.slane %v4425_v59, 1  ;;  %v13953_v10 = vsel %vm1170_vm2, %v17131_v7, %v17023_v20  ;;  %v17022_v2 = vrot.slane %v13927_v55, 2  ;;  %v5564_v21 = vshrl.u32 %v13927_v55, 16 }
 0x30b   : > { %v3892_v11 = vrot.slane %v3890_v22, 6  ;;  %v3895_v12 = vrot.slane %v3893_v27, 7  ;;  %v3465_v58 = vmax.f32 %v3429_v48, 0.0  ;;  %v2959_v27 = vshll.u32 %v13910_v34, 16 }
 0x30c   : > { %10692 = vmatmul.msk.bf16.gmra.mxu3 %vm860_vm1, %v2954_v42  ;;  %v4428_v28 = vsel %vm699_vm3, %v4423_v56, %v13946_v25  ;;  %v17132_v63 = vrot.slane %v13834_v57, 2  ;;  %v5567_v17 = vshll.u32 %v13927_v55, 16  ;;  %v2958_v20 = vrot.slane %v2956_v41, 2 }
 0x30d   : > { %v3896_v0 = vor.u32 %v3895_v12, %v3892_v11  ;;  %v3717_v60 = vmul.f32 %v3588_v62, %v3465_v58  ;;  %4627 = vmatmul.bf16.gmra.mxu1 %v4428_v28  ;;  %v13971_v11 = vld [vmem:[#allocation3 + $0x28] sm:$0xff]  ;;  %v5566_v58 = vrot.slane %v5564_v21, 1  ;;  %v2961_v26 = vrot.slane %v2959_v27, 3  ;;  %v3593_v21 = vpop.permute.xlu1 %3592 }
 0x30e   : > { %v3319_v22 = vpop.f32.mrf.mxu0  ;;  %v13966_v48 = vsel %vm2172_vm4, %v17132_v63, %v17022_v2  ;;  %v5569_v62 = vrot.slane %v5567_v17, 2  ;;  %v3206_v2 = vrot.slane %v13749_v45, 3  ;;  %v2390_v28 = vadd.f32 %v13183_v36, %v13229_v19  ;;  %v17133_v17 = vld [vmem:[#allocation4_spill] sm:$0xff] }
 0x30f   : > { %v3897_v42 = vsel %vm13584_vm13, %v3888_v18, %v3896_v0  ;;  %v3753_v43 = vpack.c.bf16 %v3717_v60, %v3717_v60  ;;  %v3390_v59 = vadd.f32 %v3319_v22, %v3142_v52  ;;  %v13973_v12 = vpop.f32.mrf.mxu3  ;;  %v6961_v22 = vrot.slane %v13971_v11, 3  ;;  %v11943_v11 = vld [vmem:[%s17002_s4 + $0xc0] sm:$0xff] }
 0x310   : > { %4192 = vst [vmem:[#allocation3 + $0x34] sm:$0xf] %v3897_v42  ;;  %v13977_v54 = vor.u32 %v5569_v62, %v5566_v58  ;;  %v3143_v42 = vadd.f32 %v13867_v9, %v17133_v17  ;;  %v3898_v41 = vrot.slane %v3896_v0, 4  ;;  %v17135_v58 = vrot.slane %v13865_v40, 3  ;;  %v11947_v40 = vld [vmem:[%s17002_s4 + $0xe0] sm:$0xff] }
 0x311   : > { %v3900_v56 = vshrl.u32 %v3753_v43, 16  ;;  %v3903_v7 = vshll.u32 %v3753_v43, 16  ;;  %v3430_v63 = vadd.f32 %v13545_v16, %v3390_v59  ;;  %v17137_v19 = vrot.slane %v13665_v37, 3  ;;  %v17138_v37 = vld [vmem:[#allocation5_spill] sm:$0xff]  ;;  %5375 = vmatpush.bf16.msrb.mxu0 %v11947_v40 }
 0x312   : > { %v13987_v43 = vsel %vm1791_vm5, %v13912_v47, %v13977_v54  ;;  %v13994_v62 = vsel %vm3174_vm7, %v17135_v58, %v6961_v22 }
 0x313   : > { %v3902_v18 = vrot.slane %v3900_v56, 6  ;;  %v3905_v52 = vrot.slane %v3903_v7, 7  ;;  %v3466_v60 = vmax.f32 %v3430_v63, 0.0  ;;  %17134 = vst [vmem:[#allocation4_spill] sm:$0xff] %v13987_v43  ;;  %v3207_v9 = vsel %vm3174_vm7, %v17137_v19, %v3206_v2 }
 0x314   : > { %17136 = vst [vmem:[#allocation40_spill] sm:$0xff] %v13994_v62  ;;  %v2962_v56 = vor.u32 %v2961_v26, %v2958_v20 }
 0x315   : > { %v3906_v27 = vor.u32 %v3905_v52, %v3902_v18  ;;  %v3718_v59 = vmul.f32 %v3593_v21, %v3466_v60  ;;  %v2763_v60 = vadd.f32 %v17138_v37, %v2390_v28 }
 0x316   : > { %v3322_v36 = vpop.f32.mrf.mxu0  ;;  %v2963_v17 = vsel %vm2793_vm6, %v13893_v6, %v2962_v56  ;;  %v17139_v56 = vrot.slane %v13916_v44, 1 }
 0x317   : > { %v3907_v47 = vsel %vm13584_vm13, %v3898_v41, %v3906_v27  ;;  %v3754_v0 = vpack.c.bf16 %v3718_v59, %v3718_v59  ;;  %v3391_v7 = vadd.f32 %v3322_v36, %v3143_v42  ;;  %v14003_v63 = vld [vmem:[#allocation3 + $0x30] sm:$0xff]  ;;  %v14008_v18 = vpop.f32.mrf.mxu3  ;;  %v4429_v42 = vshrl.u32 %v13916_v44, 16 }
 0x318   : > { %4193 = vst [vmem:[#allocation3 + $0x38] sm:$0xf] %v3907_v47  ;;  %v14010_v52 = vld [vmem:[#allocation3 + $0x30] sm:$0xff]  ;;  %4802 = vmatmul.bf16.gmra.mxu2 %v14003_v63  ;;  %v4433_v41 = vshll.u32 %v14003_v63, 16  ;;  %v17027_v59 = vrot.slane %v14003_v63, 1  ;;  %v3144_v28 = vadd.f32 %v13919_v24, %v2763_v60  ;;  %v17140_v44 = vrot.slane %v13927_v55, 2 }
 0x319   : > { %v3910_v21 = vshrl.u32 %v3754_v0, 16  ;;  %v3913_v26 = vshll.u32 %v3754_v0, 16  ;;  %v3431_v20 = vadd.f32 %v13545_v16, %v3391_v7  ;;  %10721 = vmatmul.msk.bf16.gmra.mxu0 %vm860_vm1, %v3207_v9  ;;  %v11946_v16 = vld [vmem:[%s17002_s4 + $0xd8] sm:$0xff]  ;;  %v3598_v9 = vpop.permute.xlu2 %3597  ;;  %v4431_v47 = vor.u32 %v4429_v42, %v13946_v25  ;;  %v12196_v60 = vld [vmem:[#allocation3] sm:$0xf0] }
 0x31a   : > { %v14026_v6 = vrot.slane %v4433_v41, 1  ;;  %v14033_v0 = vsel %vm1170_vm2, %v17139_v56, %v17027_v59  ;;  %v17026_v24 = vrot.slane %v14010_v52, 2  ;;  %v3908_v7 = vrot.slane %v3906_v27, 4  ;;  %5376 = vmatpush.bf16.msrb.mxu0 %v11946_v16 }
 0x31b   : > { %v3912_v58 = vrot.slane %v3910_v21, 6  ;;  %v3915_v36 = vrot.slane %v3913_v26, 7  ;;  %v3467_v19 = vmax.f32 %v3431_v20, 0.0  ;;  %v12197_v21 = vld [vmem:[#allocation3] sm:$0xe]  ;;  %v5573_v25 = vshrl.u32 %v14010_v52, 16 }
 0x31c   : > { %10693 = vmatmul.msk.bf16.gmra.mxu3 %vm860_vm1, %v2963_v17  ;;  %v4436_v20 = vsel %vm699_vm3, %v4431_v47, %v14026_v6  ;;  %v14045_v42 = vsel %vm2172_vm4, %v17140_v44, %v17026_v24  ;;  %v5576_v27 = vshll.u32 %v14010_v52, 16 }
 0x31d   : > { %v3916_v40 = vor.u32 %v3915_v36, %v3912_v58  ;;  %v3719_v37 = vmul.f32 %v3598_v9, %v3467_v19  ;;  %17141 = vst [vmem:[#allocation5_spill] sm:$0xff] %v14045_v42  ;;  %4632 = vmatmul.bf16.gmra.mxu1 %v4436_v20  ;;  %v11945_v36 = vld [vmem:[%s17002_s4 + $0xd0] sm:$0xff]  ;;  %v14053_v19 = vld [vmem:[#allocation3 + $0x30] sm:$0xff]  ;;  %v12198_v9 = vor.u32 %v12197_v21, %v12196_v60  ;;  %v5575_v47 = vrot.slane %v5573_v25, 1  ;;  %v11944_v60 = vld [vmem:[%s17002_s4 + $0xc8] sm:$0xff] }
 0x31e   : > { %v3324_v26 = vpop.f32.mrf.mxu0  ;;  %v5578_v56 = vrot.slane %v5576_v27, 2  ;;  %5377 = vmatpush.bf16.msrb.mxu0 %v11945_v36  ;;  %v6963_v21 = vrot.slane %v14053_v19, 3  ;;  %v2392_v25 = vadd.f32 %v13259_v51, %v13289_v29  ;;  %v3603_v27 = vpop.permute.xlu0 %3602 }
 0x31f   : > { %v3917_v17 = vsel %vm13584_vm13, %v3908_v7, %v3916_v40  ;;  %v3755_v41 = vpack.c.bf16 %v3719_v37, %v3719_v37  ;;  %v3392_v58 = vadd.f32 %v3324_v26, %v3144_v28  ;;  %v14055_v16 = vpop.f32.mrf.mxu3  ;;  %v14060_v7 = vld [vmem:[%s17001_s3] ss:$0 sm:$0xff]  ;;  %v17028_v37 = vrot.slane %v13838_v61, 3 }
 0x320   : > { %4194 = vst [vmem:[#allocation3 + $0x3c] sm:$0xf] %v3917_v17  ;;  %v14064_v26 = vor.u32 %v5578_v56, %v5575_v47 }
 0x321   : > { %v3920_v44 = vshrl.u32 %v3755_v41, 16  ;;  %v3923_v24 = vshll.u32 %v3755_v41, 16  ;;  %v3432_v28 = vadd.f32 %v14060_v7, %v3392_v58  ;;  %v3145_v41 = vadd.f32 %v13973_v12, %v13278_v33 }
 0x322   : > { %v4884_v58 = vrot.slane %v12198_v9, 1  ;;  %v14077_v36 = vsel %vm1791_vm5, %v13977_v54, %v14064_v26  ;;  %v3209_v33 = vsel %vm3174_vm7, %v3206_v2, %v17028_v37  ;;  %5378 = vmatpush.bf16.msrb.mxu0 %v11944_v60  ;;  %v4437_v2 = vshrl.u32 %v14003_v63, 16  ;;  %v11963_v9 = vld [vmem:[%s17002_s4 + $0x160] sm:$0xff] }
 0x323   : > { %v3922_v20 = vrot.slane %v3920_v44, 6  ;;  %v3925_v17 = vrot.slane %v3923_v24, 7  ;;  %v3468_v59 = vmax.f32 %v3432_v28, 0.0  ;;  %17142 = vst [vmem:[#allocation41_spill] sm:$0xff] %v14077_v36  ;;  %v3918_v24 = vrot.slane %v3916_v40, 4  ;;  %v11955_v28 = vld [vmem:[%s17002_s4 + $0x120] sm:$0xff]  ;;  %6026 = vmatpush.bf16.msrb.mxu2 %v11963_v9 }
 0x324   : > { %v14084_v44 = vsel %vm3174_vm7, %v6961_v22, %v6963_v21  ;;  %v2765_v40 = vadd.f32 %v13299_v1, %v2392_v25  ;;  %v17144_v1 = vrot.slane %v13616_v5, 1  ;;  %5767 = vmatpush.bf16.msrb.mxu1 %v11955_v28 }
 0x325   : > { %v3926_v47 = vor.u32 %v3925_v17, %v3922_v20  ;;  %v3720_v56 = vmul.f32 %v3603_v27, %v3468_v59  ;;  %17143 = vst [vmem:[#allocation42_spill] sm:$0xff] %v14084_v44 }
 0x326   : > { %v3327_v51 = vpop.f32.mrf.mxu0  ;;  %v4886_v25 = vsel %vm1170_vm2, %v4884_v58, %v17144_v1  ;;  %v3146_v27 = vadd.f32 %v14008_v18, %v2765_v40  ;;  %5379 = vmatpush.bf16.msrb.mxu0 %v11943_v11  ;;  %v17145_v18 = vrot.slane %v14003_v63, 1  ;;  %v17146_v11 = vrot.slane %v14010_v52, 2 }
 0x327   : > { %v3927_v29 = vsel %vm13584_vm13, %v3918_v24, %v3926_v47  ;;  %v3756_v54 = vpack.c.bf16 %v3720_v56, %v3720_v56  ;;  %v3393_v12 = vadd.f32 %v3327_v51, %v3145_v41  ;;  %v14093_v59 = vld [vmem:[#allocation3 + $0x38] sm:$0xff]  ;;  %v14101_v45 = vpop.f32.mrf.mxu3  ;;  %v4439_v41 = vor.u32 %v4437_v2, %v14026_v6 }
 0x328   : > { %v14098_v22 = vld [vmem:[#allocation3 + $0x38] sm:$0xff]  ;;  %4195 = vst [vmem:[#allocation3 + $0x40] sm:$0xf] %v3927_v29  ;;  %4807 = vmatmul.bf16.gmra.mxu2 %v14093_v59  ;;  %v4441_v24 = vshll.u32 %v14093_v59, 16  ;;  %v4897_v56 = vrot.slane %v14093_v59, 1  ;;  %v3928_v5 = vrot.slane %v3926_v47, 4 }
 0x329   : > { %v3930_v20 = vshrl.u32 %v3756_v54, 16  ;;  %v3933_v17 = vshll.u32 %v3756_v54, 16  ;;  %v3433_v60 = vadd.f32 %v14060_v7, %v3393_v12  ;;  %10722 = vmatmul.msk.bf16.gmra.mxu0 %vm860_vm1, %v3209_v33  ;;  %v5931_v33 = vrot.slane %v14098_v22, 2  ;;  %v3608_v12 = vpop.permute.xlu1 %3607 }
 0x32a   : > { %v4443_v37 = vrot.slane %v4441_v24, 1  ;;  %v14126_v6 = vsel %vm1170_vm2, %v17145_v18, %v4897_v56  ;;  %v5582_v58 = vshrl.u32 %v14098_v22, 16  ;;  %v5585_v47 = vshll.u32 %v14098_v22, 16  ;;  %v14142_v24 = vpop.f32.mrf.mxu2 }
 0x32b   : > { %v3932_v51 = vrot.slane %v3930_v20, 6  ;;  %v3935_v29 = vrot.slane %v3933_v17, 7  ;;  %v3469_v54 = vmax.f32 %v3433_v60, 0.0  ;;  %v14134_v9 = vsel %vm2172_vm4, %v17146_v11, %v5931_v33  ;;  %v14138_v17 = vld [vmem:[#allocation3 + $0x38] sm:$0xff] }
 0x32c   : > { %4995 = vmatmul.bf16.vlgmr.msrb.gmra.mxu3 %v4886_v25  ;;  %17147 = vst [vmem:[#allocation43_spill] sm:$0xff] %v14134_v9  ;;  %v4444_v63 = vsel %vm699_vm3, %v4439_v41, %v4443_v37  ;;  %v5584_v20 = vrot.slane %v5582_v58, 1  ;;  %v3210_v41 = vrot.slane %v13910_v34, 3  ;;  %v17029_v11 = vrot.slane %v14138_v17, 3 }
 0x32d   : > { %v3936_v40 = vor.u32 %v3935_v29, %v3932_v51  ;;  %v3721_v2 = vmul.f32 %v3608_v12, %v3469_v54  ;;  %4637 = vmatmul.bf16.gmra.mxu1 %v4444_v63  ;;  %v5587_v29 = vrot.slane %v5585_v47, 2  ;;  %v3613_v63 = vpop.permute.xlu2 %3612 }
 0x32e   : > { %v3329_v28 = vpop.f32.mrf.mxu0  ;;  %v14163_v34 = vsel %vm3174_vm7, %v6963_v21, %v17029_v11 }
 0x32f   : > { %v3937_v60 = vsel %vm13584_vm13, %v3928_v5, %v3936_v40  ;;  %v3757_v1 = vpack.c.bf16 %v3721_v2, %v3721_v2  ;;  %v3394_v25 = vadd.f32 %v3329_v28, %v3146_v27  ;;  %v14144_v51 = vpop.f32.mrf.mxu3  ;;  %v14148_v58 = vor.u32 %v5587_v29, %v5584_v20  ;;  %17149 = vst [vmem:[#allocation45_spill] sm:$0xff] %v14163_v34 }
 0x330   : > { %4196 = vst [vmem:[#allocation3 + $0x44] sm:$0xf] %v3937_v60  ;;  %v2394_v28 = vadd.f32 %v13309_v4, %v13339_v31  ;;  %v3147_v20 = vadd.f32 %v14055_v16, %v13326_v3  ;;  %v3938_v60 = vrot.slane %v3936_v40, 4  ;;  %v17150_v31 = vrot.slane %v13838_v61, 3 }
 0x331   : > { %v3940_v54 = vshrl.u32 %v3757_v1, 16  ;;  %v3943_v12 = vshll.u32 %v3757_v1, 16  ;;  %v3434_v18 = vadd.f32 %v14060_v7, %v3394_v25  ;;  %v14156_v47 = vsel %vm1791_vm5, %v14064_v26, %v14148_v58 }
 0x332   : > { %17148 = vst [vmem:[#allocation44_spill] sm:$0xff] %v14156_v47  ;;  %v3211_v29 = vsel %vm3174_vm7, %v17150_v31, %v3210_v41  ;;  %v14179_v16 = vpop.f32.mrf.mxu2  ;;  %v4445_v61 = vshrl.u32 %v14093_v59, 16  ;;  %v3618_v31 = vpop.permute.xlu0 %3617 }
 0x333   : > { %v3942_v5 = vrot.slane %v3940_v54, 6  ;;  %v3945_v2 = vrot.slane %v3943_v12, 7  ;;  %v3470_v27 = vmax.f32 %v3434_v18, 0.0  ;;  %v17151_v18 = vld [vmem:[#allocation6_spill] sm:$0xff] }
 0x334   : > { %v2767_v11 = vadd.f32 %v17151_v18, %v2394_v28 }
 0x335   : > { %v3946_v1 = vor.u32 %v3945_v2, %v3942_v5  ;;  %v3722_v25 = vmul.f32 %v3613_v63, %v3470_v27  ;;  %v4447_v27 = vor.u32 %v4445_v61, %v4443_v37 }
 0x336   : > { %v3332_v4 = vpop.f32.mrf.mxu0  ;;  %v3148_v2 = vadd.f32 %v14101_v45, %v2767_v11 }
 0x337   : > { %v3947_v26 = vsel %vm13584_vm13, %v3938_v60, %v3946_v1  ;;  %v3758_v54 = vpack.c.bf16 %v3722_v25, %v3722_v25  ;;  %v3395_v12 = vadd.f32 %v3332_v4, %v3147_v20  ;;  %v14172_v19 = vld [vmem:[#allocation3 + $0x40] sm:$0xff]  ;;  %v14177_v3 = vpop.f32.mrf.mxu3 }
 0x338   : > { %v14174_v21 = vld [vmem:[#allocation3 + $0x40] sm:$0xff]  ;;  %4197 = vst [vmem:[#allocation3 + $0x48] sm:$0xf] %v3947_v26  ;;  %4812 = vmatmul.bf16.gmra.mxu2 %v14172_v19  ;;  %v4449_v28 = vshll.u32 %v14172_v19, 16  ;;  %v17031_v63 = vrot.slane %v14172_v19, 1  ;;  %v3948_v26 = vrot.slane %v3946_v1, 4 }
 0x339   : > { %v3950_v40 = vshrl.u32 %v3758_v54, 16  ;;  %v3953_v41 = vshll.u32 %v3758_v54, 16  ;;  %v3435_v5 = vadd.f32 %v14060_v7, %v3395_v12  ;;  %10723 = vmatmul.msk.bf16.gmra.mxu0 %vm860_vm1, %v3211_v29  ;;  %v17030_v4 = vrot.slane %v14174_v21, 2  ;;  %v14207_v61 = vld [vmem:[#allocation3 + $0x40] sm:$0xff] }
 0x33a   : > { %v4451_v54 = vrot.slane %v4449_v28, 1  ;;  %v14194_v29 = vsel %vm1170_vm2, %v4897_v56, %v17031_v63  ;;  %v5591_v37 = vshrl.u32 %v14174_v21, 16  ;;  %v5594_v12 = vshll.u32 %v14174_v21, 16 }
 0x33b   : > { %v3952_v20 = vrot.slane %v3950_v40, 6  ;;  %v3955_v60 = vrot.slane %v3953_v41, 7  ;;  %v3471_v25 = vmax.f32 %v3435_v5, 0.0  ;;  %v14203_v1 = vsel %vm2172_vm4, %v5931_v33, %v17030_v4 }
 0x33c   : > { %5000 = vmatmul.bf16.gmra.mxu3 %v13692_v46  ;;  %17152 = vst [vmem:[#allocation6_spill] sm:$0xff] %v14203_v1  ;;  %v4452_v59 = vsel %vm699_vm3, %v4447_v27, %v4451_v54  ;;  %v5593_v56 = vrot.slane %v5591_v37, 1  ;;  %v5596_v28 = vrot.slane %v5594_v12, 2  ;;  %v17035_v12 = vrot.slane %v13676_v13, 1 }
 0x33d   : > { %v3956_v45 = vor.u32 %v3955_v60, %v3952_v20  ;;  %v3723_v11 = vmul.f32 %v3618_v31, %v3471_v25  ;;  %4642 = vmatmul.bf16.gmra.mxu1 %v4452_v59  ;;  %v14214_v25 = vpop.f32.mrf.mxu2  ;;  %v17032_v31 = vrot.slane %v14207_v61, 3 }
 0x33e   : > { %v3334_v18 = vpop.f32.mrf.mxu0  ;;  %v14216_v27 = vor.u32 %v5596_v28, %v5593_v56  ;;  %v17154_v56 = vrot.slane %v14138_v17, 3 }
 0x33f   : > { %v3957_v40 = vsel %vm13584_vm13, %v3948_v26, %v3956_v45  ;;  %v3759_v41 = vpack.c.bf16 %v3723_v11, %v3723_v11  ;;  %v3396_v46 = vadd.f32 %v3334_v18, %v3148_v2  ;;  %v14211_v5 = vpop.f32.mrf.mxu3  ;;  %v2396_v2 = vadd.f32 %v13355_v49, %v13373_v23  ;;  %v3623_v11 = vpop.permute.xlu1 %3622 }
 0x340   : > { %4198 = vst [vmem:[#allocation3 + $0x4c] sm:$0xf] %v3957_v40  ;;  %v14221_v18 = vpop.f32.mrf.mxu1  ;;  %v14227_v59 = vsel %vm1791_vm5, %v14148_v58, %v14216_v27  ;;  %v14234_v40 = vsel %vm3174_vm7, %v17154_v56, %v17032_v31  ;;  %v3149_v49 = vadd.f32 %v14144_v51, %v13366_v38  ;;  %v3958_v23 = vrot.slane %v3956_v45, 4  ;;  %v11962_v51 = vld [vmem:[%s17002_s4 + $0x158] sm:$0xff] }
 0x341   : > { %v3960_v33 = vshrl.u32 %v3759_v41, 16  ;;  %v3963_v20 = vshll.u32 %v3759_v41, 16  ;;  %v3436_v60 = vadd.f32 %v14060_v7, %v3396_v46  ;;  %17153 = vst [vmem:[#allocation46_spill] sm:$0xff] %v14227_v59  ;;  %v2769_v56 = vadd.f32 %v13379_v15, %v2396_v2  ;;  %6027 = vmatpush.bf16.msrb.mxu2 %v11962_v51  ;;  %v17183_v59 = vld [vmem:[#allocation15_spill] sm:$0xff] }
 0x342   : > { %17155 = vst [vmem:[#allocation47_spill] sm:$0xff] %v14234_v40 }
 0x343   : > { %v3962_v37 = vrot.slane %v3960_v33, 6  ;;  %v3965_v4 = vrot.slane %v3963_v20, 7  ;;  %v3472_v26 = vmax.f32 %v3436_v60, 0.0  ;;  %v5269_v33 = vrot.slane %v13669_v53, 1 }
 0x344   : > { %v4453_v53 = vshrl.u32 %v14172_v19, 16  ;;  %v3150_v15 = vadd.f32 %v14177_v3, %v2769_v56  ;;  %v17156_v3 = vrot.slane %v14172_v19, 1 }
 0x345   : > { %v3966_v41 = vor.u32 %v3965_v4, %v3962_v37  ;;  %v3724_v46 = vmul.f32 %v3623_v11, %v3472_v26  ;;  %v5271_v38 = vsel %vm1170_vm2, %v5269_v33, %v17035_v12  ;;  %v17160_v12 = vld [vmem:[#allocation8_spill] sm:$0xff] }
 0x346   : > { %v3337_v28 = vpop.f32.mrf.mxu0  ;;  %v4455_v26 = vor.u32 %v4453_v53, %v4451_v54  ;;  %v3151_v40 = vadd.f32 %v14211_v5, %v17160_v12  ;;  %v17162_v5 = vrot.slane %v14207_v61, 3  ;;  %v17165_v61 = vrot.slane %v13676_v13, 1 }
 0x347   : > { %v3967_v58 = vsel %vm13584_vm13, %v3958_v23, %v3966_v41  ;;  %v3760_v20 = vpack.c.bf16 %v3724_v46, %v3724_v46  ;;  %v3397_v60 = vadd.f32 %v3337_v28, %v3149_v49  ;;  %v14241_v63 = vld [vmem:[#allocation3 + $0x48] sm:$0xff]  ;;  %v14246_v31 = vpop.f32.mrf.mxu3  ;;  %v3628_v49 = vpop.permute.xlu2 %3627 }
 0x348   : > { %v14243_v17 = vld [vmem:[#allocation3 + $0x48] sm:$0xff]  ;;  %4199 = vst [vmem:[#allocation3 + $0x50] sm:$0xf] %v3967_v58  ;;  %4817 = vmatmul.bf16.gmra.mxu2 %v14241_v63  ;;  %v4457_v2 = vshll.u32 %v14241_v63, 16  ;;  %v17034_v11 = vrot.slane %v14241_v63, 1  ;;  %v3968_v58 = vrot.slane %v3966_v41, 4 }
 0x349   : > { %v3970_v4 = vshrl.u32 %v3760_v20, 16  ;;  %v3973_v45 = vshll.u32 %v3760_v20, 16  ;;  %v3437_v37 = vadd.f32 %v14060_v7, %v3397_v60  ;;  %5380 = vmatmul.bf16.vlgmr.msrb.gmra.mxu0 %v5271_v38  ;;  %v17033_v33 = vrot.slane %v14243_v17, 2 }
 0x34a   : > { %v4608_v20 = vpop.f32.mrf.mxu1  ;;  %v4459_v38 = vrot.slane %v4457_v2, 1  ;;  %v14268_v54 = vsel %vm1170_vm2, %v17156_v3, %v17034_v11  ;;  %v5600_v56 = vshrl.u32 %v14243_v17, 16  ;;  %v17157_v41 = vrot.slane %v14174_v21, 2 }
 0x34b   : > { %v3972_v23 = vrot.slane %v3970_v4, 6  ;;  %v3975_v46 = vrot.slane %v3973_v45, 7  ;;  %v3473_v28 = vmax.f32 %v3437_v37, 0.0  ;;  %v14261_v60 = vpop.f32.mrf.mxu2  ;;  %v14273_v4 = vadd.f32 %v14179_v16, %v4608_v20  ;;  %v14286_v16 = vld [vmem:[#allocation3 + $0x48] sm:$0xff] }
 0x34c   : > { %5005 = vmatmul.bf16.gmra.mxu3 %v13770_v14  ;;  %v14280_v45 = vsel %vm2172_vm4, %v17157_v41, %v17033_v33  ;;  %v4460_v37 = vsel %vm699_vm3, %v4455_v26, %v4459_v38  ;;  %v5602_v2 = vrot.slane %v5600_v56, 1  ;;  %v5603_v3 = vshll.u32 %v14243_v17, 16  ;;  %v17159_v33 = vld [vmem:[#allocation7_spill] sm:$0xff] }
 0x34d   : > { %v3976_v53 = vor.u32 %v3975_v46, %v3972_v23  ;;  %v3725_v51 = vmul.f32 %v3628_v49, %v3473_v28  ;;  %17158 = vst [vmem:[#allocation48_spill] sm:$0xff] %v14280_v45  ;;  %4647 = vmatmul.bf16.gmra.mxu1 %v4460_v37  ;;  %v11954_v28 = vld [vmem:[%s17002_s4 + $0x118] sm:$0xff]  ;;  %v17037_v11 = vrot.slane %v14286_v16, 3 }
 0x34e   : > { %v3339_v19 = vpop.f32.mrf.mxu0  ;;  %v5605_v20 = vrot.slane %v5603_v3, 2  ;;  %5768 = vmatpush.bf16.msrb.mxu1 %v11954_v28 }
 0x34f   : > { %v3977_v49 = vsel %vm13584_vm13, %v3968_v58, %v3976_v53  ;;  %v3761_v14 = vpack.c.bf16 %v3725_v51, %v3725_v51  ;;  %v3398_v23 = vadd.f32 %v3339_v19, %v3150_v15  ;;  %v14288_v46 = vpop.f32.mrf.mxu3  ;;  %v2398_v58 = vadd.f32 %v17159_v33, %v13398_v39  ;;  %v3633_v51 = vpop.permute.xlu0 %3632 }
 0x350   : > { %4200 = vst [vmem:[#allocation3 + $0x54] sm:$0xf] %v3977_v49  ;;  %v14296_v15 = vor.u32 %v5605_v20, %v5602_v2  ;;  %v3978_v3 = vrot.slane %v3976_v53, 4  ;;  %v14317_v12 = vsel %vm3174_vm7, %v17162_v5, %v17037_v11  ;;  %v3643_v35 = vpop.permute.xlu2 %3642 }
 0x351   : > { %v3980_v26 = vshrl.u32 %v3761_v14, 16  ;;  %v3983_v56 = vshll.u32 %v3761_v14, 16  ;;  %v3438_v41 = vadd.f32 %v14060_v7, %v3398_v23  ;;  %v17036_v23 = vrot.slane %v13752_v32, 1  ;;  %17163 = vst [vmem:[#allocation8_spill] sm:$0xff] %v14317_v12 }
 0x352   : > { %v4610_v34 = vpop.f32.mrf.mxu1  ;;  %v14307_v39 = vsel %vm1791_vm5, %v14216_v27, %v14296_v15 }
 0x353   : > { %v3982_v19 = vrot.slane %v3980_v26, 6  ;;  %v3985_v37 = vrot.slane %v3983_v56, 7  ;;  %v3474_v49 = vmax.f32 %v3438_v41, 0.0  ;;  %v14301_v14 = vpop.f32.mrf.mxu2  ;;  %17161 = vst [vmem:[#allocation7_spill] sm:$0xff] %v14307_v39  ;;  %v14310_v28 = vadd.f32 %v14214_v25, %v4610_v34 }
 0x355   : > { %v3986_v33 = vor.u32 %v3985_v37, %v3982_v19  ;;  %v3726_v2 = vmul.f32 %v3633_v51, %v3474_v49  ;;  %v17164_v51 = vld [vmem:[#allocation9_spill] sm:$0xff]  ;;  %v5273_v19 = vsel %vm1170_vm2, %v17165_v61, %v17036_v23  ;;  %v4461_v37 = vshrl.u32 %v14241_v63, 16 }
 0x356   : > { %v3342_v53 = vpop.f32.mrf.mxu0  ;;  %v2771_v34 = vadd.f32 %v17164_v51, %v2398_v58 }
 0x357   : > { %v3987_v20 = vsel %vm13584_vm13, %v3978_v3, %v3986_v33  ;;  %v3762_v26 = vpack.c.bf16 %v3726_v2, %v3726_v2  ;;  %v3399_v56 = vadd.f32 %v3342_v53, %v3151_v40  ;;  %v14321_v27 = vld [vmem:[#allocation3 + $0x50] sm:$0xff]  ;;  %v14326_v25 = vpop.f32.mrf.mxu3  ;;  %v4463_v2 = vor.u32 %v4461_v37, %v4459_v38 }
 0x358   : > { %v14323_v41 = vld [vmem:[#allocation3 + $0x50] sm:$0xff]  ;;  %4201 = vst [vmem:[#allocation3 + $0x58] sm:$0xf] %v3987_v20  ;;  %4822 = vmatmul.bf16.gmra.mxu2 %v14321_v27  ;;  %v3152_v58 = vadd.f32 %v14246_v31, %v2771_v34  ;;  %v4465_v5 = vshll.u32 %v14321_v27, 16  ;;  %v17038_v53 = vrot.slane %v14321_v27, 1  ;;  %v3638_v20 = vpop.permute.xlu1 %3637  ;;  %v3988_v11 = vrot.slane %v3986_v33, 4 }
 0x359   : > { %v3990_v49 = vshrl.u32 %v3762_v26, 16  ;;  %v3993_v3 = vshll.u32 %v3762_v26, 16  ;;  %v3439_v40 = vadd.f32 %v14060_v7, %v3399_v56  ;;  %5385 = vmatmul.bf16.gmra.mxu0 %v5273_v19  ;;  %v17039_v23 = vrot.slane %v14323_v41, 2 }
 0x35a   : > { %v4613_v26 = vpop.f32.mrf.mxu1  ;;  %v4467_v56 = vrot.slane %v4465_v5, 1  ;;  %v17166_v31 = vrot.slane %v14241_v63, 1  ;;  %v5609_v34 = vshrl.u32 %v14323_v41, 16  ;;  %v17168_v33 = vrot.slane %v14243_v17, 2 }
 0x35b   : > { %v3992_v13 = vrot.slane %v3990_v49, 6  ;;  %v3995_v51 = vrot.slane %v3993_v3, 7  ;;  %v3475_v61 = vmax.f32 %v3439_v40, 0.0  ;;  %v14340_v12 = vpop.f32.mrf.mxu2  ;;  %v17167_v49 = vld [vmem:[#allocation38_spill] sm:$0xff]  ;;  %v14352_v3 = vadd.f32 %v14261_v60, %v4613_v26  ;;  %v14365_v60 = vld [vmem:[#allocation3 + $0x50] sm:$0xff] }
 0x35c   : > { %v14347_v38 = vsel %vm1170_vm2, %v17166_v31, %v17038_v53  ;;  %5010 = vmatmul.bf16.gmra.mxu3 %v17167_v49  ;;  %v14359_v40 = vsel %vm2172_vm4, %v17168_v33, %v17039_v23  ;;  %v4468_v5 = vsel %vm699_vm3, %v4463_v2, %v4467_v56  ;;  %v5611_v31 = vrot.slane %v5609_v34, 1  ;;  %v17170_v2 = vld [vmem:[#allocation12_spill] sm:$0xff]  ;;  %v17171_v34 = vld [vmem:[#allocation10_spill] sm:$0xff] }
 0x35d   : > { %v3996_v19 = vor.u32 %v3995_v51, %v3992_v13  ;;  %v3727_v37 = vmul.f32 %v3638_v20, %v3475_v61  ;;  %17169 = vst [vmem:[#allocation9_spill] sm:$0xff] %v14359_v40  ;;  %v5612_v53 = vshll.u32 %v14323_v41, 16  ;;  %4652 = vmatmul.bf16.gmra.mxu1 %v4468_v5  ;;  %v2400_v44 = vadd.f32 %v17171_v34, %v17170_v2  ;;  %v17172_v5 = vld [vmem:[#allocation11_spill] sm:$0xff] }
 0x35e   : > { %v3344_v63 = vpop.f32.mrf.mxu0 }
 0x35f   : > { %v3997_v20 = vsel %vm13584_vm13, %v3988_v11, %v3996_v19  ;;  %v3763_v13 = vpack.c.bf16 %v3727_v37, %v3727_v37  ;;  %v3400_v51 = vadd.f32 %v3344_v63, %v3152_v58  ;;  %v14367_v61 = vpop.f32.mrf.mxu3  ;;  %v5614_v26 = vrot.slane %v5612_v53, 2 }
 0x360   : > { %4202 = vst [vmem:[#allocation3 + $0x5c] sm:$0xf] %v3997_v20  ;;  %v17041_v63 = vrot.slane %v14365_v60, 3  ;;  %v3153_v20 = vadd.f32 %v14288_v46, %v17172_v5  ;;  %v3998_v39 = vrot.slane %v3996_v19, 4  ;;  %v17174_v46 = vrot.slane %v14286_v16, 3 }
 0x361   : > { %v4000_v49 = vshrl.u32 %v3763_v13, 16  ;;  %v4003_v33 = vshll.u32 %v3763_v13, 16  ;;  %v3440_v23 = vadd.f32 %v14060_v7, %v3400_v51  ;;  %v14372_v62 = vor.u32 %v5614_v26, %v5611_v31 }
 0x362   : > { %v4615_v53 = vpop.f32.mrf.mxu1  ;;  %v17040_v13 = vrot.slane %v13834_v57, 1  ;;  %v14393_v19 = vsel %vm3174_vm7, %v17174_v46, %v17041_v63  ;;  %v17177_v16 = vrot.slane %v13752_v32, 1  ;;  %v4469_v5 = vshrl.u32 %v14321_v27, 16 }
 0x363   : > { %v4002_v11 = vrot.slane %v4000_v49, 6  ;;  %v4005_v37 = vrot.slane %v4003_v33, 7  ;;  %v3476_v58 = vmax.f32 %v3440_v23, 0.0  ;;  %v14377_v40 = vpop.f32.mrf.mxu2  ;;  %v14383_v31 = vsel %vm1791_vm5, %v14296_v15, %v14372_v62  ;;  %17175 = vst [vmem:[#allocation12_spill] sm:$0xff] %v14393_v19 }
 0x364   : > { %17173 = vst [vmem:[#allocation38_spill] sm:$0xff] %v14383_v31  ;;  %v14386_v23 = vadd.f32 %v14301_v14, %v4615_v53 }
 0x365   : > { %v4006_v51 = vor.u32 %v4005_v37, %v4002_v11  ;;  %v3728_v26 = vmul.f32 %v3643_v35, %v3476_v58  ;;  %v17176_v35 = vld [vmem:[#allocation13_spill] sm:$0xff]  ;;  %v5275_v58 = vsel %vm1170_vm2, %v17177_v16, %v17040_v13 }
 0x366   : > { %v3347_v49 = vpop.f32.mrf.mxu0  ;;  %v2773_v14 = vadd.f32 %v17176_v35, %v2400_v44 }
 0x367   : > { %v4007_v33 = vsel %vm13584_vm13, %v3998_v39, %v4006_v51  ;;  %v3764_v2 = vpack.c.bf16 %v3728_v26, %v3728_v26  ;;  %v3401_v34 = vadd.f32 %v3347_v49, %v3153_v20  ;;  %v14397_v15 = vld [vmem:[#allocation3 + $0x58] sm:$0xff]  ;;  %v14402_v37 = vpop.f32.mrf.mxu3  ;;  %v4471_v26 = vor.u32 %v4469_v5, %v4467_v56 }
 0x368   : > { %v14399_v11 = vld [vmem:[#allocation3 + $0x58] sm:$0xff]  ;;  %4203 = vst [vmem:[#allocation3 + $0x60] sm:$0xf] %v4007_v33  ;;  %4827 = vmatmul.bf16.gmra.mxu2 %v14397_v15  ;;  %v3154_v44 = vadd.f32 %v14326_v25, %v2773_v14  ;;  %v4473_v46 = vshll.u32 %v14397_v15, 16  ;;  %v17043_v49 = vrot.slane %v14397_v15, 1  ;;  %v3648_v33 = vpop.permute.xlu0 %3647  ;;  %v4008_v63 = vrot.slane %v4006_v51, 4 }
 0x369   : > { %v4010_v39 = vshrl.u32 %v3764_v2, 16  ;;  %v4013_v53 = vshll.u32 %v3764_v2, 16  ;;  %v3441_v20 = vadd.f32 %v14060_v7, %v3401_v34  ;;  %5390 = vmatmul.bf16.gmra.mxu0 %v5275_v58  ;;  %v17042_v13 = vrot.slane %v14399_v11, 2 }
 0x36a   : > { %v4618_v2 = vpop.f32.mrf.mxu1  ;;  %v4475_v34 = vrot.slane %v4473_v46, 1  ;;  %v17178_v25 = vrot.slane %v14321_v27, 1  ;;  %v5618_v14 = vshrl.u32 %v14399_v11, 16  ;;  %v17179_v51 = vrot.slane %v14323_v41, 2 }
 0x36b   : > { %v4012_v32 = vrot.slane %v4010_v39, 6  ;;  %v4015_v35 = vrot.slane %v4013_v53, 7  ;;  %v3477_v16 = vmax.f32 %v3441_v20, 0.0  ;;  %v14416_v19 = vpop.f32.mrf.mxu2  ;;  %v14428_v39 = vadd.f32 %v14340_v12, %v4618_v2  ;;  %v14441_v12 = vld [vmem:[#allocation3 + $0x58] sm:$0xff] }
 0x36c   : > { %v14423_v56 = vsel %vm1170_vm2, %v17178_v25, %v17043_v49  ;;  %5015 = vmatmul.bf16.gmra.mxu3 %v13953_v10  ;;  %v14435_v53 = vsel %vm2172_vm4, %v17179_v51, %v17042_v13  ;;  %v4476_v20 = vsel %vm699_vm3, %v4471_v26, %v4475_v34  ;;  %v5620_v46 = vrot.slane %v5618_v14, 1  ;;  %v11953_v26 = vld [vmem:[%s17002_s4 + $0x110] sm:$0xff] }
 0x36d   : > { %v4016_v58 = vor.u32 %v4015_v35, %v4012_v32  ;;  %v3729_v5 = vmul.f32 %v3648_v33, %v3477_v16  ;;  %17180 = vst [vmem:[#allocation10_spill] sm:$0xff] %v14435_v53  ;;  %v5621_v25 = vshll.u32 %v14399_v11, 16  ;;  %4657 = vmatmul.bf16.gmra.mxu1 %v4476_v20  ;;  %v11961_v16 = vld [vmem:[%s17002_s4 + $0x150] sm:$0xff]  ;;  %v17045_v53 = vrot.slane %v14441_v12, 3 }
 0x36e   : > { %v3349_v27 = vpop.f32.mrf.mxu0  ;;  %6028 = vmatpush.bf16.msrb.mxu2 %v11961_v16  ;;  %5769 = vmatpush.bf16.msrb.mxu1 %v11953_v26 }
 0x36f   : > { %v4017_v33 = vsel %vm13584_vm13, %v4008_v63, %v4016_v58  ;;  %v3765_v10 = vpack.c.bf16 %v3729_v5, %v3729_v5  ;;  %v3402_v32 = vadd.f32 %v3349_v27, %v3154_v44  ;;  %v14443_v35 = vpop.f32.mrf.mxu3  ;;  %v5623_v2 = vrot.slane %v5621_v25, 2  ;;  %v17181_v44 = vld [vmem:[#allocation16_spill] sm:$0xff]  ;;  %v17182_v5 = vld [vmem:[#allocation14_spill] sm:$0xff] }
 0x370   : > { %4204 = vst [vmem:[#allocation3 + $0x64] sm:$0xf] %v4017_v33  ;;  %v2402_v27 = vadd.f32 %v17182_v5, %v17181_v44  ;;  %v3653_v33 = vpop.permute.xlu1 %3652  ;;  %v3155_v25 = vadd.f32 %v14367_v61, %v17183_v59  ;;  %v4018_v45 = vrot.slane %v4016_v58, 4  ;;  %v17185_v59 = vrot.slane %v14365_v60, 3 }
 0x371   : > { %v4020_v14 = vshrl.u32 %v3765_v10, 16  ;;  %v4023_v51 = vshll.u32 %v3765_v10, 16  ;;  %v3442_v63 = vadd.f32 %v14060_v7, %v3402_v32  ;;  %v14454_v20 = vor.u32 %v5623_v2, %v5620_v46 }
 0x372   : > { %v4620_v10 = vpop.f32.mrf.mxu1  ;;  %v17044_v32 = vrot.slane %v13927_v55, 1  ;;  %v14475_v61 = vsel %vm3174_vm7, %v17185_v59, %v17045_v53  ;;  %v17188_v60 = vrot.slane %v13834_v57, 1  ;;  %v4477_v5 = vshrl.u32 %v14397_v15, 16 }
 0x373   : > { %v4022_v13 = vrot.slane %v4020_v14, 6  ;;  %v4025_v49 = vrot.slane %v4023_v51, 7  ;;  %v3478_v31 = vmax.f32 %v3442_v63, 0.0  ;;  %v14459_v47 = vpop.f32.mrf.mxu2  ;;  %v14465_v46 = vsel %vm1791_vm5, %v14372_v62, %v14454_v20  ;;  %17186 = vst [vmem:[#allocation13_spill] sm:$0xff] %v14475_v61 }
 0x374   : > { %17184 = vst [vmem:[#allocation11_spill] sm:$0xff] %v14465_v46  ;;  %v14468_v2 = vadd.f32 %v14377_v40, %v4620_v10  ;;  %v5277_v44 = vsel %vm1170_vm2, %v17188_v60, %v17044_v32  ;;  %v4479_v10 = vor.u32 %v4477_v5, %v4475_v34  ;;  %v3663_v46 = vpop.permute.xlu0 %3662 }
 0x375   : > { %v4026_v16 = vor.u32 %v4025_v49, %v4022_v13  ;;  %v3730_v26 = vmul.f32 %v3653_v33, %v3478_v31  ;;  %v17187_v31 = vld [vmem:[#allocation17_spill] sm:$0xff] }
 0x376   : > { %v3352_v58 = vpop.f32.mrf.mxu0  ;;  %v2775_v40 = vadd.f32 %v17187_v31, %v2402_v27 }
 0x377   : > { %v4027_v14 = vsel %vm13584_vm13, %v4018_v45, %v4026_v16  ;;  %v3766_v51 = vpack.c.bf16 %v3730_v26, %v3730_v26  ;;  %v3403_v63 = vadd.f32 %v3352_v58, %v3155_v25  ;;  %v14479_v62 = vld [vmem:[#allocation3 + $0x60] sm:$0xff]  ;;  %v14484_v49 = vpop.f32.mrf.mxu3  ;;  %v3658_v58 = vpop.permute.xlu2 %3657  ;;  %v4028_v32 = vrot.slane %v4026_v16, 4 }
 0x378   : > { %v14481_v13 = vld [vmem:[#allocation3 + $0x60] sm:$0xff]  ;;  %4205 = vst [vmem:[#allocation3 + $0x68] sm:$0xf] %v4027_v14  ;;  %4832 = vmatmul.bf16.gmra.mxu2 %v14479_v62  ;;  %v3156_v27 = vadd.f32 %v14402_v37, %v2775_v40  ;;  %v4481_v26 = vshll.u32 %v14479_v62, 16  ;;  %v17047_v59 = vrot.slane %v14479_v62, 1  ;;  %v17189_v37 = vrot.slane %v14397_v15, 1 }
 0x379   : > { %v4030_v45 = vshrl.u32 %v3766_v51, 16  ;;  %v4033_v33 = vshll.u32 %v3766_v51, 16  ;;  %v3443_v25 = vadd.f32 %v14060_v7, %v3403_v63  ;;  %5395 = vmatmul.bf16.gmra.mxu0 %v5277_v44  ;;  %v17046_v60 = vrot.slane %v14481_v13, 2 }
 0x37a   : > { %v4623_v51 = vpop.f32.mrf.mxu1  ;;  %v4483_v63 = vrot.slane %v4481_v26, 1  ;;  %v14505_v34 = vsel %vm1170_vm2, %v17189_v37, %v17047_v59  ;;  %v5627_v40 = vshrl.u32 %v14481_v13, 16  ;;  %v17190_v16 = vrot.slane %v14399_v11, 2 }
 0x37b   : > { %v4032_v57 = vrot.slane %v4030_v45, 6  ;;  %v4035_v14 = vrot.slane %v4033_v33, 7  ;;  %v3479_v31 = vmax.f32 %v3443_v25, 0.0  ;;  %v14498_v53 = vpop.f32.mrf.mxu2  ;;  %v14510_v45 = vadd.f32 %v14416_v19, %v4623_v51  ;;  %v14523_v19 = vld [vmem:[#allocation3 + $0x60] sm:$0xff] }
 0x37c   : > { %5020 = vmatmul.bf16.gmra.mxu3 %v14033_v0  ;;  %v14517_v33 = vsel %vm2172_vm4, %v17190_v16, %v17046_v60  ;;  %v4484_v25 = vsel %vm699_vm3, %v4479_v10, %v4483_v63  ;;  %v5629_v26 = vrot.slane %v5627_v40, 1  ;;  %v5630_v37 = vshll.u32 %v14481_v13, 16  ;;  %v17192_v10 = vld [vmem:[#allocation20_spill] sm:$0xff]  ;;  %v17193_v40 = vld [vmem:[#allocation18_spill] sm:$0xff] }
 0x37d   : > { %v4036_v44 = vor.u32 %v4035_v14, %v4032_v57  ;;  %v3731_v5 = vmul.f32 %v3658_v58, %v3479_v31  ;;  %17191 = vst [vmem:[#allocation16_spill] sm:$0xff] %v14517_v33  ;;  %4662 = vmatmul.bf16.gmra.mxu1 %v4484_v25  ;;  %v2404_v59 = vadd.f32 %v17193_v40, %v17192_v10  ;;  %v17194_v25 = vld [vmem:[#allocation19_spill] sm:$0xff] }
 0x37e   : > { %v3354_v15 = vpop.f32.mrf.mxu0  ;;  %v5632_v31 = vrot.slane %v5630_v37, 2 }
 0x37f   : > { %v4037_v58 = vsel %vm13584_vm13, %v4028_v32, %v4036_v44  ;;  %v3767_v0 = vpack.c.bf16 %v3731_v5, %v3731_v5  ;;  %v3404_v57 = vadd.f32 %v3354_v15, %v3156_v27  ;;  %v14525_v14 = vpop.f32.mrf.mxu3  ;;  %v17049_v15 = vrot.slane %v14523_v19, 3 }
 0x380   : > { %4206 = vst [vmem:[#allocation3 + $0x6c] sm:$0xf] %v4037_v58  ;;  %v14530_v61 = vor.u32 %v5632_v31, %v5629_v26  ;;  %v3157_v58 = vadd.f32 %v14443_v35, %v17194_v25  ;;  %v4038_v33 = vrot.slane %v4036_v44, 4  ;;  %v17196_v35 = vrot.slane %v14441_v12, 3 }
 0x381   : > { %v4040_v51 = vshrl.u32 %v3767_v0, 16  ;;  %v4043_v16 = vshll.u32 %v3767_v0, 16  ;;  %v3444_v60 = vadd.f32 %v14060_v7, %v3404_v57  ;;  %v17048_v0 = vrot.slane %v14010_v52, 1 }
 0x382   : > { %v4625_v37 = vpop.f32.mrf.mxu1  ;;  %v14541_v26 = vsel %vm1791_vm5, %v14454_v20, %v14530_v61  ;;  %v14551_v44 = vsel %vm3174_vm7, %v17196_v35, %v17049_v15  ;;  %v17199_v12 = vrot.slane %v13927_v55, 1  ;;  %v4485_v25 = vshrl.u32 %v14479_v62, 16 }
 0x383   : > { %v4042_v32 = vrot.slane %v4040_v51, 6  ;;  %v4045_v5 = vrot.slane %v4043_v16, 7  ;;  %v3480_v27 = vmax.f32 %v3444_v60, 0.0  ;;  %v14535_v1 = vpop.f32.mrf.mxu2  ;;  %17195 = vst [vmem:[#allocation14_spill] sm:$0xff] %v14541_v26  ;;  %v14544_v60 = vadd.f32 %v14459_v47, %v4625_v37 }
 0x384   : > { %17197 = vst [vmem:[#allocation15_spill] sm:$0xff] %v14551_v44 }
 0x385   : > { %v4046_v57 = vor.u32 %v4045_v5, %v4042_v32  ;;  %v3732_v31 = vmul.f32 %v3663_v46, %v3480_v27  ;;  %v17198_v46 = vld [vmem:[#allocation21_spill] sm:$0xff]  ;;  %v5279_v27 = vsel %vm1170_vm2, %v17199_v12, %v17048_v0 }
 0x386   : > { %v3357_v51 = vpop.f32.mrf.mxu0  ;;  %v2777_v47 = vadd.f32 %v17198_v46, %v2404_v59 }
 0x387   : > { %v4047_v16 = vsel %vm13584_vm13, %v4038_v33, %v4046_v57  ;;  %v3768_v10 = vpack.c.bf16 %v3732_v31, %v3732_v31  ;;  %v3405_v40 = vadd.f32 %v3357_v51, %v3157_v58  ;;  %v14555_v20 = vld [vmem:[#allocation3 + $0x68] sm:$0xff]  ;;  %v14560_v5 = vpop.f32.mrf.mxu3  ;;  %v4487_v31 = vor.u32 %v4485_v25, %v4483_v63 }
 0x388   : > { %v14557_v32 = vld [vmem:[#allocation3 + $0x68] sm:$0xff]  ;;  %4207 = vst [vmem:[#allocation3 + $0x70] sm:$0xf] %v4047_v16  ;;  %4837 = vmatmul.bf16.gmra.mxu2 %v14555_v20  ;;  %v3158_v59 = vadd.f32 %v14484_v49, %v2777_v47  ;;  %v4489_v35 = vshll.u32 %v14555_v20, 16  ;;  %v17051_v51 = vrot.slane %v14555_v20, 1  ;;  %v3668_v16 = vpop.permute.xlu1 %3667  ;;  %v4048_v15 = vrot.slane %v4046_v57, 4 }
 0x389   : > { %v4050_v33 = vshrl.u32 %v3768_v10, 16  ;;  %v4053_v37 = vshll.u32 %v3768_v10, 16  ;;  %v3445_v58 = vadd.f32 %v14060_v7, %v3405_v40  ;;  %5400 = vmatmul.bf16.gmra.mxu0 %v5279_v27  ;;  %v17050_v0 = vrot.slane %v14557_v32, 2 }
 0x38a   : > { %v4628_v10 = vpop.f32.mrf.mxu1  ;;  %v4491_v40 = vrot.slane %v4489_v35, 1  ;;  %v17200_v49 = vrot.slane %v14479_v62, 1  ;;  %v5636_v47 = vshrl.u32 %v14557_v32, 16  ;;  %v17201_v57 = vrot.slane %v14481_v13, 2 }
 0x38b   : > { %v4052_v55 = vrot.slane %v4050_v33, 6  ;;  %v4055_v46 = vrot.slane %v4053_v37, 7  ;;  %v3481_v12 = vmax.f32 %v3445_v58, 0.0  ;;  %v14574_v44 = vpop.f32.mrf.mxu2  ;;  %v14586_v33 = vadd.f32 %v14498_v53, %v4628_v10  ;;  %v14599_v53 = vld [vmem:[#allocation3 + $0x68] sm:$0xff] }
 0x38c   : > { %v14581_v63 = vsel %vm1170_vm2, %v17200_v49, %v17051_v51  ;;  %5025 = vmatmul.bf16.gmra.mxu3 %v14126_v6  ;;  %v14593_v37 = vsel %vm2172_vm4, %v17201_v57, %v17050_v0  ;;  %v4492_v58 = vsel %vm699_vm3, %v4487_v31, %v4491_v40  ;;  %v5638_v35 = vrot.slane %v5636_v47, 1  ;;  %v17203_v0 = vld [vmem:[#allocation24_spill] sm:$0xff]  ;;  %v17204_v51 = vld [vmem:[#allocation22_spill] sm:$0xff] }
 0x38d   : > { %v4056_v27 = vor.u32 %v4055_v46, %v4052_v55  ;;  %v3733_v25 = vmul.f32 %v3668_v16, %v3481_v12  ;;  %17202 = vst [vmem:[#allocation17_spill] sm:$0xff] %v14593_v37  ;;  %v5639_v49 = vshll.u32 %v14557_v32, 16  ;;  %4667 = vmatmul.bf16.gmra.mxu1 %v4492_v58  ;;  %v11960_v12 = vld [vmem:[%s17002_s4 + $0x148] sm:$0xff]  ;;  %v17053_v26 = vrot.slane %v14599_v53, 3 }
 0x38e   : > { %v3359_v62 = vpop.f32.mrf.mxu0  ;;  %6029 = vmatpush.bf16.msrb.mxu2 %v11960_v12  ;;  %v17205_v37 = vld [vmem:[#allocation23_spill] sm:$0xff] }
 0x38f   : > { %v4057_v16 = vsel %vm13584_vm13, %v4048_v15, %v4056_v27  ;;  %v3769_v6 = vpack.c.bf16 %v3733_v25, %v3733_v25  ;;  %v3406_v55 = vadd.f32 %v3359_v62, %v3158_v59  ;;  %v14601_v46 = vpop.f32.mrf.mxu3  ;;  %v5641_v10 = vrot.slane %v5639_v49, 2  ;;  %v3673_v25 = vpop.permute.xlu2 %3672 }
 0x390   : > { %4208 = vst [vmem:[#allocation3 + $0x74] sm:$0xf] %v4057_v16  ;;  %v2406_v15 = vadd.f32 %v17204_v51, %v17203_v0  ;;  %v3159_v36 = vadd.f32 %v14525_v14, %v17205_v37  ;;  %v4058_v49 = vrot.slane %v4056_v27, 4  ;;  %v17207_v14 = vrot.slane %v14523_v19, 3 }
 0x391   : > { %v4060_v31 = vshrl.u32 %v3769_v6, 16  ;;  %v4063_v47 = vshll.u32 %v3769_v6, 16  ;;  %v3446_v57 = vadd.f32 %v14060_v7, %v3406_v55  ;;  %v14609_v59 = vor.u32 %v5641_v10, %v5638_v35 }
 0x392   : > { %v4630_v9 = vpop.f32.mrf.mxu1  ;;  %v17052_v7 = vrot.slane %v14098_v22, 1  ;;  %v14630_v27 = vsel %vm3174_vm7, %v17207_v14, %v17053_v26  ;;  %v17210_v19 = vrot.slane %v14010_v52, 1 }
 0x393   : > { %v4062_v62 = vrot.slane %v4060_v31, 6  ;;  %v4065_v58 = vrot.slane %v4063_v47, 7  ;;  %v3482_v16 = vmax.f32 %v3446_v57, 0.0  ;;  %v14614_v6 = vpop.f32.mrf.mxu2  ;;  %v14620_v0 = vsel %vm1791_vm5, %v14530_v61, %v14609_v59  ;;  %17208 = vst [vmem:[#allocation18_spill] sm:$0xff] %v14630_v27  ;;  %v17209_v57 = vld [vmem:[#allocation25_spill] sm:$0xff] }
 0x394   : > { %17206 = vst [vmem:[#allocation20_spill] sm:$0xff] %v14620_v0  ;;  %v14623_v55 = vadd.f32 %v14535_v1, %v4630_v9  ;;  %v2779_v9 = vadd.f32 %v17209_v57, %v2406_v15  ;;  %v14653_v15 = vld [vmem:[%s17001_s3] ss:$0 sm:$0xff] }
 0x395   : > { %v4066_v51 = vor.u32 %v4065_v58, %v4062_v62  ;;  %v3734_v35 = vmul.f32 %v3673_v25, %v3482_v16  ;;  %v5281_v25 = vsel %vm1170_vm2, %v17210_v19, %v17052_v7  ;;  %v4493_v62 = vshrl.u32 %v14555_v20, 16 }
 0x396   : > { %v3362_v37 = vpop.f32.mrf.mxu0  ;;  %v3160_v52 = vadd.f32 %v14560_v5, %v2779_v9  ;;  %v17211_v5 = vrot.slane %v14555_v20, 1 }
 0x397   : > { %v4067_v12 = vsel %vm13584_vm13, %v4058_v49, %v4066_v51  ;;  %v3770_v10 = vpack.c.bf16 %v3734_v35, %v3734_v35  ;;  %v3407_v31 = vadd.f32 %v3362_v37, %v3159_v36  ;;  %v14634_v61 = vld [vmem:[#allocation3 + $0x70] sm:$0xff]  ;;  %v14639_v1 = vpop.f32.mrf.mxu3  ;;  %v11952_v36 = vld [vmem:[%s17002_s4 + $0x108] sm:$0xff]  ;;  %v4495_v35 = vor.u32 %v4493_v62, %v4491_v40 }
 0x398   : > { %v14636_v47 = vld [vmem:[#allocation3 + $0x70] sm:$0xff]  ;;  %4209 = vst [vmem:[#allocation3 + $0x78] sm:$0xf] %v4067_v12  ;;  %4842 = vmatmul.bf16.gmra.mxu2 %v14634_v61  ;;  %v4497_v14 = vshll.u32 %v14634_v61, 16  ;;  %5770 = vmatpush.bf16.msrb.mxu1 %v11952_v36  ;;  %v17055_v37 = vrot.slane %v14634_v61, 1  ;;  %v3678_v12 = vpop.permute.xlu0 %3677  ;;  %v4068_v26 = vrot.slane %v4066_v51, 4 }
 0x399   : > { %v4070_v58 = vshrl.u32 %v3770_v10, 16  ;;  %v4073_v16 = vshll.u32 %v3770_v10, 16  ;;  %v3447_v49 = vadd.f32 %v14653_v15, %v3407_v31  ;;  %5405 = vmatmul.bf16.gmra.mxu0 %v5281_v25  ;;  %v17054_v7 = vrot.slane %v14636_v47, 2 }
 0x39a   : > { %v4633_v27 = vpop.f32.mrf.mxu1  ;;  %v4499_v25 = vrot.slane %v4497_v14, 1  ;;  %v14668_v40 = vsel %vm1170_vm2, %v17211_v5, %v17055_v37  ;;  %v5645_v9 = vshrl.u32 %v14636_v47, 16  ;;  %v17212_v51 = vrot.slane %v14557_v32, 2 }
 0x39b   : > { %v4072_v10 = vrot.slane %v4070_v58, 6  ;;  %v4075_v57 = vrot.slane %v4073_v16, 7  ;;  %v3483_v19 = vmax.f32 %v3447_v49, 0.0  ;;  %v14661_v31 = vpop.f32.mrf.mxu2  ;;  %v14673_v58 = vadd.f32 %v14574_v44, %v4633_v27  ;;  %v14686_v44 = vld [vmem:[#allocation3 + $0x70] sm:$0xff] }
 0x39c   : > { %5030 = vmatmul.bf16.gmra.mxu3 %v14194_v29  ;;  %v14680_v16 = vsel %vm2172_vm4, %v17212_v51, %v17054_v7  ;;  %v4500_v49 = vsel %vm699_vm3, %v4495_v35, %v4499_v25  ;;  %v5647_v14 = vrot.slane %v5645_v9, 1  ;;  %v5648_v5 = vshll.u32 %v14636_v47, 16  ;;  %v17214_v35 = vld [vmem:[#allocation28_spill] sm:$0xff]  ;;  %v17215_v9 = vld [vmem:[#allocation27_spill] sm:$0xff] }
 0x39d   : > { %v4076_v62 = vor.u32 %v4075_v57, %v4072_v10  ;;  %v3735_v36 = vmul.f32 %v3678_v12, %v3483_v19  ;;  %17213 = vst [vmem:[#allocation19_spill] sm:$0xff] %v14680_v16  ;;  %4672 = vmatmul.bf16.gmra.mxu1 %v4500_v49  ;;  %v2408_v37 = vadd.f32 %v17215_v9, %v17214_v35  ;;  %v3683_v16 = vpop.permute.xlu1 %3682  ;;  %v17216_v49 = vld [vmem:[#allocation26_spill] sm:$0xff] }
 0x39e   : > { %v3364_v20 = vpop.f32.mrf.mxu0  ;;  %v5650_v57 = vrot.slane %v5648_v5, 2 }
 0x39f   : > { %v4077_v12 = vsel %vm13584_vm13, %v4068_v26, %v4076_v62  ;;  %v3771_v29 = vpack.c.bf16 %v3735_v36, %v3735_v36  ;;  %v3408_v10 = vadd.f32 %v3364_v20, %v3160_v52  ;;  %v14688_v27 = vpop.f32.mrf.mxu3  ;;  %v17057_v20 = vrot.slane %v14686_v44, 3 }
 0x3a0   : > { %4210 = vst [vmem:[#allocation3 + $0x7c] sm:$0xf] %v4077_v12  ;;  %v14693_v0 = vor.u32 %v5650_v57, %v5647_v14  ;;  %v3161_v12 = vadd.f32 %v14601_v46, %v17216_v49  ;;  %v4078_v43 = vrot.slane %v4076_v62, 4  ;;  %v17218_v46 = vrot.slane %v14599_v53, 3 }
 0x3a1   : > { %v4080_v19 = vshrl.u32 %v3771_v29, 16  ;;  %v4083_v51 = vshll.u32 %v3771_v29, 16  ;;  %v3448_v7 = vadd.f32 %v14653_v15, %v3408_v10  ;;  %v17056_v29 = vrot.slane %v14174_v21, 1 }
 0x3a2   : > { %v4635_v5 = vpop.f32.mrf.mxu1  ;;  %v14704_v14 = vsel %vm1791_vm5, %v14609_v59, %v14693_v0  ;;  %v14714_v62 = vsel %vm3174_vm7, %v17218_v46, %v17057_v20  ;;  %v17221_v53 = vrot.slane %v14098_v22, 1  ;;  %v4501_v49 = vshrl.u32 %v14634_v61, 16 }
 0x3a3   : > { %v4082_v26 = vrot.slane %v4080_v19, 6  ;;  %v4085_v36 = vrot.slane %v4083_v51, 7  ;;  %v3484_v52 = vmax.f32 %v3448_v7, 0.0  ;;  %v14698_v42 = vpop.f32.mrf.mxu2  ;;  %17217 = vst [vmem:[#allocation21_spill] sm:$0xff] %v14704_v14  ;;  %v14707_v7 = vadd.f32 %v14614_v6, %v4635_v5 }
 0x3a4   : > { %17219 = vst [vmem:[#allocation24_spill] sm:$0xff] %v14714_v62  ;;  %v17060_v14 = vrot.slane %v14243_v17, 1 }
 0x3a5   : > { %v4086_v10 = vor.u32 %v4085_v36, %v4082_v26  ;;  %v3736_v57 = vmul.f32 %v3683_v16, %v3484_v52  ;;  %v17220_v16 = vld [vmem:[#allocation29_spill] sm:$0xff]  ;;  %v5283_v52 = vsel %vm1170_vm2, %v17221_v53, %v17056_v29 }
 0x3a6   : > { %v3367_v19 = vpop.f32.mrf.mxu0  ;;  %v2781_v6 = vadd.f32 %v17220_v16, %v2408_v37 }
 0x3a7   : > { %v4087_v51 = vsel %vm13584_vm13, %v4078_v43, %v4086_v10  ;;  %v3772_v35 = vpack.c.bf16 %v3736_v57, %v3736_v57  ;;  %v3409_v9 = vadd.f32 %v3367_v19, %v3161_v12  ;;  %v14718_v59 = vld [vmem:[#allocation3 + $0x78] sm:$0xff]  ;;  %v14723_v36 = vpop.f32.mrf.mxu3  ;;  %v4503_v57 = vor.u32 %v4501_v49, %v4499_v25 }
 0x3a8   : > { %v14720_v26 = vld [vmem:[#allocation3 + $0x78] sm:$0xff]  ;;  %4211 = vst [vmem:[#allocation3 + $0x80] sm:$0xf] %v4087_v51  ;;  %4847 = vmatmul.bf16.gmra.mxu2 %v14718_v59  ;;  %v3162_v37 = vadd.f32 %v14639_v1, %v2781_v6  ;;  %v4505_v46 = vshll.u32 %v14718_v59, 16  ;;  %v17059_v19 = vrot.slane %v14718_v59, 1  ;;  %v3688_v51 = vpop.permute.xlu2 %3687  ;;  %v4088_v20 = vrot.slane %v4086_v10, 4 }
 0x3a9   : > { %v4090_v43 = vshrl.u32 %v3772_v35, 16  ;;  %v4093_v5 = vshll.u32 %v3772_v35, 16  ;;  %v3449_v12 = vadd.f32 %v14653_v15, %v3409_v9  ;;  %5410 = vmatmul.bf16.gmra.mxu0 %v5283_v52  ;;  %v17058_v29 = vrot.slane %v14720_v26, 2 }
 0x3aa   : > { %v4638_v35 = vpop.f32.mrf.mxu1  ;;  %v14739_v9 = vrot.slane %v4505_v46, 1  ;;  %v17222_v1 = vrot.slane %v14634_v61, 1  ;;  %v5654_v6 = vshrl.u32 %v14720_v26, 16 }
 0x3ab   : > { %v4092_v22 = vrot.slane %v4090_v43, 6  ;;  %v4095_v16 = vrot.slane %v4093_v5, 7  ;;  %v3485_v53 = vmax.f32 %v3449_v12, 0.0  ;;  %v14737_v62 = vpop.f32.mrf.mxu2  ;;  %v14751_v10 = vadd.f32 %v14661_v31, %v4638_v35 }
 0x3ac   : > { %v14746_v25 = vsel %vm1170_vm2, %v17222_v1, %v17059_v19  ;;  %5035 = vmatmul.bf16.gmra.mxu3 %v14268_v54  ;;  %v17223_v43 = vrot.slane %v14636_v47, 2  ;;  %v4508_v12 = vsel %vm699_vm3, %v4503_v57, %v14739_v9  ;;  %v5656_v46 = vrot.slane %v5654_v6, 1  ;;  %v17224_v6 = vld [vmem:[#allocation31_spill] sm:$0xff] }
 0x3ad   : > { %v4096_v52 = vor.u32 %v4095_v16, %v4092_v22  ;;  %v3737_v49 = vmul.f32 %v3688_v51, %v3485_v53  ;;  %v5657_v22 = vshll.u32 %v14720_v26, 16  ;;  %4677 = vmatmul.bf16.gmra.mxu1 %v4508_v12  ;;  %v14765_v16 = vld [vmem:[#allocation3 + $0x78] sm:$0xff]  ;;  %v2410_v19 = vadd.f32 %v14221_v18, %v17224_v6 }
 0x3ae   : > { %v14758_v5 = vsel %vm2172_vm4, %v17223_v43, %v17058_v29  ;;  %v3369_v61 = vpop.f32.mrf.mxu0 }
 0x3af   : > { %v4097_v54 = vsel %vm13584_vm13, %v4088_v20, %v4096_v52  ;;  %v3773_v51 = vpack.c.bf16 %v3737_v49, %v3737_v49  ;;  %v3410_v31 = vadd.f32 %v3369_v61, %v3162_v37  ;;  %v4996_v53 = vpop.f32.mrf.mxu3  ;;  %v5659_v35 = vrot.slane %v5657_v22, 2  ;;  %v11959_v20 = vld [vmem:[%s17002_s4 + $0x140] sm:$0xff]  ;;  %v3693_v61 = vpop.permute.xlu0 %3692 }
 0x3b0   : > { %4212 = vst [vmem:[#allocation3 + $0x84] sm:$0xf] %v4097_v54  ;;  %v14769_v57 = vadd.f32 %v4996_v53, %v14273_v4  ;;  %v11951_v37 = vld [vmem:[%s17002_s4 + $0x100] sm:$0xff]  ;;  %v17063_v4 = vrot.slane %v14765_v16, 3  ;;  %v4098_v18 = vrot.slane %v4096_v52, 4  ;;  %6030 = vmatpush.bf16.msrb.mxu2 %v11959_v20 }
 0x3b1   : > { %v4100_v1 = vshrl.u32 %v3773_v51, 16  ;;  %v4103_v43 = vshll.u32 %v3773_v51, 16  ;;  %v3450_v29 = vadd.f32 %v14653_v15, %v3410_v31  ;;  %v14779_v49 = vor.u32 %v5659_v35, %v5656_v46  ;;  %v17225_v51 = vld [vmem:[#allocation30_spill] sm:$0xff]  ;;  %5771 = vmatpush.bf16.msrb.mxu1 %v11951_v37 }
 0x3b2   : > { %v3163_v31 = vadd.f32 %v14688_v27, %v17225_v51  ;;  %v4640_v53 = vpop.f32.mrf.mxu1  ;;  %v17227_v27 = vrot.slane %v14686_v44, 3  ;;  %v17229_v44 = vrot.slane %v14174_v21, 1 }
 0x3b3   : > { %v4102_v12 = vrot.slane %v4100_v1, 6  ;;  %v4105_v22 = vrot.slane %v4103_v43, 7  ;;  %v3486_v54 = vmax.f32 %v3450_v29, 0.0  ;;  %v14784_v6 = vpop.f32.mrf.mxu2  ;;  %v14790_v46 = vsel %vm1791_vm5, %v14693_v0, %v14779_v49 }
 0x3b4   : > { %17226 = vst [vmem:[#allocation22_spill] sm:$0xff] %v14790_v46  ;;  %v14793_v1 = vadd.f32 %v14698_v42, %v4640_v53  ;;  %v14800_v52 = vsel %vm3174_vm7, %v17227_v27, %v17063_v4  ;;  %v2783_v42 = vadd.f32 %v14142_v24, %v2410_v19  ;;  %v3703_v4 = vpop.permute.xlu2 %3702 }
 0x3b5   : > { %v4106_v35 = vor.u32 %v4105_v22, %v4102_v12  ;;  %v3738_v29 = vmul.f32 %v3693_v61, %v3486_v54  ;;  %17228 = vst [vmem:[#allocation23_spill] sm:$0xff] %v14800_v52  ;;  %v5285_v22 = vsel %vm1170_vm2, %v17229_v44, %v17060_v14  ;;  %v4509_v54 = vshrl.u32 %v14718_v59, 16  ;;  %7059 = vmatpush.bf16.msra.mxu1 %v12007_v8 }
 0x3b6   : > { %v3372_v43 = vpop.f32.mrf.mxu0  ;;  %v3164_v24 = vadd.f32 %v14723_v36, %v2783_v42  ;;  %v17230_v36 = vrot.slane %v14718_v59, 1 }
 0x3b7   : > { %v4107_v20 = vsel %vm13584_vm13, %v4098_v18, %v4106_v35  ;;  %v3774_v37 = vpack.c.bf16 %v3738_v29, %v3738_v29  ;;  %v3411_v51 = vadd.f32 %v3372_v43, %v3163_v31  ;;  %v14804_v0 = vld [vmem:[#allocation3 + $0x80] sm:$0xff]  ;;  %v4998_v61 = vpop.f32.mrf.mxu3  ;;  %v4511_v19 = vor.u32 %v4509_v54, %v14739_v9  ;;  %v3698_v43 = vpop.permute.xlu1 %3697 }
 0x3b8   : > { %v14806_v12 = vld [vmem:[#allocation3 + $0x80] sm:$0xff]  ;;  %4213 = vst [vmem:[#allocation3 + $0x88] sm:$0xf] %v4107_v20  ;;  %v14817_v29 = vadd.f32 %v4998_v61, %v14310_v28  ;;  %4852 = vmatmul.bf16.gmra.mxu2 %v14804_v0  ;;  %v4513_v21 = vshll.u32 %v14804_v0, 16  ;;  %v17061_v27 = vrot.slane %v14804_v0, 1  ;;  %v4108_v14 = vrot.slane %v4106_v35, 4 }
 0x3b9   : > { %v4110_v53 = vshrl.u32 %v3774_v37, 16  ;;  %v4113_v18 = vshll.u32 %v3774_v37, 16  ;;  %v3451_v31 = vadd.f32 %v14653_v15, %v3411_v51  ;;  %5415 = vmatmul.bf16.gmra.mxu0 %v5285_v22  ;;  %v17062_v51 = vrot.slane %v14806_v12, 2 }
 0x3ba   : > { %v4643_v28 = vpop.f32.mrf.mxu1  ;;  %v4515_v22 = vrot.slane %v4513_v21, 1  ;;  %v14832_v9 = vsel %vm1170_vm2, %v17230_v36, %v17061_v27  ;;  %v5663_v42 = vshrl.u32 %v14806_v12, 16  ;;  %v17231_v35 = vrot.slane %v14720_v26, 2 }
 0x3bb   : > { %v4112_v20 = vrot.slane %v4110_v53, 6  ;;  %v4115_v44 = vrot.slane %v4113_v18, 7  ;;  %v3487_v37 = vmax.f32 %v3451_v31, 0.0  ;;  %v14825_v61 = vpop.f32.mrf.mxu2  ;;  %v14837_v18 = vadd.f32 %v14737_v62, %v4643_v28  ;;  %v14850_v62 = vld [vmem:[#allocation3 + $0x80] sm:$0xff] }
 0x3bc   : > { %5040 = vmatmul.bf16.gmra.mxu3 %v14347_v38  ;;  %v14844_v31 = vsel %vm2172_vm4, %v17231_v35, %v17062_v51  ;;  %v4516_v21 = vsel %vm699_vm3, %v4511_v19, %v4515_v22  ;;  %v5665_v36 = vrot.slane %v5663_v42, 1  ;;  %v5666_v27 = vshll.u32 %v14806_v12, 16 }
 0x3bd   : > { %v4116_v54 = vor.u32 %v4115_v44, %v4112_v20  ;;  %v3739_v53 = vmul.f32 %v3698_v43, %v3487_v37  ;;  %4682 = vmatmul.bf16.gmra.mxu1 %v4516_v21 }
 0x3be   : > { %v3374_v59 = vpop.f32.mrf.mxu0  ;;  %v5668_v37 = vrot.slane %v5666_v27, 2  ;;  %v17064_v27 = vrot.slane %v14323_v41, 1 }
 0x3bf   : > { %v4117_v43 = vsel %vm13584_vm13, %v4108_v14, %v4116_v54  ;;  %v3775_v38 = vpack.c.bf16 %v3739_v53, %v3739_v53  ;;  %v3412_v20 = vadd.f32 %v3374_v59, %v3164_v24  ;;  %v5001_v44 = vpop.f32.mrf.mxu3  ;;  %v17066_v24 = vrot.slane %v14850_v62, 3 }
 0x3c0   : > { %4214 = vst [vmem:[#allocation3 + $0x8c] sm:$0xf] %v4117_v43  ;;  %v14854_v19 = vadd.f32 %v5001_v44, %v14352_v3  ;;  %v14856_v42 = vor.u32 %v5668_v37, %v5665_v36  ;;  %v4118_v59 = vrot.slane %v4116_v54, 4  ;;  %v17233_v54 = vrot.slane %v14765_v16, 3 }
 0x3c1   : > { %v4120_v28 = vshrl.u32 %v3775_v38, 16  ;;  %v4123_v35 = vshll.u32 %v3775_v38, 16  ;;  %v3452_v51 = vadd.f32 %v14653_v15, %v3412_v20  ;;  %v17235_v16 = vrot.slane %v14243_v17, 1 }
 0x3c2   : > { %v4645_v21 = vpop.f32.mrf.mxu1  ;;  %v14865_v15 = vsel %vm1791_vm5, %v14779_v49, %v14856_v42  ;;  %v14878_v20 = vsel %vm3174_vm7, %v17233_v54, %v17066_v24 }
 0x3c3   : > { %v4122_v52 = vrot.slane %v4120_v28, 6  ;;  %v4125_v14 = vrot.slane %v4123_v35, 7  ;;  %v3488_v53 = vmax.f32 %v3452_v51, 0.0  ;;  %v14859_v43 = vpop.f32.mrf.mxu2  ;;  %17232 = vst [vmem:[#allocation25_spill] sm:$0xff] %v14865_v15  ;;  %v14868_v38 = vadd.f32 %v14784_v6, %v4645_v21  ;;  %v11991_v51 = vld [vmem:[%s17002_s4 + $0x1b8] sm:$0xff] }
 0x3c4   : > { %17234 = vst [vmem:[#allocation28_spill] sm:$0xff] %v14878_v20  ;;  %6408 = vmatpush.bf16.msra.mxu3 %v11991_v51  ;;  %v5287_v35 = vsel %vm1170_vm2, %v17235_v16, %v17064_v27 }
 0x3c5   : > { %v4126_v3 = vor.u32 %v4125_v14, %v4122_v52  ;;  %v3740_v36 = vmul.f32 %v3703_v4, %v3488_v53  ;;  %v4517_v14 = vshrl.u32 %v14804_v0, 16 }
 0x3c6   : > { %v5381_v44 = vpop.f32.mrf.mxu0 }
 0x3c7   : > { %v4127_v49 = vsel %vm13584_vm13, %v4118_v59, %v4126_v3  ;;  %v3776_v52 = vpack.c.bf16 %v3740_v36, %v3740_v36  ;;  %v14883_v4 = vadd.f32 %v5381_v44, %v14769_v57  ;;  %v14885_v6 = vld [vmem:[#allocation3 + $0x88] sm:$0xff]  ;;  %v5003_v28 = vpop.f32.mrf.mxu3  ;;  %v4519_v36 = vor.u32 %v4517_v14, %v4515_v22 }
 0x3c8   : > { %v14887_v37 = vld [vmem:[#allocation3 + $0x88] sm:$0xff]  ;;  %4215 = vst [vmem:[#allocation3 + $0x90] sm:$0xf] %v4127_v49  ;;  %v14896_v57 = vadd.f32 %v5003_v28, %v14386_v23  ;;  %4857 = vmatmul.bf16.gmra.mxu2 %v14885_v6  ;;  %v4521_v21 = vshll.u32 %v14885_v6, 16  ;;  %v4917_v51 = vrot.slane %v14885_v6, 1  ;;  %v17236_v28 = vrot.slane %v14804_v0, 1 }
 0x3c9   : > { %v4130_v53 = vshrl.u32 %v3776_v52, 16  ;;  %v4133_v59 = vshll.u32 %v3776_v52, 16  ;;  %5420 = vmatmul.bf16.gmra.mxu0 %v5287_v35  ;;  %v17065_v17 = vrot.slane %v14887_v37, 2  ;;  %v5672_v52 = vshrl.u32 %v14887_v37, 16 }
 0x3ca   : > { %v14902_v49 = vrot.slane %v4521_v21, 1  ;;  %v4648_v16 = vpop.f32.mrf.mxu1  ;;  %v14910_v35 = vsel %vm1170_vm2, %v17236_v28, %v4917_v51  ;;  %v17237_v22 = vrot.slane %v14806_v12, 2  ;;  %v12028_v28 = vld [vmem:[%s17004_s6 + $0x18] sm:$0xff] }
 0x3cb   : > { %v4132_v54 = vrot.slane %v4130_v53, 6  ;;  %v4135_v44 = vrot.slane %v4133_v59, 7  ;;  %v14905_v23 = vpop.f32.mrf.mxu2  ;;  %v5675_v53 = vshll.u32 %v14887_v37, 16  ;;  %v4128_v59 = vrot.slane %v4126_v3, 4  ;;  %7593 = vmatpush.bf16.msra.mxu2 %v12028_v28 }
 0x3cc   : > { %v14917_v14 = vsel %vm2172_vm4, %v17237_v22, %v17065_v17  ;;  %5045 = vmatmul.bf16.gmra.mxu3 %v14423_v56  ;;  %v14922_v27 = vadd.f32 %v14825_v61, %v4648_v16  ;;  %v4524_v0 = vsel %vm699_vm3, %v4519_v36, %v14902_v49  ;;  %v11999_v22 = vld [vmem:[%s17002_s4 + $0x1f8] sm:$0xff]  ;;  %v4219_v56 = vld [vmem:[#allocation3 + $0x98] sm:$0x3]  ;;  %v14938_v16 = vld [vmem:[#allocation3 + $0x88] sm:$0xff]  ;;  %v5288_v28 = vrot.slane %v14399_v11, 1 }
 0x3cd   : > { %17238 = vst [vmem:[#allocation27_spill] sm:$0xff] %v14917_v14  ;;  %v4136_v21 = vor.u32 %v4135_v44, %v4132_v54  ;;  %v5674_v54 = vrot.slane %v5672_v52, 1  ;;  %v5677_v44 = vrot.slane %v5675_v53, 2  ;;  %4687 = vmatmul.bf16.gmra.mxu1 %v4524_v0  ;;  %6800 = vmatpush.bf16.msra.mxu0 %v11999_v22  ;;  %v6543_v11 = vld [vmem:[#allocation3 + $0xa0] sm:$0x7] }
 0x3ce   : > { %v5383_v61 = vpop.f32.mrf.mxu0 }
 0x3cf   : > { %v4137_v36 = vsel %vm13584_vm13, %v4128_v59, %v4136_v21  ;;  %v4138_v17 = vrot.slane %v4136_v21, 4  ;;  %v14943_v24 = vadd.f32 %v5383_v61, %v14817_v29  ;;  %v4274_v20 = vld [vmem:[#allocation3 + $0x90] sm:$0x1]  ;;  %v5006_v15 = vpop.f32.mrf.mxu3  ;;  %v5678_v46 = vor.u32 %v5677_v44, %v5674_v54 }
 0x3d0   : > { %4216 = vst [vmem:[#allocation3 + $0x94] sm:$0xf] %v4137_v36  ;;  %v4365_v14 = vunpack.c.l.b16 %v4274_v20  ;;  %v5090_v53 = vadd.f32 %v5006_v15, %v14428_v39  ;;  %v6985_v21 = vrot.slane %v14938_v16, 3  ;;  %v17241_v39 = vrot.slane %v14850_v62, 3 }
 0x3d1   : > { %v4220_v52 = vsel %vm14934_vm15, %v4138_v17, %v4219_v56  ;;  %v14953_v59 = vsel %vm1791_vm5, %v14856_v42, %v5678_v46  ;;  %v17243_v62 = vrot.slane %v14323_v41, 1  ;;  %v4525_v36 = vshrl.u32 %v14885_v6, 16 }
 0x3d2   : > { %4221 = vst [vmem:[#allocation3 + $0x98] sm:$0x3] %v4220_v52  ;;  %v4384_v29 = vpack.c.b16 %v4365_v14, %v4365_v14  ;;  %v4650_v20 = vpop.f32.mrf.mxu1  ;;  %v14960_v15 = vsel %vm3174_vm7, %v17241_v39, %v6985_v21  ;;  %v17245_v41 = vrot.slane %v14887_v37, 2 }
 0x3d3   : > { %v4820_v0 = vpop.f32.mrf.mxu2  ;;  %17242 = vst [vmem:[#allocation26_spill] sm:$0xff] %v14960_v15  ;;  %v14963_v22 = vadd.f32 %v14859_v43, %v4650_v20  ;;  %v5289_v44 = vsel %vm1170_vm2, %v17243_v62, %v5288_v28  ;;  %v17244_v43 = vld [vmem:[#allocation32_spill] sm:$0xff]  ;;  %v4527_v39 = vor.u32 %v4525_v36, %v14902_v49 }
 0x3d4   : > { %v4919_v17 = vrot.slane %v4384_v29, 1  ;;  %v4529_v3 = vshll.u32 %v4384_v29, 16  ;;  %v6562_v29 = vunpack.c.l.b16 %v6543_v11 }
 0x3d6   : > { %v5386_v14 = vpop.f32.mrf.mxu0  ;;  %v14966_v42 = vsel %vm1170_vm2, %v4917_v51, %v4919_v17  ;;  %v4531_v52 = vrot.slane %v4529_v3, 1 }
 0x3d7   : > { %v14969_v56 = vadd.f32 %v5386_v14, %v14854_v19  ;;  %v14971_v61 = vld [vmem:[#allocation3 + $0x90] sm:$0xff]  ;;  %v5008_v54 = vpop.f32.mrf.mxu3 }
 0x3d8   : > { %v5091_v16 = vadd.f32 %v5008_v54, %v14468_v2  ;;  %6031 = vmatmul.bf16.vlgmr.msrb.gmra.mxu2 %v17244_v43  ;;  %v17067_v51 = vrot.slane %v14971_v61, 2  ;;  %v5681_v19 = vshrl.u32 %v14971_v61, 16  ;;  %v5684_v8 = vshll.u32 %v14971_v61, 16 }
 0x3d9   : > { %5425 = vmatmul.bf16.gmra.mxu0 %v5289_v44  ;;  %v4532_v11 = vsel %vm699_vm3, %v4527_v39, %v4531_v52  ;;  %v11982_v44 = vld [vmem:[#allocation3 + $0x90] sm:$0xff]  ;;  %v14997_v43 = vpack.c.b16 %v6562_v29, %v6562_v29  ;;  %v11983_v49 = vld [vmem:[#allocation3 + $0x98] sm:$0xff]  ;;  %v5290_v29 = vrot.slane %v14481_v13, 1  ;;  %v17251_v13 = vld [vmem:[#allocation35_spill] sm:$0xff] }
 0x3da   : > { %v14987_v20 = vsel %vm2172_vm4, %v17245_v41, %v17067_v51  ;;  %v4653_v2 = vpop.f32.mrf.mxu1  ;;  %v5683_v6 = vrot.slane %v5681_v19, 1  ;;  %v5686_v14 = vrot.slane %v5684_v8, 2  ;;  %v6987_v19 = vrot.slane %v11982_v44, 3  ;;  %v17262_v51 = vld [vmem:[#allocation48_spill] sm:$0xff] }
 0x3db   : > { %v4823_v17 = vpop.f32.mrf.mxu2  ;;  %v14992_v3 = vadd.f32 %v14905_v23, %v4653_v2  ;;  %17247 = vst [vmem:[#allocation31_spill] sm:$0xff] %v14997_v43  ;;  %v6991_v52 = vrot.slane %v14997_v43, 3  ;;  %v6989_v8 = vrot.slane %v11983_v49, 3  ;;  %v5291_v44 = vsel %vm1170_vm2, %v5288_v28, %v5290_v29  ;;  %v17252_v28 = vld [vmem:[#allocation34_spill] sm:$0xff] }
 0x3dc   : > { %5050 = vmatmul.bf16.gmra.mxu3 %v14505_v34  ;;  %v14995_v62 = vor.u32 %v5686_v14, %v5683_v6 }
 0x3dd   : > { %4692 = vmatmul.bf16.gmra.mxu1 %v4532_v11  ;;  %v15015_v14 = vsel %vm3174_vm7, %v6987_v19, %v6989_v8 }
 0x3de   : > { %v5388_v54 = vpop.f32.mrf.mxu0  ;;  %17246 = vst [vmem:[#allocation29_spill] sm:$0xff] %v14995_v62  ;;  %v15004_v34 = vsel %vm1791_vm5, %v5678_v46, %v14995_v62 }
 0x3df   : > { %v15000_v41 = vadd.f32 %v5388_v54, %v14896_v57  ;;  %v5011_v36 = vpop.f32.mrf.mxu3  ;;  %v15010_v57 = vsel %vm3174_vm7, %v6985_v21, %v6987_v19  ;;  %17249 = vst [vmem:[#allocation32_spill] sm:$0xff] %v15015_v14  ;;  %v15018_v54 = vsel %vm3174_vm7, %v6989_v8, %v6991_v52  ;;  %v11990_v21 = vld [vmem:[%s17002_s4 + $0x1b0] sm:$0xff] }
 0x3e0   : > { %v5092_v23 = vadd.f32 %v5011_v36, %v14510_v45  ;;  %17248 = vst [vmem:[#allocation30_spill] sm:$0xff] %v15010_v57  ;;  %6409 = vmatpush.bf16.msra.mxu3 %v11990_v21 }
 0x3e1   : > { %17250 = vst [vmem:[#allocation49_spill] sm:$0xff] %v15018_v54 }
 0x3e2   : > { %v4655_v2 = vpop.f32.mrf.mxu1 }
 0x3e3   : > { %v4825_v39 = vpop.f32.mrf.mxu2  ;;  %v15012_v6 = vadd.f32 %v4820_v0, %v4655_v2  ;;  %v11998_v2 = vld [vmem:[%s17002_s4 + $0x1f0] sm:$0xff] }
 0x3e4   : > { %6801 = vmatpush.bf16.msra.mxu0 %v11998_v2  ;;  %v17253_v2 = vld [vmem:[#allocation36_spill] sm:$0xff] }
 0x3e6   : > { %v5391_v46 = vpop.f32.mrf.mxu0 }
 0x3e7   : > { %v15020_v45 = vadd.f32 %v5391_v46, %v5090_v53  ;;  %v5013_v11 = vpop.f32.mrf.mxu3  ;;  %v12006_v46 = vld [vmem:[%s17002_s4 + $0x230] sm:$0xff] }
 0x3e8   : > { %v5093_v49 = vadd.f32 %v5013_v11, %v14544_v60  ;;  %6036 = vmatmul.bf16.gmra.mxu2 %v17251_v13  ;;  %7060 = vmatpush.bf16.msra.mxu1 %v12006_v46 }
 0x3e9   : > { %5430 = vmatmul.bf16.gmra.mxu0 %v5291_v44 }
 0x3ea   : > { %v4658_v0 = vpop.f32.mrf.mxu1 }
 0x3eb   : > { %v4828_v36 = vpop.f32.mrf.mxu2  ;;  %v15029_v19 = vadd.f32 %v4823_v17, %v4658_v0 }
 0x3ec   : > { %5055 = vmatmul.bf16.gmra.mxu3 %v14581_v63 }
 0x3ed   : > { %5772 = vmatmul.bf16.vlgmr.msrb.gmra.mxu1 %v17252_v28 }
 0x3ee   : > { %v5393_v53 = vpop.f32.mrf.mxu0 }
 0x3ef   : > { %v15031_v52 = vadd.f32 %v5393_v53, %v5091_v16  ;;  %v5016_v60 = vpop.f32.mrf.mxu3  ;;  %v5292_v16 = vrot.slane %v14557_v32, 1 }
 0x3f0   : > { %v5094_v8 = vadd.f32 %v5016_v60, %v14586_v33 }
 0x3f1   : > { %v5293_v21 = vsel %vm1170_vm2, %v5290_v29, %v5292_v16 }
 0x3f2   : > { %v4660_v63 = vpop.f32.mrf.mxu1 }
 0x3f3   : > { %v4830_v17 = vpop.f32.mrf.mxu2  ;;  %v15042_v11 = vadd.f32 %v4825_v39, %v4660_v63 }
 0x3f6   : > { %v5396_v44 = vpop.f32.mrf.mxu0 }
 0x3f7   : > { %v15044_v13 = vadd.f32 %v5396_v44, %v5092_v23  ;;  %v5018_v33 = vpop.f32.mrf.mxu3 }
 0x3f8   : > { %v5095_v0 = vadd.f32 %v5018_v33, %v14623_v55  ;;  %6041 = vmatmul.bf16.gmra.mxu2 %v13883_v50  ;;  %v5294_v55 = vrot.slane %v14636_v47, 1  ;;  %v11989_v47 = vld [vmem:[%s17002_s4 + $0x1a8] sm:$0xff] }
 0x3f9   : > { %5435 = vmatmul.bf16.gmra.mxu0 %v5293_v21  ;;  %6410 = vmatpush.bf16.msra.mxu3 %v11989_v47  ;;  %v17255_v47 = vld [vmem:[#allocation4_spill] sm:$0xff] }
 0x3fa   : > { %v4663_v53 = vpop.f32.mrf.mxu1 }
 0x3fb   : > { %v4833_v28 = vpop.f32.mrf.mxu2  ;;  %v15050_v60 = vadd.f32 %v4828_v36, %v4663_v53  ;;  %v5295_v36 = vsel %vm1170_vm2, %v5292_v16, %v5294_v55 }
 0x3fc   : > { %5060 = vmatmul.bf16.gmra.mxu3 %v14668_v40 }
 0x3fd   : > { %5777 = vmatmul.bf16.gmra.mxu1 %v17253_v2  ;;  %v5296_v2 = vrot.slane %v14720_v26, 1  ;;  %v12005_v26 = vld [vmem:[%s17002_s4 + $0x228] sm:$0xff] }
 0x3fe   : > { %v5398_v32 = vpop.f32.mrf.mxu0  ;;  %7061 = vmatpush.bf16.msra.mxu1 %v12005_v26 }
 0x3ff   : > { %v15052_v39 = vadd.f32 %v5398_v32, %v5093_v49  ;;  %v5021_v23 = vpop.f32.mrf.mxu3 }
 0x400   : > { %v5096_v46 = vadd.f32 %v5021_v23, %v14673_v58 }
 0x402   : > { %v4665_v29 = vpop.f32.mrf.mxu1 }
 0x403   : > { %v4835_v63 = vpop.f32.mrf.mxu2  ;;  %v15057_v44 = vadd.f32 %v4830_v17, %v4665_v29 }
 0x406   : > { %v5401_v50 = vpop.f32.mrf.mxu0 }
 0x407   : > { %v15059_v33 = vadd.f32 %v5401_v50, %v5094_v8  ;;  %v5023_v40 = vpop.f32.mrf.mxu3 }
 0x408   : > { %v5097_v49 = vadd.f32 %v5023_v40, %v14707_v7  ;;  %6046 = vmatmul.bf16.gmra.mxu2 %v13966_v48 }
 0x409   : > { %5440 = vmatmul.bf16.gmra.mxu0 %v5295_v36 }
 0x40a   : > { %v4668_v21 = vpop.f32.mrf.mxu1 }
 0x40b   : > { %v4838_v53 = vpop.f32.mrf.mxu2  ;;  %v15065_v58 = vadd.f32 %v4833_v28, %v4668_v21  ;;  %v11997_v28 = vld [vmem:[%s17002_s4 + $0x1e8] sm:$0xff] }
 0x40c   : > { %5065 = vmatmul.bf16.gmra.mxu3 %v14746_v25  ;;  %6802 = vmatpush.bf16.msra.mxu0 %v11997_v28  ;;  %v5298_v28 = vrot.slane %v14806_v12, 1  ;;  %v11984_v12 = vld [vmem:[%s17002_s4 + $0x180] sm:$0xff] }
 0x40d   : > { %5782 = vmatmul.bf16.gmra.mxu1 %v13932_v30  ;;  %v5297_v30 = vsel %vm1170_vm2, %v5294_v55, %v5296_v2 }
 0x40e   : > { %v5403_v8 = vpop.f32.mrf.mxu0 }
 0x40f   : > { %v15070_v17 = vadd.f32 %v5403_v8, %v5095_v0  ;;  %v5026_v7 = vpop.f32.mrf.mxu3 }
 0x410   : > { %v5098_v16 = vadd.f32 %v5026_v7, %v14751_v10  ;;  %v17254_v10 = vld [vmem:[#allocation5_spill] sm:$0xff] }
 0x412   : > { %v4670_v48 = vpop.f32.mrf.mxu1 }
 0x413   : > { %v4840_v32 = vpop.f32.mrf.mxu2  ;;  %v15075_v25 = vadd.f32 %v4835_v63, %v4670_v48  ;;  %v11988_v63 = vld [vmem:[%s17002_s4 + $0x1a0] sm:$0xff]  ;;  %v11986_v48 = vld [vmem:[%s17002_s4 + $0x190] sm:$0xff] }
 0x414   : > { %6411 = vmatpush.bf16.msra.mxu3 %v11988_v63  ;;  %v17256_v63 = vld [vmem:[#allocation43_spill] sm:$0xff] }
 0x416   : > { %v5406_v23 = vpop.f32.mrf.mxu0 }
 0x417   : > { %v15080_v29 = vadd.f32 %v5406_v23, %v5096_v46  ;;  %v5028_v0 = vpop.f32.mrf.mxu3 }
 0x418   : > { %v5099_v50 = vadd.f32 %v5028_v0, %v14793_v1  ;;  %6051 = vmatmul.bf16.gmra.mxu2 %v17254_v10  ;;  %v11987_v1 = vld [vmem:[%s17002_s4 + $0x198] sm:$0xff]  ;;  %v5299_v10 = vsel %vm1170_vm2, %v5296_v2, %v5298_v28 }
 0x419   : > { %5445 = vmatmul.bf16.gmra.mxu0 %v5297_v30  ;;  %6412 = vmatpush.bf16.msra.mxu3 %v11987_v1  ;;  %v17257_v2 = vld [vmem:[#allocation41_spill] sm:$0xff] }
 0x41a   : > { %v4673_v46 = vpop.f32.mrf.mxu1 }
 0x41b   : > { %v4843_v40 = vpop.f32.mrf.mxu2  ;;  %v15092_v55 = vadd.f32 %v4838_v53, %v4673_v46 }
 0x41c   : > { %5070 = vmatmul.bf16.gmra.mxu3 %v14832_v9 }
 0x41d   : > { %5787 = vmatmul.bf16.gmra.mxu1 %v17255_v47  ;;  %6413 = vmatpush.bf16.msra.mxu3 %v11986_v48 }
 0x41e   : > { %v5408_v36 = vpop.f32.mrf.mxu0 }
 0x41f   : > { %v15097_v21 = vadd.f32 %v5408_v36, %v5097_v49  ;;  %v5031_v8 = vpop.f32.mrf.mxu3  ;;  %v11985_v49 = vld [vmem:[%s17002_s4 + $0x188] sm:$0xff] }
 0x420   : > { %v5100_v7 = vadd.f32 %v5031_v8, %v14837_v18 }
 0x421   : > { %6414 = vmatpush.bf16.msra.mxu3 %v11985_v49 }
 0x422   : > { %v4675_v9 = vpop.f32.mrf.mxu1 }
 0x423   : > { %v4845_v53 = vpop.f32.mrf.mxu2  ;;  %v15105_v23 = vadd.f32 %v4840_v32, %v4675_v9  ;;  %v5300_v9 = vrot.slane %v14887_v37, 1  ;;  %v11995_v37 = vld [vmem:[%s17002_s4 + $0x1d8] sm:$0xff] }
 0x425   : > { %6415 = vmatpush.bf16.msra.mxu3 %v11984_v12 }
 0x426   : > { %v5411_v0 = vpop.f32.mrf.mxu0 }
 0x427   : > { %v15110_v30 = vadd.f32 %v5411_v0, %v5098_v16  ;;  %v5033_v18 = vpop.f32.mrf.mxu3 }
 0x428   : > { %v5101_v26 = vadd.f32 %v5033_v18, %v14868_v38  ;;  %6056 = vmatmul.bf16.gmra.mxu2 %v17256_v63 }
 0x429   : > { %5450 = vmatmul.bf16.gmra.mxu0 %v5299_v10  ;;  %v17258_v10 = vld [vmem:[#allocation6_spill] sm:$0xff] }
 0x42a   : > { %v4678_v32 = vpop.f32.mrf.mxu1 }
 0x42b   : > { %v4848_v46 = vpop.f32.mrf.mxu2  ;;  %v15119_v16 = vadd.f32 %v4843_v40, %v4678_v32  ;;  %v5301_v40 = vsel %vm1170_vm2, %v5298_v28, %v5300_v9  ;;  %v17259_v32 = vld [vmem:[#allocation44_spill] sm:$0xff] }
 0x42c   : > { %5075 = vmatmul.bf16.gmra.mxu3 %v14910_v35 }
 0x42d   : > { %5792 = vmatmul.bf16.gmra.mxu1 %v17257_v2 }
 0x42e   : > { %v5413_v1 = vpop.f32.mrf.mxu0 }
 0x42f   : > { %v15121_v36 = vadd.f32 %v5413_v1, %v5099_v50  ;;  %v5036_v38 = vpop.f32.mrf.mxu3 }
 0x430   : > { %v5102_v47 = vadd.f32 %v5036_v38, %v14922_v27  ;;  %v11996_v27 = vld [vmem:[%s17002_s4 + $0x1e0] sm:$0xff]  ;;  %v6158_v38 = vld [vmem:[#allocation3 + $0x10] sm:$0xc] }
 0x431   : > { %6803 = vmatpush.bf16.msra.mxu0 %v11996_v27  ;;  %v17260_v27 = vld [vmem:[#allocation33_spill] sm:$0xff] }
 0x432   : > { %v4680_v8 = vpop.f32.mrf.mxu1 }
 0x433   : > { %v4850_v48 = vpop.f32.mrf.mxu2  ;;  %v15126_v49 = vadd.f32 %v4845_v53, %v4680_v8 }
 0x435   : > { %6804 = vmatpush.bf16.msra.mxu0 %v11995_v37 }
 0x436   : > { %v5416_v0 = vpop.f32.mrf.mxu0 }
 0x437   : > { %v15128_v18 = vadd.f32 %v5416_v0, %v5100_v7  ;;  %v5038_v35 = vpop.f32.mrf.mxu3  ;;  %v5302_v0 = vrot.slane %v14971_v61, 1 }
 0x438   : > { %v5103_v50 = vadd.f32 %v5038_v35, %v14963_v22  ;;  %6061 = vmatmul.bf16.gmra.mxu2 %v17258_v10  ;;  %v12004_v22 = vld [vmem:[%s17002_s4 + $0x220] sm:$0xff]  ;;  %v6249_v35 = vunpack.c.l.b16 %v6158_v38 }
 0x439   : > { %5455 = vmatmul.bf16.gmra.mxu0 %v5301_v40  ;;  %7062 = vmatpush.bf16.msra.mxu1 %v12004_v22  ;;  %v5158_v38 = vld [vmem:[#allocation3 + $0x98] sm:$0x1] }
 0x43a   : > { %v4683_v53 = vpop.f32.mrf.mxu1 }
 0x43b   : > { %v4853_v7 = vpop.f32.mrf.mxu2  ;;  %v15140_v63 = vadd.f32 %v4848_v46, %v4683_v53  ;;  %v11993_v46 = vld [vmem:[%s17002_s4 + $0x1c8] sm:$0xff] }
 0x43c   : > { %5080 = vmatmul.bf16.gmra.mxu3 %v14966_v42  ;;  %v11994_v42 = vld [vmem:[%s17002_s4 + $0x1d0] sm:$0xff] }
 0x43d   : > { %5797 = vmatmul.bf16.gmra.mxu1 %v17259_v32  ;;  %6805 = vmatpush.bf16.msra.mxu0 %v11994_v42  ;;  %v12244_v32 = vld [vmem:[#allocation3 + $0x18] sm:$0xff] }
 0x43e   : > { %v5418_v28 = vpop.f32.mrf.mxu0 }
 0x43f   : > { %v15145_v12 = vadd.f32 %v5418_v28, %v5101_v26  ;;  %v5041_v1 = vpop.f32.mrf.mxu3  ;;  %v5303_v28 = vsel %vm1170_vm2, %v5300_v9, %v5302_v0 }
 0x440   : > { %v5104_v2 = vadd.f32 %v5041_v1, %v14992_v3  ;;  %v17261_v3 = vunpack.c.l.b16 %v17260_v27  ;;  %v6306_v1 = vrot.slane %v12244_v32, 2 }
 0x441   : > { %6806 = vmatpush.bf16.msra.mxu0 %v11993_v46 }
 0x442   : > { %v4685_v8 = vpop.f32.mrf.mxu1  ;;  %v6286_v37 = vpack.c.b16 %v17261_v3, %v6249_v35  ;;  %v17263_v3 = vld [vmem:[#allocation46_spill] sm:$0xff] }
 0x443   : > { %v4855_v26 = vpop.f32.mrf.mxu2  ;;  %v15156_v40 = vadd.f32 %v4850_v48, %v4685_v8  ;;  %v11992_v48 = vld [vmem:[%s17002_s4 + $0x1c0] sm:$0xff] }
 0x444   : > { %v6305_v8 = vrot.slane %v6286_v37, 2 }
 0x445   : > { %6807 = vmatpush.bf16.msra.mxu0 %v11992_v48 }
 0x446   : > { %v5421_v10 = vpop.f32.mrf.mxu0 }
 0x447   : > { %v15160_v53 = vadd.f32 %v5421_v10, %v5102_v47  ;;  %v5043_v22 = vpop.f32.mrf.mxu3  ;;  %v6307_v47 = vsel %vm2172_vm4, %v6305_v8, %v6306_v1  ;;  %v5249_v10 = vunpack.c.l.b16 %v5158_v38 }
 0x448   : > { %v5105_v42 = vadd.f32 %v5043_v22, %v15012_v6  ;;  %6066 = vmatmul.bf16.gmra.mxu2 %v17262_v51 }
 0x449   : > { %5460 = vmatmul.bf16.gmra.mxu0 %v5303_v28  ;;  %v5268_v22 = vpack.c.b16 %v5249_v10, %v5249_v10 }
 0x44a   : > { %v4688_v46 = vpop.f32.mrf.mxu1 }
 0x44b   : > { %v4858_v35 = vpop.f32.mrf.mxu2  ;;  %v15169_v9 = vadd.f32 %v4853_v7, %v4688_v46  ;;  %v5304_v48 = vrot.slane %v5268_v22, 1  ;;  %v6565_v22 = vshrl.u32 %v6286_v37, 16 }
 0x44c   : > { %6416 = vmatmul.bf16.vlgmr.msra.gmra.mxu3 %v6307_v47  ;;  %v12245_v47 = vld [vmem:[#allocation3 + $0x20] sm:$0xff] }
 0x44d   : > { %5802 = vmatmul.bf16.gmra.mxu1 %v17263_v3  ;;  %v5305_v7 = vsel %vm1170_vm2, %v5302_v0, %v5304_v48  ;;  %v6568_v48 = vshll.u32 %v6286_v37, 16 }
 0x44e   : > { %v5423_v27 = vpop.f32.mrf.mxu0 }
 0x44f   : > { %v15171_v6 = vadd.f32 %v5423_v27, %v5103_v50  ;;  %v5046_v51 = vpop.f32.mrf.mxu3  ;;  %v6308_v50 = vrot.slane %v12245_v47, 2  ;;  %v17264_v27 = vld [vmem:[#allocation9_spill] sm:$0xff] }
 0x450   : > { %v5106_v28 = vadd.f32 %v5046_v51, %v15029_v19  ;;  %v6573_v51 = vshrl.u32 %v12244_v32, 16 }
 0x451   : > { %v6309_v19 = vsel %vm2172_vm4, %v6306_v1, %v6308_v50 }
 0x452   : > { %v4690_v54 = vpop.f32.mrf.mxu1 }
 0x453   : > { %v4860_v14 = vpop.f32.mrf.mxu2  ;;  %v15175_v57 = vadd.f32 %v4855_v26, %v4690_v54  ;;  %v6576_v54 = vshll.u32 %v12244_v32, 16 }
 0x456   : > { %v5426_v8 = vpop.f32.mrf.mxu0 }
 0x457   : > { %v15177_v15 = vadd.f32 %v5426_v8, %v5104_v2  ;;  %v5048_v38 = vpop.f32.mrf.mxu3  ;;  %v12027_v2 = vld [vmem:[%s17004_s6 + $0x10] sm:$0xff]  ;;  %v17266_v8 = vld [vmem:[#allocation7_spill] sm:$0xff] }
 0x458   : > { %v5107_v46 = vadd.f32 %v5048_v38, %v15042_v11  ;;  %6071 = vmatmul.bf16.gmra.mxu2 %v17264_v27  ;;  %v6575_v38 = vrot.slane %v6573_v51, 2  ;;  %v6567_v27 = vrot.slane %v6565_v22, 2  ;;  %v17268_v22 = vld [vmem:[#allocation10_spill] sm:$0xff] }
 0x459   : > { %5465 = vmatmul.bf16.gmra.mxu0 %v5305_v7  ;;  %7594 = vmatpush.bf16.msra.mxu2 %v12027_v2  ;;  %v6578_v7 = vrot.slane %v6576_v54, 3 }
 0x45a   : > { %v4693_v10 = vpop.f32.mrf.mxu1 }
 0x45b   : > { %v6032_v3 = vpop.f32.mrf.mxu2  ;;  %v15183_v26 = vadd.f32 %v4858_v35, %v4693_v10  ;;  %v12003_v35 = vld [vmem:[%s17002_s4 + $0x218] sm:$0xff]  ;;  %v6579_v37 = vor.u32 %v6578_v7, %v6575_v38  ;;  %v6585_v7 = vshll.u32 %v12245_v47, 16 }
 0x45c   : > { %6421 = vmatmul.bf16.gmra.mxu3 %v6309_v19  ;;  %v6570_v19 = vrot.slane %v6568_v48, 3  ;;  %7063 = vmatpush.bf16.msra.mxu1 %v12003_v35 }
 0x45d   : > { %5807 = vmatmul.bf16.gmra.mxu1 %v17266_v8 }
 0x45e   : > { %v5428_v0 = vpop.f32.mrf.mxu0  ;;  %v6571_v8 = vor.u32 %v6570_v19, %v6567_v27 }
 0x45f   : > { %v15188_v11 = vadd.f32 %v5428_v0, %v5105_v42  ;;  %v5051_v1 = vpop.f32.mrf.mxu3 }
 0x460   : > { %v5108_v32 = vadd.f32 %v5051_v1, %v15050_v60  ;;  %v6580_v54 = vsel %vm2793_vm6, %v6571_v8, %v6579_v37  ;;  %v12246_v60 = vld [vmem:[#allocation3 + $0x28] sm:$0xff] }
 0x461   : > { %17265 = vst [vmem:[#allocation35_spill] sm:$0xff] %v15188_v11  ;;  %v6310_v1 = vrot.slane %v12246_v60, 2 }
 0x462   : > { %v4695_v10 = vpop.f32.mrf.mxu1 }
 0x463   : > { %v6034_v43 = vpop.f32.mrf.mxu2  ;;  %v15195_v42 = vadd.f32 %v4860_v14, %v4695_v10  ;;  %v6311_v48 = vsel %vm2172_vm4, %v6308_v50, %v6310_v1  ;;  %v6582_v14 = vshrl.u32 %v12245_v47, 16  ;;  %v17269_v10 = vld [vmem:[#allocation38_spill] sm:$0xff] }
 0x465   : > { %v6584_v8 = vrot.slane %v6582_v14, 2 }
 0x466   : > { %v5431_v0 = vpop.f32.mrf.mxu0 }
 0x467   : > { %v15197_v2 = vadd.f32 %v5431_v0, %v5106_v28  ;;  %v5053_v51 = vpop.f32.mrf.mxu3 }
 0x468   : > { %v5109_v11 = vadd.f32 %v5053_v51, %v15057_v44  ;;  %6076 = vmatmul.bf16.gmra.mxu2 %v17268_v22  ;;  %v6587_v51 = vrot.slane %v6585_v7, 3  ;;  %v17270_v7 = vld [vmem:[#allocation16_spill] sm:$0xff] }
 0x469   : > { %17267 = vst [vmem:[#allocation34_spill] sm:$0xff] %v15197_v2  ;;  %6808 = vmatmul.bf16.vlgmr.msra.gmra.mxu0 %v6580_v54 }
 0x46a   : > { %v5773_v35 = vpop.f32.mrf.mxu1  ;;  %v6588_v2 = vor.u32 %v6587_v51, %v6584_v8 }
 0x46b   : > { %v6037_v38 = vpop.f32.mrf.mxu2  ;;  %v5863_v28 = vadd.f32 %v5773_v35, %v14883_v4 }
 0x46c   : > { %6426 = vmatmul.bf16.gmra.mxu3 %v6311_v48  ;;  %v6589_v35 = vsel %vm2793_vm6, %v6579_v37, %v6588_v2  ;;  %v17271_v37 = vld [vmem:[#allocation11_spill] sm:$0xff] }
 0x46d   : > { %5812 = vmatmul.bf16.gmra.mxu1 %v17269_v10  ;;  %v15207_v0 = vadd.f32 %v6032_v3, %v5863_v28  ;;  %v12247_v3 = vld [vmem:[#allocation3 + $0x30] sm:$0xff] }
 0x46e   : > { %v5433_v27 = vpop.f32.mrf.mxu0  ;;  %v6312_v28 = vrot.slane %v12247_v3, 2 }
 0x46f   : > { %v15204_v19 = vadd.f32 %v5433_v27, %v5107_v46  ;;  %v5056_v44 = vpop.f32.mrf.mxu3 }
 0x470   : > { %v5110_v54 = vadd.f32 %v5056_v44, %v15065_v58  ;;  %v6313_v58 = vsel %vm2172_vm4, %v6310_v1, %v6312_v28  ;;  %v6594_v44 = vshll.u32 %v12246_v60, 16  ;;  %v12002_v1 = vld [vmem:[%s17002_s4 + $0x210] sm:$0xff] }
 0x471   : > { %7064 = vmatpush.bf16.msra.mxu1 %v12002_v1 }
 0x472   : > { %v5775_v50 = vpop.f32.mrf.mxu1 }
 0x473   : > { %v6039_v22 = vpop.f32.mrf.mxu2  ;;  %v5864_v47 = vadd.f32 %v5775_v50, %v14943_v24  ;;  %v6591_v24 = vshrl.u32 %v12246_v60, 16 }
 0x475   : > { %v15213_v4 = vadd.f32 %v6034_v43, %v5864_v47  ;;  %v6593_v50 = vrot.slane %v6591_v24, 2  ;;  %v6596_v47 = vrot.slane %v6594_v44, 3  ;;  %v12248_v24 = vld [vmem:[#allocation3 + $0x38] sm:$0xff] }
 0x476   : > { %v5436_v48 = vpop.f32.mrf.mxu0 }
 0x477   : > { %v15211_v62 = vadd.f32 %v5436_v48, %v5108_v32  ;;  %v5058_v46 = vpop.f32.mrf.mxu3 }
 0x478   : > { %v5111_v14 = vadd.f32 %v5058_v46, %v15075_v25  ;;  %6081 = vmatmul.bf16.gmra.mxu2 %v17270_v7 }
 0x479   : > { %6813 = vmatmul.bf16.gmra.mxu0 %v6589_v35 }
 0x47a   : > { %v5778_v27 = vpop.f32.mrf.mxu1 }
 0x47b   : > { %v6042_v10 = vpop.f32.mrf.mxu2  ;;  %v5865_v43 = vadd.f32 %v5778_v27, %v14969_v56  ;;  %v6597_v56 = vor.u32 %v6596_v47, %v6593_v50  ;;  %v6603_v50 = vshll.u32 %v12247_v3, 16 }
 0x47c   : > { %6431 = vmatmul.bf16.gmra.mxu3 %v6313_v58 }
 0x47d   : > { %5817 = vmatmul.bf16.gmra.mxu1 %v17271_v37  ;;  %v15223_v51 = vadd.f32 %v6037_v38, %v5865_v43  ;;  %v6598_v27 = vsel %vm2793_vm6, %v6588_v2, %v6597_v56  ;;  %v17272_v43 = vld [vmem:[#allocation17_spill] sm:$0xff]  ;;  %v17273_v2 = vld [vmem:[#allocation14_spill] sm:$0xff] }
 0x47e   : > { %v5438_v32 = vpop.f32.mrf.mxu0 }
 0x47f   : > { %v15220_v8 = vadd.f32 %v5438_v32, %v5109_v11  ;;  %v5061_v25 = vpop.f32.mrf.mxu3 }
 0x480   : > { %v5112_v48 = vadd.f32 %v5061_v25, %v15092_v55  ;;  %v6314_v55 = vrot.slane %v12248_v24, 2 }
 0x482   : > { %v5780_v60 = vpop.f32.mrf.mxu1  ;;  %v6315_v32 = vsel %vm2172_vm4, %v6312_v28, %v6314_v55 }
 0x483   : > { %v6044_v46 = vpop.f32.mrf.mxu2  ;;  %v5866_v11 = vadd.f32 %v5780_v60, %v15000_v41  ;;  %v6600_v41 = vshrl.u32 %v12247_v3, 16 }
 0x485   : > { %v15232_v38 = vadd.f32 %v6039_v22, %v5866_v11  ;;  %v6602_v60 = vrot.slane %v6600_v41, 2  ;;  %v6605_v11 = vrot.slane %v6603_v50, 3  ;;  %v17274_v50 = vld [vmem:[#allocation19_spill] sm:$0xff] }
 0x486   : > { %v5441_v35 = vpop.f32.mrf.mxu0 }
 0x487   : > { %v15230_v7 = vadd.f32 %v5441_v35, %v5110_v54  ;;  %v5063_v58 = vpop.f32.mrf.mxu3 }
 0x488   : > { %v5113_v44 = vadd.f32 %v5063_v58, %v15105_v23  ;;  %6086 = vmatmul.bf16.gmra.mxu2 %v17272_v43 }
 0x489   : > { %6818 = vmatmul.bf16.gmra.mxu0 %v6598_v27  ;;  %v6606_v27 = vor.u32 %v6605_v11, %v6602_v60 }
 0x48a   : > { %v5783_v37 = vpop.f32.mrf.mxu1 }
 0x48b   : > { %v6047_v25 = vpop.f32.mrf.mxu2  ;;  %v5867_v54 = vadd.f32 %v5783_v37, %v15020_v45  ;;  %v6607_v37 = vsel %vm2793_vm6, %v6597_v56, %v6606_v27  ;;  %v17275_v56 = vld [vmem:[#allocation20_spill] sm:$0xff] }
 0x48c   : > { %6436 = vmatmul.bf16.gmra.mxu3 %v6315_v32 }
 0x48d   : > { %5822 = vmatmul.bf16.gmra.mxu1 %v17273_v2  ;;  %v15242_v1 = vadd.f32 %v6042_v10, %v5867_v54  ;;  %v12249_v10 = vld [vmem:[#allocation3 + $0x40] sm:$0xff] }
 0x48e   : > { %v5443_v22 = vpop.f32.mrf.mxu0  ;;  %v6316_v54 = vrot.slane %v12249_v10, 2 }
 0x48f   : > { %v15239_v47 = vadd.f32 %v5443_v22, %v5111_v14  ;;  %v5066_v23 = vpop.f32.mrf.mxu3 }
 0x490   : > { %v5114_v35 = vadd.f32 %v5066_v23, %v15119_v16  ;;  %v6317_v16 = vsel %vm2172_vm4, %v6314_v55, %v6316_v54  ;;  %v6612_v23 = vshll.u32 %v12248_v24, 16 }
 0x492   : > { %v5785_v28 = vpop.f32.mrf.mxu1 }
 0x493   : > { %v6049_v58 = vpop.f32.mrf.mxu2  ;;  %v5868_v3 = vadd.f32 %v5785_v28, %v15031_v52  ;;  %v6609_v52 = vshrl.u32 %v12248_v24, 16 }
 0x495   : > { %v15248_v45 = vadd.f32 %v6044_v46, %v5868_v3  ;;  %v6611_v28 = vrot.slane %v6609_v52, 2  ;;  %v6614_v3 = vrot.slane %v6612_v23, 3  ;;  %v6618_v23 = vshrl.u32 %v12249_v10, 16 }
 0x496   : > { %v5446_v43 = vpop.f32.mrf.mxu0 }
 0x497   : > { %v15246_v32 = vadd.f32 %v5446_v43, %v5112_v48  ;;  %v5068_v14 = vpop.f32.mrf.mxu3 }
 0x498   : > { %v5115_v41 = vadd.f32 %v5068_v14, %v15126_v49  ;;  %6091 = vmatmul.bf16.gmra.mxu2 %v17274_v50 }
 0x499   : > { %6823 = vmatmul.bf16.gmra.mxu0 %v6607_v37  ;;  %v6615_v37 = vor.u32 %v6614_v3, %v6611_v28  ;;  %v6620_v3 = vrot.slane %v6618_v23, 2 }
 0x49a   : > { %v5788_v22 = vpop.f32.mrf.mxu1 }
 0x49b   : > { %v6052_v2 = vpop.f32.mrf.mxu2  ;;  %v5869_v48 = vadd.f32 %v5788_v22, %v15044_v13  ;;  %v6616_v22 = vsel %vm2793_vm6, %v6606_v27, %v6615_v37 }
 0x49c   : > { %6441 = vmatmul.bf16.gmra.mxu3 %v6317_v16 }
 0x49d   : > { %5827 = vmatmul.bf16.gmra.mxu1 %v17275_v56  ;;  %v15258_v11 = vadd.f32 %v6047_v25, %v5869_v48  ;;  %v12250_v25 = vld [vmem:[#allocation3 + $0x48] sm:$0xff] }
 0x49e   : > { %v5448_v46 = vpop.f32.mrf.mxu0  ;;  %v6318_v48 = vrot.slane %v12250_v25, 2 }
 0x49f   : > { %v15255_v60 = vadd.f32 %v5448_v46, %v5113_v44  ;;  %v5071_v49 = vpop.f32.mrf.mxu3  ;;  %v6621_v46 = vshll.u32 %v12249_v10, 16 }
 0x4a0   : > { %v5116_v43 = vadd.f32 %v5071_v49, %v15140_v63  ;;  %v12001_v63 = vld [vmem:[%s17002_s4 + $0x208] sm:$0xff] }
 0x4a1   : > { %7065 = vmatpush.bf16.msra.mxu1 %v12001_v63 }
 0x4a2   : > { %v5790_v55 = vpop.f32.mrf.mxu1 }
 0x4a3   : > { %v6054_v14 = vpop.f32.mrf.mxu2  ;;  %v5870_v24 = vadd.f32 %v5790_v55, %v15052_v39  ;;  %v6319_v39 = vsel %vm2172_vm4, %v6316_v54, %v6318_v48  ;;  %v6623_v55 = vrot.slane %v6621_v46, 3 }
 0x4a5   : > { %v15264_v13 = vadd.f32 %v6049_v58, %v5870_v24 }
 0x4a6   : > { %v5451_v50 = vpop.f32.mrf.mxu0 }
 0x4a7   : > { %v15262_v16 = vadd.f32 %v5451_v50, %v5114_v35  ;;  %v5073_v44 = vpop.f32.mrf.mxu3 }
 0x4a8   : > { %v5117_v52 = vadd.f32 %v5073_v44, %v15156_v40  ;;  %6096 = vmatmul.bf16.gmra.mxu2 %v14758_v5  ;;  %v17276_v40 = vld [vmem:[#allocation21_spill] sm:$0xff]  ;;  %v6624_v44 = vor.u32 %v6623_v55, %v6620_v3 }
 0x4a9   : > { %6828 = vmatmul.bf16.gmra.mxu0 %v6616_v22 }
 0x4aa   : > { %v5793_v35 = vpop.f32.mrf.mxu1 }
 0x4ab   : > { %v6057_v58 = vpop.f32.mrf.mxu2  ;;  %v5871_v27 = vadd.f32 %v5793_v35, %v15059_v33 }
 0x4ac   : > { %6446 = vmatmul.bf16.gmra.mxu3 %v6319_v39  ;;  %v6625_v39 = vsel %vm2793_vm6, %v6615_v37, %v6624_v44  ;;  %v17277_v37 = vld [vmem:[#allocation22_spill] sm:$0xff] }
 0x4ad   : > { %5832 = vmatmul.bf16.gmra.mxu1 %v17276_v40  ;;  %v15277_v5 = vadd.f32 %v6052_v2, %v5871_v27  ;;  %v12251_v2 = vld [vmem:[#allocation3 + $0x50] sm:$0xff] }
 0x4ae   : > { %v5453_v56 = vpop.f32.mrf.mxu0  ;;  %v6320_v35 = vrot.slane %v12251_v2, 2 }
 0x4af   : > { %v15274_v49 = vadd.f32 %v5453_v56, %v5115_v41  ;;  %v5076_v28 = vpop.f32.mrf.mxu3  ;;  %v6630_v56 = vshll.u32 %v12250_v25, 16 }
 0x4b0   : > { %v5118_v24 = vadd.f32 %v5076_v28, %v15169_v9  ;;  %v6321_v9 = vsel %vm2172_vm4, %v6318_v48, %v6320_v35 }
 0x4b1   : > { %v6632_v55 = vrot.slane %v6630_v56, 3 }
 0x4b2   : > { %v5795_v54 = vpop.f32.mrf.mxu1 }
 0x4b3   : > { %v6059_v50 = vpop.f32.mrf.mxu2  ;;  %v5872_v10 = vadd.f32 %v5795_v54, %v15070_v17  ;;  %v6627_v17 = vshrl.u32 %v12250_v25, 16 }
 0x4b5   : > { %v15283_v33 = vadd.f32 %v6054_v14, %v5872_v10  ;;  %v6629_v3 = vrot.slane %v6627_v17, 2  ;;  %v17278_v17 = vld [vmem:[#allocation27_spill] sm:$0xff] }
 0x4b6   : > { %v5456_v22 = vpop.f32.mrf.mxu0 }
 0x4b7   : > { %v15281_v63 = vadd.f32 %v5456_v22, %v5116_v43  ;;  %v5078_v41 = vpop.f32.mrf.mxu3  ;;  %v6633_v10 = vor.u32 %v6632_v55, %v6629_v3 }
 0x4b8   : > { %v5119_v23 = vadd.f32 %v5078_v41, %v15175_v57  ;;  %6101 = vmatmul.bf16.gmra.mxu2 %v14844_v31 }
 0x4b9   : > { %6833 = vmatmul.bf16.gmra.mxu0 %v6625_v39  ;;  %v6634_v39 = vsel %vm2793_vm6, %v6624_v44, %v6633_v10 }
 0x4ba   : > { %v5798_v46 = vpop.f32.mrf.mxu1 }
 0x4bb   : > { %v6062_v27 = vpop.f32.mrf.mxu2  ;;  %v5873_v43 = vadd.f32 %v5798_v46, %v15080_v29 }
 0x4bc   : > { %6451 = vmatmul.bf16.gmra.mxu3 %v6321_v9 }
 0x4bd   : > { %5837 = vmatmul.bf16.gmra.mxu1 %v17277_v37  ;;  %v15293_v28 = vadd.f32 %v6057_v58, %v5873_v43  ;;  %v12252_v58 = vld [vmem:[#allocation3 + $0x58] sm:$0xff] }
 0x4be   : > { %v5458_v14 = vpop.f32.mrf.mxu0  ;;  %v6322_v9 = vrot.slane %v12252_v58, 2 }
 0x4bf   : > { %v15290_v40 = vadd.f32 %v5458_v14, %v5117_v52  ;;  %v5081_v57 = vpop.f32.mrf.mxu3  ;;  %v6639_v14 = vshll.u32 %v12251_v2, 16 }
 0x4c0   : > { %v5120_v31 = vadd.f32 %v5081_v57, %v15183_v26  ;;  %v6323_v26 = vsel %vm2172_vm4, %v6320_v35, %v6322_v9 }
 0x4c1   : > { %v6641_v55 = vrot.slane %v6639_v14, 3 }
 0x4c2   : > { %v5800_v48 = vpop.f32.mrf.mxu1 }
 0x4c3   : > { %v6064_v54 = vpop.f32.mrf.mxu2  ;;  %v5874_v25 = vadd.f32 %v5800_v48, %v15097_v21  ;;  %v6636_v21 = vshrl.u32 %v12251_v2, 16 }
 0x4c5   : > { %v15299_v29 = vadd.f32 %v6059_v50, %v5874_v25  ;;  %v12000_v50 = vld [vmem:[%s17002_s4 + $0x200] sm:$0xff]  ;;  %v6638_v35 = vrot.slane %v6636_v21, 2 }
 0x4c6   : > { %v5461_v22 = vpop.f32.mrf.mxu0  ;;  %7066 = vmatpush.bf16.msra.mxu1 %v12000_v50 }
 0x4c7   : > { %v15297_v41 = vadd.f32 %v5461_v22, %v5118_v24  ;;  %v5083_v52 = vpop.f32.mrf.mxu3 }
 0x4c8   : > { %v5121_v46 = vadd.f32 %v5083_v52, %v15195_v42  ;;  %6106 = vmatmul.bf16.gmra.mxu2 %v17278_v17  ;;  %v17279_v42 = vld [vmem:[#allocation25_spill] sm:$0xff] }
 0x4c9   : > { %6838 = vmatmul.bf16.gmra.mxu0 %v6634_v39 }
 0x4ca   : > { %v5803_v56 = vpop.f32.mrf.mxu1 }
 0x4cb   : > { %v6067_v43 = vpop.f32.mrf.mxu2  ;;  %v5875_v24 = vadd.f32 %v5803_v56, %v15110_v30  ;;  %v6642_v30 = vor.u32 %v6641_v55, %v6638_v35 }
 0x4cc   : > { %6456 = vmatmul.bf16.gmra.mxu3 %v6323_v26  ;;  %v15321_v26 = vld [vmem:[#allocation3 + $0x60] sm:$0xff] }
 0x4cd   : > { %5842 = vmatmul.bf16.gmra.mxu1 %v17279_v42  ;;  %v15312_v57 = vadd.f32 %v6062_v27, %v5875_v24  ;;  %v6643_v27 = vsel %vm2793_vm6, %v6633_v10, %v6642_v30  ;;  %v6324_v56 = vrot.slane %v15321_v26, 2  ;;  %v6645_v24 = vshrl.u32 %v12252_v58, 16 }
 0x4ce   : > { %v5463_v44 = vpop.f32.mrf.mxu0 }
 0x4cf   : > { %v15309_v37 = vadd.f32 %v5463_v44, %v5119_v23  ;;  %v6417_v3 = vpop.f32.mrf.mxu3 }
 0x4d0   : > { %v6507_v2 = vadd.f32 %v6417_v3, %v15207_v0  ;;  %v5507_v0 = vld [vmem:[#allocation3 + $0x98] sm:$0x3]  ;;  %v6647_v3 = vrot.slane %v6645_v24, 2 }
 0x4d1   : > { %v5526_v50 = vunpack.c.l.b16 %v5507_v0 }
 0x4d2   : > { %v5805_v48 = vpop.f32.mrf.mxu1 }
 0x4d3   : > { %v6069_v25 = vpop.f32.mrf.mxu2  ;;  %v5876_v22 = vadd.f32 %v5805_v48, %v15121_v36  ;;  %v6325_v36 = vsel %vm2172_vm4, %v6322_v9, %v6324_v56  ;;  %v5527_v9 = vpack.c.b16 %v5526_v50, %v5526_v50 }
 0x4d5   : > { %v15318_v23 = vadd.f32 %v6064_v54, %v5876_v22  ;;  %v6648_v54 = vshll.u32 %v12252_v58, 16 }
 0x4d6   : > { %v5466_v52 = vpop.f32.mrf.mxu0 }
 0x4d7   : > { %v15316_v39 = vadd.f32 %v5466_v52, %v5120_v31  ;;  %v6419_v17 = vpop.f32.mrf.mxu3  ;;  %v6650_v35 = vrot.slane %v6648_v54, 3  ;;  %v5955_v52 = vrot.slane %v5527_v9, 2 }
 0x4d8   : > { %v6508_v21 = vadd.f32 %v6419_v17, %v15213_v4  ;;  %6111 = vmatmul.bf16.gmra.mxu2 %v14987_v20  ;;  %v15341_v17 = vld [vmem:[%s12356_s24] sm:$0xff]  }
 0x4d9   : > { %6843 = vmatmul.bf16.gmra.mxu0 %v6643_v27  ;;  %v6651_v22 = vor.u32 %v6650_v35, %v6647_v3  ;;  %v12030_v3 = vld [vmem:[%s17004_s6 + $0x28] sm:$0xff] }
 0x4da   : > { %v5808_v14 = vpop.f32.mrf.mxu1  ;;  %7951 = vmatpush.bf16.msrb.mxu0 %v12030_v3 }
 0x4db   : > { %v6072_v31 = vpop.f32.mrf.mxu2  ;;  %v5877_v10 = vadd.f32 %v5808_v14, %v15128_v18  ;;  %v6652_v0 = vsel %vm2793_vm6, %v6642_v30, %v6651_v22 }
 0x4dc   : > { %6461 = vmatmul.bf16.gmra.mxu3 %v6325_v36  ;;  %v17280_v36 = vrot.slane %v14971_v61, 2  ;;  %v6654_v61 = vshrl.u32 %v15321_v26, 16 }
 0x4dd   : > { %5847 = vmatmul.bf16.gmra.mxu1 %v14953_v59  ;;  %v15331_v4 = vadd.f32 %v6067_v43, %v5877_v10 }
 0x4de   : > { %v5468_v44 = vpop.f32.mrf.mxu0  ;;  %v5956_v14 = vsel %vm2172_vm4, %v17280_v36, %v5955_v52  ;;  %v5690_v36 = vshrl.u32 %v5527_v9, 16 }
 0x4df   : > { %v15328_v42 = vadd.f32 %v5468_v44, %v5121_v46  ;;  %v6422_v20 = vpop.f32.mrf.mxu3  ;;  %v12026_v46 = vld [vmem:[%s17004_s6 + $0x8] sm:$0xff]  ;;  %v6657_v44 = vshll.u32 %v15321_v26, 16 }
 0x4e0   : > { %v6509_v55 = vadd.f32 %v6422_v20, %v15223_v51  ;;  %7740 = vmatpush.bf16.msrb.mxu3 %v12026_v46  ;;  %v6656_v46 = vrot.slane %v6654_v61, 2 }
 0x4e2   : > { %v5810_v48 = vpop.f32.mrf.mxu1 }
 0x4e3   : > { %v6074_v58 = vpop.f32.mrf.mxu2  ;;  %v5878_v18 = vadd.f32 %v5810_v48, %v15145_v12  ;;  %v15349_v12 = vld [vmem:[#allocation3 + $0x68] sm:$0xff] }
 0x4e4   : > { %v6326_v24 = vrot.slane %v15349_v12, 2 }
 0x4e5   : > { %v15343_v27 = vadd.f32 %v6069_v25, %v5878_v18  ;;  %v7376_v25 = vshll.u32 %v15341_v17, 16 }
 0x4e6   : > { %v6809_v59 = vpop.f32.mrf.mxu0  ;;  %v6327_v50 = vsel %vm2172_vm4, %v6324_v56, %v6326_v24  ;;  %v7374_v56 = vshrl.u32 %v15341_v17, 16 }
 0x4e7   : > { %v15338_v43 = vadd.f32 %v6809_v59, %v6507_v2  ;;  %v6424_v51 = vpop.f32.mrf.mxu3  ;;  %v15356_v2 = vld [vmem:[%s12356_s24 + $0x8] sm:$0xff]  ;;  %v7378_v48 = vrot.slane %v7376_v25, 1  ;;  %v6659_v59 = vrot.slane %v6657_v44, 3  ;;  %v5692_v44 = vrot.slane %v5690_v36, 1 }
 0x4e8   : > { %v15353_v54 = vadd.f32 %v6424_v51, %v15232_v38  ;;  %6116 = vmatmul.bf16.gmra.mxu2 %v5956_v14  ;;  %v12051_v38 = vld [vmem:[%s17004_s6 + $0x48] sm:$0xff]  ;;  %v7381_v52 = vshll.u32 %v15356_v2, 16  ;;  %v5693_v14 = vshll.u32 %v5527_v9, 16 }
 0x4e9   : > { %6848 = vmatmul.bf16.gmra.mxu0 %v6652_v0  ;;  %8704 = vmatpush.bf16.msrb.mxu2 %v12051_v38  ;;  %v12049_v0 = vld [vmem:[%s17004_s6 + $0x38] sm:$0xff]  ;;  %v7379_v25 = vor.u32 %v7378_v48, %v7374_v56 }
 0x4ea   : > { %v5813_v30 = vpop.f32.mrf.mxu1  ;;  %8324 = vmatpush.bf16.msrb.mxu1 %v12049_v0  ;;  %v12255_v56 = vld [vmem:[#allocation3 + $0x70] sm:$0xff]  ;;  %v6666_v0 = vshll.u32 %v15349_v12, 16 }
 0x4eb   : > { %v6077_v10 = vpop.f32.mrf.mxu2  ;;  %v5879_v20 = vadd.f32 %v5813_v30, %v15160_v53  ;;  %v6660_v30 = vor.u32 %v6659_v59, %v6656_v46  ;;  %v6328_v48 = vrot.slane %v12255_v56, 2 }
 0x4ec   : > { %6466 = vmatmul.bf16.gmra.mxu3 %v6327_v50 }
 0x4ed   : > { %5852 = vmatmul.bf16.gmra.mxu1 %v15004_v34  ;;  %v15374_v53 = vadd.f32 %v6072_v31, %v5879_v20  ;;  %v5695_v20 = vrot.slane %v5693_v14, 2  ;;  %v6661_v9 = vsel %vm2793_vm6, %v6651_v22, %v6660_v30  ;;  %v6329_v46 = vsel %vm2172_vm4, %v6326_v24, %v6328_v48  ;;  %v17281_v14 = vld [vmem:[#allocation29_spill] sm:$0xff] }
 0x4ee   : > { %v6811_v35 = vpop.f32.mrf.mxu0 }
 0x4ef   : > { %v15371_v18 = vadd.f32 %v6811_v35, %v6508_v21  ;;  %v6427_v26 = vpop.f32.mrf.mxu3  ;;  %v7383_v21 = vrot.slane %v7381_v52, 1 }
 0x4f0   : > { %v6511_v51 = vadd.f32 %v6427_v26, %v15242_v1  ;;  %v15390_v26 = vld [vmem:[%s12356_s24 + $0x10] sm:$0xff] }
 0x4f1   : > { %v7384_v1 = vsel %vm699_vm3, %v7379_v25, %v7383_v21  ;;  %v7385_v25 = vshrl.u32 %v15356_v2, 16 }
 0x4f2   : > { %v5815_v50 = vpop.f32.mrf.mxu1 }
 0x4f3   : > { %v6079_v34 = vpop.f32.mrf.mxu2  ;;  %v5880_v31 = vadd.f32 %v5815_v50, %v15171_v6  ;;  %v5696_v6 = vor.u32 %v5695_v20, %v5692_v44  ;;  %v7389_v50 = vshll.u32 %v15390_v26, 16 }
 0x4f5   : > { %v15384_v3 = vadd.f32 %v6074_v58, %v5880_v31  ;;  %v6663_v58 = vshrl.u32 %v15349_v12, 16  ;;  %v6668_v12 = vrot.slane %v6666_v0, 3  ;;  %v12256_v0 = vld [vmem:[#allocation3 + $0x78] sm:$0xff] }
 0x4f6   : > { %v6814_v61 = vpop.f32.mrf.mxu0 }
 0x4f7   : > { %v15382_v38 = vadd.f32 %v6814_v61, %v6509_v55  ;;  %v6429_v35 = vpop.f32.mrf.mxu3  ;;  %v6665_v44 = vrot.slane %v6663_v58, 2 }
 0x4f8   : > { %v6512_v52 = vadd.f32 %v6429_v35, %v15248_v45  ;;  %11424 = vmatmul.msk.bf16.vlgmr.msra.gmra.mxu2 %vm860_vm1, %v7384_v1  ;;  %v5697_v45 = vsel %vm1791_vm5, %v17281_v14, %v5696_v6  ;;  %v7391_v1 = vrot.slane %v7389_v50, 1 }
 0x4f9   : > { %6853 = vmatmul.bf16.gmra.mxu0 %v6661_v9  ;;  %v6669_v6 = vor.u32 %v6668_v12, %v6665_v44  ;;  %v6675_v44 = vshll.u32 %v12255_v56, 16 }
 0x4fa   : > { %v5818_v59 = vpop.f32.mrf.mxu1 }
 0x4fb   : > { %v6082_v55 = vpop.f32.mrf.mxu2  ;;  %v5881_v22 = vadd.f32 %v5818_v59, %v15177_v15  ;;  %v7387_v15 = vor.u32 %v7385_v25, %v7383_v21  ;;  %v6670_v58 = vsel %vm2793_vm6, %v6660_v30, %v6669_v6  ;;  %v7393_v30 = vshrl.u32 %v15390_v26, 16 }
 0x4fc   : > { %6471 = vmatmul.bf16.gmra.mxu3 %v6329_v46  ;;  %v17283_v46 = vld [vmem:[#allocation35_spill] sm:$0xff] }
 0x4fd   : > { %5857 = vmatmul.bf16.gmra.mxu1 %v5697_v45  ;;  %v15403_v24 = vadd.f32 %v6077_v10, %v5881_v22  ;;  %v15416_v45 = vld [vmem:[%s12356_s24 + $0x18] sm:$0xff] }
 0x4fe   : > { %v6816_v36 = vpop.f32.mrf.mxu0 }
 0x4ff   : > { %v15401_v31 = vadd.f32 %v6816_v36, %v15353_v54  ;;  %v6432_v61 = vpop.f32.mrf.mxu3  ;;  %v7392_v54 = vsel %vm699_vm3, %v7387_v15, %v7391_v1 }
 0x500   : > { %v6513_v20 = vadd.f32 %v6432_v61, %v15258_v11  ;;  %v6330_v11 = vrot.slane %v12256_v0, 2 }
 0x501   : > { %17282 = vst [vmem:[#allocation36_spill] sm:$0xff] %v15401_v31 }
 0x502   : > { %v5820_v35 = vpop.f32.mrf.mxu1  ;;  %v6331_v25 = vsel %vm2172_vm4, %v6328_v48, %v6330_v11 }
 0x503   : > { %v6084_v9 = vpop.f32.mrf.mxu2  ;;  %v5882_v59 = vadd.f32 %v5820_v35, %v17283_v46  ;;  %v7397_v35 = vshll.u32 %v15416_v45, 16  ;;  %v17286_v46 = vld [vmem:[#allocation37_spill] sm:$0xff] }
 0x505   : > { %v15410_v10 = vadd.f32 %v6079_v34, %v5882_v59  ;;  %v17285_v34 = vld [vmem:[#allocation34_spill] sm:$0xff] }
 0x506   : > { %v6819_v14 = vpop.f32.mrf.mxu0 }
 0x507   : > { %v15408_v36 = vadd.f32 %v6819_v14, %v6511_v51  ;;  %v6434_v22 = vpop.f32.mrf.mxu3  ;;  %v6672_v51 = vshrl.u32 %v12255_v56, 16  ;;  %v7395_v56 = vor.u32 %v7393_v30, %v7391_v1  ;;  %v15438_v30 = vld [vmem:[%s12356_s24 + $0x20] sm:$0xff] }
 0x508   : > { %v6514_v21 = vadd.f32 %v6434_v22, %v15264_v13  ;;  %11425 = vmatmul.msk.bf16.gmra.mxu2 %vm860_vm1, %v7392_v54  ;;  %v6677_v54 = vrot.slane %v6675_v44, 3  ;;  %v12257_v44 = vld [vmem:[#allocation3 + $0x80] sm:$0xff] }
 0x509   : > { %17284 = vst [vmem:[#allocation5_spill] sm:$0xff] %v15408_v36  ;;  %6858 = vmatmul.bf16.gmra.mxu0 %v6670_v58  ;;  %v6674_v48 = vrot.slane %v6672_v51, 2  ;;  %v7399_v58 = vrot.slane %v7397_v35, 1 }
 0x50a   : > { %v5823_v50 = vpop.f32.mrf.mxu1 }
 0x50b   : > { %v6087_v61 = vpop.f32.mrf.mxu2  ;;  %v5883_v12 = vadd.f32 %v5823_v50, %v17285_v34  ;;  %v6678_v34 = vor.u32 %v6677_v54, %v6674_v48  ;;  %v17288_v48 = vld [vmem:[#allocation39_spill] sm:$0xff] }
 0x50c   : > { %6476 = vmatmul.bf16.gmra.mxu3 %v6331_v25 }
 0x50d   : > { %7067 = vmatmul.bf16.vlgmr.msra.gmra.mxu1 %v17286_v46  ;;  %v15425_v59 = vadd.f32 %v6082_v55, %v5883_v12  ;;  %v6679_v51 = vsel %vm2793_vm6, %v6669_v6, %v6678_v34  ;;  %v7401_v6 = vshrl.u32 %v15416_v45, 16 }
 0x50e   : > { %v6821_v15 = vpop.f32.mrf.mxu0 }
 0x50f   : > { %v15422_v13 = vadd.f32 %v6821_v15, %v6512_v52  ;;  %v6437_v14 = vpop.f32.mrf.mxu3  ;;  %v7400_v52 = vsel %vm699_vm3, %v7395_v56, %v7399_v58 }
 0x510   : > { %v6515_v22 = vadd.f32 %v6437_v14, %v15277_v5  ;;  %v6332_v5 = vrot.slane %v12257_v44, 2  ;;  %v7405_v14 = vshll.u32 %v15438_v30, 16 }
 0x512   : > { %v5825_v25 = vpop.f32.mrf.mxu1 }
 0x513   : > { %v6089_v50 = vpop.f32.mrf.mxu2  ;;  %v5884_v36 = vadd.f32 %v5825_v25, %v15204_v19  ;;  %v6333_v19 = vsel %vm2172_vm4, %v6330_v11, %v6332_v5 }
 0x515   : > { %v15432_v55 = vadd.f32 %v6084_v9, %v5884_v36 }
 0x516   : > { %v6824_v31 = vpop.f32.mrf.mxu0 }
 0x517   : > { %v15430_v15 = vadd.f32 %v6824_v31, %v6513_v20  ;;  %v6439_v12 = vpop.f32.mrf.mxu3  ;;  %v6681_v31 = vshrl.u32 %v12256_v0, 16  ;;  %v6684_v20 = vshll.u32 %v12256_v0, 16  ;;  %v7403_v0 = vor.u32 %v7401_v6, %v7399_v58  ;;  %v15460_v6 = vld [vmem:[%s12356_s24 + $0x28] sm:$0xff] }
 0x518   : > { %v6516_v1 = vadd.f32 %v6439_v12, %v15283_v33  ;;  %11426 = vmatmul.msk.bf16.gmra.mxu2 %vm860_vm1, %v7400_v52  ;;  %v7407_v12 = vrot.slane %v7405_v14, 1 }
 0x519   : > { %17287 = vst [vmem:[#allocation4_spill] sm:$0xff] %v15430_v15  ;;  %6863 = vmatmul.bf16.gmra.mxu0 %v6679_v51  ;;  %v6683_v11 = vrot.slane %v6681_v31, 2  ;;  %v6686_v25 = vrot.slane %v6684_v20, 3  ;;  %v12258_v20 = vld [vmem:[#allocation3 + $0x88] sm:$0xff] }
 0x51a   : > { %v5828_v35 = vpop.f32.mrf.mxu1 }
 0x51b   : > { %v6092_v46 = vpop.f32.mrf.mxu2  ;;  %v5885_v9 = vadd.f32 %v5828_v35, %v15211_v62 }
 0x51c   : > { %6481 = vmatmul.bf16.gmra.mxu3 %v6333_v19  ;;  %v6687_v19 = vor.u32 %v6686_v25, %v6683_v11  ;;  %v7413_v11 = vshll.u32 %v15460_v6, 16  ;;  %v17290_v25 = vld [vmem:[#allocation40_spill] sm:$0xff] }
 0x51d   : > { %7072 = vmatmul.bf16.gmra.mxu1 %v17288_v48  ;;  %v15447_v54 = vadd.f32 %v6087_v61, %v5885_v9 }
 0x51e   : > { %v6826_v36 = vpop.f32.mrf.mxu0  ;;  %v6688_v31 = vsel %vm2793_vm6, %v6678_v34, %v6687_v19  ;;  %v7409_v34 = vshrl.u32 %v15438_v30, 16 }
 0x51f   : > { %v15444_v33 = vadd.f32 %v6826_v36, %v6514_v21  ;;  %v6442_v56 = vpop.f32.mrf.mxu3  ;;  %v7408_v21 = vsel %vm699_vm3, %v7403_v0, %v7407_v12 }
 0x520   : > { %v6517_v52 = vadd.f32 %v6442_v56, %v15293_v28  ;;  %v6334_v28 = vrot.slane %v12258_v20, 2 }
 0x522   : > { %v5830_v62 = vpop.f32.mrf.mxu1 }
 0x523   : > { %v6094_v51 = vpop.f32.mrf.mxu2  ;;  %v5886_v35 = vadd.f32 %v5830_v62, %v15220_v8  ;;  %v6335_v8 = vsel %vm2172_vm4, %v6332_v5, %v6334_v28 }
 0x525   : > { %v15454_v61 = vadd.f32 %v6089_v50, %v5886_v35 }
 0x526   : > { %v6829_v15 = vpop.f32.mrf.mxu0 }
 0x527   : > { %v15452_v36 = vadd.f32 %v6829_v15, %v6515_v22  ;;  %v6444_v9 = vpop.f32.mrf.mxu3  ;;  %v6690_v22 = vshrl.u32 %v12257_v44, 16  ;;  %v6693_v15 = vshll.u32 %v12257_v44, 16  ;;  %v7411_v44 = vor.u32 %v7409_v34, %v7407_v12  ;;  %v15482_v34 = vld [vmem:[%s12356_s24 + $0x30] sm:$0xff] }
 0x528   : > { %v6518_v58 = vadd.f32 %v6444_v9, %v15299_v29  ;;  %11427 = vmatmul.msk.bf16.gmra.mxu2 %vm860_vm1, %v7408_v21  ;;  %v7415_v9 = vrot.slane %v7413_v11, 1 }
 0x529   : > { %17289 = vst [vmem:[#allocation43_spill] sm:$0xff] %v15452_v36  ;;  %6868 = vmatmul.bf16.gmra.mxu0 %v6688_v31  ;;  %v6692_v5 = vrot.slane %v6690_v22, 2  ;;  %v6695_v35 = vrot.slane %v6693_v15, 3  ;;  %v12259_v15 = vld [vmem:[#allocation3 + $0x90] sm:$0xff] }
 0x52a   : > { %v5833_v14 = vpop.f32.mrf.mxu1 }
 0x52b   : > { %v6097_v48 = vpop.f32.mrf.mxu2  ;;  %v5887_v50 = vadd.f32 %v5833_v14, %v15230_v7 }
 0x52c   : > { %6486 = vmatmul.bf16.gmra.mxu3 %v6335_v8  ;;  %v6696_v8 = vor.u32 %v6695_v35, %v6692_v5  ;;  %v7421_v5 = vshll.u32 %v15482_v34, 16  ;;  %v17293_v35 = vld [vmem:[#allocation42_spill] sm:$0xff] }
 0x52d   : > { %7077 = vmatmul.bf16.gmra.mxu1 %v17290_v25  ;;  %v15469_v0 = vadd.f32 %v6092_v46, %v5887_v50 }
 0x52e   : > { %v6831_v56 = vpop.f32.mrf.mxu0  ;;  %v6697_v22 = vsel %vm2793_vm6, %v6687_v19, %v6696_v8  ;;  %v7417_v19 = vshrl.u32 %v15460_v6, 16 }
 0x52f   : > { %v15466_v29 = vadd.f32 %v6831_v56, %v6516_v1  ;;  %v6447_v62 = vpop.f32.mrf.mxu3  ;;  %v7416_v1 = vsel %vm699_vm3, %v7411_v44, %v7415_v9 }
 0x530   : > { %v6519_v21 = vadd.f32 %v6447_v62, %v15312_v57  ;;  %v6336_v57 = vrot.slane %v12259_v15, 2 }
 0x532   : > { %v5835_v7 = vpop.f32.mrf.mxu1 }
 0x533   : > { %v6099_v31 = vpop.f32.mrf.mxu2  ;;  %v5888_v14 = vadd.f32 %v5835_v7, %v15239_v47  ;;  %v6337_v47 = vsel %vm2172_vm4, %v6334_v28, %v6336_v57 }
 0x535   : > { %v15476_v46 = vadd.f32 %v6094_v51, %v5888_v14 }
 0x536   : > { %v6834_v36 = vpop.f32.mrf.mxu0 }
 0x537   : > { %v15474_v56 = vadd.f32 %v6834_v36, %v6517_v52  ;;  %v6449_v50 = vpop.f32.mrf.mxu3  ;;  %v6699_v52 = vshrl.u32 %v12258_v20, 16  ;;  %v6702_v36 = vshll.u32 %v12258_v20, 16  ;;  %v7419_v20 = vor.u32 %v7417_v19, %v7415_v9  ;;  %v15507_v19 = vld [vmem:[%s12356_s24 + $0x38] sm:$0xff] }
 0x538   : > { %v6520_v12 = vadd.f32 %v6449_v50, %v15318_v23  ;;  %11428 = vmatmul.msk.bf16.gmra.mxu2 %vm860_vm1, %v7416_v1  ;;  %v7423_v50 = vrot.slane %v7421_v5, 1  ;;  %v6708_v5 = vshrl.u32 %v12259_v15, 16 }
 0x539   : > { %17291 = vst [vmem:[#allocation41_spill] sm:$0xff] %v15474_v56  ;;  %6873 = vmatmul.bf16.gmra.mxu0 %v6697_v22  ;;  %v6701_v28 = vrot.slane %v6699_v52, 2  ;;  %v6704_v14 = vrot.slane %v6702_v36, 3  ;;  %v12260_v36 = vld [vmem:[#allocation3 + $0x98] sm:$0xff] }
 0x53a   : > { %v5838_v11 = vpop.f32.mrf.mxu1 }
 0x53b   : > { %v6102_v25 = vpop.f32.mrf.mxu2  ;;  %v5889_v51 = vadd.f32 %v5838_v11, %v15246_v32 }
 0x53c   : > { %6491 = vmatmul.bf16.gmra.mxu3 %v6337_v47  ;;  %v6705_v47 = vor.u32 %v6704_v14, %v6701_v28  ;;  %v7425_v28 = vshrl.u32 %v15482_v34, 16  ;;  %v7429_v14 = vshll.u32 %v15507_v19, 16 }
 0x53d   : > { %7082 = vmatmul.bf16.gmra.mxu1 %v17293_v35  ;;  %v15491_v44 = vadd.f32 %v6097_v48, %v5889_v51 }
 0x53e   : > { %v6836_v62 = vpop.f32.mrf.mxu0  ;;  %v6706_v52 = vsel %vm2793_vm6, %v6696_v8, %v6705_v47  ;;  %v6711_v8 = vshll.u32 %v12259_v15, 16 }
 0x53f   : > { %v15488_v23 = vadd.f32 %v6836_v62, %v6518_v58  ;;  %v6452_v7 = vpop.f32.mrf.mxu3  ;;  %v7424_v58 = vsel %vm699_vm3, %v7419_v20, %v7423_v50 }
 0x540   : > { %v6521_v1 = vadd.f32 %v6452_v7, %v15331_v4  ;;  %v6338_v4 = vrot.slane %v12260_v36, 2 }
 0x541   : > { %17292 = vst [vmem:[#allocation6_spill] sm:$0xff] %v15488_v23 }
 0x542   : > { %v5840_v22 = vpop.f32.mrf.mxu1 }
 0x543   : > { %v6104_v32 = vpop.f32.mrf.mxu2  ;;  %v5890_v11 = vadd.f32 %v5840_v22, %v15255_v60  ;;  %v12025_v60 = vld [vmem:[%s17004_s6] sm:$0xff]  ;;  %v17295_v22 = vld [vmem:[#allocation45_spill] sm:$0xff] }
 0x544   : > { %7741 = vmatpush.bf16.msrb.mxu3 %v12025_v60  ;;  %v7427_v60 = vor.u32 %v7425_v28, %v7423_v50 }
 0x545   : > { %v15498_v48 = vadd.f32 %v6099_v31, %v5890_v11 }
 0x546   : > { %v6839_v56 = vpop.f32.mrf.mxu0 }
 0x547   : > { %v15496_v62 = vadd.f32 %v6839_v56, %v6519_v21  ;;  %v6454_v51 = vpop.f32.mrf.mxu3  ;;  %v6339_v21 = vsel %vm2172_vm4, %v6336_v57, %v6338_v4 }
 0x548   : > { %v6522_v9 = vadd.f32 %v6454_v51, %v15343_v27  ;;  %11429 = vmatmul.msk.bf16.gmra.mxu2 %vm860_vm1, %v7424_v58  ;;  %v6194_v27 = vld [vmem:[#allocation3 + $0xa0] sm:$0x3]  ;;  %v6710_v58 = vrot.slane %v6708_v5, 2  ;;  %v6713_v51 = vrot.slane %v6711_v8, 3 }
 0x549   : > { %17294 = vst [vmem:[#allocation44_spill] sm:$0xff] %v15496_v62  ;;  %6878 = vmatmul.bf16.gmra.mxu0 %v6706_v52  ;;  %v6285_v52 = vunpack.c.l.b16 %v6194_v27  ;;  %v15529_v27 = vld [vmem:[%s12356_s24 + $0x40] sm:$0xff] }
 0x54a   : > { %v5843_v31 = vpop.f32.mrf.mxu1  ;;  %v6714_v62 = vor.u32 %v6713_v51, %v6710_v58  ;;  %v17296_v51 = vld [vmem:[#allocation47_spill] sm:$0xff] }
 0x54b   : > { %v6107_v56 = vpop.f32.mrf.mxu2  ;;  %v5891_v35 = vadd.f32 %v5843_v31, %v15262_v16  ;;  %v7431_v16 = vrot.slane %v7429_v14, 1  ;;  %v6304_v23 = vpack.c.b16 %v6285_v52, %v6285_v52 }
 0x54c   : > { %6496 = vmatmul.bf16.gmra.mxu3 %v6339_v21  ;;  %v6715_v8 = vsel %vm2793_vm6, %v6705_v47, %v6714_v62  ;;  %v7433_v47 = vshrl.u32 %v15507_v19, 16 }
 0x54d   : > { %7087 = vmatmul.bf16.gmra.mxu1 %v17295_v22  ;;  %v15516_v11 = vadd.f32 %v6102_v25, %v5891_v35  ;;  %v7432_v22 = vsel %vm699_vm3, %v7427_v60, %v7431_v16 }
 0x54e   : > { %v6841_v7 = vpop.f32.mrf.mxu0 }
 0x54f   : > { %v15513_v20 = vadd.f32 %v6841_v7, %v6520_v12  ;;  %v6457_v57 = vpop.f32.mrf.mxu3 }
 0x550   : > { %v6523_v15 = vadd.f32 %v6457_v57, %v15374_v53  ;;  %v6340_v53 = vrot.slane %v6304_v23, 2  ;;  %v6717_v57 = vshrl.u32 %v12260_v36, 16  ;;  %v7437_v23 = vshll.u32 %v15529_v27, 16 }
 0x552   : > { %v5845_v21 = vpop.f32.mrf.mxu1 }
 0x553   : > { %v6109_v31 = vpop.f32.mrf.mxu2  ;;  %v5892_v12 = vadd.f32 %v5845_v21, %v15274_v49  ;;  %v6341_v49 = vsel %vm2172_vm4, %v6338_v4, %v6340_v53  ;;  %v6719_v4 = vrot.slane %v6717_v57, 2 }
 0x555   : > { %v15523_v35 = vadd.f32 %v6104_v32, %v5892_v12 }
 0x556   : > { %v6844_v7 = vpop.f32.mrf.mxu0 }
 0x557   : > { %v15521_v25 = vadd.f32 %v6844_v7, %v6521_v1  ;;  %v6459_v5 = vpop.f32.mrf.mxu3  ;;  %v6720_v1 = vshll.u32 %v12260_v36, 16  ;;  %v7435_v36 = vor.u32 %v7433_v47, %v7431_v16  ;;  %v7439_v7 = vrot.slane %v7437_v23, 1  ;;  %v12029_v16 = vld [vmem:[%s17004_s6 + $0x20] sm:$0xff] }
 0x558   : > { %v6524_v50 = vadd.f32 %v6459_v5, %v15384_v3  ;;  %11430 = vmatmul.msk.bf16.gmra.mxu2 %vm860_vm1, %v7432_v22  ;;  %7952 = vmatpush.bf16.msrb.mxu0 %v12029_v16  ;;  %v7441_v47 = vshrl.u32 %v15529_v27, 16 }
 0x559   : > { %6883 = vmatmul.bf16.gmra.mxu0 %v6715_v8  ;;  %v6722_v21 = vrot.slane %v6720_v1, 3 }
 0x55a   : > { %v5848_v28 = vpop.f32.mrf.mxu1 }
 0x55b   : > { %v6112_v14 = vpop.f32.mrf.mxu2  ;;  %v5893_v32 = vadd.f32 %v5848_v28, %v15281_v63  ;;  %v6723_v5 = vor.u32 %v6722_v21, %v6719_v4 }
 0x55c   : > { %6501 = vmatmul.bf16.gmra.mxu3 %v6341_v49 }
 0x55d   : > { %7092 = vmatmul.bf16.gmra.mxu1 %v17296_v51  ;;  %v15538_v52 = vadd.f32 %v6107_v56, %v5893_v32  ;;  %v6724_v57 = vsel %vm2793_vm6, %v6714_v62, %v6723_v5  ;;  %v17297_v32 = vld [vmem:[#allocation31_spill] sm:$0xff] }
 0x55e   : > { %v6846_v58 = vpop.f32.mrf.mxu0 }
 0x55f   : > { %v15535_v3 = vadd.f32 %v6846_v58, %v6522_v9  ;;  %v6462_v60 = vpop.f32.mrf.mxu3  ;;  %v7440_v9 = vsel %vm699_vm3, %v7435_v36, %v7439_v7  ;;  %v6729_v58 = vshll.u32 %v17297_v32, 16 }
 0x560   : > { %v6525_v12 = vadd.f32 %v6462_v60, %v15403_v24  ;;  %v17298_v60 = vld [vmem:[#allocation8_spill] sm:$0xff] }
 0x562   : > { %v5850_v63 = vpop.f32.mrf.mxu1 }
 0x563   : > { %v6114_v22 = vpop.f32.mrf.mxu2  ;;  %v5894_v8 = vadd.f32 %v5850_v63, %v15290_v40  ;;  %v15554_v40 = vld [vmem:[%s12356_s24 + $0x48] sm:$0xff]  ;;  %v6731_v63 = vrot.slane %v6729_v58, 3  ;;  %v12199_v58 = vld [vmem:[%s12356_s24] sm:$0xf0] }
 0x564   : > { %v7445_v23 = vshll.u32 %v15554_v40, 16 }
 0x565   : > { %v15545_v56 = vadd.f32 %v6109_v31, %v5894_v8  ;;  %v6726_v31 = vshrl.u32 %v17297_v32, 16 }
 0x566   : > { %v6849_v53 = vpop.f32.mrf.mxu0 }
 0x567   : > { %v15543_v49 = vadd.f32 %v6849_v53, %v6523_v15  ;;  %v6464_v28 = vpop.f32.mrf.mxu3  ;;  %v6728_v36 = vrot.slane %v6726_v31, 2  ;;  %v15579_v31 = vld [vmem:[%s12356_s24 + $0x50] sm:$0xff] }
 0x568   : > { %v6526_v24 = vadd.f32 %v6464_v28, %v15410_v10  ;;  %11431 = vmatmul.msk.bf16.gmra.mxu2 %vm860_vm1, %v7440_v9 }
 0x569   : > { %6888 = vmatmul.bf16.gmra.mxu0 %v6724_v57  ;;  %v6732_v28 = vor.u32 %v6731_v63, %v6728_v36 }
 0x56a   : > { %v5853_v1 = vpop.f32.mrf.mxu1 }
 0x56b   : > { %v6117_v15 = vpop.f32.mrf.mxu2  ;;  %v5895_v10 = vadd.f32 %v5853_v1, %v15297_v41  ;;  %v7447_v41 = vrot.slane %v7445_v23, 1  ;;  %v7453_v23 = vshll.u32 %v15579_v31, 16 }
 0x56c   : > { %11450 = vmatmul.msk.bf16.vlgmr.msrb.gmra.mxu3 %vm860_vm1, %v15341_v17  ;;  %v7443_v17 = vor.u32 %v7441_v47, %v7439_v7  ;;  %v7449_v47 = vshrl.u32 %v15554_v40, 16 }
 0x56d   : > { %7097 = vmatmul.bf16.gmra.mxu1 %v17298_v60  ;;  %v15566_v4 = vadd.f32 %v6112_v14, %v5895_v10  ;;  %v12200_v10 = vld [vmem:[%s12356_s24] sm:$0xe] }
 0x56e   : > { %v6851_v62 = vpop.f32.mrf.mxu0  ;;  %v7448_v16 = vsel %vm699_vm3, %v7443_v17, %v7447_v41  ;;  %v12048_v17 = vld [vmem:[%s17004_s6 + $0x30] sm:$0xff] }
 0x56f   : > { %v15563_v51 = vadd.f32 %v6851_v62, %v6524_v50  ;;  %v6467_v21 = vpop.f32.mrf.mxu3  ;;  %8325 = vmatpush.bf16.msrb.mxu1 %v12048_v17 }
 0x570   : > { %v6527_v8 = vadd.f32 %v6467_v21, %v15425_v59  ;;  %v6733_v59 = vsel %vm2793_vm6, %v6723_v5, %v6732_v28  ;;  %v12201_v5 = vor.u32 %v12200_v10, %v12199_v58  ;;  %v17299_v21 = vld [vmem:[#allocation12_spill] sm:$0xff]  ;;  %v7843_v28 = vrot.slane %v15356_v2, 1 }
 0x572   : > { %v5855_v53 = vpop.f32.mrf.mxu1 }
 0x573   : > { %v6119_v9 = vpop.f32.mrf.mxu2  ;;  %v5896_v50 = vadd.f32 %v5855_v53, %v15309_v37  ;;  %v7842_v53 = vrot.slane %v12201_v5, 1  ;;  %v17301_v5 = vld [vmem:[#allocation13_spill] sm:$0xff] }
 0x575   : > { %v15573_v1 = vadd.f32 %v6114_v22, %v5896_v50  ;;  %v12050_v22 = vld [vmem:[%s17004_s6 + $0x40] sm:$0xff]  ;;  %v7451_v50 = vor.u32 %v7449_v47, %v7447_v41  ;;  %v15616_v41 = vld [vmem:[%s12356_s24 + $0x58] sm:$0xff] }
 0x576   : > { %v6854_v57 = vpop.f32.mrf.mxu0  ;;  %8705 = vmatpush.bf16.msrb.mxu2 %v12050_v22  ;;  %v7457_v22 = vshrl.u32 %v15579_v31, 16 }
 0x577   : > { %v15571_v14 = vadd.f32 %v6854_v57, %v6525_v12  ;;  %v6469_v32 = vpop.f32.mrf.mxu3  ;;  %v7455_v57 = vrot.slane %v7453_v23, 1 }
 0x578   : > { %v6528_v7 = vadd.f32 %v6469_v32, %v15432_v55  ;;  %11432 = vmatmul.msk.bf16.gmra.mxu2 %vm860_vm1, %v7448_v16 }
 0x579   : > { %6893 = vmatmul.bf16.gmra.mxu0 %v6733_v59  ;;  %v7844_v59 = vsel %vm1170_vm2, %v7842_v53, %v7843_v28 }
 0x57a   : > { %v5858_v37 = vpop.f32.mrf.mxu1 }
 0x57b   : > { %v15583_v62 = vpop.f32.mrf.mxu2  ;;  %v5897_v12 = vadd.f32 %v5858_v37, %v15316_v39 }
 0x57c   : > { %11451 = vmatmul.msk.bf16.gmra.mxu3 %vm860_vm1, %v15356_v2 }
 0x57d   : > { %7102 = vmatmul.bf16.gmra.mxu1 %v17299_v21  ;;  %v15596_v36 = vadd.f32 %v6117_v15, %v5897_v12  ;;  %v7845_v21 = vrot.slane %v15390_v26, 1 }
 0x57e   : > { %v6856_v55 = vpop.f32.mrf.mxu0 }
 0x57f   : > { %v15593_v60 = vadd.f32 %v6856_v55, %v6526_v24  ;;  %v6472_v63 = vpop.f32.mrf.mxu3 }
 0x580   : > { %v6529_v39 = vadd.f32 %v6472_v63, %v15447_v54  ;;  %v7456_v54 = vsel %vm699_vm3, %v7451_v50, %v7455_v57  ;;  %v7459_v63 = vor.u32 %v7457_v22, %v7455_v57 }
 0x582   : > { %v5860_v24 = vpop.f32.mrf.mxu1 }
 0x583   : > { %v15603_v16 = vpop.f32.mrf.mxu2  ;;  %v5898_v15 = vadd.f32 %v5860_v24, %v15328_v42 }
 0x585   : > { %v15610_v10 = vadd.f32 %v6119_v9, %v5898_v15 }
 0x586   : > { %v6859_v32 = vpop.f32.mrf.mxu0 }
 0x587   : > { %v15608_v58 = vadd.f32 %v6859_v32, %v6527_v8  ;;  %v6474_v37 = vpop.f32.mrf.mxu3 }
 0x588   : > { %v6530_v2 = vadd.f32 %v6474_v37, %v15454_v61  ;;  %11433 = vmatmul.msk.bf16.gmra.mxu2 %vm860_vm1, %v7456_v54  ;;  %v7461_v61 = vshll.u32 %v15616_v41, 16 }
 0x589   : > { %11480 = vmatmul.msk.bf16.vlgmr.msrb.gmra.mxu0 %vm860_vm1, %v7844_v59 }
 0x58a   : > { %v7068_v12 = vpop.f32.mrf.mxu1  ;;  %v7463_v17 = vrot.slane %v7461_v61, 1  ;;  %v7847_v61 = vrot.slane %v15416_v45, 1 }
 0x58b   : > { %v15618_v42 = vpop.f32.mrf.mxu2  ;;  %v15623_v8 = vadd.f32 %v7068_v12, %v15338_v43  ;;  %v17304_v12 = vld [vmem:[#allocation15_spill] sm:$0xff] }
 0x58c   : > { %11452 = vmatmul.msk.bf16.gmra.mxu3 %vm860_vm1, %v15390_v26  ;;  %v7464_v15 = vsel %vm699_vm3, %v7459_v63, %v7463_v17  ;;  %v15645_v26 = vld [vmem:[%s12356_s24 + $0x60] sm:$0xff] }
 0x58d   : > { %17300 = vst [vmem:[#allocation33_spill] sm:$0xff] %v15623_v8  ;;  %7107 = vmatmul.bf16.gmra.mxu1 %v17301_v5 }
 0x58e   : > { %v6861_v9 = vpop.f32.mrf.mxu0 }
 0x58f   : > { %v15627_v55 = vadd.f32 %v6861_v9, %v6528_v7  ;;  %v6477_v47 = vpop.f32.mrf.mxu3  ;;  %v7846_v7 = vsel %vm1170_vm2, %v7843_v28, %v7845_v21  ;;  %v7465_v28 = vshrl.u32 %v15616_v41, 16 }
 0x590   : > { %v6531_v23 = vadd.f32 %v6477_v47, %v15469_v0 }
 0x591   : > { %v7467_v5 = vor.u32 %v7465_v28, %v7463_v17 }
 0x592   : > { %v7070_v53 = vpop.f32.mrf.mxu1 }
 0x593   : > { %v15632_v43 = vpop.f32.mrf.mxu2  ;;  %v15635_v50 = vadd.f32 %v7070_v53, %v15371_v18  ;;  %v17305_v53 = vld [vmem:[#allocation36_spill] sm:$0xff] }
 0x595   : > { %17302 = vst [vmem:[#allocation48_spill] sm:$0xff] %v15635_v50 }
 0x596   : > { %v6864_v24 = vpop.f32.mrf.mxu0 }
 0x597   : > { %v15639_v32 = vadd.f32 %v6864_v24, %v6529_v39  ;;  %v6479_v59 = vpop.f32.mrf.mxu3 }
 0x598   : > { %v6532_v0 = vadd.f32 %v6479_v59, %v15476_v46  ;;  %11434 = vmatmul.msk.bf16.gmra.mxu2 %vm860_vm1, %v7464_v15  ;;  %v7469_v46 = vshll.u32 %v15645_v26, 16 }
 0x599   : > { %11481 = vmatmul.msk.bf16.gmra.mxu0 %vm860_vm1, %v7846_v7 }
 0x59a   : > { %v7073_v57 = vpop.f32.mrf.mxu1  ;;  %v7471_v47 = vrot.slane %v7469_v46, 1  ;;  %v7473_v46 = vshrl.u32 %v15645_v26, 16 }
 0x59b   : > { %v15647_v54 = vpop.f32.mrf.mxu2  ;;  %v15652_v18 = vadd.f32 %v7073_v57, %v15382_v38 }
 0x59c   : > { %11453 = vmatmul.msk.bf16.gmra.mxu3 %vm860_vm1, %v15416_v45  ;;  %v7472_v15 = vsel %vm699_vm3, %v7467_v5, %v7471_v47  ;;  %v15674_v45 = vld [vmem:[%s12356_s24 + $0x68] sm:$0xff] }
 0x59d   : > { %17303 = vst [vmem:[#allocation46_spill] sm:$0xff] %v15652_v18  ;;  %7112 = vmatmul.bf16.gmra.mxu1 %v17304_v12 }
 0x59e   : > { %v6866_v39 = vpop.f32.mrf.mxu0 }
 0x59f   : > { %v15656_v37 = vadd.f32 %v6866_v39, %v6530_v2  ;;  %v6482_v9 = vpop.f32.mrf.mxu3  ;;  %v7848_v2 = vsel %vm1170_vm2, %v7845_v21, %v7847_v61  ;;  %v17307_v21 = vld [vmem:[#allocation5_spill] sm:$0xff] }
 0x5a0   : > { %v6533_v22 = vadd.f32 %v6482_v9, %v15491_v44  ;;  %v17309_v9 = vld [vmem:[#allocation18_spill] sm:$0xff] }
 0x5a2   : > { %v7075_v63 = vpop.f32.mrf.mxu1 }
 0x5a3   : > { %v15661_v38 = vpop.f32.mrf.mxu2  ;;  %v15664_v24 = vadd.f32 %v7075_v63, %v17305_v53  ;;  %v7849_v53 = vrot.slane %v15438_v30, 1 }
 0x5a5   : > { %17306 = vst [vmem:[#allocation9_spill] sm:$0xff] %v15664_v24 }
 0x5a6   : > { %v6869_v7 = vpop.f32.mrf.mxu0 }
 0x5a7   : > { %v15668_v59 = vadd.f32 %v6869_v7, %v6531_v23  ;;  %v6484_v57 = vpop.f32.mrf.mxu3  ;;  %v7475_v7 = vor.u32 %v7473_v46, %v7471_v47 }
 0x5a8   : > { %v6534_v44 = vadd.f32 %v6484_v57, %v15498_v48  ;;  %11435 = vmatmul.msk.bf16.gmra.mxu2 %vm860_vm1, %v7472_v15  ;;  %v7477_v48 = vshll.u32 %v15674_v45, 16 }
 0x5a9   : > { %11482 = vmatmul.msk.bf16.gmra.mxu0 %vm860_vm1, %v7848_v2 }
 0x5aa   : > { %v7078_v17 = vpop.f32.mrf.mxu1  ;;  %v7479_v2 = vrot.slane %v7477_v48, 1  ;;  %v7481_v48 = vshrl.u32 %v15674_v45, 16 }
 0x5ab   : > { %v15676_v39 = vpop.f32.mrf.mxu2  ;;  %v15681_v28 = vadd.f32 %v7078_v17, %v17307_v21 }
 0x5ac   : > { %11454 = vmatmul.msk.bf16.gmra.mxu3 %vm860_vm1, %v15438_v30  ;;  %v15703_v30 = vld [vmem:[%s12356_s24 + $0x70] sm:$0xff] }
 0x5ad   : > { %17308 = vst [vmem:[#allocation7_spill] sm:$0xff] %v15681_v28  ;;  %7117 = vmatmul.bf16.gmra.mxu1 %v17309_v9 }
 0x5ae   : > { %v6871_v23 = vpop.f32.mrf.mxu0 }
 0x5af   : > { %v15685_v12 = vadd.f32 %v6871_v23, %v6532_v0  ;;  %v6487_v5 = vpop.f32.mrf.mxu3  ;;  %v7850_v0 = vsel %vm1170_vm2, %v7847_v61, %v7849_v53  ;;  %v7480_v23 = vsel %vm699_vm3, %v7475_v7, %v7479_v2 }
 0x5b0   : > { %v6535_v63 = vadd.f32 %v6487_v5, %v15516_v11  ;;  %v17313_v5 = vld [vmem:[#allocation24_spill] sm:$0xff] }
 0x5b2   : > { %v7080_v15 = vpop.f32.mrf.mxu1 }
 0x5b3   : > { %v15690_v57 = vpop.f32.mrf.mxu2  ;;  %v15693_v17 = vadd.f32 %v7080_v15, %v15422_v13  ;;  %v17311_v13 = vld [vmem:[#allocation4_spill] sm:$0xff] }
 0x5b5   : > { %17310 = vst [vmem:[#allocation10_spill] sm:$0xff] %v15693_v17 }
 0x5b6   : > { %v6874_v21 = vpop.f32.mrf.mxu0 }
 0x5b7   : > { %v15697_v9 = vadd.f32 %v6874_v21, %v6533_v22  ;;  %v6489_v28 = vpop.f32.mrf.mxu3  ;;  %v7851_v21 = vrot.slane %v15460_v6, 1 }
 0x5b8   : > { %v6536_v11 = vadd.f32 %v6489_v28, %v15523_v35  ;;  %11436 = vmatmul.msk.bf16.gmra.mxu2 %vm860_vm1, %v7480_v23  ;;  %v7485_v35 = vshll.u32 %v15703_v30, 16 }
 0x5b9   : > { %11483 = vmatmul.msk.bf16.gmra.mxu0 %vm860_vm1, %v7850_v0  ;;  %v7483_v0 = vor.u32 %v7481_v48, %v7479_v2 }
 0x5ba   : > { %v7083_v47 = vpop.f32.mrf.mxu1  ;;  %v7487_v23 = vrot.slane %v7485_v35, 1 }
 0x5bb   : > { %v15705_v46 = vpop.f32.mrf.mxu2  ;;  %v15710_v61 = vadd.f32 %v7083_v47, %v17311_v13 }
 0x5bc   : > { %11455 = vmatmul.msk.bf16.gmra.mxu3 %vm860_vm1, %v15460_v6  ;;  %v15732_v6 = vld [vmem:[%s12356_s24 + $0x78] sm:$0xff] }
 0x5bd   : > { %17312 = vst [vmem:[#allocation38_spill] sm:$0xff] %v15710_v61  ;;  %7122 = vmatmul.bf16.gmra.mxu1 %v17313_v5 }
 0x5be   : > { %v6876_v22 = vpop.f32.mrf.mxu0 }
 0x5bf   : > { %v15714_v28 = vadd.f32 %v6876_v22, %v6534_v44  ;;  %v6492_v7 = vpop.f32.mrf.mxu3  ;;  %v7852_v44 = vsel %vm1170_vm2, %v7849_v53, %v7851_v21  ;;  %v7488_v22 = vsel %vm699_vm3, %v7483_v0, %v7487_v23  ;;  %v7853_v0 = vrot.slane %v15482_v34, 1 }
 0x5c0   : > { %v6537_v15 = vadd.f32 %v6492_v7, %v15538_v52 }
 0x5c2   : > { %v7085_v17 = vpop.f32.mrf.mxu1 }
 0x5c3   : > { %v15719_v47 = vpop.f32.mrf.mxu2  ;;  %v15722_v13 = vadd.f32 %v7085_v17, %v15444_v33  ;;  %v17315_v33 = vld [vmem:[#allocation43_spill] sm:$0xff]  ;;  %v7489_v17 = vshrl.u32 %v15703_v30, 16 }
 0x5c5   : > { %17314 = vst [vmem:[#allocation16_spill] sm:$0xff] %v15722_v13 }
 0x5c6   : > { %v6879_v61 = vpop.f32.mrf.mxu0 }
 0x5c7   : > { %v15726_v5 = vadd.f32 %v6879_v61, %v6535_v63  ;;  %v6494_v24 = vpop.f32.mrf.mxu3  ;;  %v17317_v61 = vld [vmem:[#allocation23_spill] sm:$0xff] }
 0x5c8   : > { %v6538_v52 = vadd.f32 %v6494_v24, %v15545_v56  ;;  %11437 = vmatmul.msk.bf16.gmra.mxu2 %vm860_vm1, %v7488_v22  ;;  %v7493_v56 = vshll.u32 %v15732_v6, 16 }
 0x5c9   : > { %11484 = vmatmul.msk.bf16.gmra.mxu0 %vm860_vm1, %v7852_v44  ;;  %v7491_v44 = vor.u32 %v7489_v17, %v7487_v23 }
 0x5ca   : > { %v7088_v2 = vpop.f32.mrf.mxu1  ;;  %v7495_v22 = vrot.slane %v7493_v56, 1 }
 0x5cb   : > { %v15734_v48 = vpop.f32.mrf.mxu2  ;;  %v15739_v53 = vadd.f32 %v7088_v2, %v17315_v33 }
 0x5cc   : > { %11456 = vmatmul.msk.bf16.gmra.mxu3 %vm860_vm1, %v15482_v34  ;;  %v15761_v34 = vld [vmem:[%s12356_s24 + $0x80] sm:$0xff] }
 0x5cd   : > { %17316 = vst [vmem:[#allocation11_spill] sm:$0xff] %v15739_v53  ;;  %7127 = vmatmul.bf16.gmra.mxu1 %v17317_v61 }
 0x5ce   : > { %v6881_v63 = vpop.f32.mrf.mxu0 }
 0x5cf   : > { %v15743_v24 = vadd.f32 %v6881_v63, %v6536_v11  ;;  %v6497_v35 = vpop.f32.mrf.mxu3  ;;  %v7854_v11 = vsel %vm1170_vm2, %v7851_v21, %v7853_v0  ;;  %v7496_v63 = vsel %vm699_vm3, %v7491_v44, %v7495_v22  ;;  %v7855_v44 = vrot.slane %v15507_v19, 1 }
 0x5d0   : > { %v6539_v7 = vadd.f32 %v6497_v35, %v15566_v4 }
 0x5d2   : > { %v7090_v13 = vpop.f32.mrf.mxu1 }
 0x5d3   : > { %v15748_v2 = vpop.f32.mrf.mxu2  ;;  %v15751_v33 = vadd.f32 %v7090_v13, %v15466_v29  ;;  %v17319_v29 = vld [vmem:[#allocation41_spill] sm:$0xff]  ;;  %v7497_v13 = vshrl.u32 %v15732_v6, 16 }
 0x5d5   : > { %17318 = vst [vmem:[#allocation17_spill] sm:$0xff] %v15751_v33 }
 0x5d6   : > { %v6884_v53 = vpop.f32.mrf.mxu0 }
 0x5d7   : > { %v15755_v61 = vadd.f32 %v6884_v53, %v6537_v15  ;;  %v6499_v18 = vpop.f32.mrf.mxu3  ;;  %v17321_v53 = vld [vmem:[#allocation28_spill] sm:$0xff] }
 0x5d8   : > { %v6540_v4 = vadd.f32 %v6499_v18, %v15573_v1  ;;  %11438 = vmatmul.msk.bf16.gmra.mxu2 %vm860_vm1, %v7496_v63  ;;  %v7501_v1 = vshll.u32 %v15761_v34, 16 }
 0x5d9   : > { %11485 = vmatmul.msk.bf16.gmra.mxu0 %vm860_vm1, %v7854_v11  ;;  %v7499_v11 = vor.u32 %v7497_v13, %v7495_v22 }
 0x5da   : > { %v7093_v23 = vpop.f32.mrf.mxu1  ;;  %v7503_v63 = vrot.slane %v7501_v1, 1  ;;  %v17328_v1 = vld [vmem:[#allocation26_spill] sm:$0xff] }
 0x5db   : > { %v15763_v17 = vpop.f32.mrf.mxu2  ;;  %v15768_v21 = vadd.f32 %v7093_v23, %v17319_v29  ;;  %v17322_v29 = vld [vmem:[#allocation6_spill] sm:$0xff] }
 0x5dc   : > { %11457 = vmatmul.msk.bf16.gmra.mxu3 %vm860_vm1, %v15507_v19  ;;  %v15790_v19 = vld [vmem:[%s12356_s24 + $0x88] sm:$0xff] }
 0x5dd   : > { %17320 = vst [vmem:[#allocation14_spill] sm:$0xff] %v15768_v21  ;;  %7132 = vmatmul.bf16.gmra.mxu1 %v17321_v53 }
 0x5de   : > { %v6886_v15 = vpop.f32.mrf.mxu0 }
 0x5df   : > { %v15772_v18 = vadd.f32 %v6886_v15, %v6538_v52  ;;  %v6502_v56 = vpop.f32.mrf.mxu3  ;;  %v7856_v52 = vsel %vm1170_vm2, %v7853_v0, %v7855_v44  ;;  %v7504_v15 = vsel %vm699_vm3, %v7499_v11, %v7503_v63  ;;  %v17325_v0 = vld [vmem:[#allocation44_spill] sm:$0xff]  ;;  %v7857_v11 = vrot.slane %v15529_v27, 1 }
 0x5e0   : > { %v6541_v35 = vadd.f32 %v6502_v56, %v15596_v36 }
 0x5e2   : > { %v7095_v33 = vpop.f32.mrf.mxu1 }
 0x5e3   : > { %v15777_v23 = vpop.f32.mrf.mxu2  ;;  %v15780_v21 = vadd.f32 %v7095_v33, %v17322_v29 }
 0x5e5   : > { %17323 = vst [vmem:[#allocation19_spill] sm:$0xff] %v15780_v21 }
 0x5e6   : > { %v6889_v50 = vpop.f32.mrf.mxu0 }
 0x5e7   : > { %v15784_v53 = vadd.f32 %v6889_v50, %v6539_v7  ;;  %v6504_v8 = vpop.f32.mrf.mxu3  ;;  %v7505_v7 = vshrl.u32 %v15761_v34, 16 }
 0x5e8   : > { %v6542_v36 = vadd.f32 %v6504_v8, %v15610_v10  ;;  %11439 = vmatmul.msk.bf16.gmra.mxu2 %vm860_vm1, %v7504_v15  ;;  %v7509_v10 = vshll.u32 %v15790_v19, 16  ;;  %v7274_v15 = vld [vmem:[%s12356_s24 + $0x90] sm:$0x1] }
 0x5e9   : > { %17324 = vst [vmem:[#allocation20_spill] sm:$0xff] %v15784_v53  ;;  %11486 = vmatmul.msk.bf16.gmra.mxu0 %vm860_vm1, %v7856_v52  ;;  %v7507_v29 = vor.u32 %v7505_v7, %v7503_v63 }
 0x5ea   : > { %v7098_v22 = vpop.f32.mrf.mxu1  ;;  %v7511_v52 = vrot.slane %v7509_v10, 1 }
 0x5eb   : > { %v15792_v33 = vpop.f32.mrf.mxu2  ;;  %v15797_v13 = vadd.f32 %v7098_v22, %v17325_v0 }
 0x5ec   : > { %11458 = vmatmul.msk.bf16.gmra.mxu3 %vm860_vm1, %v15529_v27 }
 0x5ed   : > { %17326 = vst [vmem:[#allocation21_spill] sm:$0xff] %v15797_v13  ;;  %7137 = vmatmul.bf16.gmra.mxu1 %v17328_v1  ;;  %v7858_v13 = vsel %vm1170_vm2, %v7855_v44, %v7857_v11  ;;  %v7513_v44 = vshrl.u32 %v15790_v19, 16 }
 0x5ee   : > { %v6891_v50 = vpop.f32.mrf.mxu0 }
 0x5ef   : > { %v15801_v8 = vadd.f32 %v6891_v50, %v6540_v4  ;;  %v7743_v56 = vpop.f32.mrf.mxu3  ;;  %v7512_v4 = vsel %vm699_vm3, %v7507_v29, %v7511_v52  ;;  %v7353_v50 = vunpack.c.l.b16 %v7274_v15  ;;  %v7859_v15 = vrot.slane %v15554_v40, 1 }
 0x5f1   : > { %17327 = vst [vmem:[#allocation22_spill] sm:$0xff] %v15801_v8  ;;  %v15817_v27 = vpack.c.b16 %v7353_v50, %v7353_v50  ;;  %v7515_v50 = vor.u32 %v7513_v44, %v7511_v52 }
 0x5f2   : > { %v7100_v21 = vpop.f32.mrf.mxu1 }
 0x5f3   : > { %v15806_v53 = vpop.f32.mrf.mxu2  ;;  %v15809_v22 = vadd.f32 %v7100_v21, %v15513_v20  ;;  %17331 = vst [vmem:[#allocation29_spill] sm:$0xff] %v15817_v27  ;;  %v7517_v7 = vshll.u32 %v15817_v27, 16  ;;  %v15846_v27 = vld [vmem:[%s12356_s24 + $0x10] sm:$0xff] }
 0x5f5   : > { %17329 = vst [vmem:[#allocation27_spill] sm:$0xff] %v15809_v22  ;;  %v7519_v22 = vrot.slane %v7517_v7, 1 }
 0x5f6   : > { %v6894_v0 = vpop.f32.mrf.mxu0 }
 0x5f7   : > { %v15813_v8 = vadd.f32 %v6894_v0, %v6541_v35  ;;  %v7745_v1 = vpop.f32.mrf.mxu3  ;;  %v8080_v0 = vld [vmem:[%s12356_s24 + $0x8] sm:$0xe] }
 0x5f8   : > { %11440 = vmatmul.msk.bf16.gmra.mxu2 %vm860_vm1, %v7512_v4  ;;  %v15834_v4 = vld [vmem:[%s12356_s24 + $0xc] sm:$0xf] }
 0x5f9   : > { %17330 = vst [vmem:[#allocation25_spill] sm:$0xff] %v15813_v8  ;;  %11487 = vmatmul.msk.bf16.gmra.mxu0 %vm860_vm1, %v7858_v13  ;;  %v17334_v13 = vld [vmem:[#allocation30_spill] sm:$0xff] }
 0x5fa   : > { %v7103_v63 = vpop.f32.mrf.mxu1 }
 0x5fb   : > { %v15819_v20 = vpop.f32.mrf.mxu2  ;;  %v15824_v21 = vadd.f32 %v7103_v63, %v15521_v25  ;;  %v8159_v25 = vunpack.c.l.b16 %v8080_v0  ;;  %v17072_v63 = vunpack.c.l.b16 %v15834_v4 }
 0x5fc   : > { %11459 = vmatmul.msk.bf16.gmra.mxu3 %vm860_vm1, %v15554_v40  ;;  %v7520_v40 = vsel %vm699_vm3, %v7515_v50, %v7519_v22  ;;  %v8471_v22 = vshrl.u32 %v15846_v27, 16  ;;  %v7746_v50 = vadd.f32 %v7745_v1, %v15603_v16  ;;  %v12074_v1 = vld [vmem:[%s17004_s6 + $0x78] sm:$0xff] }
 0x5fd   : > { %17332 = vst [vmem:[#allocation35_spill] sm:$0xff] %v15824_v21  ;;  %7142 = vmatmul.bf16.gmra.mxu1 %v17334_v13  ;;  %v15850_v52 = vpack.c.b16 %v17072_v63, %v8159_v25  ;;  %v12076_v25 = vld [vmem:[%s17004_s6 + $0x88] sm:$0xff] }
 0x5fe   : > { %v6896_v35 = vpop.f32.mrf.mxu0  ;;  %v8473_v63 = vrot.slane %v8471_v22, 1  ;;  %9951 = vmatpush.bf16.msra.mxu2 %v12076_v25  ;;  %9704 = vmatpush.bf16.msra.mxu1 %v12074_v1 }
 0x5ff   : > { %v15828_v10 = vadd.f32 %v6896_v35, %v6542_v36  ;;  %v7748_v29 = vpop.f32.mrf.mxu3  ;;  %v7744_v36 = vadd.f32 %v7743_v56, %v15583_v62  ;;  %v12053_v62 = vld [vmem:[%s17004_s6 + $0x58] sm:$0xff] }
 0x600   : > { %8951 = vmatpush.bf16.msra.mxu3 %v12053_v62 }
 0x601   : > { %17333 = vst [vmem:[#allocation34_spill] sm:$0xff] %v15828_v10  ;;  %v7860_v10 = vsel %vm1170_vm2, %v7857_v11, %v7859_v15  ;;  %v8466_v11 = vshll.u32 %v15850_v52, 16 }
 0x602   : > { %v7105_v21 = vpop.f32.mrf.mxu1 }
 0x603   : > { %v15837_v8 = vpop.f32.mrf.mxu2  ;;  %v15841_v35 = vadd.f32 %v7105_v21, %v15535_v3  ;;  %v8463_v3 = vshrl.u32 %v15850_v52, 16  ;;  %v8474_v21 = vshll.u32 %v15846_v27, 16 }
 0x605   : > { %17335 = vst [vmem:[#allocation37_spill] sm:$0xff] %v15841_v35  ;;  %v8476_v62 = vrot.slane %v8474_v21, 2 }
 0x606   : > { %v7954_v13 = vpop.f32.mrf.mxu0 }
 0x607   : > { %v15852_v44 = vadd.f32 %v7954_v13, %v7744_v36  ;;  %v7750_v56 = vpop.f32.mrf.mxu3  ;;  %v8465_v13 = vrot.slane %v8463_v3, 1  ;;  %v7861_v3 = vrot.slane %v15579_v31, 1  ;;  %v8477_v22 = vor.u32 %v8476_v62, %v8473_v63 }
 0x608   : > { %11441 = vmatmul.msk.bf16.gmra.mxu2 %vm860_vm1, %v7520_v40  ;;  %v8468_v40 = vrot.slane %v8466_v11, 2 }
 0x609   : > { %17336 = vst [vmem:[#allocation39_spill] sm:$0xff] %v15852_v44  ;;  %11488 = vmatmul.msk.bf16.gmra.mxu0 %vm860_vm1, %v7860_v10  ;;  %v17339_v44 = vld [vmem:[#allocation32_spill] sm:$0xff] }
 0x60a   : > { %v7108_v7 = vpop.f32.mrf.mxu1  ;;  %v8469_v11 = vor.u32 %v8468_v40, %v8465_v13 }
 0x60b   : > { %v15863_v0 = vpop.f32.mrf.mxu2  ;;  %v15869_v10 = vadd.f32 %v7108_v7, %v15543_v49  ;;  %v12072_v49 = vld [vmem:[%s17004_s6 + $0x68] sm:$0xff] }
 0x60c   : > { %11460 = vmatmul.msk.bf16.gmra.mxu3 %vm860_vm1, %v15579_v31  ;;  %9324 = vmatpush.bf16.msra.mxu0 %v12072_v49  ;;  %v8478_v49 = vsel %vm1791_vm5, %v8469_v11, %v8477_v22 }
 0x60d   : > { %17337 = vst [vmem:[#allocation40_spill] sm:$0xff] %v15869_v10  ;;  %7147 = vmatmul.bf16.gmra.mxu1 %v17339_v44  ;;  %v7749_v44 = vadd.f32 %v7748_v29, %v15618_v42  ;;  %v15893_v10 = vld [vmem:[%s12356_s24 + $0x18] sm:$0xff] }
 0x60e   : > { %v7956_v36 = vpop.f32.mrf.mxu0  ;;  %v8480_v63 = vshrl.u32 %v15893_v10, 16  ;;  %v8483_v42 = vshll.u32 %v15893_v10, 16 }
 0x60f   : > { %v15874_v35 = vadd.f32 %v7956_v36, %v7746_v50  ;;  %v7753_v16 = vpop.f32.mrf.mxu3  ;;  %v7862_v36 = vsel %vm1170_vm2, %v7859_v15, %v7861_v3  ;;  %v7751_v15 = vadd.f32 %v7750_v56, %v15632_v43 }
 0x610   : > { %v8482_v62 = vrot.slane %v8480_v63, 1  ;;  %v8485_v1 = vrot.slane %v8483_v42, 2  ;;  %v7754_v56 = vadd.f32 %v7753_v16, %v15647_v54 }
 0x611   : > { %17338 = vst [vmem:[#allocation42_spill] sm:$0xff] %v15874_v35 }
 0x612   : > { %v7110_v21 = vpop.f32.mrf.mxu1 }
 0x613   : > { %v15884_v7 = vpop.f32.mrf.mxu2  ;;  %v15888_v50 = vadd.f32 %v7110_v21, %v15563_v51  ;;  %v17342_v21 = vld [vmem:[#allocation49_spill] sm:$0xff] }
 0x615   : > { %17340 = vst [vmem:[#allocation45_spill] sm:$0xff] %v15888_v50 }
 0x616   : > { %v7959_v25 = vpop.f32.mrf.mxu0 }
 0x617   : > { %v15895_v35 = vadd.f32 %v7959_v25, %v7749_v44  ;;  %v7755_v31 = vpop.f32.mrf.mxu3  ;;  %v7863_v25 = vrot.slane %v15616_v41, 1 }
 0x618   : > { %11608 = vmatmul.msk.bf16.vlgmr.msrb.gmra.mxu2 %vm860_vm1, %v8478_v49 }
 0x619   : > { %11489 = vmatmul.msk.bf16.gmra.mxu0 %vm860_vm1, %v7862_v36  ;;  %v8486_v36 = vor.u32 %v8485_v1, %v8482_v62  ;;  %v7864_v63 = vsel %vm1170_vm2, %v7861_v3, %v7863_v25  ;;  %v8216_v62 = vrot.slane %v15846_v27, 1  ;;  %v7756_v1 = vadd.f32 %v7755_v31, %v15661_v38 }
 0x61a   : > { %v7113_v51 = vpop.f32.mrf.mxu1 }
 0x61b   : > { %v15901_v29 = vpop.f32.mrf.mxu2  ;;  %v15907_v13 = vadd.f32 %v7113_v51, %v15571_v14  ;;  %v8487_v42 = vsel %vm1791_vm5, %v8477_v22, %v8486_v36 }
 0x61c   : > { %11461 = vmatmul.msk.bf16.gmra.mxu3 %vm860_vm1, %v15616_v41  ;;  %v8215_v41 = vrot.slane %v15850_v52, 1 }
 0x61d   : > { %17341 = vst [vmem:[#allocation47_spill] sm:$0xff] %v15907_v13  ;;  %7152 = vmatmul.bf16.gmra.mxu1 %v17342_v21 }
 0x61e   : > { %v7961_v40 = vpop.f32.mrf.mxu0  ;;  %v8217_v3 = vsel %vm1170_vm2, %v8215_v41, %v8216_v62  ;;  %v7865_v41 = vrot.slane %v15645_v26, 1 }
 0x61f   : > { %v15909_v11 = vadd.f32 %v7961_v40, %v7751_v15  ;;  %v7758_v44 = vpop.f32.mrf.mxu3  ;;  %v15922_v15 = vld [vmem:[%s12356_s24 + $0x20] sm:$0xff] }
 0x620   : > { %v8492_v54 = vshll.u32 %v15922_v15, 16  ;;  %v7759_v31 = vadd.f32 %v7758_v44, %v15676_v39 }
 0x622   : > { %v7115_v49 = vpop.f32.mrf.mxu1 }
 0x623   : > { %v15913_v43 = vpop.f32.mrf.mxu2  ;;  %v15917_v14 = vadd.f32 %v7115_v49, %v15593_v60  ;;  %v8489_v60 = vshrl.u32 %v15922_v15, 16 }
 0x625   : > { %17343 = vst [vmem:[#allocation31_spill] sm:$0xff] %v15917_v14 }
 0x626   : > { %v7964_v51 = vpop.f32.mrf.mxu0 }
 0x627   : > { %v15924_v40 = vadd.f32 %v7964_v51, %v7754_v56  ;;  %v7760_v21 = vpop.f32.mrf.mxu3  ;;  %v8491_v56 = vrot.slane %v8489_v60, 1  ;;  %v8494_v51 = vrot.slane %v8492_v54, 2  ;;  %v7866_v60 = vsel %vm1170_vm2, %v7863_v25, %v7865_v41 }
 0x628   : > { %11609 = vmatmul.msk.bf16.gmra.mxu2 %vm860_vm1, %v8487_v42 }
 0x629   : > { %11490 = vmatmul.msk.bf16.gmra.mxu0 %vm860_vm1, %v7864_v63  ;;  %v8495_v14 = vor.u32 %v8494_v51, %v8491_v56 }
 0x62a   : > { %v7118_v16 = vpop.f32.mrf.mxu1 }
 0x62b   : > { %v15933_v22 = vpop.f32.mrf.mxu2  ;;  %v15939_v52 = vadd.f32 %v7118_v16, %v15608_v58  ;;  %v8496_v54 = vsel %vm1791_vm5, %v8486_v36, %v8495_v14  ;;  %v7761_v36 = vadd.f32 %v7760_v21, %v15690_v57 }
 0x62c   : > { %11462 = vmatmul.msk.bf16.gmra.mxu3 %vm860_vm1, %v15645_v26  ;;  %v8218_v26 = vrot.slane %v15893_v10, 1 }
 0x62d   : > { %17344 = vst [vmem:[#allocation8_spill] sm:$0xff] %v15939_v52  ;;  %11578 = vmatmul.msk.bf16.vlgmr.msrb.gmra.mxu1 %vm860_vm1, %v8217_v3 }
 0x62e   : > { %v7966_v49 = vpop.f32.mrf.mxu0  ;;  %v8219_v44 = vsel %vm1170_vm2, %v8216_v62, %v8218_v26  ;;  %v7867_v62 = vrot.slane %v15674_v45, 1 }
 0x62f   : > { %v15941_v63 = vadd.f32 %v7966_v49, %v7756_v1  ;;  %v7763_v42 = vpop.f32.mrf.mxu3  ;;  %v15954_v1 = vld [vmem:[%s12356_s24 + $0x28] sm:$0xff] }
 0x630   : > { %v8498_v39 = vshrl.u32 %v15954_v1, 16  ;;  %v7764_v21 = vadd.f32 %v7763_v42, %v15705_v46 }
 0x632   : > { %v7120_v13 = vpop.f32.mrf.mxu1 }
 0x633   : > { %v15945_v38 = vpop.f32.mrf.mxu2  ;;  %v15949_v58 = vadd.f32 %v7120_v13, %v15627_v55  ;;  %v8501_v55 = vshll.u32 %v15954_v1, 16 }
 0x635   : > { %17345 = vst [vmem:[#allocation12_spill] sm:$0xff] %v15949_v58 }
 0x636   : > { %v7969_v16 = vpop.f32.mrf.mxu0 }
 0x637   : > { %v15956_v3 = vadd.f32 %v7969_v16, %v7759_v31  ;;  %v7765_v49 = vpop.f32.mrf.mxu3  ;;  %v8500_v31 = vrot.slane %v8498_v39, 1  ;;  %v8503_v16 = vrot.slane %v8501_v55, 2  ;;  %v7868_v39 = vsel %vm1170_vm2, %v7865_v41, %v7867_v62 }
 0x638   : > { %11610 = vmatmul.msk.bf16.gmra.mxu2 %vm860_vm1, %v8496_v54 }
 0x639   : > { %11491 = vmatmul.msk.bf16.gmra.mxu0 %vm860_vm1, %v7866_v60  ;;  %v8504_v58 = vor.u32 %v8503_v16, %v8500_v31 }
 0x63a   : > { %v7123_v13 = vpop.f32.mrf.mxu1 }
 0x63b   : > { %v15964_v25 = vpop.f32.mrf.mxu2  ;;  %v15970_v56 = vadd.f32 %v7123_v13, %v15639_v32  ;;  %v8505_v55 = vsel %vm1791_vm5, %v8495_v14, %v8504_v58  ;;  %v7766_v14 = vadd.f32 %v7765_v49, %v15719_v47 }
 0x63c   : > { %11463 = vmatmul.msk.bf16.gmra.mxu3 %vm860_vm1, %v15674_v45  ;;  %v8220_v45 = vrot.slane %v15922_v15, 1 }
 0x63d   : > { %17346 = vst [vmem:[#allocation13_spill] sm:$0xff] %v15970_v56  ;;  %11579 = vmatmul.msk.bf16.gmra.mxu1 %vm860_vm1, %v8219_v44 }
 0x63e   : > { %v7971_v51 = vpop.f32.mrf.mxu0  ;;  %v8221_v42 = vsel %vm1170_vm2, %v8218_v26, %v8220_v45  ;;  %v7869_v26 = vrot.slane %v15703_v30, 1 }
 0x63f   : > { %v15972_v60 = vadd.f32 %v7971_v51, %v7761_v36  ;;  %v7768_v54 = vpop.f32.mrf.mxu3  ;;  %v15985_v36 = vld [vmem:[%s12356_s24 + $0x30] sm:$0xff] }
 0x640   : > { %v8507_v46 = vshrl.u32 %v15985_v36, 16  ;;  %v7769_v49 = vadd.f32 %v7768_v54, %v15734_v48 }
 0x642   : > { %v7125_v52 = vpop.f32.mrf.mxu1 }
 0x643   : > { %v15976_v57 = vpop.f32.mrf.mxu2  ;;  %v15980_v32 = vadd.f32 %v7125_v52, %v15656_v37  ;;  %v8510_v37 = vshll.u32 %v15985_v36, 16 }
 0x645   : > { %17347 = vst [vmem:[#allocation15_spill] sm:$0xff] %v15980_v32 }
 0x646   : > { %v7974_v13 = vpop.f32.mrf.mxu0 }
 0x647   : > { %v15987_v44 = vadd.f32 %v7974_v13, %v7764_v21  ;;  %v7770_v51 = vpop.f32.mrf.mxu3  ;;  %v8509_v21 = vrot.slane %v8507_v46, 1  ;;  %v8512_v13 = vrot.slane %v8510_v37, 2  ;;  %v7870_v46 = vsel %vm1170_vm2, %v7867_v62, %v7869_v26 }
 0x648   : > { %11611 = vmatmul.msk.bf16.gmra.mxu2 %vm860_vm1, %v8505_v55 }
 0x649   : > { %11492 = vmatmul.msk.bf16.gmra.mxu0 %vm860_vm1, %v7868_v39  ;;  %v8513_v32 = vor.u32 %v8512_v13, %v8509_v21 }
 0x64a   : > { %v7128_v52 = vpop.f32.mrf.mxu1 }
 0x64b   : > { %v15995_v41 = vpop.f32.mrf.mxu2  ;;  %v16001_v31 = vadd.f32 %v7128_v52, %v15668_v59  ;;  %v8514_v37 = vsel %vm1791_vm5, %v8504_v58, %v8513_v32  ;;  %v7771_v58 = vadd.f32 %v7770_v51, %v15748_v2 }
 0x64c   : > { %11464 = vmatmul.msk.bf16.gmra.mxu3 %vm860_vm1, %v15703_v30  ;;  %v8222_v30 = vrot.slane %v15954_v1, 1 }
 0x64d   : > { %17348 = vst [vmem:[#allocation36_spill] sm:$0xff] %v16001_v31  ;;  %11580 = vmatmul.msk.bf16.gmra.mxu1 %vm860_vm1, %v8221_v42 }
 0x64e   : > { %v7976_v16 = vpop.f32.mrf.mxu0  ;;  %v8223_v54 = vsel %vm1170_vm2, %v8220_v45, %v8222_v30  ;;  %v7871_v45 = vrot.slane %v15732_v6, 1 }
 0x64f   : > { %v16003_v39 = vadd.f32 %v7976_v16, %v7766_v14  ;;  %v7773_v55 = vpop.f32.mrf.mxu3  ;;  %v16016_v14 = vld [vmem:[%s12356_s24 + $0x38] sm:$0xff] }
 0x650   : > { %v8516_v48 = vshrl.u32 %v16016_v14, 16  ;;  %v7774_v51 = vadd.f32 %v7773_v55, %v15763_v17 }
 0x652   : > { %v7130_v56 = vpop.f32.mrf.mxu1 }
 0x653   : > { %v16007_v47 = vpop.f32.mrf.mxu2  ;;  %v16011_v59 = vadd.f32 %v7130_v56, %v15685_v12  ;;  %v8519_v12 = vshll.u32 %v16016_v14, 16 }
 0x655   : > { %17349 = vst [vmem:[#allocation5_spill] sm:$0xff] %v16011_v59 }
 0x656   : > { %v7979_v52 = vpop.f32.mrf.mxu0 }
 0x657   : > { %v16018_v42 = vadd.f32 %v7979_v52, %v7769_v49  ;;  %v7775_v16 = vpop.f32.mrf.mxu3  ;;  %v8518_v49 = vrot.slane %v8516_v48, 1  ;;  %v8521_v52 = vrot.slane %v8519_v12, 2  ;;  %v7872_v48 = vsel %vm1170_vm2, %v7869_v26, %v7871_v45 }
 0x658   : > { %11612 = vmatmul.msk.bf16.gmra.mxu2 %vm860_vm1, %v8514_v37 }
 0x659   : > { %11493 = vmatmul.msk.bf16.gmra.mxu0 %vm860_vm1, %v7870_v46  ;;  %v8522_v59 = vor.u32 %v8521_v52, %v8518_v49  ;;  %v7776_v49 = vadd.f32 %v7775_v16, %v15777_v23 }
 0x65a   : > { %v7133_v56 = vpop.f32.mrf.mxu1 }
 0x65b   : > { %v16026_v62 = vpop.f32.mrf.mxu2  ;;  %v16032_v21 = vadd.f32 %v7133_v56, %v15697_v9  ;;  %v8523_v12 = vsel %vm1791_vm5, %v8513_v32, %v8522_v59 }
 0x65c   : > { %11465 = vmatmul.msk.bf16.gmra.mxu3 %vm860_vm1, %v15732_v6  ;;  %v8224_v6 = vrot.slane %v15985_v36, 1 }
 0x65d   : > { %17350 = vst [vmem:[#allocation18_spill] sm:$0xff] %v16032_v21  ;;  %11581 = vmatmul.msk.bf16.gmra.mxu1 %vm860_vm1, %v8223_v54 }
 0x65e   : > { %v7981_v13 = vpop.f32.mrf.mxu0  ;;  %v8225_v55 = vsel %vm1170_vm2, %v8222_v30, %v8224_v6  ;;  %v7873_v30 = vrot.slane %v15761_v34, 1 }
 0x65f   : > { %v16034_v46 = vadd.f32 %v7981_v13, %v7771_v58  ;;  %v7778_v37 = vpop.f32.mrf.mxu3  ;;  %v16047_v58 = vld [vmem:[%s12356_s24 + $0x40] sm:$0xff] }
 0x660   : > { %v8525_v17 = vshrl.u32 %v16047_v58, 16  ;;  %v7779_v21 = vadd.f32 %v7778_v37, %v15792_v33  ;;  %v8833_v37 = vld [vmem:[%s12356_s24 + $0x8] sm:$0xc] }
 0x662   : > { %v7135_v31 = vpop.f32.mrf.mxu1 }
 0x663   : > { %v16038_v2 = vpop.f32.mrf.mxu2  ;;  %v16042_v9 = vadd.f32 %v7135_v31, %v15714_v28  ;;  %v12052_v28 = vld [vmem:[%s17004_s6 + $0x50] sm:$0xff]  ;;  %v8528_v31 = vshll.u32 %v16047_v58, 16 }
 0x664   : > { %8952 = vmatpush.bf16.msra.mxu3 %v12052_v28 }
 0x665   : > { %17351 = vst [vmem:[#allocation4_spill] sm:$0xff] %v16042_v9 }
 0x666   : > { %v7984_v56 = vpop.f32.mrf.mxu0 }
 0x667   : > { %v16049_v54 = vadd.f32 %v7984_v56, %v7774_v51  ;;  %v7780_v13 = vpop.f32.mrf.mxu3  ;;  %v8527_v56 = vrot.slane %v8525_v17, 1  ;;  %v7874_v17 = vsel %vm1170_vm2, %v7871_v45, %v7873_v30 }
 0x668   : > { %11613 = vmatmul.msk.bf16.gmra.mxu2 %vm860_vm1, %v8523_v12 }
 0x669   : > { %11494 = vmatmul.msk.bf16.gmra.mxu0 %vm860_vm1, %v7872_v48  ;;  %v8530_v48 = vrot.slane %v8528_v31, 2 }
 0x66a   : > { %v7138_v32 = vpop.f32.mrf.mxu1 }
 0x66b   : > { %v16060_v26 = vpop.f32.mrf.mxu2  ;;  %v16066_v52 = vadd.f32 %v7138_v32, %v15726_v5  ;;  %v8531_v9 = vor.u32 %v8530_v48, %v8527_v56 }
 0x66c   : > { %11466 = vmatmul.msk.bf16.gmra.mxu3 %vm860_vm1, %v15761_v34 }
 0x66d   : > { %17352 = vst [vmem:[#allocation24_spill] sm:$0xff] %v16066_v52  ;;  %11582 = vmatmul.msk.bf16.gmra.mxu1 %vm860_vm1, %v8225_v55  ;;  %v8532_v31 = vsel %vm1791_vm5, %v8522_v59, %v8531_v9  ;;  %v7875_v52 = vrot.slane %v15790_v19, 1 }
 0x66e   : > { %v7986_v51 = vpop.f32.mrf.mxu0 }
 0x66f   : > { %v16068_v12 = vadd.f32 %v7986_v51, %v7776_v49  ;;  %v7783_v28 = vpop.f32.mrf.mxu3  ;;  %v16081_v49 = vld [vmem:[%s12356_s24 + $0x48] sm:$0xff]  ;;  %v8226_v51 = vrot.slane %v16016_v14, 1 }
 0x670   : > { %v8534_v33 = vshrl.u32 %v16081_v49, 16 }
 0x671   : > { %17353 = vst [vmem:[#allocation43_spill] sm:$0xff] %v16068_v12  ;;  %v8227_v45 = vsel %vm1170_vm2, %v8224_v6, %v8226_v51 }
 0x672   : > { %v7140_v23 = vpop.f32.mrf.mxu1 }
 0x673   : > { %v16072_v16 = vpop.f32.mrf.mxu2  ;;  %v16076_v5 = vadd.f32 %v7140_v23, %v15743_v24  ;;  %v8537_v24 = vshll.u32 %v16081_v49, 16 }
 0x675   : > { %17354 = vst [vmem:[#allocation23_spill] sm:$0xff] %v16076_v5 }
 0x676   : > { %v7989_v32 = vpop.f32.mrf.mxu0 }
 0x677   : > { %v16083_v55 = vadd.f32 %v7989_v32, %v7779_v21  ;;  %v7785_v34 = vpop.f32.mrf.mxu3  ;;  %v7781_v21 = vadd.f32 %v7780_v13, %v15806_v53  ;;  %v8840_v32 = vunpack.c.l.b16 %v8833_v37  ;;  %v17357_v53 = vunpack.c.l.b16 %v15834_v4 }
 0x678   : > { %11614 = vmatmul.msk.bf16.gmra.mxu2 %vm860_vm1, %v8532_v31  ;;  %v8539_v31 = vrot.slane %v8537_v24, 2  ;;  %v7876_v37 = vsel %vm1170_vm2, %v7873_v30, %v7875_v52 }
 0x679   : > { %17355 = vst [vmem:[#allocation41_spill] sm:$0xff] %v16083_v55  ;;  %11495 = vmatmul.msk.bf16.gmra.mxu0 %vm860_vm1, %v7874_v17  ;;  %v8536_v17 = vrot.slane %v8534_v33, 1  ;;  %v8841_v13 = vpack.c.b16 %v17357_v53, %v8840_v32  ;;  %v8228_v32 = vrot.slane %v16047_v58, 1 }
 0x67a   : > { %v7143_v56 = vpop.f32.mrf.mxu1 }
 0x67b   : > { %v16092_v59 = vpop.f32.mrf.mxu2  ;;  %v16098_v48 = vadd.f32 %v7143_v56, %v15755_v61  ;;  %v8540_v50 = vor.u32 %v8539_v31, %v8536_v17  ;;  %v7784_v61 = vadd.f32 %v7783_v28, %v15819_v20  ;;  %v8842_v56 = vrot.slane %v8841_v13, 2  ;;  %v17359_v31 = vld [vmem:[#allocation20_spill] sm:$0xff] }
 0x67c   : > { %11467 = vmatmul.msk.bf16.gmra.mxu3 %vm860_vm1, %v15790_v19  ;;  %v8229_v30 = vsel %vm1170_vm2, %v8226_v51, %v8228_v32  ;;  %v7786_v17 = vadd.f32 %v7785_v34, %v15837_v8 }
 0x67d   : > { %17356 = vst [vmem:[#allocation28_spill] sm:$0xff] %v16098_v48  ;;  %11583 = vmatmul.msk.bf16.gmra.mxu1 %vm860_vm1, %v8227_v45  ;;  %v8843_v45 = vrot.slane %v15846_v27, 2  ;;  %v8541_v19 = vsel %vm1791_vm5, %v8531_v9, %v8540_v50 }
 0x67e   : > { %v7991_v23 = vpop.f32.mrf.mxu0 }
 0x67f   : > { %v16100_v5 = vadd.f32 %v7991_v23, %v7781_v21  ;;  %v7788_v6 = vpop.f32.mrf.mxu3  ;;  %v16116_v21 = vld [vmem:[%s12356_s24 + $0x50] sm:$0xff]  ;;  %v8844_v20 = vsel %vm2172_vm4, %v8842_v56, %v8843_v45  ;;  %v17362_v56 = vld [vmem:[#allocation29_spill] sm:$0xff] }
 0x680   : > { %v8543_v27 = vshrl.u32 %v16116_v21, 16  ;;  %v8546_v9 = vshll.u32 %v16116_v21, 16 }
 0x682   : > { %v7145_v55 = vpop.f32.mrf.mxu1 }
 0x683   : > { %v16106_v12 = vpop.f32.mrf.mxu2  ;;  %v16110_v33 = vadd.f32 %v7145_v55, %v15772_v18  ;;  %v12071_v18 = vld [vmem:[%s17004_s6 + $0x60] sm:$0xff] }
 0x684   : > { %9325 = vmatpush.bf16.msra.mxu0 %v12071_v18 }
 0x685   : > { %17358 = vst [vmem:[#allocation6_spill] sm:$0xff] %v16110_v33 }
 0x686   : > { %v7994_v24 = vpop.f32.mrf.mxu0 }
 0x687   : > { %v16118_v4 = vadd.f32 %v7994_v24, %v7784_v61  ;;  %v7790_v23 = vpop.f32.mrf.mxu3  ;;  %v8545_v61 = vrot.slane %v8543_v27, 1  ;;  %v8548_v24 = vrot.slane %v8546_v9, 2  ;;  %v8845_v27 = vrot.slane %v15893_v10, 2 }
 0x688   : > { %11615 = vmatmul.msk.bf16.gmra.mxu2 %vm860_vm1, %v8541_v19  ;;  %v7877_v19 = vrot.slane %v17362_v56, 1 }
 0x689   : > { %11496 = vmatmul.msk.bf16.gmra.mxu0 %vm860_vm1, %v7876_v37  ;;  %v8549_v18 = vor.u32 %v8548_v24, %v8545_v61  ;;  %v9080_v61 = vld [vmem:[%s12356_s24 + $0x10] sm:$0xc]  ;;  %v16157_v24 = vld [vmem:[%s12356_s24 + $0x14] sm:$0xf]  ;;  %v8846_v10 = vsel %vm2172_vm4, %v8843_v45, %v8845_v27  ;;  %v12075_v45 = vld [vmem:[%s17004_s6 + $0x80] sm:$0xff] }
 0x68a   : > { %v7148_v28 = vpop.f32.mrf.mxu1  ;;  %17366 = vst [vmem:[#allocation49_spill] sm:$0xff] %v16157_v24  ;;  %9952 = vmatpush.bf16.msra.mxu2 %v12075_v45 }
 0x68b   : > { %v16130_v55 = vpop.f32.mrf.mxu2  ;;  %v16135_v53 = vadd.f32 %v7148_v28, %v17359_v31  ;;  %v17363_v28 = vld [vmem:[#allocation22_spill] sm:$0xff] }
 0x68c   : > { %11638 = vmatmul.msk.bf16.vlgmr.msra.gmra.mxu3 %vm860_vm1, %v8844_v20  ;;  %v7789_v20 = vadd.f32 %v7788_v6, %v15863_v0  ;;  %v8230_v0 = vrot.slane %v16081_v49, 1 }
 0x68d   : > { %17360 = vst [vmem:[#allocation44_spill] sm:$0xff] %v16135_v53  ;;  %11584 = vmatmul.msk.bf16.gmra.mxu1 %vm860_vm1, %v8229_v30  ;;  %v16151_v30 = vld [vmem:[%s12356_s24 + $0x58] sm:$0xff] }
 0x68e   : > { %v7996_v13 = vpop.f32.mrf.mxu0  ;;  %v8552_v6 = vshrl.u32 %v16151_v30, 16 }
 0x68f   : > { %v16137_v37 = vadd.f32 %v7996_v13, %v7786_v17  ;;  %v7793_v51 = vpop.f32.mrf.mxu3  ;;  %v7878_v17 = vsel %vm1170_vm2, %v7875_v52, %v7877_v19  ;;  %v8550_v13 = vsel %vm1791_vm5, %v8540_v50, %v8549_v18  ;;  %v9159_v52 = vunpack.c.l.b16 %v9080_v61  ;;  %v16176_v61 = vld [vmem:[%s12356_s24 + $0x18] sm:$0xff] }
 0x690   : > { %v17073_v50 = vunpack.c.l.b16 %v16157_v24  ;;  %v8555_v19 = vshll.u32 %v16151_v30, 16  ;;  %17369 = vst [vmem:[#allocation29_spill] sm:$0xff] %v16176_v61 }
 0x691   : > { %17361 = vst [vmem:[#allocation26_spill] sm:$0xff] %v16137_v37 }
 0x692   : > { %v7150_v8 = vpop.f32.mrf.mxu1  ;;  %v16180_v33 = vpack.c.b16 %v17073_v50, %v9159_v52  ;;  %v8557_v48 = vrot.slane %v8555_v19, 2  ;;  %v7794_v19 = vadd.f32 %v7793_v51, %v15901_v29  ;;  %v8847_v50 = vrot.slane %v15922_v15, 2 }
 0x693   : > { %v16141_v34 = vpop.f32.mrf.mxu2  ;;  %v16145_v31 = vadd.f32 %v7150_v8, %v17363_v28 }
 0x694   : > { %17370 = vst [vmem:[#allocation22_spill] sm:$0xff] %v16180_v33  ;;  %v8848_v29 = vsel %vm2172_vm4, %v8845_v27, %v8847_v50 }
 0x695   : > { %17364 = vst [vmem:[#allocation30_spill] sm:$0xff] %v16145_v31 }
 0x696   : > { %v7999_v9 = vpop.f32.mrf.mxu0 }
 0x697   : > { %v16153_v53 = vadd.f32 %v7999_v9, %v7789_v20  ;;  %v7795_v56 = vpop.f32.mrf.mxu3  ;;  %v8231_v20 = vsel %vm1170_vm2, %v8228_v32, %v8230_v0  ;;  %v7791_v9 = vadd.f32 %v7790_v23, %v15884_v7  ;;  %v8554_v32 = vrot.slane %v8552_v6, 1  ;;  %v12073_v23 = vld [vmem:[%s17004_s6 + $0x70] sm:$0xff] }
 0x698   : > { %11616 = vmatmul.msk.bf16.gmra.mxu2 %vm860_vm1, %v8550_v13  ;;  %9705 = vmatpush.bf16.msra.mxu1 %v12073_v23 }
 0x699   : > { %17365 = vst [vmem:[#allocation32_spill] sm:$0xff] %v16153_v53  ;;  %11497 = vmatmul.msk.bf16.gmra.mxu0 %vm860_vm1, %v7878_v17  ;;  %v17367_v17 = vld [vmem:[#allocation25_spill] sm:$0xff] }
 0x69a   : > { %v7153_v8 = vpop.f32.mrf.mxu1 }
 0x69b   : > { %v8707_v28 = vpop.f32.mrf.mxu2  ;;  %v16170_v31 = vadd.f32 %v7153_v8, %v17367_v17  ;;  %v9216_v8 = vrot.slane %v16176_v61, 2  ;;  %v8558_v17 = vor.u32 %v8557_v48, %v8554_v32  ;;  %v8232_v32 = vrot.slane %v16116_v21, 1 }
 0x69c   : > { %11639 = vmatmul.msk.bf16.gmra.mxu3 %vm860_vm1, %v8846_v10  ;;  %v9215_v10 = vrot.slane %v16180_v33, 2 }
 0x69d   : > { %17368 = vst [vmem:[#allocation20_spill] sm:$0xff] %v16170_v31  ;;  %11585 = vmatmul.msk.bf16.gmra.mxu1 %vm860_vm1, %v8231_v20  ;;  %v8559_v31 = vsel %vm1791_vm5, %v8549_v18, %v8558_v17  ;;  %v8233_v18 = vsel %vm1170_vm2, %v8230_v0, %v8232_v32 }
 0x69e   : > { %v8001_v13 = vpop.f32.mrf.mxu0  ;;  %v9217_v45 = vsel %vm2172_vm4, %v9215_v10, %v9216_v8 }
 0x69f   : > { %v16182_v53 = vadd.f32 %v8001_v13, %v7791_v9  ;;  %v7798_v7 = vpop.f32.mrf.mxu3  ;;  %v17372_v9 = vld [vmem:[#allocation34_spill] sm:$0xff] }
 0x6a1   : > { %17371 = vst [vmem:[#allocation25_spill] sm:$0xff] %v16182_v53  ;;  %v16198_v53 = vld [vmem:[%s12356_s24 + $0x60] sm:$0xff] }
 0x6a2   : > { %v7155_v52 = vpop.f32.mrf.mxu1  ;;  %v8561_v51 = vshrl.u32 %v16198_v53, 16  ;;  %v8564_v15 = vshll.u32 %v16198_v53, 16 }
 0x6a3   : > { %v8709_v6 = vpop.f32.mrf.mxu2  ;;  %v16192_v13 = vadd.f32 %v7155_v52, %v17372_v9  ;;  %v7796_v52 = vadd.f32 %v7795_v56, %v15913_v43 }
 0x6a4   : > { %v8566_v27 = vrot.slane %v8564_v15, 2  ;;  %v8849_v15 = vrot.slane %v15954_v1, 2 }
 0x6a5   : > { %17373 = vst [vmem:[#allocation34_spill] sm:$0xff] %v16192_v13 }
 0x6a6   : > { %v8004_v20 = vpop.f32.mrf.mxu0 }
 0x6a7   : > { %v16200_v33 = vadd.f32 %v8004_v20, %v7794_v19  ;;  %v7800_v48 = vpop.f32.mrf.mxu3  ;;  %v17375_v19 = vld [vmem:[#allocation39_spill] sm:$0xff] }
 0x6a8   : > { %11617 = vmatmul.msk.bf16.gmra.mxu2 %vm860_vm1, %v8559_v31  ;;  %v8563_v31 = vrot.slane %v8561_v51, 1 }
 0x6a9   : > { %17374 = vst [vmem:[#allocation50_spill] sm:$0xff] %v16200_v33  ;;  %11736 = vmatmul.msk.bf16.vlgmr.msra.gmra.mxu0 %vm860_vm1, %v9217_v45  ;;  %v16213_v45 = vld [vmem:[%s12356_s24 + $0x20] sm:$0xff] }
 0x6aa   : > { %v8327_v23 = vpop.f32.mrf.mxu1  ;;  %v9218_v37 = vrot.slane %v16213_v45, 2  ;;  %v8567_v43 = vor.u32 %v8566_v27, %v8563_v31  ;;  %v8234_v31 = vrot.slane %v16151_v30, 1 }
 0x6ab   : > { %v8712_v10 = vpop.f32.mrf.mxu2  ;;  %v8417_v9 = vadd.f32 %v8327_v23, %v17375_v19  ;;  %v7799_v23 = vadd.f32 %v7798_v7, %v15933_v22  ;;  %v17376_v19 = vld [vmem:[#allocation42_spill] sm:$0xff]  ;;  %v8850_v22 = vsel %vm2172_vm4, %v8847_v50, %v8849_v15 }
 0x6ac   : > { %11640 = vmatmul.msk.bf16.gmra.mxu3 %vm860_vm1, %v8848_v29  ;;  %v9219_v51 = vsel %vm2172_vm4, %v9216_v8, %v9218_v37 }
 0x6ad   : > { %11586 = vmatmul.msk.bf16.gmra.mxu1 %vm860_vm1, %v8233_v18  ;;  %v16218_v33 = vadd.f32 %v8707_v28, %v8417_v9  ;;  %v16227_v18 = vld [vmem:[%s12356_s24 + $0x68] sm:$0xff] }
 0x6ae   : > { %v8006_v20 = vpop.f32.mrf.mxu0  ;;  %v8570_v1 = vshrl.u32 %v16227_v18, 16  ;;  %v8573_v7 = vshll.u32 %v16227_v18, 16 }
 0x6af   : > { %v16215_v13 = vadd.f32 %v8006_v20, %v7796_v52  ;;  %v7803_v0 = vpop.f32.mrf.mxu3  ;;  %v8568_v52 = vsel %vm1791_vm5, %v8558_v17, %v8567_v43 }
 0x6b0   : > { %v8575_v50 = vrot.slane %v8573_v7, 2  ;;  %v8851_v7 = vrot.slane %v15985_v36, 2 }
 0x6b2   : > { %v8329_v56 = vpop.f32.mrf.mxu1 }
 0x6b3   : > { %v8714_v29 = vpop.f32.mrf.mxu2  ;;  %v8418_v61 = vadd.f32 %v8329_v56, %v17376_v19  ;;  %v16244_v56 = vld [vmem:[%s12356_s24 + $0x28] sm:$0xff] }
 0x6b5   : > { %v16231_v9 = vadd.f32 %v8709_v6, %v8418_v61  ;;  %v7801_v61 = vadd.f32 %v7800_v48, %v15945_v38 }
 0x6b6   : > { %v8009_v24 = vpop.f32.mrf.mxu0 }
 0x6b7   : > { %v16229_v28 = vadd.f32 %v8009_v24, %v7799_v23  ;;  %v7805_v20 = vpop.f32.mrf.mxu3  ;;  %v8235_v24 = vsel %vm1170_vm2, %v8232_v32, %v8234_v31  ;;  %v8572_v23 = vrot.slane %v8570_v1, 1 }
 0x6b8   : > { %11618 = vmatmul.msk.bf16.gmra.mxu2 %vm860_vm1, %v8568_v52  ;;  %v9220_v52 = vrot.slane %v16244_v56, 2 }
 0x6b9   : > { %17377 = vst [vmem:[#allocation39_spill] sm:$0xff] %v16229_v28  ;;  %11737 = vmatmul.msk.bf16.gmra.mxu0 %vm860_vm1, %v9219_v51  ;;  %v8576_v38 = vor.u32 %v8575_v50, %v8572_v23  ;;  %v8236_v23 = vrot.slane %v16198_v53, 1 }
 0x6ba   : > { %v8332_v8 = vpop.f32.mrf.mxu1  ;;  %v9221_v1 = vsel %vm2172_vm4, %v9218_v37, %v9220_v52 }
 0x6bb   : > { %v8717_v17 = vpop.f32.mrf.mxu2  ;;  %v8419_v6 = vadd.f32 %v8332_v8, %v15895_v35  ;;  %v7804_v35 = vadd.f32 %v7803_v0, %v15964_v25  ;;  %v8237_v0 = vsel %vm1170_vm2, %v8234_v31, %v8236_v23 }
 0x6bc   : > { %11641 = vmatmul.msk.bf16.gmra.mxu3 %vm860_vm1, %v8850_v22 }
 0x6bd   : > { %11587 = vmatmul.msk.bf16.gmra.mxu1 %vm860_vm1, %v8235_v24  ;;  %v16249_v51 = vadd.f32 %v8712_v10, %v8419_v6  ;;  %v16258_v24 = vld [vmem:[%s12356_s24 + $0x70] sm:$0xff] }
 0x6be   : > { %v8011_v27 = vpop.f32.mrf.mxu0  ;;  %v8579_v25 = vshrl.u32 %v16258_v24, 16  ;;  %v8582_v36 = vshll.u32 %v16258_v24, 16 }
 0x6bf   : > { %v16246_v19 = vadd.f32 %v8011_v27, %v7801_v61  ;;  %v7808_v32 = vpop.f32.mrf.mxu3  ;;  %v8577_v61 = vsel %vm1791_vm5, %v8567_v43, %v8576_v38 }
 0x6c2   : > { %v8334_v48 = vpop.f32.mrf.mxu1 }
 0x6c3   : > { %v8719_v22 = vpop.f32.mrf.mxu2  ;;  %v8420_v8 = vadd.f32 %v8334_v48, %v15909_v11  ;;  %v8852_v11 = vsel %vm2172_vm4, %v8849_v15, %v8851_v7  ;;  %v16275_v48 = vld [vmem:[%s12356_s24 + $0x30] sm:$0xff]  ;;  %v8584_v15 = vrot.slane %v8582_v36, 2  ;;  %v8853_v36 = vrot.slane %v16016_v14, 2 }
 0x6c5   : > { %v16262_v6 = vadd.f32 %v8714_v29, %v8420_v8  ;;  %v7806_v29 = vadd.f32 %v7805_v20, %v15976_v57 }
 0x6c6   : > { %v8014_v28 = vpop.f32.mrf.mxu0 }
 0x6c7   : > { %v16260_v10 = vadd.f32 %v8014_v28, %v7804_v35  ;;  %v7810_v27 = vpop.f32.mrf.mxu3  ;;  %v8581_v35 = vrot.slane %v8579_v25, 1 }
 0x6c8   : > { %11619 = vmatmul.msk.bf16.gmra.mxu2 %vm860_vm1, %v8577_v61  ;;  %v9222_v61 = vrot.slane %v16275_v48, 2 }
 0x6c9   : > { %17378 = vst [vmem:[#allocation42_spill] sm:$0xff] %v16260_v10  ;;  %11738 = vmatmul.msk.bf16.gmra.mxu0 %vm860_vm1, %v9221_v1  ;;  %v8585_v57 = vor.u32 %v8584_v15, %v8581_v35  ;;  %v8238_v35 = vrot.slane %v16227_v18, 1 }
 0x6ca   : > { %v8337_v37 = vpop.f32.mrf.mxu1  ;;  %v9223_v25 = vsel %vm2172_vm4, %v9220_v52, %v9222_v61 }
 0x6cb   : > { %v8722_v43 = vpop.f32.mrf.mxu2  ;;  %v8421_v28 = vadd.f32 %v8337_v37, %v15924_v40  ;;  %v7809_v40 = vadd.f32 %v7808_v32, %v15995_v41  ;;  %v8239_v52 = vsel %vm1170_vm2, %v8236_v23, %v8238_v35 }
 0x6cc   : > { %11642 = vmatmul.msk.bf16.gmra.mxu3 %vm860_vm1, %v8852_v11 }
 0x6cd   : > { %11588 = vmatmul.msk.bf16.gmra.mxu1 %vm860_vm1, %v8237_v0  ;;  %v16280_v1 = vadd.f32 %v8717_v17, %v8421_v28  ;;  %v16289_v0 = vld [vmem:[%s12356_s24 + $0x78] sm:$0xff] }
 0x6ce   : > { %v8016_v50 = vpop.f32.mrf.mxu0  ;;  %v8588_v41 = vshrl.u32 %v16289_v0, 16  ;;  %v8591_v14 = vshll.u32 %v16289_v0, 16 }
 0x6cf   : > { %v16277_v8 = vadd.f32 %v8016_v50, %v7806_v29  ;;  %v7813_v31 = vpop.f32.mrf.mxu3  ;;  %v8586_v29 = vsel %vm1791_vm5, %v8576_v38, %v8585_v57 }
 0x6d2   : > { %v8339_v20 = vpop.f32.mrf.mxu1 }
 0x6d3   : > { %v8724_v11 = vpop.f32.mrf.mxu2  ;;  %v8422_v37 = vadd.f32 %v8339_v20, %v15941_v63  ;;  %v8854_v63 = vsel %vm2172_vm4, %v8851_v7, %v8853_v36  ;;  %v16306_v20 = vld [vmem:[%s12356_s24 + $0x38] sm:$0xff]  ;;  %v8593_v7 = vrot.slane %v8591_v14, 2  ;;  %v8855_v14 = vrot.slane %v16047_v58, 2 }
 0x6d5   : > { %v16293_v28 = vadd.f32 %v8719_v22, %v8422_v37  ;;  %v7811_v22 = vadd.f32 %v7810_v27, %v16007_v47 }
 0x6d6   : > { %v8019_v10 = vpop.f32.mrf.mxu0 }
 0x6d7   : > { %v16291_v17 = vadd.f32 %v8019_v10, %v7809_v40  ;;  %v7815_v50 = vpop.f32.mrf.mxu3  ;;  %v8590_v40 = vrot.slane %v8588_v41, 1 }
 0x6d8   : > { %11620 = vmatmul.msk.bf16.gmra.mxu2 %vm860_vm1, %v8586_v29  ;;  %v9224_v29 = vrot.slane %v16306_v20, 2 }
 0x6d9   : > { %17379 = vst [vmem:[#allocation51_spill] sm:$0xff] %v16291_v17  ;;  %11739 = vmatmul.msk.bf16.gmra.mxu0 %vm860_vm1, %v9223_v25  ;;  %v8594_v47 = vor.u32 %v8593_v7, %v8590_v40  ;;  %v8240_v40 = vrot.slane %v16258_v24, 1 }
 0x6da   : > { %v8342_v32 = vpop.f32.mrf.mxu1  ;;  %v9225_v41 = vsel %vm2172_vm4, %v9222_v61, %v9224_v29 }
 0x6db   : > { %v8727_v38 = vpop.f32.mrf.mxu2  ;;  %v8423_v10 = vadd.f32 %v8342_v32, %v15956_v3  ;;  %v7814_v3 = vadd.f32 %v7813_v31, %v16026_v62  ;;  %v8241_v61 = vsel %vm1170_vm2, %v8238_v35, %v8240_v40 }
 0x6dc   : > { %11643 = vmatmul.msk.bf16.gmra.mxu3 %vm860_vm1, %v8854_v63 }
 0x6dd   : > { %11589 = vmatmul.msk.bf16.gmra.mxu1 %vm860_vm1, %v8239_v52  ;;  %v16311_v25 = vadd.f32 %v8722_v43, %v8423_v10  ;;  %v16320_v52 = vld [vmem:[%s12356_s24 + $0x80] sm:$0xff] }
 0x6de   : > { %v8021_v15 = vpop.f32.mrf.mxu0  ;;  %v8597_v62 = vshrl.u32 %v16320_v52, 16  ;;  %v8600_v58 = vshll.u32 %v16320_v52, 16 }
 0x6df   : > { %v16308_v37 = vadd.f32 %v8021_v15, %v7811_v22  ;;  %v7818_v23 = vpop.f32.mrf.mxu3  ;;  %v8595_v22 = vsel %vm1791_vm5, %v8585_v57, %v8594_v47 }
 0x6e2   : > { %v8344_v27 = vpop.f32.mrf.mxu1 }
 0x6e3   : > { %v8729_v63 = vpop.f32.mrf.mxu2  ;;  %v8424_v32 = vadd.f32 %v8344_v27, %v15972_v60  ;;  %v8856_v60 = vsel %vm2172_vm4, %v8853_v36, %v8855_v14  ;;  %v16337_v27 = vld [vmem:[%s12356_s24 + $0x40] sm:$0xff]  ;;  %v8602_v36 = vrot.slane %v8600_v58, 2  ;;  %v8857_v58 = vrot.slane %v16081_v49, 2 }
 0x6e5   : > { %v16324_v10 = vadd.f32 %v8724_v11, %v8424_v32  ;;  %v7816_v11 = vadd.f32 %v7815_v50, %v16038_v2 }
 0x6e6   : > { %v8024_v17 = vpop.f32.mrf.mxu0 }
 0x6e7   : > { %v16322_v43 = vadd.f32 %v8024_v17, %v7814_v3  ;;  %v7820_v15 = vpop.f32.mrf.mxu3  ;;  %v8599_v3 = vrot.slane %v8597_v62, 1 }
 0x6e8   : > { %11621 = vmatmul.msk.bf16.gmra.mxu2 %vm860_vm1, %v8595_v22  ;;  %v9226_v22 = vrot.slane %v16337_v27, 2 }
 0x6e9   : > { %17380 = vst [vmem:[#allocation52_spill] sm:$0xff] %v16322_v43  ;;  %11740 = vmatmul.msk.bf16.gmra.mxu0 %vm860_vm1, %v9225_v41  ;;  %v8603_v2 = vor.u32 %v8602_v36, %v8599_v3  ;;  %v8242_v3 = vrot.slane %v16289_v0, 1 }
 0x6ea   : > { %v8347_v31 = vpop.f32.mrf.mxu1  ;;  %v9227_v62 = vsel %vm2172_vm4, %v9224_v29, %v9226_v22 }
 0x6eb   : > { %v8732_v57 = vpop.f32.mrf.mxu2  ;;  %v8425_v17 = vadd.f32 %v8347_v31, %v15987_v44  ;;  %v7819_v44 = vadd.f32 %v7818_v23, %v16060_v26  ;;  %v8243_v29 = vsel %vm1170_vm2, %v8240_v40, %v8242_v3 }
 0x6ec   : > { %11644 = vmatmul.msk.bf16.gmra.mxu3 %vm860_vm1, %v8856_v60 }
 0x6ed   : > { %11590 = vmatmul.msk.bf16.gmra.mxu1 %vm860_vm1, %v8241_v61  ;;  %v16342_v41 = vadd.f32 %v8727_v38, %v8425_v17  ;;  %v16351_v61 = vld [vmem:[%s12356_s24 + $0x88] sm:$0xff] }
 0x6ee   : > { %v8026_v7 = vpop.f32.mrf.mxu0  ;;  %v8606_v26 = vshrl.u32 %v16351_v61, 16  ;;  %v8609_v49 = vshll.u32 %v16351_v61, 16 }
 0x6ef   : > { %v16339_v32 = vadd.f32 %v8026_v7, %v7816_v11  ;;  %v7823_v35 = vpop.f32.mrf.mxu3  ;;  %v8604_v11 = vsel %vm1791_vm5, %v8594_v47, %v8603_v2 }
 0x6f2   : > { %v8349_v50 = vpop.f32.mrf.mxu1 }
 0x6f3   : > { %v8734_v60 = vpop.f32.mrf.mxu2  ;;  %v8426_v31 = vadd.f32 %v8349_v50, %v16003_v39  ;;  %v8858_v39 = vsel %vm2172_vm4, %v8855_v14, %v8857_v58  ;;  %v16368_v50 = vld [vmem:[%s12356_s24 + $0x48] sm:$0xff]  ;;  %v8611_v14 = vrot.slane %v8609_v49, 2  ;;  %v8859_v49 = vrot.slane %v16116_v21, 2 }
 0x6f5   : > { %v16355_v17 = vadd.f32 %v8729_v63, %v8426_v31  ;;  %v7821_v63 = vadd.f32 %v7820_v15, %v16072_v16 }
 0x6f6   : > { %v8029_v43 = vpop.f32.mrf.mxu0 }
 0x6f7   : > { %v16353_v38 = vadd.f32 %v8029_v43, %v7819_v44  ;;  %v7825_v7 = vpop.f32.mrf.mxu3  ;;  %v8608_v44 = vrot.slane %v8606_v26, 1 }
 0x6f8   : > { %11622 = vmatmul.msk.bf16.gmra.mxu2 %vm860_vm1, %v8604_v11  ;;  %v9228_v11 = vrot.slane %v16368_v50, 2 }
 0x6f9   : > { %17381 = vst [vmem:[#allocation53_spill] sm:$0xff] %v16353_v38  ;;  %11741 = vmatmul.msk.bf16.gmra.mxu0 %vm860_vm1, %v9227_v62  ;;  %v8612_v16 = vor.u32 %v8611_v14, %v8608_v44  ;;  %v8244_v44 = vrot.slane %v16320_v52, 1 }
 0x6fa   : > { %v8352_v23 = vpop.f32.mrf.mxu1  ;;  %v9229_v26 = vsel %vm2172_vm4, %v9226_v22, %v9228_v11 }
 0x6fb   : > { %v8737_v47 = vpop.f32.mrf.mxu2  ;;  %v8427_v43 = vadd.f32 %v8352_v23, %v16018_v42  ;;  %v7824_v42 = vadd.f32 %v7823_v35, %v16092_v59  ;;  %v8245_v22 = vsel %vm1170_vm2, %v8242_v3, %v8244_v44 }
 0x6fc   : > { %11645 = vmatmul.msk.bf16.gmra.mxu3 %vm860_vm1, %v8858_v39 }
 0x6fd   : > { %11591 = vmatmul.msk.bf16.gmra.mxu1 %vm860_vm1, %v8243_v29  ;;  %v16373_v62 = vadd.f32 %v8732_v57, %v8427_v43  ;;  %v16382_v29 = vld [vmem:[%s12356_s24 + $0x90] sm:$0xff] }
 0x6fe   : > { %v8031_v36 = vpop.f32.mrf.mxu0  ;;  %v8615_v59 = vshrl.u32 %v16382_v29, 16  ;;  %v8618_v21 = vshll.u32 %v16382_v29, 16 }
 0x6ff   : > { %v16370_v31 = vadd.f32 %v8031_v36, %v7821_v63  ;;  %v7828_v40 = vpop.f32.mrf.mxu3  ;;  %v8613_v63 = vsel %vm1791_vm5, %v8603_v2, %v8612_v16 }
 0x701   : > { %17382 = vst [vmem:[#allocation54_spill] sm:$0xff] %v16370_v31  ;;  %v7829_v31 = vadd.f32 %v7828_v40, %v16130_v55 }
 0x702   : > { %v8354_v15 = vpop.f32.mrf.mxu1 }
 0x703   : > { %v8739_v39 = vpop.f32.mrf.mxu2  ;;  %v8428_v23 = vadd.f32 %v8354_v15, %v16034_v46  ;;  %v8860_v46 = vsel %vm2172_vm4, %v8857_v58, %v8859_v49  ;;  %v16399_v15 = vld [vmem:[%s12356_s24 + $0x50] sm:$0xff]  ;;  %v8620_v58 = vrot.slane %v8618_v21, 2 }
 0x705   : > { %v16386_v43 = vadd.f32 %v8734_v60, %v8428_v23  ;;  %v7826_v60 = vadd.f32 %v7825_v7, %v16106_v12  ;;  %v9230_v12 = vrot.slane %v16399_v15, 2 }
 0x706   : > { %v8034_v38 = vpop.f32.mrf.mxu0 }
 0x707   : > { %v16384_v57 = vadd.f32 %v8034_v38, %v7824_v42  ;;  %v7830_v36 = vpop.f32.mrf.mxu3  ;;  %v8617_v42 = vrot.slane %v8615_v59, 1  ;;  %v17384_v59 = vld [vmem:[#allocation43_spill] sm:$0xff] }
 0x708   : > { %11623 = vmatmul.msk.bf16.gmra.mxu2 %vm860_vm1, %v8613_v63 }
 0x709   : > { %17383 = vst [vmem:[#allocation55_spill] sm:$0xff] %v16384_v57  ;;  %11742 = vmatmul.msk.bf16.gmra.mxu0 %vm860_vm1, %v9229_v26  ;;  %v8453_v57 = vld [vmem:[%s12356_s24 + $0x98] sm:$0x3]  ;;  %v8621_v7 = vor.u32 %v8620_v58, %v8617_v42  ;;  %v8246_v42 = vrot.slane %v16351_v61, 1  ;;  %v7831_v58 = vadd.f32 %v7830_v36, %v16141_v34 }
 0x70a   : > { %v8357_v35 = vpop.f32.mrf.mxu1 }
 0x70b   : > { %v8742_v2 = vpop.f32.mrf.mxu2  ;;  %v8429_v38 = vadd.f32 %v8357_v35, %v16049_v54 }
 0x70c   : > { %11646 = vmatmul.msk.bf16.gmra.mxu3 %vm860_vm1, %v8860_v46  ;;  %v8460_v46 = vunpack.c.l.b16 %v8453_v57 }
 0x70d   : > { %11592 = vmatmul.msk.bf16.gmra.mxu1 %vm860_vm1, %v8245_v22  ;;  %v16404_v26 = vadd.f32 %v8737_v47, %v8429_v38  ;;  %v8861_v47 = vrot.slane %v16151_v30, 2  ;;  %v8622_v22 = vsel %vm1791_vm5, %v8612_v16, %v8621_v7  ;;  %v8247_v16 = vsel %vm1170_vm2, %v8244_v44, %v8246_v42 }
 0x70e   : > { %v8036_v14 = vpop.f32.mrf.mxu0  ;;  %v16414_v38 = vpack.c.b16 %v8460_v46, %v8460_v46  ;;  %v17386_v46 = vld [vmem:[#allocation41_spill] sm:$0xff] }
 0x70f   : > { %v16401_v23 = vadd.f32 %v8036_v14, %v7826_v60  ;;  %v8954_v63 = vpop.f32.mrf.mxu3  ;;  %v9231_v14 = vsel %vm2172_vm4, %v9228_v11, %v9230_v12  ;;  %v8862_v30 = vsel %vm2172_vm4, %v8859_v49, %v8861_v47 }
 0x710   : > { %v9044_v3 = vadd.f32 %v8954_v63, %v16218_v33  ;;  %v8624_v40 = vshrl.u32 %v16414_v38, 16  ;;  %v8627_v11 = vshll.u32 %v16414_v38, 16 }
 0x712   : > { %v8359_v54 = vpop.f32.mrf.mxu1 }
 0x713   : > { %v8744_v35 = vpop.f32.mrf.mxu2  ;;  %v8430_v21 = vadd.f32 %v8359_v54, %v17384_v59  ;;  %v16432_v59 = vld [vmem:[%s12356_s24 + $0x58] sm:$0xff] }
 0x714   : > { %v9232_v34 = vrot.slane %v16432_v59, 2 }
 0x715   : > { %v16418_v63 = vadd.f32 %v8739_v39, %v8430_v21  ;;  %v8626_v21 = vrot.slane %v8624_v40, 1 }
 0x716   : > { %v8039_v60 = vpop.f32.mrf.mxu0  ;;  %v9233_v40 = vsel %vm2172_vm4, %v9230_v12, %v9232_v34 }
 0x717   : > { %v16416_v33 = vadd.f32 %v8039_v60, %v7829_v31  ;;  %17385 = vst [vmem:[#allocation43_spill] sm:$0xff] %v16418_v63  ;;  %v8956_v57 = vpop.f32.mrf.mxu3  ;;  %v8629_v60 = vrot.slane %v8627_v11, 2  ;;  %v8863_v11 = vrot.slane %v16198_v53, 2 }
 0x718   : > { %v9045_v55 = vadd.f32 %v8956_v57, %v16231_v9  ;;  %11624 = vmatmul.msk.bf16.gmra.mxu2 %vm860_vm1, %v8622_v22 }
 0x719   : > { %11743 = vmatmul.msk.bf16.gmra.mxu0 %vm860_vm1, %v9231_v14  ;;  %v8630_v36 = vor.u32 %v8629_v60, %v8626_v21  ;;  %v8116_v60 = vld [vmem:[%s12356_s24 + $0x98] sm:$0x1] }
 0x71a   : > { %v8362_v31 = vpop.f32.mrf.mxu1 }
 0x71b   : > { %v8747_v39 = vpop.f32.mrf.mxu2  ;;  %v8431_v9 = vadd.f32 %v8362_v31, %v17386_v46 }
 0x71c   : > { %11647 = vmatmul.msk.bf16.gmra.mxu3 %vm860_vm1, %v8862_v30 }
 0x71d   : > { %11593 = vmatmul.msk.bf16.gmra.mxu1 %vm860_vm1, %v8247_v16  ;;  %v16437_v14 = vadd.f32 %v8742_v2, %v8431_v9  ;;  %v9833_v16 = vld [vmem:[%s12356_s24 + $0x10] sm:$0x8] }
 0x71e   : > { %v8041_v54 = vpop.f32.mrf.mxu0  ;;  %v9840_v53 = vunpack.c.l.b16 %v9833_v16 }
 0x71f   : > { %v16434_v49 = vadd.f32 %v8041_v54, %v7831_v58  ;;  %17387 = vst [vmem:[#allocation41_spill] sm:$0xff] %v16437_v14  ;;  %v8959_v44 = vpop.f32.mrf.mxu3  ;;  %v8631_v58 = vsel %vm1791_vm5, %v8621_v7, %v8630_v36  ;;  %v8248_v54 = vrot.slane %v16382_v29, 1  ;;  %v16460_v36 = vld [vmem:[%s12356_s24 + $0x60] sm:$0xff] }
 0x720   : > { %v9046_v22 = vadd.f32 %v8959_v44, %v16249_v51  ;;  %v9234_v16 = vrot.slane %v16460_v36, 2 }
 0x722   : > { %v8364_v57 = vpop.f32.mrf.mxu1 }
 0x723   : > { %v8749_v30 = vpop.f32.mrf.mxu2  ;;  %v8432_v31 = vadd.f32 %v8364_v57, %v16100_v5  ;;  %v8864_v5 = vsel %vm2172_vm4, %v8861_v47, %v8863_v11 }
 0x725   : > { %v16448_v51 = vadd.f32 %v8744_v35, %v8432_v31 }
 0x726   : > { %v9327_v46 = vpop.f32.mrf.mxu0 }
 0x727   : > { %v16445_v2 = vadd.f32 %v9327_v46, %v9044_v3  ;;  %17388 = vst [vmem:[#allocation56_spill] sm:$0xff] %v16448_v51  ;;  %v8961_v9 = vpop.f32.mrf.mxu3  ;;  %v8249_v3 = vsel %vm1170_vm2, %v8246_v42, %v8248_v54  ;;  %v8195_v42 = vunpack.c.l.b16 %v8116_v60 }
 0x728   : > { %v9047_v21 = vadd.f32 %v8961_v9, %v16262_v6  ;;  %11625 = vmatmul.msk.bf16.gmra.mxu2 %vm860_vm1, %v8631_v58  ;;  %v17389_v6 = vld [vmem:[#allocation49_spill] sm:$0xff] }
 0x729   : > { %11744 = vmatmul.msk.bf16.gmra.mxu0 %vm860_vm1, %v9233_v40  ;;  %v17390_v57 = vunpack.c.l.b16 %v17389_v6  ;;  %v17392_v9 = vld [vmem:[#allocation29_spill] sm:$0xff]  ;;  %v8214_v14 = vpack.c.b16 %v8195_v42, %v8195_v42  ;;  %v17393_v6 = vld [vmem:[#allocation26_spill] sm:$0xff] }
 0x72a   : > { %v8367_v12 = vpop.f32.mrf.mxu1 }
 0x72b   : > { %v8752_v7 = vpop.f32.mrf.mxu2  ;;  %v8433_v35 = vadd.f32 %v8367_v12, %v16118_v4  ;;  %v9841_v31 = vpack.c.b16 %v17390_v57, %v9840_v53  ;;  %v8250_v57 = vrot.slane %v8214_v14, 1 }
 0x72c   : > { %11648 = vmatmul.msk.bf16.gmra.mxu3 %vm860_vm1, %v8864_v5  ;;  %v9843_v5 = vrot.slane %v17392_v9, 3 }
 0x72d   : > { %11594 = vmatmul.msk.bf16.gmra.mxu1 %vm860_vm1, %v8249_v3  ;;  %v16467_v47 = vadd.f32 %v8747_v39, %v8433_v35  ;;  %v9842_v4 = vrot.slane %v9841_v31, 3  ;;  %v8865_v39 = vrot.slane %v16227_v18, 2  ;;  %v8251_v18 = vsel %vm1170_vm2, %v8248_v54, %v8250_v57 }
 0x72e   : > { %v9329_v44 = vpop.f32.mrf.mxu0  ;;  %v9471_v54 = vshrl.u32 %v17392_v9, 16 }
 0x72f   : > { %v16464_v46 = vadd.f32 %v9329_v44, %v9045_v55  ;;  %17391 = vst [vmem:[#allocation49_spill] sm:$0xff] %v16467_v47  ;;  %v8964_v40 = vpop.f32.mrf.mxu3  ;;  %v9235_v44 = vsel %vm2172_vm4, %v9232_v34, %v9234_v16  ;;  %v9844_v3 = vsel %vm3174_vm7, %v9842_v4, %v9843_v5 }
 0x730   : > { %v9048_v58 = vadd.f32 %v8964_v40, %v16280_v1  ;;  %v8866_v40 = vsel %vm2172_vm4, %v8863_v11, %v8865_v39 }
 0x732   : > { %v8369_v12 = vpop.f32.mrf.mxu1 }
 0x733   : > { %v8754_v51 = vpop.f32.mrf.mxu2  ;;  %v8434_v53 = vadd.f32 %v8369_v12, %v17393_v6  ;;  %v16488_v12 = vld [vmem:[%s12356_s24 + $0x68] sm:$0xff] }
 0x735   : > { %v16478_v1 = vadd.f32 %v8749_v30, %v8434_v53  ;;  %v17397_v53 = vld [vmem:[#allocation22_spill] sm:$0xff] }
 0x736   : > { %v9332_v55 = vpop.f32.mrf.mxu0  ;;  %v9463_v11 = vshrl.u32 %v17397_v53, 16 }
 0x737   : > { %v16476_v35 = vadd.f32 %v9332_v55, %v9046_v22  ;;  %17394 = vst [vmem:[#allocation29_spill] sm:$0xff] %v16478_v1  ;;  %v8966_v60 = vpop.f32.mrf.mxu3  ;;  %v17395_v22 = vld [vmem:[#allocation32_spill] sm:$0xff]  ;;  %v9466_v55 = vshll.u32 %v17397_v53, 16  ;;  %v8867_v1 = vrot.slane %v16258_v24, 2 }
 0x738   : > { %v9049_v31 = vadd.f32 %v8966_v60, %v16293_v28  ;;  %11796 = vmatmul.msk.bf16.vlgmr.msra.gmra.mxu2 %vm860_vm1, %v9844_v3  ;;  %v9236_v60 = vrot.slane %v16488_v12, 2 }
 0x739   : > { %11745 = vmatmul.msk.bf16.gmra.mxu0 %vm860_vm1, %v9235_v44  ;;  %v9474_v44 = vshll.u32 %v17392_v9, 16 }
 0x73a   : > { %v8372_v34 = vpop.f32.mrf.mxu1  ;;  %v9237_v53 = vsel %vm2172_vm4, %v9234_v16, %v9236_v60  ;;  %v8868_v16 = vsel %vm2172_vm4, %v8865_v39, %v8867_v1  ;;  %v9480_v39 = vshrl.u32 %v16213_v45, 16 }
 0x73b   : > { %v8757_v42 = vpop.f32.mrf.mxu2  ;;  %v8435_v4 = vadd.f32 %v8372_v34, %v17395_v22  ;;  %v9465_v34 = vrot.slane %v9463_v11, 2  ;;  %v9476_v22 = vrot.slane %v9474_v44, 3  ;;  %v16518_v44 = vld [vmem:[%s12356_s24 + $0x70] sm:$0xff] }
 0x73c   : > { %11649 = vmatmul.msk.bf16.gmra.mxu3 %vm860_vm1, %v8866_v40 }
 0x73d   : > { %11595 = vmatmul.msk.bf16.gmra.mxu1 %vm860_vm1, %v8251_v18  ;;  %v16493_v28 = vadd.f32 %v8752_v7, %v8435_v4  ;;  %v9468_v7 = vrot.slane %v9466_v55, 3  ;;  %v9473_v18 = vrot.slane %v9471_v54, 2  ;;  %v17398_v4 = vld [vmem:[#allocation25_spill] sm:$0xff] }
 0x73e   : > { %v9334_v30 = vpop.f32.mrf.mxu0 }
 0x73f   : > { %v16490_v14 = vadd.f32 %v9334_v30, %v9047_v21  ;;  %17396 = vst [vmem:[#allocation26_spill] sm:$0xff] %v16493_v28  ;;  %v8969_v6 = vpop.f32.mrf.mxu3  ;;  %v9845_v21 = vrot.slane %v16213_v45, 3  ;;  %v9469_v63 = vor.u32 %v9468_v7, %v9465_v34  ;;  %v9477_v11 = vor.u32 %v9476_v22, %v9473_v18 }
 0x740   : > { %v9050_v3 = vadd.f32 %v8969_v6, %v16311_v25  ;;  %v9483_v34 = vshll.u32 %v16213_v45, 16  ;;  %v9238_v7 = vrot.slane %v16518_v44, 2  ;;  %v9847_v18 = vrot.slane %v16244_v56, 3 }
 0x741   : > { %v9846_v9 = vsel %vm3174_vm7, %v9843_v5, %v9845_v21  ;;  %v9478_v24 = vsel %vm2793_vm6, %v9469_v63, %v9477_v11 }
 0x742   : > { %v8374_v57 = vpop.f32.mrf.mxu1  ;;  %v9848_v45 = vsel %vm3174_vm7, %v9845_v21, %v9847_v18 }
 0x743   : > { %v8759_v40 = vpop.f32.mrf.mxu2  ;;  %v8436_v30 = vadd.f32 %v8374_v57, %v17398_v4 }
 0x745   : > { %v16508_v6 = vadd.f32 %v8754_v51, %v8436_v30  ;;  %v9482_v30 = vrot.slane %v9480_v39, 2 }
 0x746   : > { %v9337_v28 = vpop.f32.mrf.mxu0 }
 0x747   : > { %v16506_v25 = vadd.f32 %v9337_v28, %v9048_v58  ;;  %v8971_v47 = vpop.f32.mrf.mxu3  ;;  %v17399_v58 = vld [vmem:[#allocation50_spill] sm:$0xff] }
 0x748   : > { %v9051_v55 = vadd.f32 %v8971_v47, %v16324_v10  ;;  %11797 = vmatmul.msk.bf16.gmra.mxu2 %vm860_vm1, %v9846_v9 }
 0x749   : > { %11746 = vmatmul.msk.bf16.gmra.mxu0 %vm860_vm1, %v9237_v53 }
 0x74a   : > { %v8377_v54 = vpop.f32.mrf.mxu1 }
 0x74b   : > { %v8762_v5 = vpop.f32.mrf.mxu2  ;;  %v8437_v51 = vadd.f32 %v8377_v54, %v17399_v58 }
 0x74c   : > { %11650 = vmatmul.msk.bf16.gmra.mxu3 %vm860_vm1, %v8868_v16  ;;  %v8869_v16 = vrot.slane %v16289_v0, 2 }
 0x74d   : > { %11766 = vmatmul.msk.bf16.vlgmr.msra.gmra.mxu1 %vm860_vm1, %v9478_v24  ;;  %v16523_v10 = vadd.f32 %v8757_v42, %v8437_v51  ;;  %v9239_v42 = vsel %vm2172_vm4, %v9236_v60, %v9238_v7 }
 0x74e   : > { %v9339_v28 = vpop.f32.mrf.mxu0 }
 0x74f   : > { %v16520_v57 = vadd.f32 %v9339_v28, %v9049_v31  ;;  %v8974_v47 = vpop.f32.mrf.mxu3  ;;  %v9485_v31 = vrot.slane %v9483_v34, 3 }
 0x750   : > { %v9052_v63 = vadd.f32 %v8974_v47, %v16342_v41  ;;  %v16546_v47 = vld [vmem:[%s12356_s24 + $0x78] sm:$0xff] }
 0x751   : > { %v9486_v58 = vor.u32 %v9485_v31, %v9482_v30  ;;  %v9240_v30 = vrot.slane %v16546_v47, 2  ;;  %v9849_v31 = vrot.slane %v16275_v48, 3 }
 0x752   : > { %v8379_v22 = vpop.f32.mrf.mxu1 }
 0x753   : > { %v8764_v4 = vpop.f32.mrf.mxu2  ;;  %v8438_v53 = vadd.f32 %v8379_v22, %v16215_v13  ;;  %v8870_v13 = vsel %vm2172_vm4, %v8867_v1, %v8869_v16  ;;  %v9487_v0 = vsel %vm2793_vm6, %v9477_v11, %v9486_v58  ;;  %v9489_v1 = vshrl.u32 %v16244_v56, 16 }
 0x754   : > { %v9492_v22 = vshll.u32 %v16244_v56, 16  ;;  %v9850_v56 = vsel %vm3174_vm7, %v9847_v18, %v9849_v31 }
 0x755   : > { %v16536_v41 = vadd.f32 %v8759_v40, %v8438_v53 }
 0x756   : > { %v9342_v9 = vpop.f32.mrf.mxu0 }
 0x757   : > { %v16534_v54 = vadd.f32 %v9342_v9, %v9050_v3  ;;  %v8976_v24 = vpop.f32.mrf.mxu3  ;;  %v17400_v3 = vld [vmem:[#allocation39_spill] sm:$0xff] }
 0x758   : > { %v9053_v51 = vadd.f32 %v8976_v24, %v16355_v17  ;;  %11798 = vmatmul.msk.bf16.gmra.mxu2 %vm860_vm1, %v9848_v45 }
 0x759   : > { %11747 = vmatmul.msk.bf16.gmra.mxu0 %vm860_vm1, %v9239_v42  ;;  %v9491_v42 = vrot.slane %v9489_v1, 2 }
 0x75a   : > { %v8382_v60 = vpop.f32.mrf.mxu1 }
 0x75b   : > { %v8767_v28 = vpop.f32.mrf.mxu2  ;;  %v8439_v21 = vadd.f32 %v8382_v60, %v17400_v3 }
 0x75c   : > { %11651 = vmatmul.msk.bf16.gmra.mxu3 %vm860_vm1, %v8870_v13  ;;  %v8871_v13 = vrot.slane %v16320_v52, 2 }
 0x75d   : > { %11767 = vmatmul.msk.bf16.gmra.mxu1 %vm860_vm1, %v9487_v0  ;;  %v16551_v17 = vadd.f32 %v8762_v5, %v8439_v21  ;;  %v9241_v5 = vsel %vm2172_vm4, %v9238_v7, %v9240_v30 }
 0x75e   : > { %v9344_v40 = vpop.f32.mrf.mxu0 }
 0x75f   : > { %v16548_v39 = vadd.f32 %v9344_v40, %v9051_v55  ;;  %v8979_v34 = vpop.f32.mrf.mxu3  ;;  %v9494_v55 = vrot.slane %v9492_v22, 3  ;;  %v9498_v22 = vshrl.u32 %v16275_v48, 16 }
 0x760   : > { %v9054_v11 = vadd.f32 %v8979_v34, %v16373_v62  ;;  %v16574_v34 = vld [vmem:[%s12356_s24 + $0x80] sm:$0xff] }
 0x761   : > { %v9495_v3 = vor.u32 %v9494_v55, %v9491_v42 }
 0x762   : > { %v8384_v53 = vpop.f32.mrf.mxu1 }
 0x763   : > { %v8769_v9 = vpop.f32.mrf.mxu2  ;;  %v8440_v45 = vadd.f32 %v8384_v53, %v16246_v19  ;;  %v8872_v19 = vsel %vm2172_vm4, %v8869_v16, %v8871_v13  ;;  %v9496_v52 = vsel %vm2793_vm6, %v9486_v58, %v9495_v3  ;;  %v9501_v16 = vshll.u32 %v16275_v48, 16 }
 0x764   : > { %v9242_v58 = vrot.slane %v16574_v34, 2  ;;  %v9851_v53 = vrot.slane %v16306_v20, 3 }
 0x765   : > { %v16564_v62 = vadd.f32 %v8764_v4, %v8440_v45  ;;  %v9500_v45 = vrot.slane %v9498_v22, 2  ;;  %v9507_v22 = vshrl.u32 %v16306_v20, 16 }
 0x766   : > { %v9347_v24 = vpop.f32.mrf.mxu0 }
 0x767   : > { %v16562_v60 = vadd.f32 %v9347_v24, %v9052_v63  ;;  %v8981_v0 = vpop.f32.mrf.mxu3  ;;  %v17401_v63 = vld [vmem:[#allocation42_spill] sm:$0xff]  ;;  %v9503_v24 = vrot.slane %v9501_v16, 3  ;;  %v9853_v16 = vrot.slane %v16337_v27, 3 }
 0x768   : > { %v9055_v21 = vadd.f32 %v8981_v0, %v16386_v43  ;;  %11799 = vmatmul.msk.bf16.gmra.mxu2 %vm860_vm1, %v9850_v56  ;;  %v9243_v56 = vsel %vm2172_vm4, %v9240_v30, %v9242_v58  ;;  %v9852_v0 = vsel %vm3174_vm7, %v9849_v31, %v9851_v53 }
 0x769   : > { %11748 = vmatmul.msk.bf16.gmra.mxu0 %vm860_vm1, %v9241_v5 }
 0x76a   : > { %v8387_v7 = vpop.f32.mrf.mxu1 }
 0x76b   : > { %v8772_v40 = vpop.f32.mrf.mxu2  ;;  %v8441_v18 = vadd.f32 %v8387_v7, %v17401_v63  ;;  %v9504_v7 = vor.u32 %v9503_v24, %v9500_v45  ;;  %v9509_v24 = vrot.slane %v9507_v22, 2 }
 0x76c   : > { %11652 = vmatmul.msk.bf16.gmra.mxu3 %vm860_vm1, %v8872_v19 }
 0x76d   : > { %11768 = vmatmul.msk.bf16.gmra.mxu1 %vm860_vm1, %v9496_v52  ;;  %v16579_v43 = vadd.f32 %v8767_v28, %v8441_v18  ;;  %v8873_v28 = vrot.slane %v16351_v61, 2  ;;  %v9505_v63 = vsel %vm2793_vm6, %v9495_v3, %v9504_v7  ;;  %v17402_v61 = vld [vmem:[#allocation51_spill] sm:$0xff] }
 0x76e   : > { %v9349_v4 = vpop.f32.mrf.mxu0 }
 0x76f   : > { %v16576_v1 = vadd.f32 %v9349_v4, %v9053_v51  ;;  %v8874_v52 = vsel %vm2172_vm4, %v8871_v13, %v8873_v28  ;;  %v9510_v13 = vshll.u32 %v16306_v20, 16 }
 0x772   : > { %v8389_v42 = vpop.f32.mrf.mxu1 }
 0x773   : > { %v8774_v55 = vpop.f32.mrf.mxu2  ;;  %v8442_v5 = vadd.f32 %v8389_v42, %v16277_v8 }
 0x775   : > { %v16591_v48 = vadd.f32 %v8769_v9, %v8442_v5  ;;  %v9512_v5 = vrot.slane %v9510_v13, 3 }
 0x776   : > { %v9352_v51 = vpop.f32.mrf.mxu0 }
 0x777   : > { %v16589_v19 = vadd.f32 %v9352_v51, %v9054_v11  ;;  %v16600_v11 = vld [vmem:[%s12356_s24 + $0x88] sm:$0xff]  ;;  %v9513_v20 = vor.u32 %v9512_v5, %v9509_v24 }
 0x778   : > { %11800 = vmatmul.msk.bf16.gmra.mxu2 %vm860_vm1, %v9852_v0  ;;  %v9244_v3 = vrot.slane %v16600_v11, 2 }
 0x779   : > { %11749 = vmatmul.msk.bf16.gmra.mxu0 %vm860_vm1, %v9243_v56  ;;  %v9854_v56 = vsel %vm3174_vm7, %v9851_v53, %v9853_v16 }
 0x77a   : > { %v8392_v8 = vpop.f32.mrf.mxu1  ;;  %v9245_v51 = vsel %vm2172_vm4, %v9242_v58, %v9244_v3 }
 0x77b   : > { %v8777_v18 = vpop.f32.mrf.mxu2  ;;  %v8443_v30 = vadd.f32 %v8392_v8, %v17402_v61 }
 0x77c   : > { %11653 = vmatmul.msk.bf16.gmra.mxu3 %vm860_vm1, %v8874_v52 }
 0x77d   : > { %11769 = vmatmul.msk.bf16.gmra.mxu1 %vm860_vm1, %v9505_v63  ;;  %v16605_v4 = vadd.f32 %v8772_v40, %v8443_v30  ;;  %v8875_v40 = vrot.slane %v16382_v29, 2  ;;  %v9514_v63 = vsel %vm2793_vm6, %v9504_v7, %v9513_v20  ;;  %v16624_v29 = vld [vmem:[%s12356_s24 + $0x90] sm:$0xff]  ;;  %v9519_v30 = vshll.u32 %v16337_v27, 16 }
 0x77e   : > { %v9354_v31 = vpop.f32.mrf.mxu0 }
 0x77f   : > { %v16602_v9 = vadd.f32 %v9354_v31, %v9055_v21  ;;  %v8876_v52 = vsel %vm2172_vm4, %v8873_v28, %v8875_v40  ;;  %v9246_v28 = vrot.slane %v16624_v29, 2  ;;  %v9855_v31 = vrot.slane %v16368_v50, 3 }
 0x781   : > { %v9247_v5 = vsel %vm2172_vm4, %v9244_v3, %v9246_v28  ;;  %v16646_v3 = vld [vmem:[%s12356_s24 + $0x98] sm:$0xff] }
 0x782   : > { %v8394_v42 = vpop.f32.mrf.mxu1 }
 0x783   : > { %v8779_v45 = vpop.f32.mrf.mxu2  ;;  %v8444_v21 = vadd.f32 %v8394_v42, %v16308_v37  ;;  %v17403_v37 = vld [vmem:[#allocation52_spill] sm:$0xff]  ;;  %v9521_v42 = vrot.slane %v9519_v30, 3 }
 0x785   : > { %v16615_v0 = vadd.f32 %v8774_v55, %v8444_v21  ;;  %v9516_v55 = vshrl.u32 %v16337_v27, 16  ;;  %v9856_v21 = vsel %vm3174_vm7, %v9853_v16, %v9855_v31 }
 0x787   : > { %v9518_v13 = vrot.slane %v9516_v55, 2 }
 0x788   : > { %11801 = vmatmul.msk.bf16.gmra.mxu2 %vm860_vm1, %v9854_v56 }
 0x789   : > { %11750 = vmatmul.msk.bf16.gmra.mxu0 %vm860_vm1, %v9245_v51  ;;  %v9522_v27 = vor.u32 %v9521_v42, %v9518_v13  ;;  %v17405_v13 = vld [vmem:[#allocation54_spill] sm:$0xff] }
 0x78a   : > { %v8397_v8 = vpop.f32.mrf.mxu1 }
 0x78b   : > { %v8782_v61 = vpop.f32.mrf.mxu2  ;;  %v8445_v58 = vadd.f32 %v8397_v8, %v17403_v37  ;;  %v9523_v8 = vsel %vm2793_vm6, %v9513_v20, %v9522_v27  ;;  %v9528_v37 = vshll.u32 %v16368_v50, 16  ;;  %v9857_v20 = vrot.slane %v16399_v15, 3 }
 0x78c   : > { %11654 = vmatmul.msk.bf16.gmra.mxu3 %vm860_vm1, %v8876_v52 }
 0x78d   : > { %11770 = vmatmul.msk.bf16.gmra.mxu1 %vm860_vm1, %v9514_v63  ;;  %v16627_v53 = vadd.f32 %v8777_v18, %v8445_v58  ;;  %v8877_v18 = vrot.slane %v16414_v38, 2 }
 0x78f   : > { %v8878_v56 = vsel %vm2172_vm4, %v8875_v40, %v8877_v18  ;;  %v9248_v40 = vrot.slane %v16646_v3, 2 }
 0x792   : > { %v8399_v7 = vpop.f32.mrf.mxu1 }
 0x793   : > { %v8784_v22 = vpop.f32.mrf.mxu2  ;;  %v8446_v24 = vadd.f32 %v8399_v7, %v16339_v32  ;;  %v17404_v32 = vld [vmem:[#allocation53_spill] sm:$0xff]  ;;  %v9530_v7 = vrot.slane %v9528_v37, 3 }
 0x795   : > { %v16637_v51 = vadd.f32 %v8779_v45, %v8446_v24  ;;  %v9525_v45 = vshrl.u32 %v16368_v50, 16  ;;  %v9249_v24 = vsel %vm2172_vm4, %v9246_v28, %v9248_v40 }
 0x797   : > { %v9527_v30 = vrot.slane %v9525_v45, 2 }
 0x798   : > { %11802 = vmatmul.msk.bf16.gmra.mxu2 %vm860_vm1, %v9856_v21 }
 0x799   : > { %11751 = vmatmul.msk.bf16.gmra.mxu0 %vm860_vm1, %v9247_v5  ;;  %v9858_v5 = vsel %vm3174_vm7, %v9855_v31, %v9857_v20  ;;  %v9531_v21 = vor.u32 %v9530_v7, %v9527_v30  ;;  %v9534_v31 = vshrl.u32 %v16399_v15, 16 }
 0x79a   : > { %v8402_v52 = vpop.f32.mrf.mxu1 }
 0x79b   : > { %v8787_v63 = vpop.f32.mrf.mxu2  ;;  %v8447_v38 = vadd.f32 %v8402_v52, %v17404_v32  ;;  %v9532_v52 = vsel %vm2793_vm6, %v9522_v27, %v9531_v21  ;;  %v17406_v32 = vld [vmem:[#allocation55_spill] sm:$0xff] }
 0x79c   : > { %11655 = vmatmul.msk.bf16.gmra.mxu3 %vm860_vm1, %v8878_v56 }
 0x79d   : > { %11771 = vmatmul.msk.bf16.gmra.mxu1 %vm860_vm1, %v9523_v8  ;;  %v16649_v16 = vadd.f32 %v8782_v61, %v8447_v38  ;;  %v9116_v61 = vld [vmem:[%s12356_s24 + $0xa0] sm:$0x3] }
 0x79e   : > { %v9195_v50 = vunpack.c.l.b16 %v9116_v61 }
 0x7a0   : > { %v9214_v45 = vpack.c.b16 %v9195_v50, %v9195_v50 }
 0x7a2   : > { %v8404_v58 = vpop.f32.mrf.mxu1  ;;  %v9250_v37 = vrot.slane %v9214_v45, 2 }
 0x7a3   : > { %v8789_v55 = vpop.f32.mrf.mxu2  ;;  %v8448_v42 = vadd.f32 %v8404_v58, %v17405_v13  ;;  %v9859_v58 = vrot.slane %v16432_v59, 3  ;;  %v9536_v13 = vrot.slane %v9534_v31, 2 }
 0x7a5   : > { %v16659_v18 = vadd.f32 %v8784_v22, %v8448_v42  ;;  %v9537_v22 = vshll.u32 %v16399_v15, 16 }
 0x7a7   : > { %v9539_v42 = vrot.slane %v9537_v22, 3 }
 0x7a8   : > { %11803 = vmatmul.msk.bf16.gmra.mxu2 %vm860_vm1, %v9858_v5  ;;  %v9860_v5 = vsel %vm3174_vm7, %v9857_v20, %v9859_v58  ;;  %v9546_v20 = vshll.u32 %v16432_v59, 16 }
 0x7a9   : > { %11752 = vmatmul.msk.bf16.gmra.mxu0 %vm860_vm1, %v9249_v24  ;;  %v9251_v24 = vsel %vm2172_vm4, %v9248_v40, %v9250_v37  ;;  %v9540_v61 = vor.u32 %v9539_v42, %v9536_v13  ;;  %v9543_v40 = vshrl.u32 %v16432_v59, 16  ;;  %v16695_v13 = vld [vmem:[%s17003_s5] ss:$0 sm:$0xff] }
 0x7aa   : > { %v8407_v56 = vpop.f32.mrf.mxu1  ;;  %v9548_v31 = vrot.slane %v9546_v20, 3 }
 0x7ab   : > { %v8792_v8 = vpop.f32.mrf.mxu2  ;;  %v8449_v38 = vadd.f32 %v8407_v56, %v17406_v32  ;;  %v9541_v50 = vsel %vm2793_vm6, %v9531_v21, %v9540_v61  ;;  %v9545_v45 = vrot.slane %v9543_v40, 2 }
 0x7ad   : > { %11772 = vmatmul.msk.bf16.gmra.mxu1 %vm860_vm1, %v9532_v52  ;;  %v16666_v28 = vadd.f32 %v8787_v63, %v8449_v38 }
 0x7b2   : > { %v8409_v30 = vpop.f32.mrf.mxu1 }
 0x7b3   : > { %v8794_v7 = vpop.f32.mrf.mxu2  ;;  %v8450_v27 = vadd.f32 %v8409_v30, %v16401_v23 }
 0x7b5   : > { %v16674_v63 = vadd.f32 %v8789_v55, %v8450_v27  ;;  %v9861_v55 = vrot.slane %v16460_v36, 3  ;;  %v9555_v27 = vshll.u32 %v16460_v36, 16 }
 0x7b7   : > { %v9862_v22 = vsel %vm3174_vm7, %v9859_v58, %v9861_v55  ;;  %v9557_v40 = vrot.slane %v9555_v27, 3  ;;  %v17409_v27 = vld [vmem:[#allocation46_spill] sm:$0xff] }
 0x7b8   : > { %11804 = vmatmul.msk.bf16.gmra.mxu2 %vm860_vm1, %v9860_v5 }
 0x7b9   : > { %11753 = vmatmul.msk.bf16.gmra.mxu0 %vm860_vm1, %v9251_v24  ;;  %v17407_v24 = vld [vmem:[#allocation33_spill] sm:$0xff] }
 0x7ba   : > { %v8412_v15 = vpop.f32.mrf.mxu1  ;;  %v7198_v5 = vadd.f32 %v16695_v13, %v17407_v24  ;;  %v7200_v24 = vadd.f32 %v16695_v13, %v17409_v27 }
 0x7bb   : > { %v9954_v56 = vpop.f32.mrf.mxu2  ;;  %v8451_v52 = vadd.f32 %v8412_v15, %v16416_v33  ;;  %v9549_v33 = vor.u32 %v9548_v31, %v9545_v45  ;;  %v17408_v31 = vld [vmem:[#allocation48_spill] sm:$0xff] }
 0x7bd   : > { %11773 = vmatmul.msk.bf16.gmra.mxu1 %vm860_vm1, %v9541_v50  ;;  %v16681_v23 = vadd.f32 %v8792_v8, %v8451_v52  ;;  %v9550_v30 = vsel %vm2793_vm6, %v9540_v61, %v9549_v33 }
 0x7c2   : > { %v8414_v32 = vpop.f32.mrf.mxu1 }
 0x7c3   : > { %v9956_v38 = vpop.f32.mrf.mxu2  ;;  %v8452_v21 = vadd.f32 %v8414_v32, %v16434_v49  ;;  %v16701_v49 = vld [vmem:[%s17005_s7] ss:$0 sm:$0xff] }
 0x7c5   : > { %v16688_v37 = vadd.f32 %v8794_v7, %v8452_v21  ;;  %v9552_v7 = vshrl.u32 %v16460_v36, 16  ;;  %v7199_v21 = vadd.f32 %v16695_v13, %v17408_v31 }
 0x7c7   : > { %v9554_v52 = vrot.slane %v9552_v7, 2 }
 0x7c8   : > { %11805 = vmatmul.msk.bf16.gmra.mxu2 %vm860_vm1, %v9862_v22 }
 0x7c9   : > { %v9558_v45 = vor.u32 %v9557_v40, %v9554_v52 }
 0x7ca   : > { %v9707_v8 = vpop.f32.mrf.mxu1 }
 0x7cb   : > { %v9959_v59 = vpop.f32.mrf.mxu2  ;;  %v9797_v42 = vadd.f32 %v9707_v8, %v16445_v2  ;;  %v9863_v2 = vrot.slane %v16488_v12, 3 }
 0x7cd   : > { %v10044_v58 = vadd.f32 %v9954_v56, %v9797_v42  ;;  %11774 = vmatmul.msk.bf16.gmra.mxu1 %vm860_vm1, %v9550_v30  ;;  %v9864_v20 = vsel %vm3174_vm7, %v9861_v55, %v9863_v2  ;;  %v9559_v42 = vsel %vm2793_vm6, %v9549_v33, %v9558_v45  ;;  %v9561_v55 = vshrl.u32 %v16488_v12, 16 }
 0x7cf   : > { %v10084_v61 = vadd.f32 %v16701_v49, %v10044_v58  ;;  %v9563_v52 = vrot.slane %v9561_v55, 2 }
 0x7d1   : > { %v10120_v15 = vadd.f32 %v10084_v61, %v7198_v5  ;;  %v9865_v61 = vrot.slane %v16518_v44, 3 }
 0x7d2   : > { %v9709_v50 = vpop.f32.mrf.mxu1 }
 0x7d3   : > { %v9961_v56 = vpop.f32.mrf.mxu2  ;;  %10156 = vst [vmem:[%s16713_s29] sm:$0xff] %v10120_v15  ;;  %v9798_v36 = vadd.f32 %v9709_v50, %v16464_v46  ;;  %v9866_v40 = vsel %vm3174_vm7, %v9863_v2, %v9865_v61  ;;  %v9570_v2 = vshrl.u32 %v16518_v44, 16 }
 0x7d5   : > { %v10045_v32 = vadd.f32 %v9956_v38, %v9798_v36  ;;  %v9564_v38 = vshll.u32 %v16488_v12, 16 }
 0x7d7   : > { %v10085_v22 = vadd.f32 %v16701_v49, %v10045_v32 }
 0x7d8   : > { %11806 = vmatmul.msk.bf16.gmra.mxu2 %vm860_vm1, %v9864_v20  ;;  %v17410_v20 = vld [vmem:[#allocation9_spill] sm:$0xff] }
 0x7d9   : > { %v10121_v8 = vadd.f32 %v10085_v22, %v7199_v21  ;;  %v7201_v32 = vadd.f32 %v16695_v13, %v17410_v20 }
 0x7da   : > { %v9712_v30 = vpop.f32.mrf.mxu1 }
 0x7db   : > { %v9964_v58 = vpop.f32.mrf.mxu2  ;;  %10157 = vst [vmem:[%s16713_s29 + $0x8] sm:$0xff] %v10121_v8  ;;  %v9799_v46 = vadd.f32 %v9712_v30, %v16476_v35  ;;  %v9566_v35 = vrot.slane %v9564_v38, 3  ;;  %v9867_v38 = vrot.slane %v16546_v47, 3 }
 0x7dd   : > { %v10046_v7 = vadd.f32 %v9959_v59, %v9799_v46  ;;  %11775 = vmatmul.msk.bf16.gmra.mxu1 %vm860_vm1, %v9559_v42  ;;  %v9567_v12 = vor.u32 %v9566_v35, %v9563_v52  ;;  %v17411_v46 = vld [vmem:[#allocation7_spill] sm:$0xff]  ;;  %v17412_v35 = vld [vmem:[#allocation10_spill] sm:$0xff] }
 0x7df   : > { %v10086_v5 = vadd.f32 %v16701_v49, %v10046_v7  ;;  %v9568_v8 = vsel %vm2793_vm6, %v9558_v45, %v9567_v12  ;;  %v7202_v7 = vadd.f32 %v16695_v13, %v17411_v46 }
 0x7e1   : > { %v10122_v33 = vadd.f32 %v10086_v5, %v7200_v24  ;;  %v9572_v5 = vrot.slane %v9570_v2, 2 }
 0x7e2   : > { %v9714_v15 = vpop.f32.mrf.mxu1 }
 0x7e3   : > { %v9966_v50 = vpop.f32.mrf.mxu2  ;;  %10158 = vst [vmem:[%s16713_s29 + $0x10] sm:$0xff] %v10122_v33  ;;  %v9800_v59 = vadd.f32 %v9714_v15, %v16490_v14  ;;  %v9868_v33 = vsel %vm3174_vm7, %v9865_v61, %v9867_v38  ;;  %v16753_v15 = vpop.f32.mrf.mxu3 }
 0x7e5   : > { %v10047_v36 = vadd.f32 %v9961_v56, %v9800_v59  ;;  %v9573_v56 = vshll.u32 %v16518_v44, 16  ;;  %v7203_v59 = vadd.f32 %v16695_v13, %v17412_v35 }
 0x7e7   : > { %v10087_v31 = vadd.f32 %v16701_v49, %v10047_v36 }
 0x7e8   : > { %11807 = vmatmul.msk.bf16.gmra.mxu2 %vm860_vm1, %v9866_v40  ;;  %v16757_v40 = vpop.f32.mrf.mxu0 }
 0x7e9   : > { %v10123_v21 = vadd.f32 %v10087_v31, %v7201_v32 }
 0x7ea   : > { %v9717_v22 = vpop.f32.mrf.mxu1 }
 0x7eb   : > { %v9969_v30 = vpop.f32.mrf.mxu2  ;;  %10159 = vst [vmem:[%s16713_s29 + $0x18] sm:$0xff] %v10123_v21  ;;  %v9801_v14 = vadd.f32 %v9717_v22, %v16506_v25  ;;  %v9575_v25 = vrot.slane %v9573_v56, 3  ;;  %v9579_v21 = vshrl.u32 %v16546_v47, 16  ;;  %v9582_v22 = vshll.u32 %v16546_v47, 16 }
 0x7ed   : > { %v10048_v42 = vadd.f32 %v9964_v58, %v9801_v14  ;;  %11776 = vmatmul.msk.bf16.gmra.mxu1 %vm860_vm1, %v9568_v8  ;;  %v9576_v52 = vor.u32 %v9575_v25, %v9572_v5  ;;  %v17413_v8 = vld [vmem:[#allocation38_spill] sm:$0xff]  ;;  %v17414_v25 = vld [vmem:[#allocation16_spill] sm:$0xff] }
 0x7ee   : > { %v7204_v14 = vadd.f32 %v16695_v13, %v17413_v8 }
 0x7ef   : > { %v10088_v55 = vadd.f32 %v16701_v49, %v10048_v42  ;;  %v9577_v31 = vsel %vm2793_vm6, %v9567_v12, %v9576_v52  ;;  %v16769_v42 = vpop.f32.mrf.mxu3  ;;  %v9869_v12 = vrot.slane %v16574_v34, 3 }
 0x7f0   : > { %v16773_v56 = vpop.f32.mrf.mxu0 }
 0x7f1   : > { %v10124_v45 = vadd.f32 %v10088_v55, %v7202_v7  ;;  %v9581_v7 = vrot.slane %v9579_v21, 2  ;;  %v9584_v55 = vrot.slane %v9582_v22, 3 }
 0x7f2   : > { %v9719_v27 = vpop.f32.mrf.mxu1 }
 0x7f3   : > { %v9971_v24 = vpop.f32.mrf.mxu2  ;;  %10160 = vst [vmem:[%s16713_s29 + $0x20] sm:$0xff] %v10124_v45  ;;  %v9802_v58 = vadd.f32 %v9719_v27, %v16520_v57  ;;  %v9870_v45 = vsel %vm3174_vm7, %v9867_v38, %v9869_v12  ;;  %v9585_v5 = vor.u32 %v9584_v55, %v9581_v7 }
 0x7f5   : > { %v10049_v44 = vadd.f32 %v9966_v50, %v9802_v58  ;;  %v7205_v58 = vadd.f32 %v16695_v13, %v17414_v25 }
 0x7f7   : > { %v10089_v36 = vadd.f32 %v16701_v49, %v10049_v44  ;;  %v16782_v44 = vpop.f32.mrf.mxu3 }
 0x7f8   : > { %11808 = vmatmul.msk.bf16.gmra.mxu2 %vm860_vm1, %v9868_v33 }
 0x7f9   : > { %v10125_v20 = vadd.f32 %v10089_v36, %v7203_v59  ;;  %v9586_v36 = vsel %vm2793_vm6, %v9576_v52, %v9585_v5  ;;  %v9871_v52 = vrot.slane %v16600_v11, 3 }
 0x7fa   : > { %v9722_v32 = vpop.f32.mrf.mxu1 }
 0x7fb   : > { %v9974_v57 = vpop.f32.mrf.mxu2  ;;  %10161 = vst [vmem:[%s16713_s29 + $0x28] sm:$0xff] %v10125_v20  ;;  %v9803_v61 = vadd.f32 %v9722_v32, %v16534_v54  ;;  %v16785_v32 = vpop.f32.mrf.mxu0 }
 0x7fd   : > { %v10050_v50 = vadd.f32 %v9969_v30, %v9803_v61  ;;  %11777 = vmatmul.msk.bf16.gmra.mxu1 %vm860_vm1, %v9577_v31  ;;  %v9591_v31 = vshll.u32 %v16574_v34, 16  ;;  %v17415_v61 = vld [vmem:[#allocation11_spill] sm:$0xff] }
 0x7ff   : > { %v10090_v2 = vadd.f32 %v16701_v49, %v10050_v50  ;;  %v7206_v50 = vadd.f32 %v16695_v13, %v17415_v61 }
 0x801   : > { %v10126_v46 = vadd.f32 %v10090_v2, %v7204_v14 }
 0x802   : > { %v9724_v54 = vpop.f32.mrf.mxu1 }
 0x803   : > { %v9976_v30 = vpop.f32.mrf.mxu2  ;;  %10162 = vst [vmem:[%s16713_s29 + $0x30] sm:$0xff] %v10126_v46  ;;  %v9804_v47 = vadd.f32 %v9724_v54, %v16548_v39  ;;  %v16801_v54 = vpop.f32.mrf.mxu0 }
 0x805   : > { %v10051_v27 = vadd.f32 %v9971_v24, %v9804_v47  ;;  %v9588_v24 = vshrl.u32 %v16574_v34, 16  ;;  %v9872_v34 = vsel %vm3174_vm7, %v9869_v12, %v9871_v52  ;;  %v17416_v47 = vld [vmem:[#allocation17_spill] sm:$0xff] }
 0x807   : > { %v10091_v33 = vadd.f32 %v16701_v49, %v10051_v27  ;;  %v9590_v2 = vrot.slane %v9588_v24, 2 }
 0x808   : > { %11809 = vmatmul.msk.bf16.gmra.mxu2 %vm860_vm1, %v9870_v45  ;;  %v7207_v45 = vadd.f32 %v16695_v13, %v17416_v47 }
 0x809   : > { %v10127_v35 = vadd.f32 %v10091_v33, %v7205_v58 }
 0x80a   : > { %v9727_v59 = vpop.f32.mrf.mxu1 }
 0x80b   : > { %v9979_v20 = vpop.f32.mrf.mxu2  ;;  %10163 = vst [vmem:[%s16713_s29 + $0x38] sm:$0xff] %v10127_v35  ;;  %v9805_v39 = vadd.f32 %v9727_v59, %v16562_v60  ;;  %v9593_v60 = vrot.slane %v9591_v31, 3  ;;  %v9597_v59 = vshrl.u32 %v16600_v11, 16  ;;  %v16817_v24 = vpop.f32.mrf.mxu0  ;;  %v9873_v31 = vrot.slane %v16624_v29, 3 }
 0x80d   : > { %v10052_v38 = vadd.f32 %v9974_v57, %v9805_v39  ;;  %11778 = vmatmul.msk.bf16.gmra.mxu1 %vm860_vm1, %v9586_v36  ;;  %v16796_v57 = vpop.f32.mrf.mxu3  ;;  %v9594_v55 = vor.u32 %v9593_v60, %v9590_v2  ;;  %v9600_v36 = vshll.u32 %v16600_v11, 16  ;;  %v17417_v39 = vld [vmem:[#allocation14_spill] sm:$0xff]  ;;  %v9874_v11 = vsel %vm3174_vm7, %v9871_v52, %v9873_v31  ;;  %v17418_v60 = vld [vmem:[#allocation19_spill] sm:$0xff] }
 0x80f   : > { %v10092_v21 = vadd.f32 %v16701_v49, %v10052_v38  ;;  %v9595_v33 = vsel %vm2793_vm6, %v9585_v5, %v9594_v55  ;;  %v7208_v38 = vadd.f32 %v16695_v13, %v17417_v39 }
 0x811   : > { %v10128_v22 = vadd.f32 %v10092_v21, %v7206_v50  ;;  %v9599_v21 = vrot.slane %v9597_v59, 2 }
 0x812   : > { %v9729_v8 = vpop.f32.mrf.mxu1 }
 0x813   : > { %v9981_v14 = vpop.f32.mrf.mxu2  ;;  %10164 = vst [vmem:[%s16713_s29 + $0x40] sm:$0xff] %v10128_v22  ;;  %v9806_v46 = vadd.f32 %v9729_v8, %v16576_v1 }
 0x815   : > { %v10053_v7 = vadd.f32 %v9976_v30, %v9806_v46  ;;  %v16810_v12 = vpop.f32.mrf.mxu3  ;;  %v7209_v46 = vadd.f32 %v16695_v13, %v17418_v60  ;;  %v17421_v60 = vld [vmem:[#allocation27_spill] sm:$0xff] }
 0x817   : > { %v10093_v27 = vadd.f32 %v16701_v49, %v10053_v7 }
 0x818   : > { %11810 = vmatmul.msk.bf16.gmra.mxu2 %vm860_vm1, %v9872_v34  ;;  %v9056_v34 = vadd.f32 %v16753_v15, %v16404_v26  ;;  %v9606_v26 = vshrl.u32 %v16624_v29, 16  ;;  %v9609_v15 = vshll.u32 %v16624_v29, 16 }
 0x819   : > { %v10129_v25 = vadd.f32 %v10093_v27, %v7207_v45  ;;  %v16833_v27 = vpop.f32.mrf.mxu0 }
 0x81a   : > { %v9732_v58 = vpop.f32.mrf.mxu1  ;;  %v9429_v45 = vadd.f32 %v16757_v40, %v9056_v34  ;;  %v9611_v29 = vrot.slane %v9609_v15, 3 }
 0x81b   : > { %v9984_v35 = vpop.f32.mrf.mxu2  ;;  %10165 = vst [vmem:[%s16713_s29 + $0x48] sm:$0xff] %v10129_v25  ;;  %v9807_v1 = vadd.f32 %v9732_v58, %v16589_v19 }
 0x81d   : > { %v10054_v30 = vadd.f32 %v9979_v20, %v9807_v1  ;;  %11779 = vmatmul.msk.bf16.gmra.mxu1 %vm860_vm1, %v9595_v33  ;;  %v9602_v20 = vrot.slane %v9600_v36, 3  ;;  %v16828_v7 = vpop.f32.mrf.mxu3  ;;  %v17419_v1 = vld [vmem:[#allocation21_spill] sm:$0xff]  ;;  %v9875_v36 = vrot.slane %v16646_v3, 3 }
 0x81e   : > { %v7210_v40 = vadd.f32 %v16695_v13, %v17419_v1  ;;  %v9615_v1 = vshrl.u32 %v16646_v3, 16 }
 0x81f   : > { %v10094_v5 = vadd.f32 %v16701_v49, %v10054_v30  ;;  %v9603_v2 = vor.u32 %v9602_v20, %v9599_v21  ;;  %v17420_v30 = vld [vmem:[#allocation43_spill] sm:$0xff] }
 0x820   : > { %v9057_v59 = vadd.f32 %v16769_v42, %v17420_v30  ;;  %v9876_v42 = vsel %vm3174_vm7, %v9873_v31, %v9875_v36 }
 0x821   : > { %v10130_v61 = vadd.f32 %v10094_v5, %v7208_v38  ;;  %v16849_v21 = vpop.f32.mrf.mxu0 }
 0x822   : > { %v9734_v19 = vpop.f32.mrf.mxu1 }
 0x823   : > { %v9986_v50 = vpop.f32.mrf.mxu2  ;;  %10166 = vst [vmem:[%s16713_s29 + $0x50] sm:$0xff] %v10130_v61  ;;  %v9808_v22 = vadd.f32 %v9734_v19, %v16602_v9  ;;  %v9608_v19 = vrot.slane %v9606_v26, 2 }
 0x825   : > { %v10055_v8 = vadd.f32 %v9981_v14, %v9808_v22  ;;  %v9604_v14 = vsel %vm2793_vm6, %v9594_v55, %v9603_v2  ;;  %v16847_v39 = vpop.f32.mrf.mxu3 }
 0x827   : > { %v10095_v47 = vadd.f32 %v16701_v49, %v10055_v8  ;;  %v9612_v8 = vor.u32 %v9611_v29, %v9608_v19  ;;  %v9617_v29 = vrot.slane %v9615_v1, 2 }
 0x828   : > { %11811 = vmatmul.msk.bf16.gmra.mxu2 %vm860_vm1, %v9874_v11  ;;  %v9453_v11 = vld [vmem:[%s12356_s24 + $0xa0] sm:$0x7] }
 0x829   : > { %v10131_v9 = vadd.f32 %v10095_v47, %v7209_v46  ;;  %v17422_v46 = vld [vmem:[#allocation41_spill] sm:$0xff]  ;;  %v9613_v31 = vsel %vm2793_vm6, %v9603_v2, %v9612_v8  ;;  %v16865_v15 = vpop.f32.mrf.mxu0  ;;  %v17424_v2 = vld [vmem:[#allocation56_spill] sm:$0xff] }
 0x82a   : > { %v9737_v52 = vpop.f32.mrf.mxu1  ;;  %v9058_v34 = vadd.f32 %v16782_v44, %v17422_v46  ;;  %v17426_v46 = vld [vmem:[#allocation49_spill] sm:$0xff] }
 0x82b   : > { %v9989_v25 = vpop.f32.mrf.mxu2  ;;  %10167 = vst [vmem:[%s16713_s29 + $0x58] sm:$0xff] %v10131_v9  ;;  %v9809_v58 = vadd.f32 %v9737_v52, %v9429_v45  ;;  %v9460_v45 = vunpack.c.l.b16 %v9453_v11 }
 0x82c   : > { %v9431_v9 = vadd.f32 %v16785_v32, %v9058_v34  ;;  %v9618_v32 = vshll.u32 %v16646_v3, 16  ;;  %v9060_v34 = vadd.f32 %v16810_v12, %v17426_v46 }
 0x82d   : > { %v10056_v33 = vadd.f32 %v9984_v35, %v9809_v58  ;;  %11780 = vmatmul.msk.bf16.gmra.mxu1 %vm860_vm1, %v9604_v14  ;;  %v9430_v35 = vadd.f32 %v16773_v56, %v9057_v59  ;;  %v7211_v56 = vadd.f32 %v16695_v13, %v17421_v60  ;;  %v16862_v58 = vpop.f32.mrf.mxu3  ;;  %v9461_v26 = vpack.c.b16 %v9460_v45, %v9460_v45 }
 0x82e   : > { %v9059_v59 = vadd.f32 %v16796_v57, %v17424_v2  ;;  %v9433_v45 = vadd.f32 %v16817_v24, %v9060_v34 }
 0x82f   : > { %v10096_v55 = vadd.f32 %v16701_v49, %v10056_v33  ;;  %v9627_v12 = vshll.u32 %v9461_v26, 16 }
 0x831   : > { %v10132_v38 = vadd.f32 %v10096_v55, %v7210_v40  ;;  %v17423_v40 = vld [vmem:[#allocation35_spill] sm:$0xff] }
 0x832   : > { %v9739_v5 = vpop.f32.mrf.mxu1  ;;  %v7212_v30 = vadd.f32 %v16695_v13, %v17423_v40 }
 0x833   : > { %v9991_v61 = vpop.f32.mrf.mxu2  ;;  %10168 = vst [vmem:[%s16713_s29 + $0x60] sm:$0xff] %v10132_v38  ;;  %v9810_v20 = vadd.f32 %v9739_v5, %v9430_v35  ;;  %v9877_v35 = vrot.slane %v9461_v26, 3  ;;  %v9432_v38 = vadd.f32 %v16801_v54, %v9059_v59  ;;  %v9377_v54 = vpop.f32.mrf.mxu0 }
 0x835   : > { %v10057_v22 = vadd.f32 %v9986_v50, %v9810_v20  ;;  %v9620_v20 = vrot.slane %v9618_v32, 3  ;;  %v9878_v3 = vsel %vm3174_vm7, %v9875_v36, %v9877_v35  ;;  %v17428_v32 = vld [vmem:[#allocation29_spill] sm:$0xff] }
 0x836   : > { %v9061_v40 = vadd.f32 %v16828_v7, %v17428_v32  ;;  %v17430_v7 = vld [vmem:[#allocation26_spill] sm:$0xff] }
 0x837   : > { %v10097_v47 = vadd.f32 %v16701_v49, %v10057_v22  ;;  %v9004_v22 = vpop.f32.mrf.mxu3  ;;  %v9621_v60 = vor.u32 %v9620_v20, %v9617_v29  ;;  %v17429_v29 = vld [vmem:[#allocation45_spill] sm:$0xff] }
 0x838   : > { %11812 = vmatmul.msk.bf16.gmra.mxu2 %vm860_vm1, %v9876_v42  ;;  %v7215_v20 = vadd.f32 %v16695_v13, %v17429_v29 }
 0x839   : > { %v10133_v52 = vadd.f32 %v10097_v47, %v7211_v56  ;;  %v17425_v56 = vld [vmem:[#allocation37_spill] sm:$0xff]  ;;  %v9622_v36 = vsel %vm2793_vm6, %v9612_v8, %v9621_v60  ;;  %v9434_v8 = vadd.f32 %v16833_v27, %v9061_v40  ;;  %v9064_v40 = vadd.f32 %v9004_v22, %v16523_v10 }
 0x83a   : > { %v9742_v14 = vpop.f32.mrf.mxu1  ;;  %v7213_v57 = vadd.f32 %v16695_v13, %v17425_v56 }
 0x83b   : > { %v9994_v50 = vpop.f32.mrf.mxu2  ;;  %10169 = vst [vmem:[%s16713_s29 + $0x68] sm:$0xff] %v10133_v52  ;;  %v9811_v33 = vadd.f32 %v9742_v14, %v9431_v9  ;;  %v9379_v2 = vpop.f32.mrf.mxu0 }
 0x83d   : > { %v10058_v44 = vadd.f32 %v9989_v25, %v9811_v33  ;;  %11781 = vmatmul.msk.bf16.gmra.mxu1 %vm860_vm1, %v9613_v31  ;;  %v9624_v33 = vshrl.u32 %v9461_v26, 16 }
 0x83f   : > { %v10098_v55 = vadd.f32 %v16701_v49, %v10058_v44  ;;  %v17427_v44 = vld [vmem:[#allocation40_spill] sm:$0xff]  ;;  %v9006_v24 = vpop.f32.mrf.mxu3 }
 0x840   : > { %v7214_v1 = vadd.f32 %v16695_v13, %v17427_v44 }
 0x841   : > { %v10134_v5 = vadd.f32 %v10098_v55, %v7212_v30 }
 0x842   : > { %v9744_v19 = vpop.f32.mrf.mxu1 }
 0x843   : > { %v9996_v25 = vpop.f32.mrf.mxu2  ;;  %10170 = vst [vmem:[%s16713_s29 + $0x70] sm:$0xff] %v10134_v5  ;;  %v9812_v42 = vadd.f32 %v9744_v19, %v9432_v38  ;;  %v9629_v38 = vrot.slane %v9627_v12, 3 }
 0x845   : > { %v10059_v11 = vadd.f32 %v9991_v61, %v9812_v42  ;;  %v9062_v42 = vadd.f32 %v16847_v39, %v17430_v7 }
 0x847   : > { %v10099_v47 = vadd.f32 %v16701_v49, %v10059_v11  ;;  %v9435_v27 = vadd.f32 %v16849_v21, %v9062_v42  ;;  %v9009_v11 = vpop.f32.mrf.mxu3  ;;  %v17434_v42 = vld [vmem:[#allocation12_spill] sm:$0xff] }
 0x848   : > { %11813 = vmatmul.msk.bf16.gmra.mxu2 %vm860_vm1, %v9878_v3 }
 0x849   : > { %v10135_v9 = vadd.f32 %v10099_v47, %v7213_v57  ;;  %v9382_v47 = vpop.f32.mrf.mxu0 }
 0x84a   : > { %v9747_v52 = vpop.f32.mrf.mxu1 }
 0x84b   : > { %v9999_v14 = vpop.f32.mrf.mxu2  ;;  %10171 = vst [vmem:[%s16713_s29 + $0x78] sm:$0xff] %v10135_v9  ;;  %v9813_v61 = vadd.f32 %v9747_v52, %v9433_v45  ;;  %v17431_v9 = vld [vmem:[#allocation47_spill] sm:$0xff]  ;;  %v9063_v52 = vadd.f32 %v16862_v58, %v16508_v6  ;;  %v9437_v58 = vadd.f32 %v9377_v54, %v9064_v40 }
 0x84c   : > { %v7216_v39 = vadd.f32 %v16695_v13, %v17431_v9  ;;  %v17435_v9 = vld [vmem:[#allocation13_spill] sm:$0xff] }
 0x84d   : > { %v10060_v31 = vadd.f32 %v9994_v50, %v9813_v61  ;;  %11782 = vmatmul.msk.bf16.gmra.mxu1 %vm860_vm1, %v9622_v36  ;;  %v9626_v50 = vrot.slane %v9624_v33, 2  ;;  %v9436_v36 = vadd.f32 %v16865_v15, %v9063_v52 }
 0x84f   : > { %v10100_v30 = vadd.f32 %v16701_v49, %v10060_v31  ;;  %v9630_v19 = vor.u32 %v9629_v38, %v9626_v50  ;;  %v9011_v33 = vpop.f32.mrf.mxu3  ;;  %v17433_v38 = vld [vmem:[#allocation8_spill] sm:$0xff] }
 0x850   : > { %v9067_v52 = vadd.f32 %v9011_v33, %v16564_v62 }
 0x851   : > { %v10136_v59 = vadd.f32 %v10100_v30, %v7214_v1  ;;  %v9631_v46 = vsel %vm2793_vm6, %v9621_v60, %v9630_v19  ;;  %v17432_v1 = vld [vmem:[#allocation31_spill] sm:$0xff] }
 0x852   : > { %v9749_v55 = vpop.f32.mrf.mxu1  ;;  %v7217_v32 = vadd.f32 %v16695_v13, %v17432_v1 }
 0x853   : > { %v10001_v35 = vpop.f32.mrf.mxu2  ;;  %10172 = vst [vmem:[%s16713_s29 + $0x80] sm:$0xff] %v10136_v59  ;;  %v9814_v26 = vadd.f32 %v9749_v55, %v9434_v8 }
 0x855   : > { %v10061_v5 = vadd.f32 %v9996_v25, %v9814_v26  ;;  %v7218_v26 = vadd.f32 %v16695_v13, %v17433_v38 }
 0x857   : > { %v10101_v3 = vadd.f32 %v16701_v49, %v10061_v5  ;;  %v9014_v55 = vpop.f32.mrf.mxu3 }
 0x859   : > { %v10137_v56 = vadd.f32 %v10101_v3, %v7215_v20  ;;  %v7219_v3 = vadd.f32 %v16695_v13, %v17434_v42 }
 0x85a   : > { %v9752_v57 = vpop.f32.mrf.mxu1 }
 0x85b   : > { %v10004_v34 = vpop.f32.mrf.mxu2  ;;  %10173 = vst [vmem:[%s16713_s29 + $0x88] sm:$0xff] %v10137_v56  ;;  %v9815_v25 = vadd.f32 %v9752_v57, %v9435_v27  ;;  %v9066_v27 = vadd.f32 %v9009_v11, %v16551_v17 }
 0x85d   : > { %v10062_v45 = vadd.f32 %v9999_v14, %v9815_v25  ;;  %11783 = vmatmul.msk.bf16.gmra.mxu1 %vm860_vm1, %v9631_v46  ;;  %v9384_v14 = vpop.f32.mrf.mxu0 }
 0x85e   : > { %v9440_v11 = vadd.f32 %v9384_v14, %v9067_v52 }
 0x85f   : > { %v10102_v21 = vadd.f32 %v16701_v49, %v10062_v45  ;;  %v9016_v56 = vpop.f32.mrf.mxu3 }
 0x860   : > { %v9069_v38 = vadd.f32 %v9016_v56, %v16591_v48 }
 0x861   : > { %v10138_v61 = vadd.f32 %v10102_v21, %v7216_v39  ;;  %v7220_v39 = vadd.f32 %v16695_v13, %v17435_v9 }
 0x862   : > { %v9754_v60 = vpop.f32.mrf.mxu1 }
 0x863   : > { %v10006_v31 = vpop.f32.mrf.mxu2  ;;  %10174 = vst [vmem:[%s16713_s29 + $0x90] sm:$0xff] %v10138_v61  ;;  %v9816_v12 = vadd.f32 %v9754_v60, %v9436_v36 }
 0x865   : > { %v10063_v44 = vadd.f32 %v10001_v35, %v9816_v12  ;;  %v9065_v35 = vadd.f32 %v9006_v24, %v16536_v41  ;;  %v9387_v5 = vpop.f32.mrf.mxu0  ;;  %v9439_v41 = vadd.f32 %v9382_v47, %v9066_v27 }
 0x867   : > { %v10103_v6 = vadd.f32 %v16701_v49, %v10063_v44  ;;  %v9438_v10 = vadd.f32 %v9379_v2, %v9065_v35  ;;  %v9019_v17 = vpop.f32.mrf.mxu3  ;;  %v17436_v44 = vld [vmem:[#allocation15_spill] sm:$0xff] }
 0x868   : > { %v7221_v1 = vadd.f32 %v16695_v13, %v17436_v44 }
 0x869   : > { %v10139_v30 = vadd.f32 %v10103_v6, %v7217_v32  ;;  %v9068_v32 = vadd.f32 %v9014_v55, %v16579_v43 }
 0x86a   : > { %v9757_v15 = vpop.f32.mrf.mxu1 }
 0x86b   : > { %v10009_v8 = vpop.f32.mrf.mxu2  ;;  %10175 = vst [vmem:[%s16713_s29 + $0x98] sm:$0xff] %v10139_v30  ;;  %v9817_v59 = vadd.f32 %v9757_v15, %v9437_v58  ;;  %v9441_v62 = vadd.f32 %v9387_v5, %v9068_v32 }
 0x86d   : > { %v10064_v50 = vadd.f32 %v10004_v34, %v9817_v59  ;;  %v9389_v24 = vpop.f32.mrf.mxu0  ;;  %v17437_v59 = vld [vmem:[#allocation36_spill] sm:$0xff] }
 0x86e   : > { %v9442_v43 = vadd.f32 %v9389_v24, %v9069_v38  ;;  %v17439_v24 = vld [vmem:[#allocation18_spill] sm:$0xff]  ;;  %v17442_v38 = vld [vmem:[#allocation23_spill] sm:$0xff] }
 0x86f   : > { %v10104_v19 = vadd.f32 %v16701_v49, %v10064_v50  ;;  %v9021_v30 = vpop.f32.mrf.mxu3  ;;  %v7222_v50 = vadd.f32 %v16695_v13, %v17437_v59 }
 0x871   : > { %v10140_v22 = vadd.f32 %v10104_v19, %v7218_v26 }
 0x872   : > { %v9759_v54 = vpop.f32.mrf.mxu1 }
 0x873   : > { %v10011_v29 = vpop.f32.mrf.mxu2  ;;  %10176 = vst [vmem:[%s16713_s29 + $0xa0] sm:$0xff] %v10140_v22  ;;  %v9818_v20 = vadd.f32 %v9759_v54, %v9438_v10  ;;  %v17438_v54 = vld [vmem:[#allocation5_spill] sm:$0xff] }
 0x875   : > { %v10065_v7 = vadd.f32 %v10006_v31, %v9818_v20  ;;  %v9392_v31 = vpop.f32.mrf.mxu0  ;;  %v9070_v20 = vadd.f32 %v9019_v17, %v16605_v4  ;;  %v17440_v17 = vld [vmem:[#allocation4_spill] sm:$0xff] }
 0x877   : > { %v10105_v57 = vadd.f32 %v16701_v49, %v10065_v7  ;;  %v9024_v22 = vpop.f32.mrf.mxu3  ;;  %v9443_v48 = vadd.f32 %v9392_v31, %v9070_v20 }
 0x879   : > { %v10141_v46 = vadd.f32 %v10105_v57, %v7219_v3 }
 0x87a   : > { %v9762_v2 = vpop.f32.mrf.mxu1 }
 0x87b   : > { %v10014_v34 = vpop.f32.mrf.mxu2  ;;  %10177 = vst [vmem:[%s16713_s29 + $0xa8] sm:$0xff] %v10141_v46  ;;  %v9819_v25 = vadd.f32 %v9762_v2, %v9439_v41  ;;  %v7224_v46 = vadd.f32 %v16695_v13, %v17439_v24  ;;  %v9071_v2 = vadd.f32 %v9021_v30, %v16615_v0  ;;  %v17444_v24 = vld [vmem:[#allocation6_spill] sm:$0xff] }
 0x87d   : > { %v10066_v45 = vadd.f32 %v10009_v8, %v9819_v25  ;;  %v9394_v8 = vpop.f32.mrf.mxu0 }
 0x87e   : > { %v9444_v4 = vadd.f32 %v9394_v8, %v9071_v2 }
 0x87f   : > { %v10106_v21 = vadd.f32 %v16701_v49, %v10066_v45  ;;  %v9026_v25 = vpop.f32.mrf.mxu3 }
 0x881   : > { %v10142_v36 = vadd.f32 %v10106_v21, %v7220_v39 }
 0x882   : > { %v9764_v47 = vpop.f32.mrf.mxu1 }
 0x883   : > { %v10016_v61 = vpop.f32.mrf.mxu2  ;;  %10178 = vst [vmem:[%s16713_s29 + $0xb0] sm:$0xff] %v10142_v36  ;;  %v9820_v60 = vadd.f32 %v9764_v47, %v9440_v11  ;;  %v7225_v11 = vadd.f32 %v16695_v13, %v17440_v17  ;;  %v9072_v36 = vadd.f32 %v9024_v22, %v16627_v53 }
 0x885   : > { %v10067_v12 = vadd.f32 %v10011_v29, %v9820_v60  ;;  %v7223_v29 = vadd.f32 %v16695_v13, %v17438_v54  ;;  %v9397_v42 = vpop.f32.mrf.mxu0 }
 0x886   : > { %v9445_v0 = vadd.f32 %v9397_v42, %v9072_v36 }
 0x887   : > { %v10107_v40 = vadd.f32 %v16701_v49, %v10067_v12  ;;  %v9029_v31 = vpop.f32.mrf.mxu3 }
 0x889   : > { %v10143_v33 = vadd.f32 %v10107_v40, %v7221_v1  ;;  %v17441_v40 = vld [vmem:[#allocation24_spill] sm:$0xff] }
 0x88a   : > { %v9767_v6 = vpop.f32.mrf.mxu1 }
 0x88b   : > { %v10019_v58 = vpop.f32.mrf.mxu2  ;;  %10179 = vst [vmem:[%s16713_s29 + $0xb8] sm:$0xff] %v10143_v33  ;;  %v9821_v14 = vadd.f32 %v9767_v6, %v9441_v62  ;;  %v7226_v62 = vadd.f32 %v16695_v13, %v17441_v40  ;;  %v9073_v33 = vadd.f32 %v9026_v25, %v16637_v51 }
 0x88d   : > { %v10068_v15 = vadd.f32 %v10014_v34, %v9821_v14  ;;  %v9399_v9 = vpop.f32.mrf.mxu0 }
 0x88e   : > { %v9446_v53 = vadd.f32 %v9399_v9, %v9073_v33 }
 0x88f   : > { %v10108_v26 = vadd.f32 %v16701_v49, %v10068_v15  ;;  %v9031_v8 = vpop.f32.mrf.mxu3 }
 0x891   : > { %v10144_v55 = vadd.f32 %v10108_v26, %v7222_v50  ;;  %v7227_v26 = vadd.f32 %v16695_v13, %v17442_v38 }
 0x892   : > { %v9769_v35 = vpop.f32.mrf.mxu1 }
 0x893   : > { %10180 = vst [vmem:[%s16713_s29 + $0xc0] sm:$0xff] %v10144_v55  ;;  %v9822_v5 = vadd.f32 %v9769_v35, %v9442_v43  ;;  %v10021_v19 = vpop.f32.mrf.mxu2  ;;  %v9074_v43 = vadd.f32 %v9029_v31, %v16649_v16 }
 0x895   : > { %v10069_v10 = vadd.f32 %v10016_v61, %v9822_v5  ;;  %v9402_v1 = vpop.f32.mrf.mxu0 }
 0x896   : > { %v9447_v51 = vadd.f32 %v9402_v1, %v9074_v43  ;;  %v17446_v1 = vld [vmem:[#allocation30_spill] sm:$0xff] }
 0x897   : > { %v10109_v7 = vadd.f32 %v16701_v49, %v10069_v10  ;;  %v9034_v54 = vpop.f32.mrf.mxu3 }
 0x898   : > { %v9076_v2 = vadd.f32 %v9034_v54, %v16666_v28 }
 0x899   : > { %v10145_v3 = vadd.f32 %v10109_v7, %v7223_v29  ;;  %v17443_v29 = vld [vmem:[#allocation28_spill] sm:$0xff]  ;;  %v9075_v7 = vadd.f32 %v9031_v8, %v16659_v18 }
 0x89a   : > { %v9772_v27 = vpop.f32.mrf.mxu1  ;;  %v7228_v20 = vadd.f32 %v16695_v13, %v17443_v29  ;;  %v17447_v8 = vld [vmem:[#allocation20_spill] sm:$0xff] }
 0x89b   : > { %10181 = vst [vmem:[%s16713_s29 + $0xc8] sm:$0xff] %v10145_v3  ;;  %v9823_v56 = vadd.f32 %v9772_v27, %v9443_v48  ;;  %v10024_v41 = vpop.f32.mrf.mxu2 }
 0x89d   : > { %v10070_v57 = vadd.f32 %v10019_v58, %v9823_v56  ;;  %v9404_v50 = vpop.f32.mrf.mxu0 }
 0x89e   : > { %v9448_v16 = vadd.f32 %v9404_v50, %v9075_v7 }
 0x89f   : > { %v10110_v34 = vadd.f32 %v16701_v49, %v10070_v57  ;;  %v9036_v25 = vpop.f32.mrf.mxu3 }
 0x8a1   : > { %v10146_v45 = vadd.f32 %v10110_v34, %v7224_v46  ;;  %v7229_v46 = vadd.f32 %v16695_v13, %v17444_v24 }
 0x8a2   : > { %v9774_v39 = vpop.f32.mrf.mxu1 }
 0x8a3   : > { %10182 = vst [vmem:[%s16713_s29 + $0xd0] sm:$0xff] %v10146_v45  ;;  %v9824_v52 = vadd.f32 %v9774_v39, %v9444_v4  ;;  %v10026_v61 = vpop.f32.mrf.mxu2 }
 0x8a5   : > { %v10071_v21 = vadd.f32 %v10021_v19, %v9824_v52  ;;  %v9407_v48 = vpop.f32.mrf.mxu0 }
 0x8a6   : > { %v9449_v18 = vadd.f32 %v9407_v48, %v9076_v2 }
 0x8a7   : > { %v10111_v47 = vadd.f32 %v16701_v49, %v10071_v21  ;;  %v17445_v21 = vld [vmem:[#allocation44_spill] sm:$0xff] }
 0x8a8   : > { %v7230_v17 = vadd.f32 %v16695_v13, %v17445_v21 }
 0x8a9   : > { %v10147_v60 = vadd.f32 %v10111_v47, %v7225_v11  ;;  %v9077_v11 = vadd.f32 %v9036_v25, %v16674_v63 }
 0x8aa   : > { %v9777_v12 = vpop.f32.mrf.mxu1 }
 0x8ab   : > { %10183 = vst [vmem:[%s16713_s29 + $0xd8] sm:$0xff] %v10147_v60  ;;  %v9825_v44 = vadd.f32 %v9777_v12, %v9445_v0  ;;  %v10029_v30 = vpop.f32.mrf.mxu2  ;;  %v9039_v0 = vpop.f32.mrf.mxu3 }
 0x8ac   : > { %v9078_v40 = vadd.f32 %v9039_v0, %v16681_v23 }
 0x8ad   : > { %v10072_v32 = vadd.f32 %v10024_v41, %v9825_v44  ;;  %v9409_v45 = vpop.f32.mrf.mxu0 }
 0x8ae   : > { %v9450_v28 = vadd.f32 %v9409_v45, %v9077_v11 }
 0x8af   : > { %v10112_v6 = vadd.f32 %v16701_v49, %v10072_v32  ;;  %v7231_v32 = vadd.f32 %v16695_v13, %v17446_v1 }
 0x8b1   : > { %v10148_v58 = vadd.f32 %v10112_v6, %v7226_v62 }
 0x8b2   : > { %v9779_v14 = vpop.f32.mrf.mxu1 }
 0x8b3   : > { %10184 = vst [vmem:[%s16713_s29 + $0xe0] sm:$0xff] %v10148_v58  ;;  %v9826_v15 = vadd.f32 %v9779_v14, %v9446_v53  ;;  %v10031_v10 = vpop.f32.mrf.mxu2  ;;  %v9041_v14 = vpop.f32.mrf.mxu3 }
 0x8b4   : > { %v9079_v50 = vadd.f32 %v9041_v14, %v16688_v37 }
 0x8b5   : > { %v10073_v59 = vadd.f32 %v10026_v61, %v9826_v15  ;;  %v9412_v12 = vpop.f32.mrf.mxu0 }
 0x8b6   : > { %v9451_v63 = vadd.f32 %v9412_v12, %v9078_v40 }
 0x8b7   : > { %v10113_v55 = vadd.f32 %v16701_v49, %v10073_v59  ;;  %v7232_v59 = vadd.f32 %v16695_v13, %v17447_v8 }
 0x8b9   : > { %v10149_v35 = vadd.f32 %v10113_v55, %v7227_v26 }
 0x8ba   : > { %v9782_v5 = vpop.f32.mrf.mxu1 }
 0x8bb   : > { %10185 = vst [vmem:[%s16713_s29 + $0xe8] sm:$0xff] %v10149_v35  ;;  %v9827_v19 = vadd.f32 %v9782_v5, %v9447_v51  ;;  %v10034_v41 = vpop.f32.mrf.mxu2  ;;  %v17448_v5 = vld [vmem:[#allocation34_spill] sm:$0xff] }
 0x8bd   : > { %v10074_v22 = vadd.f32 %v10029_v30, %v9827_v19  ;;  %v9414_v15 = vpop.f32.mrf.mxu0  ;;  %v7233_v19 = vadd.f32 %v16695_v13, %v17448_v5 }
 0x8be   : > { %v9452_v38 = vadd.f32 %v9414_v15, %v9079_v50 }
 0x8bf   : > { %v10114_v42 = vadd.f32 %v16701_v49, %v10074_v22 }
 0x8c1   : > { %v10150_v3 = vadd.f32 %v10114_v42, %v7228_v20 }
 0x8c2   : > { %v9784_v27 = vpop.f32.mrf.mxu1 }
 0x8c3   : > { %10186 = vst [vmem:[%s16713_s29 + $0xf0] sm:$0xff] %v10150_v3  ;;  %v9828_v56 = vadd.f32 %v9784_v27, %v9448_v16  ;;  %v10036_v47 = vpop.f32.mrf.mxu2 }
 0x8c5   : > { %v10075_v57 = vadd.f32 %v10031_v10, %v9828_v56 }
 0x8c7   : > { %v10115_v34 = vadd.f32 %v16701_v49, %v10075_v57 }
 0x8c9   : > { %v10151_v4 = vadd.f32 %v10115_v34, %v7229_v46 }
 0x8ca   : > { %v9787_v9 = vpop.f32.mrf.mxu1 }
 0x8cb   : > { %10187 = vst [vmem:[%s16713_s29 + $0xf8] sm:$0xff] %v10151_v4  ;;  %v9829_v39 = vadd.f32 %v9787_v9, %v9449_v18  ;;  %v10039_v6 = vpop.f32.mrf.mxu2 }
 0x8cd   : > { %v10076_v52 = vadd.f32 %v10034_v41, %v9829_v39 }
 0x8cf   : > { %v10116_v36 = vadd.f32 %v16701_v49, %v10076_v52 }
 0x8d1   : > { %v10152_v61 = vadd.f32 %v10116_v36, %v7230_v17 }
 0x8d2   : > { %v9789_v60 = vpop.f32.mrf.mxu1 }
 0x8d3   : > { %10188 = vst [vmem:[%s16713_s29 + $0x100] sm:$0xff] %v10152_v61  ;;  %v9830_v31 = vadd.f32 %v9789_v60, %v9450_v28  ;;  %v10041_v51 = vpop.f32.mrf.mxu2 }
 0x8d5   : > { %v10077_v44 = vadd.f32 %v10036_v47, %v9830_v31 }
 0x8d7   : > { %v10117_v62 = vadd.f32 %v16701_v49, %v10077_v44 }
 0x8d9   : > { %v10153_v33 = vadd.f32 %v10117_v62, %v7231_v32 }
 0x8da   : > { %v9792_v53 = vpop.f32.mrf.mxu1 }
 0x8db   : > { %10189 = vst [vmem:[%s16713_s29 + $0x108] sm:$0xff] %v10153_v33  ;;  %v9831_v58 = vadd.f32 %v9792_v53, %v9451_v63 }
 0x8dd   : > { %v10078_v30 = vadd.f32 %v10039_v6, %v9831_v58 }
 0x8df   : > { %v10118_v23 = vadd.f32 %v16701_v49, %v10078_v30 }
 0x8e1   : > { %v10154_v26 = vadd.f32 %v10118_v23, %v7232_v59 }
 0x8e2   : > { %v9794_v43 = vpop.f32.mrf.mxu1 }
 0x8e3   : > { %10190 = vst [vmem:[%s16713_s29 + $0x110] sm:$0xff] %v10154_v26  ;;  %v9832_v55 = vadd.f32 %v9794_v43, %v9452_v38 }
 0x8e5   : > { %v10079_v35 = vadd.f32 %v10041_v51, %v9832_v55 }
 0x8e7   : > { %v10119_v10 = vadd.f32 %v16701_v49, %v10079_v35 }
 0x8e9   : > { %v10155_v22 = vadd.f32 %v10119_v10, %v7233_v19 }
 0x8eb   : > { %10191 = vst [vmem:[%s16713_s29 + $0x118] sm:$0xff] %v10155_v22 }
 0x8ec PF: > { %s18_s27 = sadd.s32 1, %s12267_s27  }
 0x8ed   : > { %p15_p4 = scmp.ge.s32.totalorder %s18_s27, 4  }
 0x8ef   :  { %17 = sbr.rel (!%p15_p4) target bundleno = 1 (0x1), region = 106 }

</bundles_post_ra>
